<compile_context>
chip_gen: v6e
topology: v6e:2x2x1
jax: 0.10.0
libtpu: 0.0.40
codegen_flags: <defaults>
</compile_context>

<pallas_src>
import functools
import math

import jax
import jax.numpy as jnp
from jax.experimental import pallas as pl
from jax.experimental.pallas import tpu as pltpu

BN_EPS = 1e-5
LANE = 128
SUBLANE = 8


def _round_up(x, m):
    return (x + m - 1) // m * m


def _bias_relu_bn(y, b, g, be, use_bn, m_rows):
    """bias + ReLU + (optional) BatchNorm2d training-mode (biased batch stats).

    One-pass statistics: sum and sum-of-squares, then mean/var — avoids a
    second full traversal of the (M, CP) activation.
    Padded channels stay exactly 0: weights/bias/beta pads are 0 and gamma
    pads are 1, so sum = ss = 0 -> (0 - 0) * rsqrt(eps) * 1 + 0 = 0.
    """
    y = y + b
    y = jnp.maximum(y, 0.0)                       # ReLU
    if use_bn:
        inv_m = 1.0 / float(m_rows)
        s = jnp.sum(y, axis=0, keepdims=True)
        ss = jnp.sum(y * y, axis=0, keepdims=True)
        mean = s * inv_m
        var = ss * inv_m - mean * mean
        y = (y - mean) * jax.lax.rsqrt(var + BN_EPS) * g + be
    return y


def _unet_block_kernel(im1_ref, w1_ref, b1_ref, g1_ref, be1_ref,
                       w2_ref, b2_ref, g2_ref, be2_ref,
                       o_ref, ypad_ref,
                       *, k, pad, wl, n, oh1, ow1, oh2, ow2, use_bn):
    """Fused: conv1 (pre-packed im2col dot) -> bias/ReLU/BN1
              -> conv2 (per-tap-pair accumulating dots) -> bias/ReLU/BN2."""
    cp = o_ref.shape[-1]
    m1 = n * oh1 * ow1
    m2 = n * oh2 * ow2
    wpad2 = ypad_ref.shape[2]

    # ---------- stage 1: one lane-dense matmul (M1, KP1) x (KP1, CP) ----------
    # KP1 and CP are multiples of 128 -> operands, contraction and result are
    # fully (8,128)-tile aligned; no in-kernel relayout.
    y = jnp.dot(im1_ref[...], w1_ref[...], preferred_element_type=jnp.float32)
    y = _bias_relu_bn(y, b1_ref[...], g1_ref[...], be1_ref[...], use_bn, m1)

    # ---------- stage 2: stage-1 activation never leaves VMEM ----------
    # Zero only the halo frame (top/bottom rows + left/right column strips);
    # the interior is fully overwritten and columns outside
    # [wl - pad, wl + ow1 + pad) are never read.
    if pad > 0:
        zrows = jnp.zeros((n, pad, wpad2, cp), ypad_ref.dtype)
        ypad_ref[:, 0:pad, :, :] = zrows
        ypad_ref[:, pad + oh1:pad + oh1 + pad, :, :] = zrows
        zcols = jnp.zeros((n, oh1, pad, cp), ypad_ref.dtype)
        ypad_ref[:, pad:pad + oh1, wl - pad:wl, :] = zcols
        ypad_ref[:, pad:pad + oh1, wl + ow1:wl + ow1 + pad, :] = zcols
    # Interior store at a sublane-aligned W offset (wl is a multiple of 8).
    ypad_ref[:, pad:pad + oh1, wl:wl + ow1, :] = y.reshape(n, oh1, ow1, cp)

    # conv2 as accumulating per-tap matmuls; taps fused in pairs so each
    # contraction is K = 2*CP (fills the 256-deep MXU on v6e/v7x; two
    # back-to-back 128-deep passes on v5e).  The (M, k*k*CP) im2col operand is
    # never materialized, accumulation stays in f32.
    wbase = wl - pad
    taps = [(dh, dw) for dh in range(k) for dw in range(k)]

    def tap_slice(t):
        dh, dw = taps[t]
        w0 = wbase + dw
        # TODO(synk): if profiling shows sublane-relayout cost on the
        # unaligned dw slices, prebuild k dw-shifted copies of ypad with
        # pltpu.roll (XLU slot is idle next to the MXU) and slice aligned.
        return ypad_ref[:, dh:dh + oh2, w0:w0 + ow2, :].reshape(m2, cp)

    acc = None
    t = 0
    nt = len(taps)
    while t < nt:
        if t + 1 < nt:
            im = jnp.concatenate([tap_slice(t), tap_slice(t + 1)], axis=-1)
            wblk = w2_ref[t * cp:(t + 2) * cp, :]
            t += 2
        else:
            im = tap_slice(t)
            wblk = w2_ref[t * cp:(t + 1) * cp, :]
            t += 1
        d = jnp.dot(im, wblk, preferred_element_type=jnp.float32)
        acc = d if acc is None else acc + d

    z = _bias_relu_bn(acc, b2_ref[...], g2_ref[...], be2_ref[...], use_bn, m2)
    o_ref[...] = z.astype(o_ref.dtype)            # lane-dense (M2, 128k) store


def unet_conv_block(x_nchw, params, batch_norm, kernel_size):
    """Forward of UNetConvBlock.

    Module quirks replicated on purpose (do NOT "fix"):
      * actual Conv2d kernel size is kernel_size + 1,
      * spatial padding is int(kernel_size / 2),
      * the ctor's `padding` argument is unused by the module.
    """
    pad = kernel_size // 2
    k = kernel_size + 1
    x = jnp.transpose(x_nchw, (0, 2, 3, 1))       # NCHW -> NHWC
    n, h, w, cin = x.shape
    cout = params["b1"].shape[0]
    cp = _round_up(cout, LANE)                    # lane-dense padded channel count
    pc = cp - cout

    oh1, ow1 = h + 2 * pad - k + 1, w + 2 * pad - k + 1
    oh2, ow2 = oh1 + 2 * pad - k + 1, ow1 + 2 * pad - k + 1
    m1, m2 = n * oh1 * ow1, n * oh2 * ow2
    wl = _round_up(max(pad, 1), SUBLANE) if pad > 0 else 0   # 8-aligned left W margin
    wpad2 = _round_up(wl + ow1 + pad, SUBLANE)               # padded W extent

    # ---- stage-1 im2col built by XLA in the wrapper: with Cin << 128 an
    # in-kernel lane concat of Cin-wide slices forces cross-lane packing; the
    # (M1, k*k*Cin) matrix is tiny here, packed once, and K-padded to 128. ----
    kraw = k * k * cin
    kp1 = _round_up(kraw, LANE)
    xpad = jnp.pad(x, ((0, 0), (pad, pad), (pad, pad), (0, 0)))
    patches = [xpad[:, dh:dh + oh1, dw:dw + ow1, :]
               for dh in range(k) for dw in range(k)]
    im1 = jnp.concatenate(patches, axis=-1).reshape(m1, kraw)
    im1 = jnp.pad(im1, ((0, 0), (0, kp1 - kraw)))

    # Parameter packing: channel dims lane-padded; gamma padded with 1, all
    # other pads 0, so padded channels stay exactly 0 through BN.
    w1 = jnp.pad(params["w1"].reshape(kraw, cout), ((0, kp1 - kraw), (0, pc)))
    w2 = jnp.pad(params["w2"], ((0, 0), (0, 0), (0, pc), (0, pc)))
    w2 = w2.reshape(k * k * cp, cp)
    b1 = jnp.pad(params["b1"], (0, pc)).reshape(1, cp)
    b2 = jnp.pad(params["b2"], (0, pc)).reshape(1, cp)
    g1 = jnp.pad(params["g1"], (0, pc), constant_values=1.0).reshape(1, cp)
    g2 = jnp.pad(params["g2"], (0, pc), constant_values=1.0).reshape(1, cp)
    be1 = jnp.pad(params["be1"], (0, pc)).reshape(1, cp)
    be2 = jnp.pad(params["be2"], (0, pc)).reshape(1, cp)

    # Shape-derived VMEM budget: operands + output + ypad scratch + an
    # allowance for matmul/BN transients, clamped to the chip's VMEM capacity.
    f32b = jnp.dtype(jnp.float32).itemsize
    operand_bytes = sum(int(math.prod(a.shape)) * a.dtype.itemsize
                        for a in (im1, w1, b1, g1, be1, w2, b2, g2, be2))
    out_bytes = m2 * cp * jnp.dtype(x.dtype).itemsize
    ypad_bytes = n * (oh1 + 2 * pad) * wpad2 * cp * f32b
    transient_bytes = 6 * max(m1 * kp1, m2 * 2 * cp) * f32b
    needed = operand_bytes + out_bytes + ypad_bytes + transient_bytes
    try:
        vmem_cap = int(pltpu.get_tpu_info().vmem_capacity_bytes)
    except Exception:
        vmem_cap = 64 * 1024 * 1024               # conservative (v7x per-core)
    vmem_limit = min(max(int(needed * 1.5), 16 * 1024 * 1024),
                     int(vmem_cap * 0.85))

    kern = functools.partial(
        _unet_block_kernel, k=k, pad=pad, wl=wl, n=n,
        oh1=oh1, ow1=ow1, oh2=oh2, ow2=ow2, use_bn=batch_norm)

    flat = pl.pallas_call(
        kern,
        out_shape=jax.ShapeDtypeStruct((m2, cp), x.dtype),
        in_specs=[pl.BlockSpec(memory_space=pltpu.MemorySpace.VMEM)] * 9,
        out_specs=pl.BlockSpec(memory_space=pltpu.MemorySpace.VMEM),
        scratch_shapes=[
            # zero-halo'd stage-1 activation, kept in VMEM between the convs
            pltpu.VMEM((n, oh1 + 2 * pad, wpad2, cp), jnp.float32),
        ],
        compiler_params=pltpu.CompilerParams(vmem_limit_bytes=vmem_limit),
    )(im1, w1, b1, g1, be1, w2, b2, g2, be2)

    y = flat[:, :cout].reshape(n, oh2, ow2, cout)  # drop padded channels
    return jnp.transpose(y, (0, 3, 1, 2))          # NHWC -> NCHW


def init_params(key, in_size, out_size, kernel_size):
    k = kernel_size + 1  # actual Conv2d kernel size used by the module
    k1, k2, k3, k4 = jax.random.split(key, 4)
    # PyTorch Conv2d weights are OIHW; stored directly as HWIO for the kernel.
    w1 = jax.random.normal(k1, (k, k, in_size, out_size), jnp.float32) * 0.1
    b1 = jax.random.normal(k2, (out_size,), jnp.float32) * 0.1
    w2 = jax.random.normal(k3, (k, k, out_size, out_size), jnp.float32) * 0.1
    b2 = jax.random.normal(k4, (out_size,), jnp.float32) * 0.1
    ones = jnp.ones((out_size,), jnp.float32)
    zeros = jnp.zeros((out_size,), jnp.float32)
    return dict(w1=w1, b1=b1, g1=ones, be1=zeros,
                w2=w2, b2=b2, g2=ones, be2=zeros)


def _ref_stage(x, w, b, g, be, pad, use_bn):
    """Pure-JAX reference for one Conv->ReLU->(BN) stage (correctness check)."""
    y = jax.lax.conv_general_dilated(
        x, w, window_strides=(1, 1), padding=[(pad, pad), (pad, pad)],
        dimension_numbers=("NHWC", "HWIO", "NHWC"))
    y = y + b.reshape(1, 1, 1, -1)
    y = jnp.maximum(y, 0.0)
    if use_bn:
        mean = jnp.mean(y, axis=(0, 1, 2), keepdims=True)
        var = jnp.mean(jnp.square(y - mean), axis=(0, 1, 2), keepdims=True)
        y = (y - mean) * jax.lax.rsqrt(var + BN_EPS)
        y = y * g.reshape(1, 1, 1, -1) + be.reshape(1, 1, 1, -1)
    return y


if __name__ == "__main__":
    # Module config: UNetConvBlock(in_size=4, out_size=8, padding=<unused>,
    #                              batch_norm=True, kernel_size=2)
    # -> two Conv2d with 3x3 kernels, stride 1, padding 1 ("same" spatial size).
    in_size, out_size, kernel_size, batch_norm = 4, 8, 2, True

    key = jax.random.PRNGKey(0)
    kx, kp = jax.random.split(key)
    x = jax.random.normal(kx, (2, in_size, 16, 16), jnp.float32)  # NCHW, like PyTorch
    params = init_params(kp, in_size, out_size, kernel_size)

    out = jax.block_until_ready(unet_conv_block(x, params, batch_norm, kernel_size))

    # Validate against a pure-JAX reference of the same forward pass.
    pad = kernel_size // 2
    xr = jnp.transpose(x, (0, 2, 3, 1))
    yr = _ref_stage(xr, params["w1"], params["b1"], params["g1"], params["be1"],
                    pad, batch_norm)
    yr = _ref_stage(yr, params["w2"], params["b2"], params["g2"], params["be2"],
                    pad, batch_norm)
    yr = jnp.transpose(yr, (0, 3, 1, 2))
    assert out.shape == yr.shape == (2, out_size, 16, 16)
    assert jnp.allclose(out, yr, atol=2e-4, rtol=2e-4)
    print("KERNEL_OK")
</pallas_src>

<mosaic_0001>
module attributes {stable_mosaic.version = 11 : i64} {
  func.func @_unet_block_kernel(%arg0: memref<512x128xf32, #tpu.memory_space<vmem>>, %arg1: memref<128x128xf32, #tpu.memory_space<vmem>>, %arg2: memref<1x128xf32, #tpu.memory_space<vmem>>, %arg3: memref<1x128xf32, #tpu.memory_space<vmem>>, %arg4: memref<1x128xf32, #tpu.memory_space<vmem>>, %arg5: memref<1152x128xf32, #tpu.memory_space<vmem>>, %arg6: memref<1x128xf32, #tpu.memory_space<vmem>>, %arg7: memref<1x128xf32, #tpu.memory_space<vmem>>, %arg8: memref<1x128xf32, #tpu.memory_space<vmem>>, %arg9: memref<512x128xf32, #tpu.memory_space<vmem>>, %arg10: memref<2x18x32x128xf32, #tpu.memory_space<vmem>>) attributes {dimension_semantics = [], scalar_prefetch = 0 : i64, scratch_operands = 1 : i64, tpu.core_type = #tpu.core_type<tc>} {
    %c0 = arith.constant 0 : index
    %c0_0 = arith.constant 0 : index
    %0 = vector.load %arg0[%c0, %c0_0] : memref<512x128xf32, #tpu.memory_space<vmem>>, vector<512x128xf32>
    %c0_1 = arith.constant 0 : index
    %c0_2 = arith.constant 0 : index
    %1 = vector.load %arg1[%c0_1, %c0_2] : memref<128x128xf32, #tpu.memory_space<vmem>>, vector<128x128xf32>
    %cst = arith.constant dense<0.000000e+00> : vector<512x128xf32>
    %2 = tpu.matmul %0, %1, %cst {dimension_numbers = #tpu.dot_dimension_numbers<[1], [0], [0], [1], [0, 0, 1, 1], [], []>} : vector<512x128xf32>, vector<128x128xf32>, vector<512x128xf32> -> vector<512x128xf32>
    %c0_3 = arith.constant 0 : index
    %c0_4 = arith.constant 0 : index
    %3 = vector.load %arg2[%c0_3, %c0_4] : memref<1x128xf32, #tpu.memory_space<vmem>>, vector<1x128xf32>
    %c0_5 = arith.constant 0 : index
    %c0_6 = arith.constant 0 : index
    %4 = vector.load %arg3[%c0_5, %c0_6] : memref<1x128xf32, #tpu.memory_space<vmem>>, vector<1x128xf32>
    %c0_7 = arith.constant 0 : index
    %c0_8 = arith.constant 0 : index
    %5 = vector.load %arg4[%c0_7, %c0_8] : memref<1x128xf32, #tpu.memory_space<vmem>>, vector<1x128xf32>
    %6 = vector.broadcast %3 : vector<1x128xf32> to vector<512x128xf32>
    %7 = arith.addf %2, %6 : vector<512x128xf32>
    %cst_9 = arith.constant 0.000000e+00 : f32
    %8 = vector.broadcast %cst_9 : f32 to vector<512x128xf32>
    %9 = arith.maximumf %7, %8 : vector<512x128xf32>
    %cst_10 = arith.constant dense<0.000000e+00> : vector<128xf32>
    %10 = vector.multi_reduction <add>, %9, %cst_10 [0] : vector<512x128xf32> to vector<128xf32>
    %11 = vector.shape_cast %10 : vector<128xf32> to vector<1x128xf32>
    %12 = arith.mulf %9, %9 : vector<512x128xf32>
    %cst_11 = arith.constant dense<0.000000e+00> : vector<128xf32>
    %13 = vector.multi_reduction <add>, %12, %cst_11 [0] : vector<512x128xf32> to vector<128xf32>
    %14 = vector.shape_cast %13 : vector<128xf32> to vector<1x128xf32>
    %cst_12 = arith.constant 0.001953125 : f32
    %15 = vector.broadcast %cst_12 : f32 to vector<1x128xf32>
    %16 = arith.mulf %11, %15 : vector<1x128xf32>
    %cst_13 = arith.constant 0.001953125 : f32
    %17 = vector.broadcast %cst_13 : f32 to vector<1x128xf32>
    %18 = arith.mulf %14, %17 : vector<1x128xf32>
    %19 = arith.mulf %16, %16 : vector<1x128xf32>
    %20 = arith.subf %18, %19 : vector<1x128xf32>
    %21 = vector.broadcast %16 : vector<1x128xf32> to vector<512x128xf32>
    %22 = arith.subf %9, %21 : vector<512x128xf32>
    %cst_14 = arith.constant 9.99999974E-6 : f32
    %23 = vector.broadcast %cst_14 : f32 to vector<1x128xf32>
    %24 = arith.addf %20, %23 : vector<1x128xf32>
    %25 = math.rsqrt %24 : vector<1x128xf32>
    %26 = vector.broadcast %25 : vector<1x128xf32> to vector<512x128xf32>
    %27 = arith.mulf %22, %26 : vector<512x128xf32>
    %28 = vector.broadcast %4 : vector<1x128xf32> to vector<512x128xf32>
    %29 = arith.mulf %27, %28 : vector<512x128xf32>
    %30 = vector.broadcast %5 : vector<1x128xf32> to vector<512x128xf32>
    %31 = arith.addf %29, %30 : vector<512x128xf32>
    %cst_15 = arith.constant 0.000000e+00 : f32
    %32 = vector.broadcast %cst_15 : f32 to vector<2x1x32x128xf32>
    %c0_16 = arith.constant 0 : index
    %c0_17 = arith.constant 0 : index
    %c0_18 = arith.constant 0 : index
    %c0_19 = arith.constant 0 : index
    %33 = vector.load %arg10[%c0_16, %c0_17, %c0_18, %c0_19] : memref<2x18x32x128xf32, #tpu.memory_space<vmem>>, vector<2x1x32x128xf32>
    tpu.vector_store %arg10[%c0_16, %c0_17, %c0_18, %c0_19], %32 {strides = array<i32>} : memref<2x18x32x128xf32, #tpu.memory_space<vmem>>, vector<2x1x32x128xf32>,
    %c0_20 = arith.constant 0 : index
    %c17 = arith.constant 17 : index
    %c0_21 = arith.constant 0 : index
    %c0_22 = arith.constant 0 : index
    %34 = vector.load %arg10[%c0_20, %c17, %c0_21, %c0_22] : memref<2x18x32x128xf32, #tpu.memory_space<vmem>>, vector<2x1x32x128xf32>
    tpu.vector_store %arg10[%c0_20, %c17, %c0_21, %c0_22], %32 {strides = array<i32>} : memref<2x18x32x128xf32, #tpu.memory_space<vmem>>, vector<2x1x32x128xf32>,
    %cst_23 = arith.constant 0.000000e+00 : f32
    %35 = vector.broadcast %cst_23 : f32 to vector<2x16x1x128xf32>
    %c0_24 = arith.constant 0 : index
    %c1 = arith.constant 1 : index
    %c7 = arith.constant 7 : index
    %c0_25 = arith.constant 0 : index
    %36 = vector.load %arg10[%c0_24, %c1, %c7, %c0_25] : memref<2x18x32x128xf32, #tpu.memory_space<vmem>>, vector<2x16x1x128xf32>
    tpu.vector_store %arg10[%c0_24, %c1, %c7, %c0_25], %35 {strides = array<i32>} : memref<2x18x32x128xf32, #tpu.memory_space<vmem>>, vector<2x16x1x128xf32>,
    %c0_26 = arith.constant 0 : index
    %c1_27 = arith.constant 1 : index
    %c24 = arith.constant 24 : index
    %c0_28 = arith.constant 0 : index
    %37 = vector.load %arg10[%c0_26, %c1_27, %c24, %c0_28] : memref<2x18x32x128xf32, #tpu.memory_space<vmem>>, vector<2x16x1x128xf32>
    tpu.vector_store %arg10[%c0_26, %c1_27, %c24, %c0_28], %35 {strides = array<i32>} : memref<2x18x32x128xf32, #tpu.memory_space<vmem>>, vector<2x16x1x128xf32>,
    %38 = vector.shape_cast %31 : vector<512x128xf32> to vector<2x16x16x128xf32>
    %c0_29 = arith.constant 0 : index
    %c1_30 = arith.constant 1 : index
    %c8 = arith.constant 8 : index
    %c0_31 = arith.constant 0 : index
    %39 = vector.load %arg10[%c0_29, %c1_30, %c8, %c0_31] : memref<2x18x32x128xf32, #tpu.memory_space<vmem>>, vector<2x16x16x128xf32>
    tpu.vector_store %arg10[%c0_29, %c1_30, %c8, %c0_31], %38 {strides = array<i32>} : memref<2x18x32x128xf32, #tpu.memory_space<vmem>>, vector<2x16x16x128xf32>,
    %c0_32 = arith.constant 0 : index
    %c0_33 = arith.constant 0 : index
    %c7_34 = arith.constant 7 : index
    %c0_35 = arith.constant 0 : index
    %40 = vector.load %arg10[%c0_32, %c0_33, %c7_34, %c0_35] : memref<2x18x32x128xf32, #tpu.memory_space<vmem>>, vector<2x16x16x128xf32>
    %41 = vector.shape_cast %40 : vector<2x16x16x128xf32> to vector<512x128xf32>
    %c0_36 = arith.constant 0 : index
    %c0_37 = arith.constant 0 : index
    %c8_38 = arith.constant 8 : index
    %c0_39 = arith.constant 0 : index
    %42 = vector.load %arg10[%c0_36, %c0_37, %c8_38, %c0_39] : memref<2x18x32x128xf32, #tpu.memory_space<vmem>>, vector<2x16x16x128xf32>
    %43 = vector.shape_cast %42 : vector<2x16x16x128xf32> to vector<512x128xf32>
    %44 = tpu.concatenate %41, %43 in 1 : vector<512x128xf32>, vector<512x128xf32> -> vector<512x256xf32>
    %c0_40 = arith.constant 0 : index
    %c0_41 = arith.constant 0 : index
    %45 = vector.load %arg5[%c0_40, %c0_41] : memref<1152x128xf32, #tpu.memory_space<vmem>>, vector<256x128xf32>
    %cst_42 = arith.constant dense<0.000000e+00> : vector<512x128xf32>
    %46 = tpu.matmul %44, %45, %cst_42 {dimension_numbers = #tpu.dot_dimension_numbers<[1], [0], [0], [1], [0, 0, 1, 1], [], []>} : vector<512x256xf32>, vector<256x128xf32>, vector<512x128xf32> -> vector<512x128xf32>
    %c0_43 = arith.constant 0 : index
    %c0_44 = arith.constant 0 : index
    %c9 = arith.constant 9 : index
    %c0_45 = arith.constant 0 : index
    %47 = vector.load %arg10[%c0_43, %c0_44, %c9, %c0_45] : memref<2x18x32x128xf32, #tpu.memory_space<vmem>>, vector<2x16x16x128xf32>
    %48 = vector.shape_cast %47 : vector<2x16x16x128xf32> to vector<512x128xf32>
    %c0_46 = arith.constant 0 : index
    %c1_47 = arith.constant 1 : index
    %c7_48 = arith.constant 7 : index
    %c0_49 = arith.constant 0 : index
    %49 = vector.load %arg10[%c0_46, %c1_47, %c7_48, %c0_49] : memref<2x18x32x128xf32, #tpu.memory_space<vmem>>, vector<2x16x16x128xf32>
    %50 = vector.shape_cast %49 : vector<2x16x16x128xf32> to vector<512x128xf32>
    %51 = tpu.concatenate %48, %50 in 1 : vector<512x128xf32>, vector<512x128xf32> -> vector<512x256xf32>
    %c256 = arith.constant 256 : index
    %c0_50 = arith.constant 0 : index
    %52 = vector.load %arg5[%c256, %c0_50] : memref<1152x128xf32, #tpu.memory_space<vmem>>, vector<256x128xf32>
    %cst_51 = arith.constant dense<0.000000e+00> : vector<512x128xf32>
    %53 = tpu.matmul %51, %52, %cst_51 {dimension_numbers = #tpu.dot_dimension_numbers<[1], [0], [0], [1], [0, 0, 1, 1], [], []>} : vector<512x256xf32>, vector<256x128xf32>, vector<512x128xf32> -> vector<512x128xf32>
    %54 = arith.addf %46, %53 : vector<512x128xf32>
    %c0_52 = arith.constant 0 : index
    %c1_53 = arith.constant 1 : index
    %c8_54 = arith.constant 8 : index
    %c0_55 = arith.constant 0 : index
    %55 = vector.load %arg10[%c0_52, %c1_53, %c8_54, %c0_55] : memref<2x18x32x128xf32, #tpu.memory_space<vmem>>, vector<2x16x16x128xf32>
    %56 = vector.shape_cast %55 : vector<2x16x16x128xf32> to vector<512x128xf32>
    %c0_56 = arith.constant 0 : index
    %c1_57 = arith.constant 1 : index
    %c9_58 = arith.constant 9 : index
    %c0_59 = arith.constant 0 : index
    %57 = vector.load %arg10[%c0_56, %c1_57, %c9_58, %c0_59] : memref<2x18x32x128xf32, #tpu.memory_space<vmem>>, vector<2x16x16x128xf32>
    %58 = vector.shape_cast %57 : vector<2x16x16x128xf32> to vector<512x128xf32>
    %59 = tpu.concatenate %56, %58 in 1 : vector<512x128xf32>, vector<512x128xf32> -> vector<512x256xf32>
    %c512 = arith.constant 512 : index
    %c0_60 = arith.constant 0 : index
    %60 = vector.load %arg5[%c512, %c0_60] : memref<1152x128xf32, #tpu.memory_space<vmem>>, vector<256x128xf32>
    %cst_61 = arith.constant dense<0.000000e+00> : vector<512x128xf32>
    %61 = tpu.matmul %59, %60, %cst_61 {dimension_numbers = #tpu.dot_dimension_numbers<[1], [0], [0], [1], [0, 0, 1, 1], [], []>} : vector<512x256xf32>, vector<256x128xf32>, vector<512x128xf32> -> vector<512x128xf32>
    %62 = arith.addf %54, %61 : vector<512x128xf32>
    %c0_62 = arith.constant 0 : index
    %c2 = arith.constant 2 : index
    %c7_63 = arith.constant 7 : index
    %c0_64 = arith.constant 0 : index
    %63 = vector.load %arg10[%c0_62, %c2, %c7_63, %c0_64] : memref<2x18x32x128xf32, #tpu.memory_space<vmem>>, vector<2x16x16x128xf32>
    %64 = vector.shape_cast %63 : vector<2x16x16x128xf32> to vector<512x128xf32>
    %c0_65 = arith.constant 0 : index
    %c2_66 = arith.constant 2 : index
    %c8_67 = arith.constant 8 : index
    %c0_68 = arith.constant 0 : index
    %65 = vector.load %arg10[%c0_65, %c2_66, %c8_67, %c0_68] : memref<2x18x32x128xf32, #tpu.memory_space<vmem>>, vector<2x16x16x128xf32>
    %66 = vector.shape_cast %65 : vector<2x16x16x128xf32> to vector<512x128xf32>
    %67 = tpu.concatenate %64, %66 in 1 : vector<512x128xf32>, vector<512x128xf32> -> vector<512x256xf32>
    %c768 = arith.constant 768 : index
    %c0_69 = arith.constant 0 : index
    %68 = vector.load %arg5[%c768, %c0_69] : memref<1152x128xf32, #tpu.memory_space<vmem>>, vector<256x128xf32>
    %cst_70 = arith.constant dense<0.000000e+00> : vector<512x128xf32>
    %69 = tpu.matmul %67, %68, %cst_70 {dimension_numbers = #tpu.dot_dimension_numbers<[1], [0], [0], [1], [0, 0, 1, 1], [], []>} : vector<512x256xf32>, vector<256x128xf32>, vector<512x128xf32> -> vector<512x128xf32>
    %70 = arith.addf %62, %69 : vector<512x128xf32>
    %c0_71 = arith.constant 0 : index
    %c2_72 = arith.constant 2 : index
    %c9_73 = arith.constant 9 : index
    %c0_74 = arith.constant 0 : index
    %71 = vector.load %arg10[%c0_71, %c2_72, %c9_73, %c0_74] : memref<2x18x32x128xf32, #tpu.memory_space<vmem>>, vector<2x16x16x128xf32>
    %72 = vector.shape_cast %71 : vector<2x16x16x128xf32> to vector<512x128xf32>
    %c1024 = arith.constant 1024 : index
    %c0_75 = arith.constant 0 : index
    %73 = vector.load %arg5[%c1024, %c0_75] : memref<1152x128xf32, #tpu.memory_space<vmem>>, vector<128x128xf32>
    %cst_76 = arith.constant dense<0.000000e+00> : vector<512x128xf32>
    %74 = tpu.matmul %72, %73, %cst_76 {dimension_numbers = #tpu.dot_dimension_numbers<[1], [0], [0], [1], [0, 0, 1, 1], [], []>} : vector<512x128xf32>, vector<128x128xf32>, vector<512x128xf32> -> vector<512x128xf32>
    %75 = arith.addf %70, %74 : vector<512x128xf32>
    %c0_77 = arith.constant 0 : index
    %c0_78 = arith.constant 0 : index
    %76 = vector.load %arg6[%c0_77, %c0_78] : memref<1x128xf32, #tpu.memory_space<vmem>>, vector<1x128xf32>
    %c0_79 = arith.constant 0 : index
    %c0_80 = arith.constant 0 : index
    %77 = vector.load %arg7[%c0_79, %c0_80] : memref<1x128xf32, #tpu.memory_space<vmem>>, vector<1x128xf32>
    %c0_81 = arith.constant 0 : index
    %c0_82 = arith.constant 0 : index
    %78 = vector.load %arg8[%c0_81, %c0_82] : memref<1x128xf32, #tpu.memory_space<vmem>>, vector<1x128xf32>
    %79 = vector.broadcast %76 : vector<1x128xf32> to vector<512x128xf32>
    %80 = arith.addf %75, %79 : vector<512x128xf32>
    %cst_83 = arith.constant 0.000000e+00 : f32
    %81 = vector.broadcast %cst_83 : f32 to vector<512x128xf32>
    %82 = arith.maximumf %80, %81 : vector<512x128xf32>
    %cst_84 = arith.constant dense<0.000000e+00> : vector<128xf32>
    %83 = vector.multi_reduction <add>, %82, %cst_84 [0] : vector<512x128xf32> to vector<128xf32>
    %84 = vector.shape_cast %83 : vector<128xf32> to vector<1x128xf32>
    %85 = arith.mulf %82, %82 : vector<512x128xf32>
    %cst_85 = arith.constant dense<0.000000e+00> : vector<128xf32>
    %86 = vector.multi_reduction <add>, %85, %cst_85 [0] : vector<512x128xf32> to vector<128xf32>
    %87 = vector.shape_cast %86 : vector<128xf32> to vector<1x128xf32>
    %cst_86 = arith.constant 0.001953125 : f32
    %88 = vector.broadcast %cst_86 : f32 to vector<1x128xf32>
    %89 = arith.mulf %84, %88 : vector<1x128xf32>
    %cst_87 = arith.constant 0.001953125 : f32
    %90 = vector.broadcast %cst_87 : f32 to vector<1x128xf32>
    %91 = arith.mulf %87, %90 : vector<1x128xf32>
    %92 = arith.mulf %89, %89 : vector<1x128xf32>
    %93 = arith.subf %91, %92 : vector<1x128xf32>
    %94 = vector.broadcast %89 : vector<1x128xf32> to vector<512x128xf32>
    %95 = arith.subf %82, %94 : vector<512x128xf32>
    %cst_88 = arith.constant 9.99999974E-6 : f32
    %96 = vector.broadcast %cst_88 : f32 to vector<1x128xf32>
    %97 = arith.addf %93, %96 : vector<1x128xf32>
    %98 = math.rsqrt %97 : vector<1x128xf32>
    %99 = vector.broadcast %98 : vector<1x128xf32> to vector<512x128xf32>
    %100 = arith.mulf %95, %99 : vector<512x128xf32>
    %101 = vector.broadcast %77 : vector<1x128xf32> to vector<512x128xf32>
    %102 = arith.mulf %100, %101 : vector<512x128xf32>
    %103 = vector.broadcast %78 : vector<1x128xf32> to vector<512x128xf32>
    %104 = arith.addf %102, %103 : vector<512x128xf32>
    %c0_89 = arith.constant 0 : index
    %c0_90 = arith.constant 0 : index
    %105 = vector.load %arg9[%c0_89, %c0_90] : memref<512x128xf32, #tpu.memory_space<vmem>>, vector<512x128xf32>
    tpu.vector_store %arg9[%c0_89, %c0_90], %104 {strides = array<i32>} : memref<512x128xf32, #tpu.memory_space<vmem>>, vector<512x128xf32>,
    return
  }
}

</mosaic_0001>

<bundles_post_ra>
// kernel: tpu_custom_call.1
= control target key start
LH: loop header
LB: loop body
LE: loop exit
PB: predicated region body
PF: predicated region fallthrough
CT: control target
= control target key end

     0   :  { %14 = vsyncpa [#allocation4], 0  ;;  %s8906_s0 = inlined_call_operand.hbm [shape: f32[512,128], index: 0, kind: input, shape index: {}]   ;;  %s8907_s1 = inlined_call_operand.hbm [shape: f32[128,128], index: 1, kind: input, shape index: {}]   ;;  %s8908_s2 = inlined_call_operand.vmem [shape: f32[1,128], index: 2, kind: input, shape index: {}]   ;;  %s8909_s3 = inlined_call_operand.vmem [shape: f32[1,128], index: 3, kind: input, shape index: {}]   ;;  %s8910_s4 = inlined_call_operand.vmem [shape: f32[1,128], index: 4, kind: input, shape index: {}]   ;;  %s8911_s5 = inlined_call_operand.hbm [shape: f32[1152,128], index: 5, kind: input, shape index: {}]   ;;  %s8912_s6 = inlined_call_operand.vmem [shape: f32[1,128], index: 6, kind: input, shape index: {}]   ;;  %s8913_s7 = inlined_call_operand.vmem [shape: f32[1,128], index: 7, kind: input, shape index: {}]   ;;  %s8914_s8 = inlined_call_operand.vmem [shape: f32[1,128], index: 8, kind: input, shape index: {}]   ;;  %s8915_s9 = inlined_call_operand.hbm [shape: f32[512,128], index: 9, kind: output, shape index: {}]  }
   0x1   :  { %15 = vsyncpa [#allocation7], 0 }
   0x2   :  { %16 = vsyncpa [#allocation5], 0  ;;  %s5322_s30 = smov [#allocation6]   ;;  %s5323_s11 = smov [#allocation3]  }
   0x3   :  { %s34_s10 = sshll.u32 %s5322_s30, 4  ;;  %s22_s12 = sshll.u32 %s5323_s11, 4  ;;  %s35_s10 = int_to_ptr.vmem [resolvable:$true] %s34_s10  ;;  %s23_s12 = int_to_ptr.vmem [resolvable:$true] %s22_s12 }
   0x4   :  { %s5244_s13 = scalar_lea.vmem %s35_s10, 2048  ;;  %p5249_p1 = scmp.lt.s32.totalorder %s35_s10, %s35_s10 }
   0x5   :  { %p5245_p0 = scmp.ne.s32.totalorder %s35_s10, %s5244_s13  ;;  %p5250_p2 = scmp.lt.s32.totalorder %s5244_s13, %s5244_s13 }
   0x7   :  { %p5251_p3 = por %p5250_p2, %p5249_p1 }
   0x9   :  { %p5252_p4 = pnand %p5251_p3, %p5245_p0 }
   0xb   :  { %5255 = shalt.err (!%p5252_p4)
}
   0xc   :  { %s5324_s14 = smov 128   ;;  %s5325_s15 = smov 8  }
   0xd   :  { %40 = dma.hbm_to_vmem [thread:$0]  %s8907_s1, 2048, %s35_s10, [#allocation7], %s5324_s14, %s5324_s14, %s5325_s15  }
   0xe   :  { %s5264_s18 = scalar_lea.vmem %s23_s12, 8192  ;;  %p5269_p6 = scmp.lt.s32.totalorder %s23_s12, %s23_s12 }
   0xf   :  { %p5265_p5 = scmp.ne.s32.totalorder %s23_s12, %s5264_s18  ;;  %p5270_p7 = scmp.lt.s32.totalorder %s5264_s18, %s5264_s18 }
  0x11   :  { %p5271_p8 = por %p5270_p7, %p5269_p6 }
  0x13   :  { %p5272_p9 = pnand %p5271_p8, %p5265_p5 }
  0x15   :  { %5275 = shalt.err (!%p5272_p9)
}
  0x16   :  { %28 = dma.hbm_to_vmem [thread:$0]  %s8906_s0, 8192, %s23_s12, [#allocation4], %s5324_s14, %s5324_s14, %s5325_s15  }
  0x17   :  { %s5326_s21 = smov [#allocation8]  }
  0x18   :  { %s52_s22 = sshll.u32 %s5326_s21, 4  ;;  %s53_s22 = int_to_ptr.vmem [resolvable:$true] %s52_s22 }
  0x19   :  { %s5284_s23 = scalar_lea.vmem %s53_s22, 18432  ;;  %p5289_p11 = scmp.lt.s32.totalorder %s53_s22, %s53_s22 }
  0x1a   :  { %p5285_p10 = scmp.ne.s32.totalorder %s53_s22, %s5284_s23  ;;  %p5290_p12 = scmp.lt.s32.totalorder %s5284_s23, %s5284_s23 }
  0x1c   :  { %p5291_p13 = por %p5290_p12, %p5289_p11 }
  0x1e   :  { %p5292_p0 = pnand %p5291_p13, %p5285_p10 }
  0x20   :  { %5295 = shalt.err (!%p5292_p0)
}
  0x21   :  { %58 = dma.hbm_to_vmem [thread:$0]  %s8911_s5, 18432, %s53_s22, [#allocation7], %s5324_s14, %s5324_s14, %s5325_s15  }
  0x22   :  { %5316 = dma.done.wait [#allocation4], 8192  }
  0x23   :  { %5317 = vsyncadd [#allocation4], 4294959104 }
  0x24   :  { %5318 = dma.done.wait [#allocation7], 20480  }
  0x25   :  { %5319 = vsyncadd [#allocation7], 4294946816  ;;  %v153_v0 = vld [vmem:[#allocation6 + $0x78] sm:$0xff]  ;;  %v152_v1 = vld [vmem:[#allocation6 + $0x70] sm:$0xff] }
  0x26   :  { %4933 = vmatprep.subr.mxu0 %v153_v0  ;;  %v151_v2 = vld [vmem:[#allocation6 + $0x68] sm:$0xff]  ;;  %v150_v3 = vld [vmem:[#allocation6 + $0x60] sm:$0xff]  ;;  %v149_v5 = vld [vmem:[#allocation6 + $0x58] sm:$0xff] }
  0x27   :  { %4934 = vmatpush3.msra.mxu0 %v153_v0  ;;  %v74_v4 = vld [vmem:[#allocation3] sm:$0xff]  ;;  %v148_v6 = vld [vmem:[#allocation6 + $0x50] sm:$0xff]  ;;  %v147_v7 = vld [vmem:[#allocation6 + $0x48] sm:$0xff] }
  0x28   :  { %4935 = vmatprep.subr.mxu0 %v152_v1  ;;  %4965 = vmatprep.mubr.f32.mxu0 %v74_v4  ;;  %v146_v8 = vld [vmem:[#allocation6 + $0x40] sm:$0xff]  ;;  %v145_v9 = vld [vmem:[#allocation6 + $0x38] sm:$0xff]  ;;  %v144_v10 = vld [vmem:[#allocation6 + $0x30] sm:$0xff] }
  0x29   :  { %4936 = vmatpush3.msra.mxu0 %v152_v1  ;;  %v143_v11 = vld [vmem:[#allocation6 + $0x28] sm:$0xff]  ;;  %v142_v12 = vld [vmem:[#allocation6 + $0x20] sm:$0xff]  ;;  %v141_v13 = vld [vmem:[#allocation6 + $0x18] sm:$0xff] }
  0x2a   :  { %4937 = vmatprep.subr.mxu0 %v151_v2  ;;  %v140_v14 = vld [vmem:[#allocation6 + $0x10] sm:$0xff]  ;;  %v139_v15 = vld [vmem:[#allocation6 + $0x8] sm:$0xff]  ;;  %v138_v16 = vld [vmem:[#allocation6] sm:$0xff] }
  0x2b   :  { %4938 = vmatpush3.msra.mxu0 %v151_v2  ;;  %v75_v17 = vld [vmem:[#allocation3 + $0x8] sm:$0xff]  ;;  %v76_v18 = vld [vmem:[#allocation3 + $0x10] sm:$0xff]  ;;  %v77_v19 = vld [vmem:[#allocation3 + $0x18] sm:$0xff] }
  0x2c   :  { %4939 = vmatprep.subr.mxu0 %v150_v3  ;;  %v78_v20 = vld [vmem:[#allocation3 + $0x20] sm:$0xff]  ;;  %v79_v21 = vld [vmem:[#allocation3 + $0x28] sm:$0xff]  ;;  %v80_v22 = vld [vmem:[#allocation3 + $0x30] sm:$0xff] }
  0x2d   :  { %4940 = vmatpush3.msra.mxu0 %v150_v3  ;;  %v81_v23 = vld [vmem:[#allocation3 + $0x38] sm:$0xff]  ;;  %v82_v24 = vld [vmem:[#allocation3 + $0x40] sm:$0xff]  ;;  %v83_v25 = vld [vmem:[#allocation3 + $0x48] sm:$0xff] }
  0x2e   :  { %4941 = vmatprep.subr.mxu0 %v149_v5  ;;  %v84_v26 = vld [vmem:[#allocation3 + $0x50] sm:$0xff]  ;;  %v85_v27 = vld [vmem:[#allocation3 + $0x58] sm:$0xff]  ;;  %v86_v28 = vld [vmem:[#allocation3 + $0x60] sm:$0xff] }
  0x2f   :  { %4942 = vmatpush3.msra.mxu0 %v149_v5  ;;  %v87_v29 = vld [vmem:[#allocation3 + $0x68] sm:$0xff]  ;;  %v88_v30 = vld [vmem:[#allocation3 + $0x70] sm:$0xff]  ;;  %v89_v31 = vld [vmem:[#allocation3 + $0x78] sm:$0xff] }
  0x30   :  { %4943 = vmatprep.subr.mxu0 %v148_v6  ;;  %v90_v32 = vld [vmem:[#allocation3 + $0x80] sm:$0xff]  ;;  %v91_v33 = vld [vmem:[#allocation3 + $0x88] sm:$0xff]  ;;  %v92_v34 = vld [vmem:[#allocation3 + $0x90] sm:$0xff] }
  0x31   :  { %4944 = vmatpush3.msra.mxu0 %v148_v6  ;;  %v93_v35 = vld [vmem:[#allocation3 + $0x98] sm:$0xff]  ;;  %v94_v36 = vld [vmem:[#allocation3 + $0xa0] sm:$0xff]  ;;  %v95_v37 = vld [vmem:[#allocation3 + $0xa8] sm:$0xff] }
  0x32   :  { %4945 = vmatprep.subr.mxu0 %v147_v7  ;;  %v96_v38 = vld [vmem:[#allocation3 + $0xb0] sm:$0xff]  ;;  %v97_v39 = vld [vmem:[#allocation3 + $0xb8] sm:$0xff]  ;;  %v98_v40 = vld [vmem:[#allocation3 + $0xc0] sm:$0xff] }
  0x33   :  { %4946 = vmatpush3.msra.mxu0 %v147_v7  ;;  %v99_v41 = vld [vmem:[#allocation3 + $0xc8] sm:$0xff]  ;;  %v100_v42 = vld [vmem:[#allocation3 + $0xd0] sm:$0xff]  ;;  %v101_v43 = vld [vmem:[#allocation3 + $0xd8] sm:$0xff] }
  0x34   :  { %4947 = vmatprep.subr.mxu0 %v146_v8  ;;  %v102_v44 = vld [vmem:[#allocation3 + $0xe0] sm:$0xff]  ;;  %v103_v45 = vld [vmem:[#allocation3 + $0xe8] sm:$0xff]  ;;  %v104_v46 = vld [vmem:[#allocation3 + $0xf0] sm:$0xff] }
  0x35   :  { %4948 = vmatpush3.msra.mxu0 %v146_v8  ;;  %v105_v47 = vld [vmem:[#allocation3 + $0xf8] sm:$0xff]  ;;  %v106_v48 = vld [vmem:[#allocation3 + $0x100] sm:$0xff]  ;;  %v107_v49 = vld [vmem:[#allocation3 + $0x108] sm:$0xff] }
  0x36   :  { %4949 = vmatprep.subr.mxu0 %v145_v9  ;;  %v108_v50 = vld [vmem:[#allocation3 + $0x110] sm:$0xff]  ;;  %v109_v51 = vld [vmem:[#allocation3 + $0x118] sm:$0xff]  ;;  %v110_v52 = vld [vmem:[#allocation3 + $0x120] sm:$0xff] }
  0x37   :  { %4950 = vmatpush3.msra.mxu0 %v145_v9  ;;  %v111_v53 = vld [vmem:[#allocation3 + $0x128] sm:$0xff]  ;;  %v112_v54 = vld [vmem:[#allocation3 + $0x130] sm:$0xff]  ;;  %v113_v55 = vld [vmem:[#allocation3 + $0x138] sm:$0xff] }
  0x38   :  { %4951 = vmatprep.subr.mxu0 %v144_v10  ;;  %v114_v56 = vld [vmem:[#allocation3 + $0x140] sm:$0xff]  ;;  %v115_v57 = vld [vmem:[#allocation3 + $0x148] sm:$0xff]  ;;  %v116_v58 = vld [vmem:[#allocation3 + $0x150] sm:$0xff] }
  0x39   :  { %4952 = vmatpush3.msra.mxu0 %v144_v10  ;;  %v117_v59 = vld [vmem:[#allocation3 + $0x158] sm:$0xff]  ;;  %v118_v60 = vld [vmem:[#allocation3 + $0x160] sm:$0xff]  ;;  %v119_v61 = vld [vmem:[#allocation3 + $0x168] sm:$0xff] }
  0x3a   :  { %4953 = vmatprep.subr.mxu0 %v143_v11  ;;  %v120_v62 = vld [vmem:[#allocation3 + $0x170] sm:$0xff]  ;;  %v121_v63 = vld [vmem:[#allocation3 + $0x178] sm:$0xff]  ;;  %v122_v0 = vld [vmem:[#allocation3 + $0x180] sm:$0xff] }
  0x3b   :  { %4954 = vmatpush3.msra.mxu0 %v143_v11  ;;  %v123_v1 = vld [vmem:[#allocation3 + $0x188] sm:$0xff]  ;;  %v124_v2 = vld [vmem:[#allocation3 + $0x190] sm:$0xff]  ;;  %v125_v3 = vld [vmem:[#allocation3 + $0x198] sm:$0xff] }
  0x3c   :  { %4955 = vmatprep.subr.mxu0 %v142_v12  ;;  %v126_v4 = vld [vmem:[#allocation3 + $0x1a0] sm:$0xff]  ;;  %v127_v5 = vld [vmem:[#allocation3 + $0x1a8] sm:$0xff]  ;;  %v128_v6 = vld [vmem:[#allocation3 + $0x1b0] sm:$0xff] }
  0x3d   :  { %4956 = vmatpush3.msra.mxu0 %v142_v12  ;;  %v129_v7 = vld [vmem:[#allocation3 + $0x1b8] sm:$0xff]  ;;  %v130_v8 = vld [vmem:[#allocation3 + $0x1c0] sm:$0xff]  ;;  %v131_v9 = vld [vmem:[#allocation3 + $0x1c8] sm:$0xff] }
  0x3e   :  { %4957 = vmatprep.subr.mxu0 %v141_v13  ;;  %v132_v10 = vld [vmem:[#allocation3 + $0x1d0] sm:$0xff]  ;;  %v133_v11 = vld [vmem:[#allocation3 + $0x1d8] sm:$0xff]  ;;  %v134_v12 = vld [vmem:[#allocation3 + $0x1e0] sm:$0xff] }
  0x3f   :  { %4958 = vmatpush3.msra.mxu0 %v141_v13  ;;  %v5397_v13 = vld [vmem:[#allocation3 + $0x1e8] sm:$0xff] }
  0x40   :  { %4959 = vmatprep.subr.mxu0 %v140_v14 }
  0x41   :  { %4960 = vmatpush3.msra.mxu0 %v140_v14  ;;  %v5399_v14 = vld [vmem:[#allocation3 + $0x1f0] sm:$0xff] }
  0x42   :  { %4961 = vmatprep.subr.mxu0 %v139_v15 }
  0x43   :  { %4962 = vmatpush3.msra.mxu0 %v139_v15  ;;  %v5401_v15 = vld [vmem:[#allocation8 + $0x78] sm:$0xff] }
  0x44   :  { %4963 = vmatprep.subr.mxu0 %v138_v16 }
  0x45   :  { %4964 = vmatpush3.msra.mxu0 %v138_v16  ;;  %v5327_v16 = vmov 0.0  }
  0x46   :  { %4966 = vmatmul.mubr.f32.vlgmr.msra.gmra.mxu0 %v75_v17  ;;  %1939 = vmatprep.subr.mxu0 %v5327_v16  ;;  %1088 = vst [vmem:[#allocation2] sm:$0xff] %v5327_v16  ;;  %1089 = vst [vmem:[#allocation2 + $0x8] sm:$0xff] %v5327_v16  ;;  %v137_v17 = vld [vmem:[#allocation3 + $0x1f8] sm:$0xff] }
  0x47   :  { %4968 = vmatprep.mubr.f32.mxu0 %v76_v18  ;;  %1090 = vst [vmem:[#allocation2 + $0x10] sm:$0xff] %v5327_v16  ;;  %1091 = vst [vmem:[#allocation2 + $0x18] sm:$0xff] %v5327_v16  ;;  %1554 = vmatprep.subr.mxu1 %v5327_v16  ;;  %v1376_v18 = vld [vmem:[#allocation8 + $0x70] sm:$0xff] }
  0x48   :  { %1092 = vst [vmem:[#allocation2 + $0x240] sm:$0xff] %v5327_v16  ;;  %1093 = vst [vmem:[#allocation2 + $0x248] sm:$0xff] %v5327_v16  ;;  %1940 = vmatpush1.msra.mxu0 %v5401_v15 }
  0x49   :  { %1094 = vst [vmem:[#allocation2 + $0x250] sm:$0xff] %v5327_v16  ;;  %1095 = vst [vmem:[#allocation2 + $0x258] sm:$0xff] %v5327_v16  ;;  %1941 = vmatprep.subr.mxu0 %v5327_v16 }
  0x4a   :  { %4969 = vmatmul.mubr.f32.gmra.mxu0 %v77_v19  ;;  %1097 = vst [vmem:[#allocation2 + $0x220] sm:$0xff] %v5327_v16  ;;  %1098 = vst [vmem:[#allocation2 + $0x228] sm:$0xff] %v5327_v16  ;;  %v1375_v19 = vld [vmem:[#allocation8 + $0x68] sm:$0xff] }
  0x4b   :  { %4971 = vmatprep.mubr.f32.mxu0 %v78_v20  ;;  %1099 = vst [vmem:[#allocation2 + $0x230] sm:$0xff] %v5327_v16  ;;  %1100 = vst [vmem:[#allocation2 + $0x238] sm:$0xff] %v5327_v16  ;;  %1942 = vmatpush1.msra.mxu0 %v1376_v18  ;;  %v1374_v20 = vld [vmem:[#allocation8 + $0x60] sm:$0xff] }
  0x4c   :  { %1101 = vst [vmem:[#allocation2 + $0x460] sm:$0xff] %v5327_v16  ;;  %1102 = vst [vmem:[#allocation2 + $0x468] sm:$0xff] %v5327_v16  ;;  %1943 = vmatprep.subr.mxu0 %v5327_v16 }
  0x4d   :  { %1103 = vst [vmem:[#allocation2 + $0x470] sm:$0xff] %v5327_v16  ;;  %1104 = vst [vmem:[#allocation2 + $0x478] sm:$0xff] %v5327_v16  ;;  %1944 = vmatpush1.msra.mxu0 %v1375_v19 }
  0x4e   :  { %4972 = vmatmul.mubr.f32.gmra.mxu0 %v79_v21  ;;  %1106 = vst [vmem:[#allocation2 + $0x27] sm:$0x1] %v5327_v16  ;;  %1107 = vst [vmem:[#allocation2 + $0x47] sm:$0x1] %v5327_v16  ;;  %1945 = vmatprep.subr.mxu0 %v5327_v16  ;;  %v1373_v21 = vld [vmem:[#allocation8 + $0x58] sm:$0xff] }
  0x4f   :  { %4974 = vmatprep.mubr.f32.mxu0 %v80_v22  ;;  %1108 = vst [vmem:[#allocation2 + $0x67] sm:$0x1] %v5327_v16  ;;  %1109 = vst [vmem:[#allocation2 + $0x87] sm:$0x1] %v5327_v16  ;;  %1946 = vmatpush1.msra.mxu0 %v1374_v20  ;;  %v1372_v22 = vld [vmem:[#allocation8 + $0x50] sm:$0xff] }
  0x50   :  { %1110 = vst [vmem:[#allocation2 + $0xa7] sm:$0x1] %v5327_v16  ;;  %1111 = vst [vmem:[#allocation2 + $0xc7] sm:$0x1] %v5327_v16  ;;  %1947 = vmatprep.subr.mxu0 %v5327_v16 }
  0x51   :  { %1112 = vst [vmem:[#allocation2 + $0xe7] sm:$0x1] %v5327_v16  ;;  %1113 = vst [vmem:[#allocation2 + $0x107] sm:$0x1] %v5327_v16  ;;  %1948 = vmatpush1.msra.mxu0 %v1373_v21 }
  0x52   :  { %4975 = vmatmul.mubr.f32.gmra.mxu0 %v81_v23  ;;  %1114 = vst [vmem:[#allocation2 + $0x127] sm:$0x1] %v5327_v16  ;;  %1115 = vst [vmem:[#allocation2 + $0x147] sm:$0x1] %v5327_v16  ;;  %1949 = vmatprep.subr.mxu0 %v5327_v16  ;;  %v1371_v23 = vld [vmem:[#allocation8 + $0x48] sm:$0xff] }
  0x53   :  { %4977 = vmatprep.mubr.f32.mxu0 %v82_v24  ;;  %1116 = vst [vmem:[#allocation2 + $0x167] sm:$0x1] %v5327_v16  ;;  %1117 = vst [vmem:[#allocation2 + $0x187] sm:$0x1] %v5327_v16  ;;  %1950 = vmatpush1.msra.mxu0 %v1372_v22  ;;  %v1370_v24 = vld [vmem:[#allocation8 + $0x40] sm:$0xff] }
  0x54   :  { %1118 = vst [vmem:[#allocation2 + $0x1a7] sm:$0x1] %v5327_v16  ;;  %1119 = vst [vmem:[#allocation2 + $0x1c7] sm:$0x1] %v5327_v16  ;;  %1951 = vmatprep.subr.mxu0 %v5327_v16 }
  0x55   :  { %1120 = vst [vmem:[#allocation2 + $0x1e7] sm:$0x1] %v5327_v16  ;;  %1121 = vst [vmem:[#allocation2 + $0x207] sm:$0x1] %v5327_v16  ;;  %1952 = vmatpush1.msra.mxu0 %v1371_v23 }
  0x56   :  { %4978 = vmatmul.mubr.f32.gmra.mxu0 %v83_v25  ;;  %1122 = vst [vmem:[#allocation2 + $0x267] sm:$0x1] %v5327_v16  ;;  %1123 = vst [vmem:[#allocation2 + $0x287] sm:$0x1] %v5327_v16  ;;  %1953 = vmatprep.subr.mxu0 %v5327_v16  ;;  %v1369_v25 = vld [vmem:[#allocation8 + $0x38] sm:$0xff] }
  0x57   :  { %4980 = vmatprep.mubr.f32.mxu0 %v84_v26  ;;  %1124 = vst [vmem:[#allocation2 + $0x2a7] sm:$0x1] %v5327_v16  ;;  %1125 = vst [vmem:[#allocation2 + $0x2c7] sm:$0x1] %v5327_v16  ;;  %1954 = vmatpush1.msra.mxu0 %v1370_v24  ;;  %v1368_v26 = vld [vmem:[#allocation8 + $0x30] sm:$0xff] }
  0x58   :  { %1126 = vst [vmem:[#allocation2 + $0x2e7] sm:$0x1] %v5327_v16  ;;  %1127 = vst [vmem:[#allocation2 + $0x307] sm:$0x1] %v5327_v16  ;;  %1955 = vmatprep.subr.mxu0 %v5327_v16 }
  0x59   :  { %1128 = vst [vmem:[#allocation2 + $0x327] sm:$0x1] %v5327_v16  ;;  %1129 = vst [vmem:[#allocation2 + $0x347] sm:$0x1] %v5327_v16  ;;  %1956 = vmatpush1.msra.mxu0 %v1369_v25 }
  0x5a   :  { %4981 = vmatmul.mubr.f32.gmra.mxu0 %v85_v27  ;;  %1130 = vst [vmem:[#allocation2 + $0x367] sm:$0x1] %v5327_v16  ;;  %1131 = vst [vmem:[#allocation2 + $0x387] sm:$0x1] %v5327_v16  ;;  %1957 = vmatprep.subr.mxu0 %v5327_v16  ;;  %v1367_v27 = vld [vmem:[#allocation8 + $0x28] sm:$0xff] }
  0x5b   :  { %4983 = vmatprep.mubr.f32.mxu0 %v86_v28  ;;  %1132 = vst [vmem:[#allocation2 + $0x3a7] sm:$0x1] %v5327_v16  ;;  %1133 = vst [vmem:[#allocation2 + $0x3c7] sm:$0x1] %v5327_v16  ;;  %1958 = vmatpush1.msra.mxu0 %v1368_v26  ;;  %v1366_v28 = vld [vmem:[#allocation8 + $0x20] sm:$0xff] }
  0x5c   :  { %1134 = vst [vmem:[#allocation2 + $0x3e7] sm:$0x1] %v5327_v16  ;;  %1135 = vst [vmem:[#allocation2 + $0x407] sm:$0x1] %v5327_v16  ;;  %1959 = vmatprep.subr.mxu0 %v5327_v16 }
  0x5d   :  { %1136 = vst [vmem:[#allocation2 + $0x427] sm:$0x1] %v5327_v16  ;;  %1137 = vst [vmem:[#allocation2 + $0x447] sm:$0x1] %v5327_v16  ;;  %1960 = vmatpush1.msra.mxu0 %v1367_v27 }
  0x5e   :  { %4984 = vmatmul.mubr.f32.gmra.mxu0 %v87_v29  ;;  %1138 = vst [vmem:[#allocation2 + $0x38] sm:$0x1] %v5327_v16  ;;  %1139 = vst [vmem:[#allocation2 + $0x58] sm:$0x1] %v5327_v16  ;;  %1961 = vmatprep.subr.mxu0 %v5327_v16  ;;  %v1365_v29 = vld [vmem:[#allocation8 + $0x18] sm:$0xff] }
  0x5f   :  { %4986 = vmatprep.mubr.f32.mxu0 %v88_v30  ;;  %1140 = vst [vmem:[#allocation2 + $0x78] sm:$0x1] %v5327_v16  ;;  %1141 = vst [vmem:[#allocation2 + $0x98] sm:$0x1] %v5327_v16  ;;  %1962 = vmatpush1.msra.mxu0 %v1366_v28  ;;  %v1364_v30 = vld [vmem:[#allocation8 + $0x10] sm:$0xff] }
  0x60   :  { %1142 = vst [vmem:[#allocation2 + $0xb8] sm:$0x1] %v5327_v16  ;;  %1143 = vst [vmem:[#allocation2 + $0xd8] sm:$0x1] %v5327_v16  ;;  %1963 = vmatprep.subr.mxu0 %v5327_v16 }
  0x61   :  { %1144 = vst [vmem:[#allocation2 + $0xf8] sm:$0x1] %v5327_v16  ;;  %1145 = vst [vmem:[#allocation2 + $0x118] sm:$0x1] %v5327_v16  ;;  %1964 = vmatpush1.msra.mxu0 %v1365_v29 }
  0x62   :  { %4987 = vmatmul.mubr.f32.gmra.mxu0 %v89_v31  ;;  %1146 = vst [vmem:[#allocation2 + $0x138] sm:$0x1] %v5327_v16  ;;  %1147 = vst [vmem:[#allocation2 + $0x158] sm:$0x1] %v5327_v16  ;;  %1965 = vmatprep.subr.mxu0 %v5327_v16  ;;  %v1363_v31 = vld [vmem:[#allocation8 + $0x8] sm:$0xff] }
  0x63   :  { %4989 = vmatprep.mubr.f32.mxu0 %v90_v32  ;;  %1148 = vst [vmem:[#allocation2 + $0x178] sm:$0x1] %v5327_v16  ;;  %1149 = vst [vmem:[#allocation2 + $0x198] sm:$0x1] %v5327_v16  ;;  %1966 = vmatpush1.msra.mxu0 %v1364_v30  ;;  %v1362_v32 = vld [vmem:[#allocation8] sm:$0xff] }
  0x64   :  { %1150 = vst [vmem:[#allocation2 + $0x1b8] sm:$0x1] %v5327_v16  ;;  %1151 = vst [vmem:[#allocation2 + $0x1d8] sm:$0x1] %v5327_v16  ;;  %1967 = vmatprep.subr.mxu0 %v5327_v16 }
  0x65   :  { %1152 = vst [vmem:[#allocation2 + $0x1f8] sm:$0x1] %v5327_v16  ;;  %1153 = vst [vmem:[#allocation2 + $0x218] sm:$0x1] %v5327_v16  ;;  %1968 = vmatpush1.msra.mxu0 %v1363_v31 }
  0x66   :  { %4990 = vmatmul.mubr.f32.gmra.mxu0 %v91_v33  ;;  %1154 = vst [vmem:[#allocation2 + $0x278] sm:$0x1] %v5327_v16  ;;  %1155 = vst [vmem:[#allocation2 + $0x298] sm:$0x1] %v5327_v16  ;;  %1969 = vmatprep.subr.mxu0 %v5327_v16  ;;  %v1393_v33 = vld [vmem:[#allocation8 + $0xf8] sm:$0xff] }
  0x67   :  { %4992 = vmatprep.mubr.f32.mxu0 %v92_v34  ;;  %1156 = vst [vmem:[#allocation2 + $0x2b8] sm:$0x1] %v5327_v16  ;;  %1157 = vst [vmem:[#allocation2 + $0x2d8] sm:$0x1] %v5327_v16  ;;  %1970 = vmatpush1.msra.mxu0 %v1362_v32  ;;  %v1537_v34 = vld [vmem:[#allocation8 + $0x178] sm:$0xff] }
  0x68   :  { %1158 = vst [vmem:[#allocation2 + $0x2f8] sm:$0x1] %v5327_v16  ;;  %1159 = vst [vmem:[#allocation2 + $0x318] sm:$0x1] %v5327_v16  ;;  %1971 = vmatprep.subr.mxu0 %v5327_v16  ;;  %1555 = vmatpush1.msra.mxu1 %v1537_v34 }
  0x69   :  { %1160 = vst [vmem:[#allocation2 + $0x338] sm:$0x1] %v5327_v16  ;;  %1161 = vst [vmem:[#allocation2 + $0x358] sm:$0x1] %v5327_v16  ;;  %1972 = vmatpush2.msra.mxu0 %v1393_v33  ;;  %1556 = vmatprep.subr.mxu1 %v5327_v16 }
  0x6a   :  { %4993 = vmatmul.mubr.f32.gmra.mxu0 %v93_v35  ;;  %1162 = vst [vmem:[#allocation2 + $0x378] sm:$0x1] %v5327_v16  ;;  %1163 = vst [vmem:[#allocation2 + $0x398] sm:$0x1] %v5327_v16  ;;  %1973 = vmatprep.subr.mxu0 %v5327_v16  ;;  %v1392_v35 = vld [vmem:[#allocation8 + $0xf0] sm:$0xff] }
  0x6b   :  { %4995 = vmatprep.mubr.f32.mxu0 %v94_v36  ;;  %1164 = vst [vmem:[#allocation2 + $0x3b8] sm:$0x1] %v5327_v16  ;;  %1165 = vst [vmem:[#allocation2 + $0x3d8] sm:$0x1] %v5327_v16  ;;  %1974 = vmatpush2.msra.mxu0 %v1392_v35  ;;  %v1536_v36 = vld [vmem:[#allocation8 + $0x170] sm:$0xff] }
  0x6c   :  { %1166 = vst [vmem:[#allocation2 + $0x3f8] sm:$0x1] %v5327_v16  ;;  %1167 = vst [vmem:[#allocation2 + $0x418] sm:$0x1] %v5327_v16  ;;  %1975 = vmatprep.subr.mxu0 %v5327_v16  ;;  %1557 = vmatpush1.msra.mxu1 %v1536_v36 }
  0x6d   :  { %1168 = vst [vmem:[#allocation2 + $0x438] sm:$0x1] %v5327_v16  ;;  %1169 = vst [vmem:[#allocation2 + $0x458] sm:$0x1] %v5327_v16  ;;  %1558 = vmatprep.subr.mxu1 %v5327_v16 }
  0x6e   :  { %4996 = vmatmul.mubr.f32.gmra.mxu0 %v95_v37  ;;  %v1535_v37 = vld [vmem:[#allocation8 + $0x168] sm:$0xff] }
  0x6f   :  { %4998 = vmatprep.mubr.f32.mxu0 %v96_v38  ;;  %v5512_v38 = vld [vmem:[%s8908_s2] ss:$0 sm:$0xff]  ;;  %1559 = vmatpush1.msra.mxu1 %v1535_v37 }
  0x70   :  { %1560 = vmatprep.subr.mxu1 %v5327_v16 }
  0x72   :  { %4999 = vmatmul.mubr.f32.gmra.mxu0 %v97_v39  ;;  %v1391_v39 = vld [vmem:[#allocation8 + $0xe8] sm:$0xff] }
  0x73   :  { %5001 = vmatprep.mubr.f32.mxu0 %v98_v40  ;;  %1976 = vmatpush2.msra.mxu0 %v1391_v39 }
  0x74   :  { %1977 = vmatprep.subr.mxu0 %v5327_v16 }
  0x76   :  { %5002 = vmatmul.mubr.f32.gmra.mxu0 %v99_v41 }
  0x77   :  { %5004 = vmatprep.mubr.f32.mxu0 %v100_v42 }
  0x7a   :  { %5005 = vmatmul.mubr.f32.gmra.mxu0 %v101_v43  ;;  %v1390_v43 = vld [vmem:[#allocation8 + $0xe0] sm:$0xff] }
  0x7b   :  { %5007 = vmatprep.mubr.f32.mxu0 %v102_v44  ;;  %1978 = vmatpush2.msra.mxu0 %v1390_v43 }
  0x7c   :  { %1979 = vmatprep.subr.mxu0 %v5327_v16 }
  0x7e   :  { %5008 = vmatmul.mubr.f32.gmra.mxu0 %v103_v45 }
  0x7f   :  { %5010 = vmatprep.mubr.f32.mxu0 %v104_v46 }
  0x82   :  { %5011 = vmatmul.mubr.f32.gmra.mxu0 %v105_v47 }
  0x83   :  { %5013 = vmatprep.mubr.f32.mxu0 %v106_v48 }
  0x86   :  { %5014 = vmatmul.mubr.f32.gmra.mxu0 %v107_v49 }
  0x87   :  { %5016 = vmatprep.mubr.f32.mxu0 %v108_v50 }
  0x8a   :  { %5017 = vmatmul.mubr.f32.gmra.mxu0 %v109_v51 }
  0x8b   :  { %5019 = vmatprep.mubr.f32.mxu0 %v110_v52 }
  0x8e   :  { %5020 = vmatmul.mubr.f32.gmra.mxu0 %v111_v53 }
  0x8f   :  { %5022 = vmatprep.mubr.f32.mxu0 %v112_v54 }
  0x92   :  { %5023 = vmatmul.mubr.f32.gmra.mxu0 %v113_v55 }
  0x93   :  { %5025 = vmatprep.mubr.f32.mxu0 %v114_v56 }
  0x96   :  { %5026 = vmatmul.mubr.f32.gmra.mxu0 %v115_v57 }
  0x97   :  { %5028 = vmatprep.mubr.f32.mxu0 %v116_v58 }
  0x9a   :  { %5029 = vmatmul.mubr.f32.gmra.mxu0 %v117_v59 }
  0x9b   :  { %5031 = vmatprep.mubr.f32.mxu0 %v118_v60 }
  0x9e   :  { %5032 = vmatmul.mubr.f32.gmra.mxu0 %v119_v61 }
  0x9f   :  { %5034 = vmatprep.mubr.f32.mxu0 %v120_v62 }
  0xa2   :  { %5035 = vmatmul.mubr.f32.gmra.mxu0 %v121_v63 }
  0xa3   :  { %5037 = vmatprep.mubr.f32.mxu0 %v122_v0 }
  0xa6   :  { %5038 = vmatmul.mubr.f32.gmra.mxu0 %v123_v1 }
  0xa7   :  { %5040 = vmatprep.mubr.f32.mxu0 %v124_v2 }
  0xaa   :  { %5041 = vmatmul.mubr.f32.gmra.mxu0 %v125_v3 }
  0xab   :  { %5043 = vmatprep.mubr.f32.mxu0 %v126_v4 }
  0xae   :  { %5044 = vmatmul.mubr.f32.gmra.mxu0 %v127_v5 }
  0xaf   :  { %5046 = vmatprep.mubr.f32.mxu0 %v128_v6 }
  0xb2   :  { %5047 = vmatmul.mubr.f32.gmra.mxu0 %v129_v7 }
  0xb3   :  { %5049 = vmatprep.mubr.f32.mxu0 %v130_v8 }
  0xb6   :  { %5050 = vmatmul.mubr.f32.gmra.mxu0 %v131_v9 }
  0xb7   :  { %5052 = vmatprep.mubr.f32.mxu0 %v132_v10 }
  0xba   :  { %5053 = vmatmul.mubr.f32.gmra.mxu0 %v133_v11 }
  0xbb   :  { %5055 = vmatprep.mubr.f32.mxu0 %v134_v12 }
  0xbe   :  { %5056 = vmatmul.mubr.f32.gmra.mxu0 %v5397_v13 }
  0xbf   :  { %5058 = vmatprep.mubr.f32.mxu0 %v5399_v14 }
  0xc2   :  { %5059 = vmatmul.mubr.f32.gmra.mxu0 %v137_v17 }
  0xc3   :  { %2003 = vmatprep.mubr.f32.mxu0 %v5327_v16 }
 0x106   :  { %v4967_v40 = vpop.f32.mrf.mxu0 }
 0x107   :  { %v235_v41 = vadd.f32 %v4967_v40, %v5512_v38 }
 0x108   :  { %v229_v42 = vpop.f32.mrf.mxu0 }
 0x109   :  { %v230_v44 = vadd.f32 %v5512_v38, %v229_v42  ;;  %v5518_v45 = vmax.f32 %v235_v41, 0.0 }
 0x10a   :  { %v4970_v46 = vpop.f32.mrf.mxu0 }
 0x10b   :  { %v5521_v47 = vmax.f32 %v230_v44, 0.0  ;;  %v245_v48 = vadd.f32 %v4970_v46, %v5512_v38  ;;  %v682_v52 = vmul.f32 %v5518_v45, %v5518_v45 }
 0x10c   :  { %v239_v49 = vpop.f32.mrf.mxu0 }
 0x10d   :  { %v681_v50 = vmul.f32 %v5521_v47, %v5521_v47  ;;  %v240_v51 = vadd.f32 %v5512_v38, %v239_v49  ;;  %v612_v54 = vadd.f32 %v5518_v45, %v5521_v47  ;;  %v5531_v55 = vmax.f32 %v245_v48, 0.0 }
 0x10e   :  { %v4973_v53 = vpop.f32.mrf.mxu0 }
 0x10f   :  { %v5533_v56 = vmax.f32 %v240_v51, 0.0  ;;  %v255_v57 = vadd.f32 %v4973_v53, %v5512_v38  ;;  %v745_v59 = vadd.f32 %v682_v52, %v681_v50  ;;  %v684_v1 = vmul.f32 %v5531_v55, %v5531_v55 }
 0x110   :  { %v249_v58 = vpop.f32.mrf.mxu0 }
 0x111   :  { %v613_v60 = vadd.f32 %v612_v54, %v5533_v56  ;;  %v683_v61 = vmul.f32 %v5533_v56, %v5533_v56  ;;  %v250_v62 = vadd.f32 %v5512_v38, %v249_v58  ;;  %v5540_v63 = vmax.f32 %v255_v57, 0.0 }
 0x112   :  { %v4976_v0 = vpop.f32.mrf.mxu0 }
 0x113   :  { %v614_v2 = vadd.f32 %v613_v60, %v5531_v55  ;;  %v746_v3 = vadd.f32 %v745_v59, %v683_v61  ;;  %v5545_v4 = vmax.f32 %v250_v62, 0.0  ;;  %v265_v5 = vadd.f32 %v4976_v0, %v5512_v38 }
 0x114   :  { %v259_v6 = vpop.f32.mrf.mxu0  ;;  %v686_v11 = vmul.f32 %v5540_v63, %v5540_v63 }
 0x115   :  { %v747_v7 = vadd.f32 %v746_v3, %v684_v1  ;;  %v615_v8 = vadd.f32 %v614_v2, %v5545_v4  ;;  %v685_v9 = vmul.f32 %v5545_v4, %v5545_v4  ;;  %v260_v10 = vadd.f32 %v5512_v38, %v259_v6 }
 0x116   :  { %v4979_v12 = vpop.f32.mrf.mxu0  ;;  %v5554_v14 = vmax.f32 %v265_v5, 0.0 }
 0x117   :  { %v748_v13 = vadd.f32 %v747_v7, %v685_v9  ;;  %v5556_v15 = vmax.f32 %v260_v10, 0.0  ;;  %v616_v17 = vadd.f32 %v615_v8, %v5540_v63  ;;  %v275_v18 = vadd.f32 %v4979_v12, %v5512_v38 }
 0x118   :  { %v269_v19 = vpop.f32.mrf.mxu0  ;;  %v688_v25 = vmul.f32 %v5554_v14, %v5554_v14 }
 0x119   :  { %v617_v20 = vadd.f32 %v616_v17, %v5556_v15  ;;  %v687_v21 = vmul.f32 %v5556_v15, %v5556_v15  ;;  %v749_v22 = vadd.f32 %v748_v13, %v686_v11  ;;  %v270_v23 = vadd.f32 %v5512_v38, %v269_v19 }
 0x11a   :  { %v4982_v24 = vpop.f32.mrf.mxu0  ;;  %v5567_v28 = vmax.f32 %v275_v18, 0.0 }
 0x11b   :  { %v750_v26 = vadd.f32 %v749_v22, %v687_v21  ;;  %v618_v27 = vadd.f32 %v617_v20, %v5554_v14  ;;  %v5569_v29 = vmax.f32 %v270_v23, 0.0  ;;  %v285_v30 = vadd.f32 %v4982_v24, %v5512_v38 }
 0x11c   :  { %v279_v31 = vpop.f32.mrf.mxu0  ;;  %v690_v40 = vmul.f32 %v5567_v28, %v5567_v28 }
 0x11d   :  { %v751_v32 = vadd.f32 %v750_v26, %v688_v25  ;;  %v280_v33 = vadd.f32 %v5512_v38, %v279_v31  ;;  %v619_v34 = vadd.f32 %v618_v27, %v5569_v29  ;;  %v689_v35 = vmul.f32 %v5569_v29, %v5569_v29 }
 0x11e   :  { %v4985_v36 = vpop.f32.mrf.mxu0  ;;  %v5581_v42 = vmax.f32 %v285_v30, 0.0 }
 0x11f   :  { %v5576_v37 = vmax.f32 %v280_v33, 0.0  ;;  %v295_v39 = vadd.f32 %v4985_v36, %v5512_v38  ;;  %v752_v41 = vadd.f32 %v751_v32, %v689_v35  ;;  %v620_v43 = vadd.f32 %v619_v34, %v5567_v28 }
 0x120   :  { %v289_v44 = vpop.f32.mrf.mxu0  ;;  %v692_v54 = vmul.f32 %v5581_v42, %v5581_v42 }
 0x121   :  { %v691_v46 = vmul.f32 %v5576_v37, %v5576_v37  ;;  %v290_v48 = vadd.f32 %v5512_v38, %v289_v44  ;;  %v621_v49 = vadd.f32 %v620_v43, %v5576_v37  ;;  %v753_v50 = vadd.f32 %v752_v41, %v690_v40  ;;  %v1534_v43 = vld [vmem:[#allocation8 + $0x160] sm:$0xff] }
 0x122   :  { %v4988_v51 = vpop.f32.mrf.mxu0  ;;  %v5588_v52 = vmax.f32 %v295_v39, 0.0  ;;  %1561 = vmatpush1.msra.mxu1 %v1534_v43  ;;  %v1528_v43 = vld [vmem:[#allocation8 + $0x130] sm:$0xff] }
 0x123   :  { %v5590_v53 = vmax.f32 %v290_v48, 0.0  ;;  %v754_v57 = vadd.f32 %v753_v50, %v691_v46  ;;  %v622_v58 = vadd.f32 %v621_v49, %v5581_v42  ;;  %v305_v59 = vadd.f32 %v4988_v51, %v5512_v38  ;;  %1562 = vmatprep.subr.mxu1 %v5327_v16  ;;  %v1533_v51 = vld [vmem:[#allocation8 + $0x158] sm:$0xff] }
 0x124   :  { %v299_v60 = vpop.f32.mrf.mxu0  ;;  %v694_v3 = vmul.f32 %v5588_v52, %v5588_v52  ;;  %1563 = vmatpush1.msra.mxu1 %v1533_v51  ;;  %v1527_v51 = vld [vmem:[#allocation8 + $0x128] sm:$0xff] }
 0x125   :  { %v693_v61 = vmul.f32 %v5590_v53, %v5590_v53  ;;  %v300_v62 = vadd.f32 %v5512_v38, %v299_v60  ;;  %v623_v0 = vadd.f32 %v622_v58, %v5590_v53  ;;  %v755_v1 = vadd.f32 %v754_v57, %v692_v54  ;;  %1564 = vmatprep.subr.mxu1 %v5327_v16 }
 0x126   :  { %v4991_v2 = vpop.f32.mrf.mxu0  ;;  %v5604_v7 = vmax.f32 %v305_v59, 0.0 }
 0x127   :  { %v5602_v5 = vmax.f32 %v300_v62, 0.0  ;;  %v756_v6 = vadd.f32 %v755_v1, %v693_v61  ;;  %v624_v8 = vadd.f32 %v623_v0, %v5588_v52  ;;  %v315_v9 = vadd.f32 %v4991_v2, %v5512_v38  ;;  %v1532_v0 = vld [vmem:[#allocation8 + $0x150] sm:$0xff] }
 0x128   :  { %v309_v10 = vpop.f32.mrf.mxu0  ;;  %v696_v21 = vmul.f32 %v5604_v7, %v5604_v7  ;;  %1565 = vmatpush1.msra.mxu1 %v1532_v0 }
 0x129   :  { %v695_v11 = vmul.f32 %v5602_v5, %v5602_v5  ;;  %v310_v12 = vadd.f32 %v5512_v38, %v309_v10  ;;  %v625_v13 = vadd.f32 %v624_v8, %v5602_v5  ;;  %v757_v17 = vadd.f32 %v756_v6, %v694_v3  ;;  %1566 = vmatprep.subr.mxu1 %v5327_v16 }
 0x12a   :  { %v4994_v18 = vpop.f32.mrf.mxu0  ;;  %v5617_v23 = vmax.f32 %v315_v9, 0.0  ;;  %v1531_v9 = vld [vmem:[#allocation8 + $0x148] sm:$0xff] }
 0x12b   :  { %v5612_v19 = vmax.f32 %v310_v12, 0.0  ;;  %v325_v20 = vadd.f32 %v4994_v18, %v5512_v38  ;;  %v758_v22 = vadd.f32 %v757_v17, %v695_v11  ;;  %v626_v24 = vadd.f32 %v625_v13, %v5604_v7  ;;  %1567 = vmatpush1.msra.mxu1 %v1531_v9 }
 0x12c   :  { %v319_v25 = vpop.f32.mrf.mxu0  ;;  %v698_v35 = vmul.f32 %v5617_v23, %v5617_v23  ;;  %1568 = vmatprep.subr.mxu1 %v5327_v16 }
 0x12d   :  { %v697_v26 = vmul.f32 %v5612_v19, %v5612_v19  ;;  %v320_v27 = vadd.f32 %v5512_v38, %v319_v25  ;;  %v627_v30 = vadd.f32 %v626_v24, %v5612_v19  ;;  %v759_v31 = vadd.f32 %v758_v22, %v696_v21  ;;  %v1530_v21 = vld [vmem:[#allocation8 + $0x140] sm:$0xff] }
 0x12e   :  { %v4997_v32 = vpop.f32.mrf.mxu0  ;;  %v5624_v33 = vmax.f32 %v325_v20, 0.0  ;;  %1569 = vmatpush1.msra.mxu1 %v1530_v21 }
 0x12f   :  { %v5626_v34 = vmax.f32 %v320_v27, 0.0  ;;  %v760_v36 = vadd.f32 %v759_v31, %v697_v26  ;;  %v628_v39 = vadd.f32 %v627_v30, %v5617_v23  ;;  %v335_v40 = vadd.f32 %v4997_v32, %v5512_v38  ;;  %1570 = vmatprep.subr.mxu1 %v5327_v16  ;;  %v1529_v30 = vld [vmem:[#allocation8 + $0x138] sm:$0xff] }
 0x130   :  { %v329_v41 = vpop.f32.mrf.mxu0  ;;  %v700_v54 = vmul.f32 %v5624_v33, %v5624_v33  ;;  %1571 = vmatpush1.msra.mxu1 %v1529_v30 }
 0x131   :  { %v699_v44 = vmul.f32 %v5626_v34, %v5626_v34  ;;  %v330_v46 = vadd.f32 %v5512_v38, %v329_v41  ;;  %v629_v48 = vadd.f32 %v628_v39, %v5626_v34  ;;  %v761_v49 = vadd.f32 %v760_v36, %v698_v35  ;;  %1572 = vmatprep.subr.mxu1 %v5327_v16 }
 0x132   :  { %v5000_v50 = vpop.f32.mrf.mxu0  ;;  %v5641_v59 = vmax.f32 %v335_v40, 0.0  ;;  %1573 = vmatpush1.msra.mxu1 %v1528_v43  ;;  %v1523_v43 = vld [vmem:[#allocation8 + $0x108] sm:$0xff] }
 0x133   :  { %v5639_v57 = vmax.f32 %v330_v46, 0.0  ;;  %v762_v58 = vadd.f32 %v761_v49, %v699_v44  ;;  %v630_v60 = vadd.f32 %v629_v48, %v5624_v33  ;;  %v345_v61 = vadd.f32 %v5000_v50, %v5512_v38  ;;  %1574 = vmatprep.subr.mxu1 %v5327_v16 }
 0x134   :  { %v339_v62 = vpop.f32.mrf.mxu0  ;;  %v702_v12 = vmul.f32 %v5641_v59, %v5641_v59  ;;  %1575 = vmatpush1.msra.mxu1 %v1527_v51 }
 0x135   :  { %v701_v1 = vmul.f32 %v5639_v57, %v5639_v57  ;;  %v340_v2 = vadd.f32 %v5512_v38, %v339_v62  ;;  %v631_v3 = vadd.f32 %v630_v60, %v5639_v57  ;;  %v763_v6 = vadd.f32 %v762_v58, %v700_v54  ;;  %1576 = vmatprep.subr.mxu1 %v5327_v16 }
 0x136   :  { %v5003_v8 = vpop.f32.mrf.mxu0  ;;  %v5656_v17 = vmax.f32 %v345_v61, 0.0 }
 0x137   :  { %v5651_v10 = vmax.f32 %v340_v2, 0.0  ;;  %v355_v11 = vadd.f32 %v5003_v8, %v5512_v38  ;;  %v764_v13 = vadd.f32 %v763_v6, %v701_v1  ;;  %v632_v18 = vadd.f32 %v631_v3, %v5641_v59  ;;  %v1526_v2 = vld [vmem:[#allocation8 + $0x120] sm:$0xff] }
 0x138   :  { %v349_v20 = vpop.f32.mrf.mxu0  ;;  %v704_v35 = vmul.f32 %v5656_v17, %v5656_v17  ;;  %1577 = vmatpush1.msra.mxu1 %v1526_v2 }
 0x139   :  { %v703_v22 = vmul.f32 %v5651_v10, %v5651_v10  ;;  %v350_v24 = vadd.f32 %v5512_v38, %v349_v20  ;;  %v633_v25 = vadd.f32 %v632_v18, %v5651_v10  ;;  %v765_v26 = vadd.f32 %v764_v13, %v702_v12  ;;  %1578 = vmatprep.subr.mxu1 %v5327_v16  ;;  %v1525_v12 = vld [vmem:[#allocation8 + $0x118] sm:$0xff] }
 0x13a   :  { %v5006_v27 = vpop.f32.mrf.mxu0  ;;  %v5665_v31 = vmax.f32 %v355_v11, 0.0  ;;  %1579 = vmatpush1.msra.mxu1 %v1525_v12 }
 0x13b   :  { %v5667_v32 = vmax.f32 %v350_v24, 0.0  ;;  %v766_v36 = vadd.f32 %v765_v26, %v703_v22  ;;  %v634_v39 = vadd.f32 %v633_v25, %v5656_v17  ;;  %v365_v40 = vadd.f32 %v5006_v27, %v5512_v38  ;;  %v1389_v26 = vld [vmem:[#allocation8 + $0xd8] sm:$0xff]  ;;  %1580 = vmatprep.subr.mxu1 %v5327_v16  ;;  %v1524_v27 = vld [vmem:[#allocation8 + $0x110] sm:$0xff] }
 0x13c   :  { %v359_v41 = vpop.f32.mrf.mxu0  ;;  %v706_v54 = vmul.f32 %v5665_v31, %v5665_v31  ;;  %1980 = vmatpush2.msra.mxu0 %v1389_v26  ;;  %1581 = vmatpush1.msra.mxu1 %v1524_v27  ;;  %v1385_v26 = vld [vmem:[#allocation8 + $0xb8] sm:$0xff]  ;;  %v1552_v27 = vld [vmem:[#allocation8 + $0x1f0] sm:$0xff] }
 0x13d   :  { %v705_v44 = vmul.f32 %v5667_v32, %v5667_v32  ;;  %v360_v46 = vadd.f32 %v5512_v38, %v359_v41  ;;  %v635_v48 = vadd.f32 %v634_v39, %v5667_v32  ;;  %v767_v49 = vadd.f32 %v766_v36, %v704_v35  ;;  %1981 = vmatprep.subr.mxu0 %v5327_v16  ;;  %v1388_v41 = vld [vmem:[#allocation8 + $0xd0] sm:$0xff] }
 0x13e   :  { %v5009_v50 = vpop.f32.mrf.mxu0  ;;  %v5683_v61 = vmax.f32 %v365_v40, 0.0  ;;  %1582 = vmatprep.subr.mxu1 %v5327_v16  ;;  %1982 = vmatpush2.msra.mxu0 %v1388_v41  ;;  %v1384_v41 = vld [vmem:[#allocation8 + $0xb0] sm:$0xff] }
 0x13f   :  { %v5681_v58 = vmax.f32 %v360_v46, 0.0  ;;  %v768_v60 = vadd.f32 %v767_v49, %v705_v44  ;;  %v636_v62 = vadd.f32 %v635_v48, %v5665_v31  ;;  %v375_v0 = vadd.f32 %v5009_v50, %v5512_v38  ;;  %1583 = vmatpush1.msra.mxu1 %v1523_v43  ;;  %1983 = vmatprep.subr.mxu0 %v5327_v16  ;;  %v1551_v43 = vld [vmem:[#allocation8 + $0x1e8] sm:$0xff] }
 0x140   :  { %v369_v1 = vpop.f32.mrf.mxu0  ;;  %v708_v20 = vmul.f32 %v5683_v61, %v5683_v61  ;;  %1584 = vmatprep.subr.mxu1 %v5327_v16 }
 0x141   :  { %v707_v3 = vmul.f32 %v5681_v58, %v5681_v58  ;;  %v370_v6 = vadd.f32 %v5512_v38, %v369_v1  ;;  %v637_v8 = vadd.f32 %v636_v62, %v5681_v58  ;;  %v769_v9 = vadd.f32 %v768_v60, %v706_v54  ;;  %v1387_v60 = vld [vmem:[#allocation8 + $0xc8] sm:$0xff]  ;;  %v1522_v62 = vld [vmem:[#allocation8 + $0x100] sm:$0xff] }
 0x142   :  { %v5012_v11 = vpop.f32.mrf.mxu0  ;;  %v5698_v22 = vmax.f32 %v375_v0, 0.0  ;;  %1984 = vmatpush2.msra.mxu0 %v1387_v60  ;;  %1585 = vmatpush1.msra.mxu1 %v1522_v62 }
 0x143   :  { %v5693_v13 = vmax.f32 %v370_v6, 0.0  ;;  %v385_v18 = vadd.f32 %v5012_v11, %v5512_v38  ;;  %v770_v21 = vadd.f32 %v769_v9, %v707_v3  ;;  %v638_v24 = vadd.f32 %v637_v8, %v5683_v61  ;;  %1985 = vmatprep.subr.mxu0 %v5327_v16  ;;  %v1386_v8 = vld [vmem:[#allocation8 + $0xc0] sm:$0xff]  ;;  %1586 = vmatprep.subr.mxu1 %v5327_v16  ;;  %v1553_v9 = vld [vmem:[#allocation8 + $0x1f8] sm:$0xff] }
 0x144   :  { %v379_v25 = vpop.f32.mrf.mxu0  ;;  %v710_v49 = vmul.f32 %v5698_v22, %v5698_v22  ;;  %1986 = vmatpush2.msra.mxu0 %v1386_v8  ;;  %1587 = vmatpush2.msra.mxu1 %v1553_v9 }
 0x145   :  { %v709_v30 = vmul.f32 %v5693_v13, %v5693_v13  ;;  %v380_v35 = vadd.f32 %v5512_v38, %v379_v25  ;;  %v639_v36 = vadd.f32 %v638_v24, %v5693_v13  ;;  %v771_v39 = vadd.f32 %v770_v21, %v708_v20  ;;  %1987 = vmatprep.subr.mxu0 %v5327_v16 }
 0x146   :  { %v5015_v40 = vpop.f32.mrf.mxu0  ;;  %v5708_v44 = vmax.f32 %v385_v18, 0.0  ;;  %1588 = vmatprep.subr.mxu1 %v5327_v16  ;;  %1988 = vmatpush2.msra.mxu0 %v1385_v26 }
 0x147   :  { %v5710_v46 = vmax.f32 %v380_v35, 0.0  ;;  %v395_v48 = vadd.f32 %v5015_v40, %v5512_v38  ;;  %v772_v50 = vadd.f32 %v771_v39, %v709_v30  ;;  %v640_v51 = vadd.f32 %v639_v36, %v5698_v22  ;;  %1589 = vmatpush2.msra.mxu1 %v1552_v27  ;;  %1989 = vmatprep.subr.mxu0 %v5327_v16 }
 0x148   :  { %v389_v54 = vpop.f32.mrf.mxu0  ;;  %v712_v11 = vmul.f32 %v5708_v44, %v5708_v44  ;;  %1590 = vmatprep.subr.mxu1 %v5327_v16  ;;  %1990 = vmatpush2.msra.mxu0 %v1384_v41 }
 0x149   :  { %v711_v0 = vmul.f32 %v5710_v46, %v5710_v46  ;;  %v390_v1 = vadd.f32 %v5512_v38, %v389_v54  ;;  %v641_v2 = vadd.f32 %v640_v51, %v5710_v46  ;;  %v773_v3 = vadd.f32 %v772_v50, %v710_v49  ;;  %1591 = vmatpush2.msra.mxu1 %v1551_v43 }
 0x14a   :  { %v5018_v6 = vpop.f32.mrf.mxu0  ;;  %v5726_v12 = vmax.f32 %v395_v48, 0.0  ;;  %1991 = vmatprep.subr.mxu0 %v5327_v16  ;;  %1592 = vmatprep.subr.mxu1 %v5327_v16 }
 0x14b   :  { %v5728_v18 = vmax.f32 %v390_v1, 0.0  ;;  %v774_v20 = vadd.f32 %v773_v3, %v711_v0  ;;  %v642_v21 = vadd.f32 %v641_v2, %v5708_v44  ;;  %v405_v24 = vadd.f32 %v5018_v6, %v5512_v38  ;;  %v1383_v0 = vld [vmem:[#allocation8 + $0xa8] sm:$0xff]  ;;  %v1550_v1 = vld [vmem:[#allocation8 + $0x1e0] sm:$0xff] }
 0x14c   :  { %v399_v25 = vpop.f32.mrf.mxu0  ;;  %v714_v48 = vmul.f32 %v5726_v12, %v5726_v12  ;;  %1992 = vmatpush2.msra.mxu0 %v1383_v0  ;;  %1593 = vmatpush2.msra.mxu1 %v1550_v1 }
 0x14d   :  { %v713_v30 = vmul.f32 %v5728_v18, %v5728_v18  ;;  %v400_v35 = vadd.f32 %v5512_v38, %v399_v25  ;;  %v643_v36 = vadd.f32 %v642_v21, %v5728_v18  ;;  %v775_v39 = vadd.f32 %v774_v20, %v712_v11  ;;  %1993 = vmatprep.subr.mxu0 %v5327_v16  ;;  %v1382_v11 = vld [vmem:[#allocation8 + $0xa0] sm:$0xff]  ;;  %v1549_v20 = vld [vmem:[#allocation8 + $0x1d8] sm:$0xff] }
 0x14e   :  { %v5021_v40 = vpop.f32.mrf.mxu0  ;;  %v5744_v51 = vmax.f32 %v405_v24, 0.0  ;;  %1594 = vmatprep.subr.mxu1 %v5327_v16  ;;  %1994 = vmatpush2.msra.mxu0 %v1382_v11  ;;  %v1379_v11 = vld [vmem:[#allocation8 + $0x88] sm:$0xff] }
 0x14f   :  { %v5742_v49 = vmax.f32 %v400_v35, 0.0  ;;  %v776_v50 = vadd.f32 %v775_v39, %v713_v30  ;;  %v644_v54 = vadd.f32 %v643_v36, %v5726_v12  ;;  %v415_v60 = vadd.f32 %v5021_v40, %v5512_v38  ;;  %1595 = vmatpush2.msra.mxu1 %v1549_v20  ;;  %1995 = vmatprep.subr.mxu0 %v5327_v16  ;;  %v1381_v36 = vld [vmem:[#allocation8 + $0x98] sm:$0xff]  ;;  %v1548_v39 = vld [vmem:[#allocation8 + $0x1d0] sm:$0xff] }
 0x150   :  { %v409_v62 = vpop.f32.mrf.mxu0  ;;  %v716_v25 = vmul.f32 %v5744_v51, %v5744_v51  ;;  %1596 = vmatprep.subr.mxu1 %v5327_v16  ;;  %1996 = vmatpush2.msra.mxu0 %v1381_v36  ;;  %v1378_v36 = vld [vmem:[#allocation8 + $0x80] sm:$0xff] }
 0x151   :  { %v715_v2 = vmul.f32 %v5742_v49, %v5742_v49  ;;  %v410_v3 = vadd.f32 %v5512_v38, %v409_v62  ;;  %v645_v6 = vadd.f32 %v644_v54, %v5742_v49  ;;  %v777_v8 = vadd.f32 %v776_v50, %v714_v48  ;;  %1597 = vmatpush2.msra.mxu1 %v1548_v39  ;;  %v1380_v54 = vld [vmem:[#allocation8 + $0x90] sm:$0xff] }
 0x152   :  { %v5024_v9 = vpop.f32.mrf.mxu0  ;;  %v5761_v27 = vmax.f32 %v415_v60, 0.0  ;;  %1997 = vmatprep.subr.mxu0 %v5327_v16  ;;  %1598 = vmatprep.subr.mxu1 %v5327_v16  ;;  %v1547_v60 = vld [vmem:[#allocation8 + $0x1c8] sm:$0xff] }
 0x153   :  { %v5756_v21 = vmax.f32 %v410_v3, 0.0  ;;  %v425_v24 = vadd.f32 %v5024_v9, %v5512_v38  ;;  %v778_v26 = vadd.f32 %v777_v8, %v715_v2  ;;  %v646_v30 = vadd.f32 %v645_v6, %v5744_v51  ;;  %1998 = vmatpush2.msra.mxu0 %v1380_v54  ;;  %1599 = vmatpush2.msra.mxu1 %v1547_v60  ;;  %v1546_v9 = vld [vmem:[#allocation8 + $0x1c0] sm:$0xff] }
 0x154   :  { %v419_v35 = vpop.f32.mrf.mxu0  ;;  %v718_v2 = vmul.f32 %v5761_v27, %v5761_v27  ;;  %1600 = vmatprep.subr.mxu1 %v5327_v16  ;;  %1999 = vmatprep.subr.mxu0 %v5327_v16 }
 0x155   :  { %v717_v40 = vmul.f32 %v5756_v21, %v5756_v21  ;;  %v420_v41 = vadd.f32 %v5512_v38, %v419_v35  ;;  %v647_v43 = vadd.f32 %v646_v30, %v5756_v21  ;;  %v779_v48 = vadd.f32 %v778_v26, %v716_v25  ;;  %1601 = vmatpush2.msra.mxu1 %v1546_v9  ;;  %v1545_v35 = vld [vmem:[#allocation8 + $0x1b8] sm:$0xff] }
 0x156   :  { %v5027_v50 = vpop.f32.mrf.mxu0  ;;  %v5772_v62 = vmax.f32 %v425_v24, 0.0  ;;  %2000 = vmatpush2.msra.mxu0 %v1379_v11  ;;  %1602 = vmatprep.subr.mxu1 %v5327_v16  ;;  %v5802_v11 = vld [vmem:[#allocation2] sm:$0xff] }
 0x157   :  { %v5774_v0 = vmax.f32 %v420_v41, 0.0  ;;  %v435_v1 = vadd.f32 %v5027_v50, %v5512_v38  ;;  %v780_v3 = vadd.f32 %v779_v48, %v717_v40  ;;  %v648_v6 = vadd.f32 %v647_v43, %v5761_v27  ;;  %2001 = vmatprep.subr.mxu0 %v5327_v16  ;;  %1603 = vmatpush2.msra.mxu1 %v1545_v35  ;;  %v1234_v43 = vld [vmem:[#allocation2 + $0x7] sm:$0xff] }
 0x158   :  { %v429_v8 = vpop.f32.mrf.mxu0  ;;  %v720_v39 = vmul.f32 %v5772_v62, %v5772_v62  ;;  %2002 = vmatpush2.msra.mxu0 %v1378_v36  ;;  %1604 = vmatprep.subr.mxu1 %v5327_v16 }
 0x159   :  { %v719_v20 = vmul.f32 %v5774_v0, %v5774_v0  ;;  %v430_v24 = vadd.f32 %v5512_v38, %v429_v8  ;;  %v649_v25 = vadd.f32 %v648_v6, %v5774_v0  ;;  %v781_v26 = vadd.f32 %v780_v3, %v718_v2  ;;  %v1544_v2 = vld [vmem:[#allocation8 + $0x1b0] sm:$0xff]  ;;  %2004 = vmatmul.mubr.f32.vlgmr.msra.gmra.mxu0 %v1234_v43  ;;  %v1542_v43 = vld [vmem:[#allocation8 + $0x1a0] sm:$0xff] }
 0x15a   :  { %v5030_v30 = vpop.f32.mrf.mxu0  ;;  %v5790_v40 = vmax.f32 %v435_v1, 0.0  ;;  %1605 = vmatpush2.msra.mxu1 %v1544_v2  ;;  %3094 = vmatprep.subr.mxu0 %v5327_v16  ;;  %v1541_v2 = vld [vmem:[#allocation8 + $0x198] sm:$0xff] }
 0x15b   :  { %v5792_v41 = vmax.f32 %v430_v24, 0.0  ;;  %v782_v48 = vadd.f32 %v781_v26, %v719_v20  ;;  %v650_v50 = vadd.f32 %v649_v25, %v5772_v62  ;;  %v445_v54 = vadd.f32 %v5030_v30, %v5512_v38  ;;  %1606 = vmatprep.subr.mxu1 %v5802_v11  ;;  %v1543_v20 = vld [vmem:[#allocation8 + $0x1a8] sm:$0xff]  ;;  %2008 = vmatprep.mubr.f32.mxu0 %v5802_v11 }
 0x15c   :  { %v439_v60 = vpop.f32.mrf.mxu0  ;;  %v722_v24 = vmul.f32 %v5790_v40, %v5790_v40  ;;  %1607 = vmatpush2.msra.mxu1 %v1543_v20  ;;  %v1235_v26 = vld [vmem:[#allocation2 + $0xf] sm:$0xff] }
 0x15d   :  { %v721_v3 = vmul.f32 %v5792_v41, %v5792_v41  ;;  %v440_v1 = vadd.f32 %v5512_v38, %v439_v60  ;;  %v651_v6 = vadd.f32 %v650_v50, %v5792_v41  ;;  %v783_v8 = vadd.f32 %v782_v48, %v720_v39  ;;  %1608 = vmatprep.subr.mxu1 %v5802_v11  ;;  %v3077_v60 = vld [vmem:[#allocation8 + $0x378] sm:$0xff]  ;;  %v3076_v20 = vld [vmem:[#allocation8 + $0x370] sm:$0xff] }
 0x15e   :  { %v5033_v9 = vpop.f32.mrf.mxu0  ;;  %v5810_v16 = vmax.f32 %v445_v54, 0.0  ;;  %2009 = vmatmul.mubr.f32.gmra.mxu0 %v1235_v26  ;;  %1609 = vmatpush2.msra.mxu1 %v1542_v43 }
 0x15f   :  { %v5808_v25 = vmax.f32 %v440_v1, 0.0  ;;  %v784_v30 = vadd.f32 %v783_v8, %v721_v3  ;;  %v652_v35 = vadd.f32 %v651_v6, %v5790_v40  ;;  %v455_v36 = vadd.f32 %v5033_v9, %v5512_v38  ;;  %1610 = vmatprep.subr.mxu1 %v5802_v11  ;;  %3095 = vmatpush1.msra.mxu0 %v3077_v60  ;;  %v1540_v6 = vld [vmem:[#allocation8 + $0x190] sm:$0xff] }
 0x160   :  { %9005 = vst [vmem:[#allocation14_spill] sm:$0xff] %v5810_v16  ;;  %v449_v39 = vpop.f32.mrf.mxu0  ;;  %1611 = vmatpush2.msra.mxu1 %v1541_v2  ;;  %3096 = vmatprep.subr.mxu0 %v5802_v11  ;;  %v724_v26 = vmul.f32 %v5810_v16, %v5810_v16 }
 0x161   :  { %9004 = vst [vmem:[#allocation13_spill] sm:$0xff] %v5808_v25  ;;  %v723_v48 = vmul.f32 %v5808_v25, %v5808_v25  ;;  %v450_v50 = vadd.f32 %v5512_v38, %v449_v39  ;;  %v653_v54 = vadd.f32 %v652_v35, %v5808_v25  ;;  %v785_v3 = vadd.f32 %v784_v30, %v722_v24  ;;  %v1539_v35 = vld [vmem:[#allocation8 + $0x188] sm:$0xff]  ;;  %v3073_v25 = vld [vmem:[#allocation8 + $0x358] sm:$0xff] }
 0x162   :  { %v5036_v1 = vpop.f32.mrf.mxu0  ;;  %v5826_v43 = vmax.f32 %v455_v36, 0.0  ;;  %1612 = vmatprep.subr.mxu1 %v5802_v11  ;;  %3097 = vmatpush1.msra.mxu0 %v3076_v20 }
 0x163   :  { %v5820_v8 = vmax.f32 %v450_v50, 0.0  ;;  %v465_v9 = vadd.f32 %v5036_v1, %v5512_v38  ;;  %v786_v39 = vadd.f32 %v785_v3, %v723_v48  ;;  %v654_v24 = vadd.f32 %v653_v54, %v5810_v16  ;;  %v3075_v50 = vld [vmem:[#allocation8 + $0x368] sm:$0xff]  ;;  %1613 = vmatpush2.msra.mxu1 %v1540_v6  ;;  %3098 = vmatprep.subr.mxu0 %v5802_v11  ;;  %v1538_v54 = vld [vmem:[#allocation8 + $0x180] sm:$0xff] }
 0x164   :  { %9007 = vst [vmem:[#allocation16_spill] sm:$0xff] %v5826_v43  ;;  %v459_v30 = vpop.f32.mrf.mxu0  ;;  %1614 = vmatprep.subr.mxu1 %v5802_v11  ;;  %3099 = vmatpush1.msra.mxu0 %v3075_v50  ;;  %v726_v6 = vmul.f32 %v5826_v43, %v5826_v43 }
 0x165   :  { %9006 = vst [vmem:[#allocation15_spill] sm:$0xff] %v5820_v8  ;;  %v725_v60 = vmul.f32 %v5820_v8, %v5820_v8  ;;  %v460_v2 = vadd.f32 %v5512_v38, %v459_v30  ;;  %v655_v48 = vadd.f32 %v654_v24, %v5820_v8  ;;  %v787_v36 = vadd.f32 %v786_v39, %v724_v26 }
 0x166   :  { %v5039_v3 = vpop.f32.mrf.mxu0  ;;  %v5836_v1 = vmax.f32 %v465_v9, 0.0  ;;  %1615 = vmatpush2.msra.mxu1 %v1539_v35  ;;  %3100 = vmatprep.subr.mxu0 %v5802_v11 }
 0x167   :  { %v5838_v20 = vmax.f32 %v460_v2, 0.0  ;;  %v788_v30 = vadd.f32 %v787_v36, %v725_v60  ;;  %v656_v16 = vadd.f32 %v655_v48, %v5826_v43  ;;  %v475_v26 = vadd.f32 %v5039_v3, %v5512_v38  ;;  %1616 = vmatprep.subr.mxu1 %v5802_v11 }
 0x168   :  { %9008 = vst [vmem:[#allocation17_spill] sm:$0xff] %v5836_v1  ;;  %v469_v39 = vpop.f32.mrf.mxu0  ;;  %1617 = vmatpush2.msra.mxu1 %v1538_v54  ;;  %v728_v60 = vmul.f32 %v5836_v1, %v5836_v1  ;;  %v3074_v54 = vld [vmem:[#allocation8 + $0x360] sm:$0xff] }
 0x169   :  { %9009 = vst [vmem:[#allocation18_spill] sm:$0xff] %v5838_v20  ;;  %v727_v9 = vmul.f32 %v5838_v20, %v5838_v20  ;;  %v470_v24 = vadd.f32 %v5512_v38, %v469_v39  ;;  %v657_v35 = vadd.f32 %v656_v16, %v5838_v20  ;;  %v789_v50 = vadd.f32 %v788_v30, %v726_v6 }
 0x16a   :  { %v5042_v2 = vpop.f32.mrf.mxu0  ;;  %2484 = vmatprep.subr.mxu1 %v5802_v11  ;;  %v5855_v3 = vmax.f32 %v475_v26, 0.0  ;;  %3101 = vmatpush1.msra.mxu0 %v3074_v54 }
 0x16b   :  { %v5853_v48 = vmax.f32 %v470_v24, 0.0  ;;  %v790_v36 = vadd.f32 %v789_v50, %v727_v9  ;;  %v658_v43 = vadd.f32 %v657_v35, %v5836_v1  ;;  %v485_v8 = vadd.f32 %v5042_v2, %v5512_v38  ;;  %3102 = vmatprep.subr.mxu0 %v5802_v11 }
 0x16c   :  { %9011 = vst [vmem:[#allocation20_spill] sm:$0xff] %v5855_v3  ;;  %v479_v39 = vpop.f32.mrf.mxu0  ;;  %v730_v35 = vmul.f32 %v5855_v3, %v5855_v3  ;;  %3103 = vmatpush1.msra.mxu0 %v3073_v25 }
 0x16d   :  { %9010 = vst [vmem:[#allocation19_spill] sm:$0xff] %v5853_v48  ;;  %v729_v16 = vmul.f32 %v5853_v48, %v5853_v48  ;;  %v480_v6 = vadd.f32 %v5512_v38, %v479_v39  ;;  %v659_v30 = vadd.f32 %v658_v43, %v5853_v48  ;;  %v791_v20 = vadd.f32 %v790_v36, %v728_v60 }
 0x16e   :  { %v5045_v24 = vpop.f32.mrf.mxu0  ;;  %v5869_v2 = vmax.f32 %v485_v8, 0.0  ;;  %3104 = vmatprep.subr.mxu0 %v5802_v11 }
 0x16f   :  { %v5864_v26 = vmax.f32 %v480_v6, 0.0  ;;  %v495_v9 = vadd.f32 %v5045_v24, %v5512_v38  ;;  %v792_v50 = vadd.f32 %v791_v20, %v729_v16  ;;  %v660_v1 = vadd.f32 %v659_v30, %v5855_v3 }
 0x170   :  { %9013 = vst [vmem:[#allocation22_spill] sm:$0xff] %v5869_v2  ;;  %v489_v39 = vpop.f32.mrf.mxu0  ;;  %v732_v8 = vmul.f32 %v5869_v2, %v5869_v2 }
 0x171   :  { %9012 = vst [vmem:[#allocation21_spill] sm:$0xff] %v5864_v26  ;;  %v731_v43 = vmul.f32 %v5864_v26, %v5864_v26  ;;  %v490_v60 = vadd.f32 %v5512_v38, %v489_v39  ;;  %v661_v36 = vadd.f32 %v660_v1, %v5864_v26  ;;  %v793_v54 = vadd.f32 %v792_v50, %v730_v35 }
 0x172   :  { %v5048_v6 = vpop.f32.mrf.mxu0  ;;  %v5876_v48 = vmax.f32 %v495_v9, 0.0 }
 0x173   :  { %v5878_v24 = vmax.f32 %v490_v60, 0.0  ;;  %v794_v20 = vadd.f32 %v793_v54, %v731_v43  ;;  %v662_v16 = vadd.f32 %v661_v36, %v5869_v2  ;;  %v505_v30 = vadd.f32 %v5048_v6, %v5512_v38 }
 0x174   :  { %9014 = vst [vmem:[#allocation23_spill] sm:$0xff] %v5876_v48  ;;  %v499_v3 = vpop.f32.mrf.mxu0  ;;  %v734_v43 = vmul.f32 %v5876_v48, %v5876_v48 }
 0x175   :  { %9015 = vst [vmem:[#allocation24_spill] sm:$0xff] %v5878_v24  ;;  %v733_v39 = vmul.f32 %v5878_v24, %v5878_v24  ;;  %v500_v1 = vadd.f32 %v5512_v38, %v499_v3  ;;  %v663_v9 = vadd.f32 %v662_v16, %v5878_v24  ;;  %v795_v35 = vadd.f32 %v794_v20, %v732_v8 }
 0x176   :  { %v5051_v50 = vpop.f32.mrf.mxu0  ;;  %v5893_v54 = vmax.f32 %v505_v30, 0.0 }
 0x177   :  { %v5891_v60 = vmax.f32 %v500_v1, 0.0  ;;  %v796_v36 = vadd.f32 %v795_v35, %v733_v39  ;;  %v664_v6 = vadd.f32 %v663_v9, %v5876_v48  ;;  %v515_v2 = vadd.f32 %v5051_v50, %v5512_v38  ;;  %v3072_v48 = vld [vmem:[#allocation8 + $0x350] sm:$0xff] }
 0x178   :  { %9017 = vst [vmem:[#allocation26_spill] sm:$0xff] %v5893_v54  ;;  %v509_v3 = vpop.f32.mrf.mxu0  ;;  %v736_v30 = vmul.f32 %v5893_v54, %v5893_v54  ;;  %3105 = vmatpush1.msra.mxu0 %v3072_v48 }
 0x179   :  { %9016 = vst [vmem:[#allocation25_spill] sm:$0xff] %v5891_v60  ;;  %v735_v25 = vmul.f32 %v5891_v60, %v5891_v60  ;;  %v510_v8 = vadd.f32 %v5512_v38, %v509_v3  ;;  %v665_v20 = vadd.f32 %v664_v6, %v5891_v60  ;;  %v797_v16 = vadd.f32 %v796_v36, %v734_v43 }
 0x17a   :  { %v5054_v24 = vpop.f32.mrf.mxu0  ;;  %v5906_v9 = vmax.f32 %v515_v2, 0.0  ;;  %3106 = vmatprep.subr.mxu0 %v5802_v11 }
 0x17b   :  { %v5901_v26 = vmax.f32 %v510_v8, 0.0  ;;  %v525_v39 = vadd.f32 %v5054_v24, %v5512_v38  ;;  %v798_v1 = vadd.f32 %v797_v16, %v735_v25  ;;  %v666_v35 = vadd.f32 %v665_v20, %v5893_v54 }
 0x17c   :  { %9019 = vst [vmem:[#allocation28_spill] sm:$0xff] %v5906_v9  ;;  %v519_v50 = vpop.f32.mrf.mxu0  ;;  %v738_v25 = vmul.f32 %v5906_v9, %v5906_v9 }
 0x17d   :  { %9018 = vst [vmem:[#allocation27_spill] sm:$0xff] %v5901_v26  ;;  %v737_v3 = vmul.f32 %v5901_v26, %v5901_v26  ;;  %v520_v43 = vadd.f32 %v5512_v38, %v519_v50  ;;  %v667_v36 = vadd.f32 %v666_v35, %v5901_v26  ;;  %v799_v6 = vadd.f32 %v798_v1, %v736_v30 }
 0x17e   :  { %v5057_v24 = vpop.f32.mrf.mxu0  ;;  %v5914_v8 = vmax.f32 %v525_v39, 0.0 }
 0x17f   :  { %v5916_v2 = vmax.f32 %v520_v43, 0.0  ;;  %v800_v20 = vadd.f32 %v799_v6, %v737_v3  ;;  %v668_v16 = vadd.f32 %v667_v36, %v5906_v9  ;;  %v535_v54 = vadd.f32 %v5057_v24, %v5512_v38  ;;  %v5233_v24 = vld [vmem:[%s8908_s2] ss:$0 sm:$0xff] }
 0x180   :  { %9020 = vst [vmem:[#allocation29_spill] sm:$0xff] %v5914_v8  ;;  %v529_v50 = vpop.f32.mrf.mxu0  ;;  %v740_v43 = vmul.f32 %v5914_v8, %v5914_v8 }
 0x181   :  { %9021 = vst [vmem:[#allocation30_spill] sm:$0xff] %v5916_v2  ;;  %v739_v48 = vmul.f32 %v5916_v2, %v5916_v2  ;;  %v530_v30 = vadd.f32 %v5512_v38, %v529_v50  ;;  %v669_v1 = vadd.f32 %v668_v16, %v5916_v2  ;;  %v801_v39 = vadd.f32 %v800_v20, %v738_v25  ;;  %v3071_v50 = vld [vmem:[#allocation8 + $0x348] sm:$0xff] }
 0x182   :  { %v5060_v35 = vpop.f32.mrf.mxu0  ;;  %v5930_v6 = vmax.f32 %v535_v54, 0.0  ;;  %3107 = vmatpush1.msra.mxu0 %v3071_v50  ;;  %v3070_v50 = vld [vmem:[#allocation8 + $0x340] sm:$0xff] }
 0x183   :  { %v5928_v26 = vmax.f32 %v530_v30, 0.0  ;;  %v802_v3 = vadd.f32 %v801_v39, %v739_v48  ;;  %v670_v36 = vadd.f32 %v669_v1, %v5914_v8  ;;  %v545_v9 = vadd.f32 %v5233_v24, %v5060_v35  ;;  %3108 = vmatprep.subr.mxu0 %v5802_v11 }
 0x184   :  { %9023 = vst [vmem:[#allocation32_spill] sm:$0xff] %v5930_v6  ;;  %v539_v38 = vpop.f32.mrf.mxu0  ;;  %v742_v48 = vmul.f32 %v5930_v6, %v5930_v6  ;;  %3109 = vmatpush1.msra.mxu0 %v3070_v50 }
 0x185   :  { %9022 = vst [vmem:[#allocation31_spill] sm:$0xff] %v5928_v26  ;;  %v741_v25 = vmul.f32 %v5928_v26, %v5928_v26  ;;  %v540_v20 = vadd.f32 %v5233_v24, %v539_v38  ;;  %v671_v16 = vadd.f32 %v670_v36, %v5928_v26  ;;  %v803_v30 = vadd.f32 %v802_v3, %v740_v43 }
 0x186   :  { %v5944_v39 = vmax.f32 %v545_v9, 0.0  ;;  %3110 = vmatprep.subr.mxu0 %v5802_v11 }
 0x187   :  { %v5940_v54 = vmax.f32 %v540_v20, 0.0  ;;  %v804_v1 = vadd.f32 %v803_v30, %v741_v25  ;;  %v672_v35 = vadd.f32 %v671_v16, %v5930_v6 }
 0x188   :  { %v744_v43 = vmul.f32 %v5944_v39, %v5944_v39 }
 0x189   :  { %v743_v8 = vmul.f32 %v5940_v54, %v5940_v54  ;;  %v673_v24 = vadd.f32 %v672_v35, %v5940_v54  ;;  %v805_v38 = vadd.f32 %v804_v1, %v742_v48  ;;  %v3069_v35 = vld [vmem:[#allocation8 + $0x338] sm:$0xff] }
 0x18a   :  { %3111 = vmatpush1.msra.mxu0 %v3069_v35  ;;  %v9034_v35 = vld [vmem:[#allocation24_spill] sm:$0xff] }
 0x18b   :  { %v674_v3 = vadd.f32 %v673_v24, %v5944_v39  ;;  %v806_v36 = vadd.f32 %v805_v38, %v743_v8  ;;  %3112 = vmatprep.subr.mxu0 %v5802_v11 }
 0x18d   :  { %v675_v20 = vrot.slane %v674_v3, 4  ;;  %v807_v25 = vadd.f32 %v806_v36, %v744_v43  ;;  %v3068_v36 = vld [vmem:[#allocation8 + $0x330] sm:$0xff] }
 0x18e   :  { %3113 = vmatpush1.msra.mxu0 %v3068_v36 }
 0x18f   :  { %v676_v9 = vadd.f32 %v675_v20, %v674_v3  ;;  %v808_v16 = vrot.slane %v807_v25, 4  ;;  %3114 = vmatprep.subr.mxu0 %v5802_v11 }
 0x191   :  { %v677_v30 = vrot.slane %v676_v9, 2  ;;  %v809_v6 = vadd.f32 %v808_v16, %v807_v25  ;;  %v3066_v25 = vld [vmem:[#allocation8 + $0x320] sm:$0xff] }
 0x193   :  { %v678_v26 = vadd.f32 %v677_v30, %v676_v9  ;;  %v810_v2 = vrot.slane %v809_v6, 2  ;;  %v9035_v30 = vld [vmem:[#allocation23_spill] sm:$0xff] }
 0x195   :  { %v679_v48 = vrot.slane %v678_v26, 1  ;;  %v811_v1 = vadd.f32 %v810_v2, %v809_v6  ;;  %v9040_v6 = vld [vmem:[#allocation29_spill] sm:$0xff]  ;;  %v9041_v2 = vld [vmem:[#allocation31_spill] sm:$0xff] }
 0x197   :  { %v680_v24 = vadd.f32 %v679_v48, %v678_v26  ;;  %v812_v8 = vrot.slane %v811_v1, 1 }
 0x199   :  { %v813_v38 = vadd.f32 %v812_v8, %v811_v1  ;;  %v5955_v50 = vmul.f32 0.001953125, %v680_v24  ;;  %v3067_v24 = vld [vmem:[#allocation8 + $0x328] sm:$0xff] }
 0x19a   :  { %3115 = vmatpush1.msra.mxu0 %v3067_v24  ;;  %v9024_v24 = vld [vmem:[#allocation13_spill] sm:$0xff] }
 0x19b   :  { %v815_v43 = vmul.f32 0.001953125, %v813_v38  ;;  %v816_v3 = vmul.f32 %v5955_v50, %v5955_v50  ;;  %3116 = vmatprep.subr.mxu0 %v5802_v11  ;;  %v9025_v38 = vld [vmem:[#allocation14_spill] sm:$0xff]  ;;  %v9044_v9 = vsub.f32 %v5521_v47, %v5955_v50  ;;  %v9046_v48 = vsub.f32 %v5533_v56, %v5955_v50 }
 0x19c   :  { %3117 = vmatpush1.msra.mxu0 %v3066_v25  ;;  %v6087_v25 = vld [vmem:[%s8909_s3] ss:$0 sm:$0xff]  ;;  %v9048_v47 = vsub.f32 %v5531_v55, %v5955_v50  ;;  %v9050_v56 = vsub.f32 %v5540_v63, %v5955_v50  ;;  %v9053_v63 = vsub.f32 %v5569_v29, %v5955_v50 }
 0x19d   :  { %v817_v20 = vsub.f32 %v815_v43, %v816_v3  ;;  %3118 = vmatprep.subr.mxu0 %v5802_v11  ;;  %v9043_v43 = vsub.f32 %v5940_v54, %v5955_v50  ;;  %v9045_v3 = vsub.f32 %v5518_v45, %v5955_v50  ;;  %v6122_v54 = vld [vmem:[%s8910_s4] ss:$0 sm:$0xff]  ;;  %v9049_v45 = vsub.f32 %v5545_v4, %v5955_v50 }
 0x19e   :  { %9047 = vst [vmem:[#allocation13_spill] sm:$0xff] %v6122_v54  ;;  %v9052_v4 = vsub.f32 %v5554_v14, %v5955_v50 }
 0x19f   :  { %v882_v26 = vadd.f32 1e-05, %v817_v20  ;;  %v9042_v20 = vld [vmem:[#allocation32_spill] sm:$0xff] }
 0x1a1   :  { %5228 = vrsqrt.f32 %v882_v26  ;;  %v9029_v26 = vld [vmem:[#allocation17_spill] sm:$0xff] }
 0x1ae   :  { %v6082_v8 = vpop.eup %5228 }
 0x1af   :  { %v946_v36 = vmul.f32 %v6082_v8, %v9043_v43  ;;  %v6105_v60 = vmul.f32 %v6082_v8, %v9044_v9  ;;  %v6111_v16 = vmul.f32 %v6082_v8, %v9045_v3  ;;  %v6117_v1 = vmul.f32 %v6082_v8, %v9046_v48 }
 0x1b0   :  { %v6128_v9 = vmul.f32 %v6082_v8, %v9048_v47  ;;  %v6134_v43 = vmul.f32 %v6082_v8, %v9049_v45  ;;  %v6140_v48 = vmul.f32 %v6082_v8, %v9050_v56  ;;  %v9051_v3 = vsub.f32 %v5556_v15, %v5955_v50 }
 0x1b1   :  { %v1016_v47 = vmul.f32 %v6087_v25, %v946_v36  ;;  %v6153_v45 = vmul.f32 %v6082_v8, %v9052_v4  ;;  %v6159_v56 = vmul.f32 %v6082_v8, %v9053_v63  ;;  %v9054_v15 = vsub.f32 %v5567_v28, %v5955_v50 }
 0x1b2   :  { %v6146_v55 = vmul.f32 %v6082_v8, %v9051_v3  ;;  %v9055_v36 = vsub.f32 %v5576_v37, %v5955_v50  ;;  %v9056_v4 = vsub.f32 %v5581_v42, %v5955_v50  ;;  %v9057_v63 = vsub.f32 %v5590_v53, %v5955_v50 }
 0x1b3   :  { %v6165_v3 = vmul.f32 %v6082_v8, %v9054_v15  ;;  %v9058_v15 = vsub.f32 %v5588_v52, %v5955_v50  ;;  %v9060_v42 = vsub.f32 %v5602_v5, %v5955_v50  ;;  %v9061_v53 = vsub.f32 %v5604_v7, %v5955_v50 }
 0x1b4   :  { %v6171_v14 = vmul.f32 %v6082_v8, %v9055_v36  ;;  %v6177_v29 = vmul.f32 %v6082_v8, %v9056_v4  ;;  %v6183_v28 = vmul.f32 %v6082_v8, %v9057_v63  ;;  %v1086_v36 = vadd.f32 %v6122_v54, %v1016_v47 }
 0x1b5   :  { %v6189_v37 = vmul.f32 %v6082_v8, %v9058_v15  ;;  %v6196_v4 = vmul.f32 %v6082_v8, %v9060_v42  ;;  %v6202_v63 = vmul.f32 %v6082_v8, %v9061_v53  ;;  %v9062_v52 = vsub.f32 %v5612_v19, %v5955_v50 }
 0x1b6   :  { %v9063_v47 = vsub.f32 %v5617_v23, %v5955_v50  ;;  %v9064_v42 = vsub.f32 %v5626_v34, %v5955_v50  ;;  %v9065_v53 = vsub.f32 %v5624_v33, %v5955_v50  ;;  %1232 = vst [vmem:[#allocation2 + $0x448] sm:$0xff] %v1086_v36  ;;  %v9067_v34 = vsub.f32 %v5641_v59, %v5955_v50 }
 0x1b7   :  { %9059 = vst [vmem:[#allocation14_spill] sm:$0xff] %v6189_v37  ;;  %v6208_v15 = vmul.f32 %v6082_v8, %v9062_v52  ;;  %v3065_v37 = vld [vmem:[#allocation8 + $0x318] sm:$0xff]  ;;  %v9066_v52 = vsub.f32 %v5639_v57, %v5955_v50  ;;  %v9068_v33 = vsub.f32 %v5651_v10, %v5955_v50  ;;  %v9069_v57 = vsub.f32 %v5656_v17, %v5955_v50 }
 0x1b8   :  { %v6214_v5 = vmul.f32 %v6082_v8, %v9063_v47  ;;  %v6220_v7 = vmul.f32 %v6082_v8, %v9064_v42  ;;  %v6226_v19 = vmul.f32 %v6082_v8, %v9065_v53  ;;  %3119 = vmatpush1.msra.mxu0 %v3065_v37  ;;  %v6238_v47 = vmul.f32 %v6082_v8, %v9067_v34 }
 0x1b9   :  { %v6232_v23 = vmul.f32 %v6082_v8, %v9066_v52  ;;  %v6244_v42 = vmul.f32 %v6082_v8, %v9068_v33  ;;  %v6250_v53 = vmul.f32 %v6082_v8, %v9069_v57  ;;  %v9070_v37 = vsub.f32 %v5667_v32, %v5955_v50  ;;  %3120 = vmatprep.subr.mxu0 %v5802_v11 }
 0x1ba   :  { %v9071_v10 = vsub.f32 %v5665_v31, %v5955_v50  ;;  %v9072_v17 = vsub.f32 %v5681_v58, %v5955_v50  ;;  %v9073_v32 = vsub.f32 %v5683_v61, %v5955_v50  ;;  %v9074_v33 = vsub.f32 %v5693_v13, %v5955_v50 }
 0x1bb   :  { %v6256_v59 = vmul.f32 %v6082_v8, %v9070_v37  ;;  %v9075_v57 = vsub.f32 %v5698_v22, %v5955_v50  ;;  %v9076_v37 = vsub.f32 %v5710_v46, %v5955_v50 }
 0x1bc   :  { %v6263_v36 = vmul.f32 %v6082_v8, %v9071_v10  ;;  %v6269_v52 = vmul.f32 %v6082_v8, %v9072_v17  ;;  %v6275_v34 = vmul.f32 %v6082_v8, %v9073_v32  ;;  %v6281_v31 = vmul.f32 %v6082_v8, %v9074_v33 }
 0x1bd   :  { %v6287_v58 = vmul.f32 %v6082_v8, %v9075_v57  ;;  %v6293_v61 = vmul.f32 %v6082_v8, %v9076_v37  ;;  %v9077_v10 = vsub.f32 %v5708_v44, %v5955_v50  ;;  %v9078_v17 = vsub.f32 %v5728_v18, %v5955_v50 }
 0x1be   :  { %v9079_v32 = vsub.f32 %v5726_v12, %v5955_v50  ;;  %v9080_v33 = vsub.f32 %v5742_v49, %v5955_v50  ;;  %v9081_v57 = vsub.f32 %v5744_v51, %v5955_v50  ;;  %v9082_v37 = vsub.f32 %v5756_v21, %v5955_v50 }
 0x1bf   :  { %v6299_v13 = vmul.f32 %v6082_v8, %v9077_v10  ;;  %v6305_v22 = vmul.f32 %v6082_v8, %v9078_v17  ;;  %v9083_v10 = vsub.f32 %v5761_v27, %v5955_v50  ;;  %v9084_v17 = vsub.f32 %v5774_v0, %v5955_v50 }
 0x1c0   :  { %v6311_v46 = vmul.f32 %v6082_v8, %v9079_v32  ;;  %v6317_v44 = vmul.f32 %v6082_v8, %v9080_v33  ;;  %v6323_v18 = vmul.f32 %v6082_v8, %v9081_v57  ;;  %v6329_v12 = vmul.f32 %v6082_v8, %v9082_v37 }
 0x1c1   :  { %v6335_v49 = vmul.f32 %v6082_v8, %v9083_v10  ;;  %v6341_v51 = vmul.f32 %v6082_v8, %v9084_v17  ;;  %v9085_v32 = vsub.f32 %v5772_v62, %v5955_v50  ;;  %v9086_v33 = vsub.f32 %v5792_v41, %v5955_v50  ;;  %v9091_v17 = vld [vmem:[#allocation15_spill] sm:$0xff] }
 0x1c2   :  { %v9087_v57 = vsub.f32 %v5790_v40, %v5955_v50  ;;  %v9088_v37 = vsub.f32 %v9024_v24, %v5955_v50  ;;  %v9089_v10 = vsub.f32 %v9025_v38, %v5955_v50 }
 0x1c3   :  { %v6347_v21 = vmul.f32 %v6082_v8, %v9085_v32  ;;  %v6353_v27 = vmul.f32 %v6082_v8, %v9086_v33  ;;  %v9092_v32 = vsub.f32 %v9091_v17, %v5955_v50  ;;  %v9094_v33 = vld [vmem:[#allocation16_spill] sm:$0xff] }
 0x1c4   :  { %v6359_v0 = vmul.f32 %v6082_v8, %v9087_v57  ;;  %v6365_v62 = vmul.f32 %v6082_v8, %v9088_v37  ;;  %v6371_v41 = vmul.f32 %v6082_v8, %v9089_v10  ;;  %v9095_v57 = vsub.f32 %v9094_v33, %v5955_v50  ;;  %v9097_v37 = vld [vmem:[#allocation18_spill] sm:$0xff] }
 0x1c5   :  { %v6377_v40 = vmul.f32 %v6082_v8, %v9092_v32  ;;  %v9098_v54 = vsub.f32 %v9097_v37, %v5955_v50  ;;  %v9100_v10 = vsub.f32 %v9029_v26, %v5955_v50  ;;  %v9102_v32 = vld [vmem:[#allocation19_spill] sm:$0xff] }
 0x1c6   :  { %9090 = vst [vmem:[#allocation17_spill] sm:$0xff] %v6371_v41  ;;  %v6383_v24 = vmul.f32 %v6082_v8, %v9095_v57  ;;  %v3064_v57 = vld [vmem:[#allocation8 + $0x310] sm:$0xff] }
 0x1c7   :  { %9093 = vst [vmem:[#allocation24_spill] sm:$0xff] %v6377_v40  ;;  %v6389_v38 = vmul.f32 %v6082_v8, %v9098_v54  ;;  %v6395_v17 = vmul.f32 %v6082_v8, %v9100_v10  ;;  %v9103_v40 = vsub.f32 %v9102_v32, %v5955_v50  ;;  %v9106_v54 = vld [vmem:[#allocation21_spill] sm:$0xff]  ;;  %v9109_v10 = vld [vmem:[#allocation22_spill] sm:$0xff]  ;;  %3121 = vmatpush1.msra.mxu0 %v3064_v57 }
 0x1c8   :  { %9096 = vst [vmem:[#allocation23_spill] sm:$0xff] %v6383_v24  ;;  %v9104_v24 = vld [vmem:[#allocation20_spill] sm:$0xff]  ;;  %3122 = vmatprep.subr.mxu0 %v5802_v11 }
 0x1c9   :  { %9099 = vst [vmem:[#allocation29_spill] sm:$0xff] %v6389_v38  ;;  %9101 = vst [vmem:[#allocation31_spill] sm:$0xff] %v6395_v17  ;;  %v6401_v33 = vmul.f32 %v6082_v8, %v9103_v40  ;;  %v9105_v41 = vsub.f32 %v9104_v24, %v5955_v50  ;;  %v9107_v38 = vsub.f32 %v9106_v54, %v5955_v50 }
 0x1ca   :  { %v9110_v17 = vsub.f32 %v9109_v10, %v5955_v50  ;;  %v9112_v40 = vsub.f32 %v9034_v35, %v5955_v50 }
 0x1cb   :  { %v6407_v37 = vmul.f32 %v6082_v8, %v9105_v41  ;;  %v6413_v26 = vmul.f32 %v6082_v8, %v9107_v38  ;;  %v9113_v41 = vsub.f32 %v9035_v30, %v5955_v50  ;;  %v9114_v38 = vld [vmem:[#allocation25_spill] sm:$0xff] }
 0x1cc   :  { %v6419_v32 = vmul.f32 %v6082_v8, %v9110_v17  ;;  %v6425_v24 = vmul.f32 %v6082_v8, %v9112_v40  ;;  %v9117_v17 = vld [vmem:[#allocation26_spill] sm:$0xff]  ;;  %v9119_v40 = vld [vmem:[#allocation27_spill] sm:$0xff] }
 0x1cd   :  { %9108 = vst [vmem:[#allocation32_spill] sm:$0xff] %v6413_v26  ;;  %v6431_v54 = vmul.f32 %v6082_v8, %v9113_v41  ;;  %v9115_v26 = vsub.f32 %v9114_v38, %v5955_v50  ;;  %v9120_v57 = vsub.f32 %v9119_v40, %v5955_v50  ;;  %v9122_v41 = vld [vmem:[#allocation28_spill] sm:$0xff]  ;;  %v9126_v40 = vsub.f32 %v9040_v6, %v5955_v50 }
 0x1ce   :  { %9111 = vst [vmem:[#allocation15_spill] sm:$0xff] %v6419_v32  ;;  %v9118_v32 = vsub.f32 %v9117_v17, %v5955_v50  ;;  %v9123_v38 = vsub.f32 %v9122_v41, %v5955_v50 }
 0x1cf   :  { %v6437_v10 = vmul.f32 %v6082_v8, %v9115_v26  ;;  %v6449_v30 = vmul.f32 %v6082_v8, %v9120_v57  ;;  %v6468_v57 = vmul.f32 %v6082_v8, %v9126_v40  ;;  %v6490_v40 = vmul.f32 %v6087_v25, %v6105_v60 }
 0x1d0   :  { %v6443_v35 = vmul.f32 %v6082_v8, %v9118_v32  ;;  %v6456_v26 = vmul.f32 %v6082_v8, %v9123_v38  ;;  %v9128_v38 = vsub.f32 %v9042_v20, %v5955_v50  ;;  %v6498_v20 = vmul.f32 %v6087_v25, %v6117_v1 }
 0x1d1   :  { %9116 = vst [vmem:[#allocation16_spill] sm:$0xff] %v6437_v10  ;;  %9121 = vst [vmem:[#allocation18_spill] sm:$0xff] %v6449_v30  ;;  %v9124_v10 = vld [vmem:[#allocation30_spill] sm:$0xff]  ;;  %v9127_v30 = vsub.f32 %v9041_v2, %v5955_v50  ;;  %v6494_v2 = vmul.f32 %v6087_v25, %v6111_v16  ;;  %v6510_v60 = vmul.f32 %v6087_v25, %v6140_v48 }
 0x1d2   :  { %v9125_v17 = vsub.f32 %v9124_v10, %v5955_v50  ;;  %v6480_v10 = vmul.f32 %v6082_v8, %v9128_v38  ;;  %v6518_v16 = vmul.f32 %v6087_v25, %v6153_v45  ;;  %v6522_v1 = vmul.f32 %v6087_v25, %v6159_v56 }
 0x1d3   :  { %v6474_v41 = vmul.f32 %v6082_v8, %v9127_v30  ;;  %v6502_v30 = vmul.f32 %v6087_v25, %v6128_v9  ;;  %v6530_v9 = vmul.f32 %v6087_v25, %v6171_v14  ;;  %v6538_v48 = vmul.f32 %v6087_v25, %v6183_v28  ;;  %v3063_v28 = vld [vmem:[#allocation8 + $0x308] sm:$0xff] }
 0x1d4   :  { %v6462_v32 = vmul.f32 %v6082_v8, %v9125_v17  ;;  %v9129_v17 = vsub.f32 %v5944_v39, %v5955_v50  ;;  %v6506_v39 = vmul.f32 %v6087_v25, %v6134_v43  ;;  %v6514_v50 = vmul.f32 %v6087_v25, %v6146_v55  ;;  %v9130_v55 = vld [vmem:[#allocation14_spill] sm:$0xff]  ;;  %3123 = vmatpush1.msra.mxu0 %v3063_v28  ;;  %v9137_v28 = vld [vmem:[#allocation23_spill] sm:$0xff] }
 0x1d5   :  { %v6534_v43 = vmul.f32 %v6087_v25, %v6177_v29  ;;  %v6542_v45 = vmul.f32 %v6087_v25, %v9130_v55  ;;  %v6546_v56 = vmul.f32 %v6087_v25, %v6196_v4  ;;  %v6554_v14 = vmul.f32 %v6087_v25, %v6208_v15  ;;  %3124 = vmatprep.subr.mxu0 %v5802_v11  ;;  %v9135_v55 = vld [vmem:[#allocation24_spill] sm:$0xff] }
 0x1d6   :  { %v6486_v6 = vmul.f32 %v6082_v8, %v9129_v17  ;;  %v6526_v8 = vmul.f32 %v6087_v25, %v6165_v3  ;;  %v6550_v3 = vmul.f32 %v6087_v25, %v6202_v63  ;;  %v6558_v29 = vmul.f32 %v6087_v25, %v6214_v5  ;;  %v9133_v17 = vld [vmem:[#allocation17_spill] sm:$0xff] }
 0x1d7   :  { %v6562_v38 = vmul.f32 %v6087_v25, %v6220_v7  ;;  %v6566_v4 = vmul.f32 %v6087_v25, %v6226_v19  ;;  %v6570_v63 = vmul.f32 %v6087_v25, %v6232_v23  ;;  %v6574_v15 = vmul.f32 %v6087_v25, %v6238_v47 }
 0x1d8   :  { %v6578_v5 = vmul.f32 %v6087_v25, %v6244_v42  ;;  %v6582_v7 = vmul.f32 %v6087_v25, %v6250_v53  ;;  %v6586_v19 = vmul.f32 %v6087_v25, %v6256_v59  ;;  %v6590_v23 = vmul.f32 %v6087_v25, %v6263_v36 }
 0x1d9   :  { %v6595_v47 = vmul.f32 %v6087_v25, %v6269_v52  ;;  %v6599_v42 = vmul.f32 %v6087_v25, %v6275_v34  ;;  %v6603_v53 = vmul.f32 %v6087_v25, %v6281_v31  ;;  %v6607_v59 = vmul.f32 %v6087_v25, %v6287_v58 }
 0x1da   :  { %v6611_v36 = vmul.f32 %v6087_v25, %v6293_v61  ;;  %v6615_v52 = vmul.f32 %v6087_v25, %v6299_v13  ;;  %v6619_v34 = vmul.f32 %v6087_v25, %v6305_v22  ;;  %v6623_v31 = vmul.f32 %v6087_v25, %v6311_v46 }
 0x1db   :  { %v6627_v58 = vmul.f32 %v6087_v25, %v6317_v44  ;;  %v6631_v61 = vmul.f32 %v6087_v25, %v6323_v18  ;;  %v6635_v13 = vmul.f32 %v6087_v25, %v6329_v12  ;;  %v6639_v22 = vmul.f32 %v6087_v25, %v6335_v49 }
 0x1dc   :  { %v6643_v46 = vmul.f32 %v6087_v25, %v6341_v51  ;;  %v6647_v44 = vmul.f32 %v6087_v25, %v6347_v21  ;;  %v6651_v18 = vmul.f32 %v6087_v25, %v6353_v27  ;;  %v6655_v12 = vmul.f32 %v6087_v25, %v6359_v0 }
 0x1dd   :  { %v6659_v49 = vmul.f32 %v6087_v25, %v6365_v62  ;;  %v6663_v51 = vmul.f32 %v6087_v25, %v9133_v17  ;;  %v6667_v21 = vmul.f32 %v6087_v25, %v9135_v55  ;;  %v6671_v27 = vmul.f32 %v6087_v25, %v9137_v28 }
 0x1de   :  { %9131 = vst [vmem:[#allocation19_spill] sm:$0xff] %v6651_v18  ;;  %9132 = vst [vmem:[#allocation20_spill] sm:$0xff] %v6655_v12  ;;  %v9139_v18 = vld [vmem:[#allocation29_spill] sm:$0xff]  ;;  %v9140_v12 = vld [vmem:[#allocation31_spill] sm:$0xff]  ;;  %v6683_v17 = vmul.f32 %v6087_v25, %v6401_v33  ;;  %v6687_v55 = vmul.f32 %v6087_v25, %v6407_v37  ;;  %v6703_v33 = vmul.f32 %v6087_v25, %v6431_v54 }
 0x1df   :  { %9134 = vst [vmem:[#allocation21_spill] sm:$0xff] %v6663_v51  ;;  %9136 = vst [vmem:[#allocation22_spill] sm:$0xff] %v6667_v21  ;;  %v6675_v0 = vmul.f32 %v6087_v25, %v9139_v18  ;;  %v6679_v62 = vmul.f32 %v6087_v25, %v9140_v12  ;;  %v3062_v21 = vld [vmem:[#allocation8 + $0x300] sm:$0xff]  ;;  %v9142_v51 = vld [vmem:[#allocation32_spill] sm:$0xff]  ;;  %v6699_v12 = vmul.f32 %v6087_v25, %v6425_v24 }
 0x1e0   :  { %9138 = vst [vmem:[#allocation25_spill] sm:$0xff] %v6671_v27  ;;  %9141 = vst [vmem:[#allocation26_spill] sm:$0xff] %v6687_v55  ;;  %v6691_v28 = vmul.f32 %v6087_v25, %v9142_v51  ;;  %v9144_v27 = vld [vmem:[#allocation15_spill] sm:$0xff]  ;;  %3125 = vmatpush1.msra.mxu0 %v3062_v21  ;;  %v9145_v37 = vld [vmem:[#allocation16_spill] sm:$0xff]  ;;  %v6711_v51 = vmul.f32 %v6087_v25, %v6443_v35  ;;  %v6719_v24 = vmul.f32 %v6087_v25, %v6456_v26 }
 0x1e1   :  { %v6695_v18 = vmul.f32 %v6087_v25, %v9144_v27  ;;  %v6707_v55 = vmul.f32 %v6087_v25, %v9145_v37  ;;  %3126 = vmatprep.subr.mxu0 %v5802_v11  ;;  %v6724_v54 = vmul.f32 %v6087_v25, %v6462_v32  ;;  %v6728_v21 = vmul.f32 %v6087_v25, %v6468_v57  ;;  %v9148_v37 = vld [vmem:[#allocation13_spill] sm:$0xff] }
 0x1e2   :  { %9143 = vst [vmem:[#allocation27_spill] sm:$0xff] %v6691_v28  ;;  %v9146_v28 = vld [vmem:[#allocation18_spill] sm:$0xff]  ;;  %v6732_v35 = vmul.f32 %v6087_v25, %v6474_v41  ;;  %v6740_v26 = vmul.f32 %v6087_v25, %v6486_v6  ;;  %v1024_v32 = vadd.f32 %v9148_v37, %v6490_v40  ;;  %v6750_v57 = vadd.f32 %v9148_v37, %v6498_v20 }
 0x1e3   :  { %v6715_v27 = vmul.f32 %v6087_v25, %v9146_v28  ;;  %9147 = vst [vmem:[#allocation28_spill] sm:$0xff] %v6724_v54  ;;  %v6736_v28 = vmul.f32 %v6087_v25, %v6480_v10  ;;  %v6746_v54 = vadd.f32 %v9148_v37, %v6494_v2  ;;  %v6754_v41 = vadd.f32 %v9148_v37, %v6502_v30 }
 0x1e4   :  { %v6758_v10 = vadd.f32 %v9148_v37, %v6506_v39  ;;  %v6762_v25 = vadd.f32 %v9148_v37, %v6510_v60  ;;  %v6766_v6 = vadd.f32 %v9148_v37, %v6514_v50  ;;  %v6770_v40 = vadd.f32 %v9148_v37, %v6518_v16  ;;  %1170 = vst [vmem:[#allocation2 + $0x28] sm:$0xff] %v1024_v32 }
 0x1e5   :  { %v6774_v2 = vadd.f32 %v9148_v37, %v6522_v1  ;;  %v6778_v20 = vadd.f32 %v9148_v37, %v6526_v8  ;;  %v6782_v30 = vadd.f32 %v9148_v37, %v6530_v9  ;;  %1171 = vst [vmem:[#allocation2 + $0x30] sm:$0xff] %v6746_v54  ;;  %1172 = vst [vmem:[#allocation2 + $0x48] sm:$0xff] %v6750_v57  ;;  %2013 = vmatprep.mubr.f32.mxu0 %v1024_v32  ;;  %v9152_v32 = vld [vmem:[#allocation20_spill] sm:$0xff] }
 0x1e6   :  { %v6788_v39 = vadd.f32 %v9148_v37, %v6534_v43  ;;  %v6792_v60 = vadd.f32 %v9148_v37, %v6538_v48  ;;  %v6796_v50 = vadd.f32 %v9148_v37, %v6542_v45  ;;  %v6800_v16 = vadd.f32 %v9148_v37, %v6546_v56  ;;  %1173 = vst [vmem:[#allocation2 + $0x50] sm:$0xff] %v6754_v41  ;;  %v3093_v48 = vld [vmem:[#allocation8 + $0x3f8] sm:$0xff] }
 0x1e7   :  { %1174 = vst [vmem:[#allocation2 + $0x68] sm:$0xff] %v6758_v10  ;;  %1175 = vst [vmem:[#allocation2 + $0x70] sm:$0xff] %v6762_v25  ;;  %v6808_v1 = vadd.f32 %v9148_v37, %v6550_v3  ;;  %v6812_v8 = vadd.f32 %v9148_v37, %v6554_v14  ;;  %v6816_v9 = vadd.f32 %v9148_v37, %v6558_v29  ;;  %3127 = vmatpush2.msra.mxu0 %v3093_v48  ;;  %v9153_v48 = vld [vmem:[#allocation21_spill] sm:$0xff] }
 0x1e8   :  { %1176 = vst [vmem:[#allocation2 + $0x88] sm:$0xff] %v6766_v6  ;;  %v6820_v43 = vadd.f32 %v9148_v37, %v6562_v38  ;;  %1177 = vst [vmem:[#allocation2 + $0x90] sm:$0xff] %v6770_v40  ;;  %v6828_v45 = vadd.f32 %v9148_v37, %v6566_v4  ;;  %v6832_v56 = vadd.f32 %v9148_v37, %v6570_v63  ;;  %3128 = vmatprep.subr.mxu0 %v5802_v11 }
 0x1e9   :  { %1178 = vst [vmem:[#allocation2 + $0xa8] sm:$0xff] %v6774_v2  ;;  %1179 = vst [vmem:[#allocation2 + $0xb0] sm:$0xff] %v6778_v20  ;;  %v6836_v3 = vadd.f32 %v9148_v37, %v6574_v15  ;;  %v6840_v14 = vadd.f32 %v9148_v37, %v6578_v5  ;;  %v6848_v29 = vadd.f32 %v9148_v37, %v6582_v7 }
 0x1ea   :  { %1180 = vst [vmem:[#allocation2 + $0xc8] sm:$0xff] %v6782_v30  ;;  %1181 = vst [vmem:[#allocation2 + $0xd0] sm:$0xff] %v6788_v39  ;;  %v6852_v38 = vadd.f32 %v9148_v37, %v6586_v19  ;;  %v6856_v4 = vadd.f32 %v9148_v37, %v6590_v23  ;;  %v6860_v63 = vadd.f32 %v9148_v37, %v6595_v47 }
 0x1eb   :  { %1182 = vst [vmem:[#allocation2 + $0xe8] sm:$0xff] %v6792_v60  ;;  %1183 = vst [vmem:[#allocation2 + $0xf0] sm:$0xff] %v6796_v50  ;;  %v6869_v15 = vadd.f32 %v9148_v37, %v6599_v42  ;;  %v6873_v5 = vadd.f32 %v9148_v37, %v6603_v53  ;;  %v6877_v7 = vadd.f32 %v9148_v37, %v6607_v59  ;;  %v1394_v53 = vld [vmem:[#allocation2 + $0x9] sm:$0xff] }
 0x1ec   :  { %1184 = vst [vmem:[#allocation2 + $0x108] sm:$0xff] %v6800_v16  ;;  %1185 = vst [vmem:[#allocation2 + $0x110] sm:$0xff] %v6808_v1  ;;  %v1054_v19 = vadd.f32 %v9148_v37, %v6611_v36  ;;  %v1055_v11 = vadd.f32 %v9148_v37, %v6615_v52  ;;  %v1056_v23 = vadd.f32 %v9148_v37, %v6619_v34 }
 0x1ed   :  { %1186 = vst [vmem:[#allocation2 + $0x128] sm:$0xff] %v6812_v8  ;;  %1187 = vst [vmem:[#allocation2 + $0x130] sm:$0xff] %v6816_v9  ;;  %v1057_v47 = vadd.f32 %v9148_v37, %v6623_v31  ;;  %v1058_v42 = vadd.f32 %v9148_v37, %v6627_v58  ;;  %v1059_v59 = vadd.f32 %v9148_v37, %v6631_v61  ;;  %v1458_v31 = vld [vmem:[#allocation2 + $0x27] sm:$0xff]  ;;  %v9151_v61 = vld [vmem:[#allocation19_spill] sm:$0xff] }
 0x1ee   :  { %1188 = vst [vmem:[#allocation2 + $0x148] sm:$0xff] %v6820_v43  ;;  %9149 = vst [vmem:[#allocation30_spill] sm:$0xff] %v6873_v5  ;;  %v1060_v36 = vadd.f32 %v9148_v37, %v6635_v13  ;;  %v1061_v52 = vadd.f32 %v9148_v37, %v6639_v22  ;;  %v1062_v34 = vadd.f32 %v9148_v37, %v6643_v46  ;;  %1618 = vmatprep.mubr.f32.mxu1 %v1458_v31 }
 0x1ef   :  { %9150 = vst [vmem:[#allocation14_spill] sm:$0xff] %v6877_v7  ;;  %1189 = vst [vmem:[#allocation2 + $0x150] sm:$0xff] %v6828_v45  ;;  %v1063_v58 = vadd.f32 %v9148_v37, %v6647_v44  ;;  %v1064_v13 = vadd.f32 %v9148_v37, %v9151_v61  ;;  %v1065_v22 = vadd.f32 %v9148_v37, %v9152_v32  ;;  %1619 = vmatmul.mubr.f32.vlgmr.msra.gmra.mxu1 %v1394_v53 }
 0x1f0   :  { %1190 = vst [vmem:[#allocation2 + $0x168] sm:$0xff] %v6832_v56  ;;  %1191 = vst [vmem:[#allocation2 + $0x170] sm:$0xff] %v6836_v3  ;;  %v1066_v46 = vadd.f32 %v9148_v37, %v6659_v49  ;;  %v1070_v32 = vadd.f32 %v9148_v37, %v6675_v0  ;;  %v1071_v49 = vadd.f32 %v9148_v37, %v6679_v62  ;;  %2014 = vmatmul.mubr.f32.gmra.mxu0 %v1458_v31  ;;  %v1459_v0 = vld [vmem:[#allocation2 + $0x2f] sm:$0xff]  ;;  %v1460_v31 = vld [vmem:[#allocation2 + $0x47] sm:$0xff] }
 0x1f1   :  { %1192 = vst [vmem:[#allocation2 + $0x188] sm:$0xff] %v6840_v14  ;;  %1193 = vst [vmem:[#allocation2 + $0x190] sm:$0xff] %v6848_v29  ;;  %v1075_v53 = vadd.f32 %v9148_v37, %v6695_v18  ;;  %v1076_v62 = vadd.f32 %v9148_v37, %v6699_v12  ;;  %1623 = vmatprep.mubr.f32.mxu1 %v1459_v0  ;;  %v1080_v18 = vadd.f32 %v9148_v37, %v6715_v27 }
 0x1f2   :  { %1194 = vst [vmem:[#allocation2 + $0x1a8] sm:$0xff] %v6852_v38  ;;  %1195 = vst [vmem:[#allocation2 + $0x1b0] sm:$0xff] %v6856_v4  ;;  %v1081_v12 = vadd.f32 %v9148_v37, %v6719_v24  ;;  %2018 = vmatprep.mubr.f32.mxu0 %v6746_v54  ;;  %v1085_v27 = vadd.f32 %v9148_v37, %v6736_v28  ;;  %v1087_v24 = vadd.f32 %v9148_v37, %v6740_v26  ;;  %v1396_v54 = vld [vmem:[#allocation2 + $0x29] sm:$0xff]  ;;  %v1397_v26 = vld [vmem:[#allocation2 + $0x31] sm:$0xff] }
 0x1f3   :  { %1196 = vst [vmem:[#allocation2 + $0x1c8] sm:$0xff] %v6860_v63  ;;  %1197 = vst [vmem:[#allocation2 + $0x1d0] sm:$0xff] %v6869_v15  ;;  %v1461_v28 = vld [vmem:[#allocation2 + $0x4f] sm:$0xff] }
 0x1f4   :  { %1198 = vst [vmem:[#allocation2 + $0x1e8] sm:$0xff] %v6873_v5  ;;  %1199 = vst [vmem:[#allocation2 + $0x1f0] sm:$0xff] %v6877_v7  ;;  %v9154_v7 = vld [vmem:[#allocation22_spill] sm:$0xff]  ;;  %v9155_v5 = vld [vmem:[#allocation25_spill] sm:$0xff]  ;;  %2019 = vmatmul.mubr.f32.gmra.mxu0 %v1459_v0 }
 0x1f5   :  { %1200 = vst [vmem:[#allocation2 + $0x208] sm:$0xff] %v1054_v19  ;;  %1201 = vst [vmem:[#allocation2 + $0x210] sm:$0xff] %v1055_v11  ;;  %v1067_v19 = vadd.f32 %v9148_v37, %v9153_v48  ;;  %v1068_v44 = vadd.f32 %v9148_v37, %v9154_v7  ;;  %v1069_v61 = vadd.f32 %v9148_v37, %v9155_v5  ;;  %2023 = vmatprep.mubr.f32.mxu0 %v6750_v57  ;;  %v1462_v57 = vld [vmem:[#allocation2 + $0x67] sm:$0xff] }
 0x1f6   :  { %1202 = vst [vmem:[#allocation2 + $0x268] sm:$0xff] %v1056_v23  ;;  %1203 = vst [vmem:[#allocation2 + $0x270] sm:$0xff] %v1057_v47  ;;  %v1072_v11 = vadd.f32 %v9148_v37, %v6683_v17  ;;  %v9156_v23 = vld [vmem:[#allocation26_spill] sm:$0xff]  ;;  %v9157_v47 = vld [vmem:[#allocation27_spill] sm:$0xff]  ;;  %v1077_v17 = vadd.f32 %v9148_v37, %v6703_v33 }
 0x1f7   :  { %1204 = vst [vmem:[#allocation2 + $0x288] sm:$0xff] %v1058_v42  ;;  %1205 = vst [vmem:[#allocation2 + $0x290] sm:$0xff] %v1059_v59  ;;  %v1073_v7 = vadd.f32 %v9148_v37, %v9156_v23  ;;  %v1074_v5 = vadd.f32 %v9148_v37, %v9157_v47  ;;  %v1395_v42 = vld [vmem:[#allocation2 + $0x11] sm:$0xff]  ;;  %v1078_v59 = vadd.f32 %v9148_v37, %v6707_v55  ;;  %v1464_v48 = vld [vmem:[#allocation2 + $0x87] sm:$0xff] }
 0x1f8   :  { %1206 = vst [vmem:[#allocation2 + $0x2a8] sm:$0xff] %v1060_v36  ;;  %1207 = vst [vmem:[#allocation2 + $0x2b0] sm:$0xff] %v1061_v52  ;;  %v1079_v36 = vadd.f32 %v9148_v37, %v6711_v51  ;;  %v9158_v52 = vld [vmem:[#allocation28_spill] sm:$0xff]  ;;  %v1084_v51 = vadd.f32 %v9148_v37, %v6732_v35  ;;  %1624 = vmatmul.mubr.f32.gmra.mxu1 %v1395_v42  ;;  %v2466_v35 = vld [vmem:[#allocation8 + $0x270] sm:$0xff]  ;;  %2024 = vmatmul.mubr.f32.gmra.mxu0 %v1460_v31 }
 0x1f9   :  { %1208 = vst [vmem:[#allocation2 + $0x2c8] sm:$0xff] %v1062_v34  ;;  %1209 = vst [vmem:[#allocation2 + $0x2d0] sm:$0xff] %v1063_v58  ;;  %v1082_v33 = vadd.f32 %v9148_v37, %v9158_v52  ;;  %v2467_v55 = vld [vmem:[#allocation8 + $0x278] sm:$0xff]  ;;  %v1083_v34 = vadd.f32 %v9148_v37, %v6728_v21  ;;  %1628 = vmatprep.mubr.f32.mxu1 %v1460_v31  ;;  %v6958_v21 = vld [vmem:[#allocation2] sm:$0xff]  ;;  %2028 = vmatprep.mubr.f32.mxu0 %v6754_v41 }
 0x1fa   :  { %1210 = vst [vmem:[#allocation2 + $0x2e8] sm:$0xff] %v1064_v13  ;;  %1211 = vst [vmem:[#allocation2 + $0x2f0] sm:$0xff] %v1065_v22  ;;  %2485 = vmatpush1.msra.mxu1 %v2467_v55  ;;  %v2465_v37 = vld [vmem:[#allocation8 + $0x268] sm:$0xff]  ;;  %v2464_v13 = vld [vmem:[#allocation8 + $0x260] sm:$0xff] }
 0x1fb   :  { %1212 = vst [vmem:[#allocation2 + $0x308] sm:$0xff] %v1066_v46  ;;  %1213 = vst [vmem:[#allocation2 + $0x310] sm:$0xff] %v1067_v19  ;;  %2486 = vmatprep.subr.mxu1 %v6958_v21  ;;  %v1398_v58 = vld [vmem:[#allocation2 + $0x49] sm:$0xff]  ;;  %v1399_v41 = vld [vmem:[#allocation2 + $0x51] sm:$0xff] }
 0x1fc   :  { %1214 = vst [vmem:[#allocation2 + $0x328] sm:$0xff] %v1068_v44  ;;  %1215 = vst [vmem:[#allocation2 + $0x330] sm:$0xff] %v1069_v61  ;;  %1629 = vmatmul.mubr.f32.gmra.mxu1 %v1396_v54  ;;  %2029 = vmatmul.mubr.f32.gmra.mxu0 %v1461_v28  ;;  %v1463_v22 = vld [vmem:[#allocation2 + $0x6f] sm:$0xff]  ;;  %v2463_v46 = vld [vmem:[#allocation8 + $0x258] sm:$0xff] }
 0x1fd   :  { %1216 = vst [vmem:[#allocation2 + $0x348] sm:$0xff] %v1070_v32  ;;  %1217 = vst [vmem:[#allocation2 + $0x350] sm:$0xff] %v1071_v49  ;;  %1633 = vmatprep.mubr.f32.mxu1 %v1461_v28  ;;  %2487 = vmatpush1.msra.mxu1 %v2466_v35  ;;  %v3092_v19 = vld [vmem:[#allocation8 + $0x3f0] sm:$0xff]  ;;  %v3091_v61 = vld [vmem:[#allocation8 + $0x3e8] sm:$0xff] }
 0x1fe   :  { %1218 = vst [vmem:[#allocation2 + $0x368] sm:$0xff] %v1072_v11  ;;  %1219 = vst [vmem:[#allocation2 + $0x370] sm:$0xff] %v1073_v7  ;;  %2488 = vmatprep.subr.mxu1 %v6958_v21  ;;  %2033 = vmatprep.mubr.f32.mxu0 %v6758_v10  ;;  %v1400_v10 = vld [vmem:[#allocation2 + $0x69] sm:$0xff]  ;;  %v1401_v32 = vld [vmem:[#allocation2 + $0x71] sm:$0xff] }
 0x1ff   :  { %1220 = vst [vmem:[#allocation2 + $0x388] sm:$0xff] %v1074_v5  ;;  %1221 = vst [vmem:[#allocation2 + $0x390] sm:$0xff] %v1075_v53  ;;  %2489 = vmatpush1.msra.mxu1 %v2465_v37  ;;  %v2462_v44 = vld [vmem:[#allocation8 + $0x250] sm:$0xff]  ;;  %3129 = vmatpush2.msra.mxu0 %v3092_v19  ;;  %v1466_v49 = vld [vmem:[#allocation2 + $0xa7] sm:$0xff] }
 0x200   :  { %1222 = vst [vmem:[#allocation2 + $0x3a8] sm:$0xff] %v1076_v62  ;;  %1223 = vst [vmem:[#allocation2 + $0x3b0] sm:$0xff] %v1077_v17  ;;  %1634 = vmatmul.mubr.f32.gmra.mxu1 %v1397_v26  ;;  %2490 = vmatprep.subr.mxu1 %v6958_v21  ;;  %v3090_v11 = vld [vmem:[#allocation8 + $0x3e0] sm:$0xff]  ;;  %v1402_v23 = vld [vmem:[#allocation2 + $0x89] sm:$0xff] }
 0x201   :  { %1224 = vst [vmem:[#allocation2 + $0x3c8] sm:$0xff] %v1078_v59  ;;  %1225 = vst [vmem:[#allocation2 + $0x3d0] sm:$0xff] %v1079_v36  ;;  %1638 = vmatprep.mubr.f32.mxu1 %v1462_v57  ;;  %2034 = vmatmul.mubr.f32.gmra.mxu0 %v1462_v57  ;;  %v1467_v7 = vld [vmem:[#allocation2 + $0xaf] sm:$0xff]  ;;  %v3089_v47 = vld [vmem:[#allocation8 + $0x3d8] sm:$0xff] }
 0x202   :  { %1226 = vst [vmem:[#allocation2 + $0x3e8] sm:$0xff] %v1080_v18  ;;  %1227 = vst [vmem:[#allocation2 + $0x3f0] sm:$0xff] %v1081_v12  ;;  %2038 = vmatprep.mubr.f32.mxu0 %v6762_v25  ;;  %2491 = vmatpush1.msra.mxu1 %v2464_v13  ;;  %v1465_v25 = vld [vmem:[#allocation2 + $0x8f] sm:$0xff]  ;;  %v1468_v0 = vld [vmem:[#allocation2 + $0xc7] sm:$0xff] }
 0x203   :  { %1228 = vst [vmem:[#allocation2 + $0x408] sm:$0xff] %v1082_v33  ;;  %1229 = vst [vmem:[#allocation2 + $0x410] sm:$0xff] %v1083_v34  ;;  %2492 = vmatprep.subr.mxu1 %v6958_v21  ;;  %3130 = vmatprep.subr.mxu0 %v6958_v21  ;;  %v1403_v5 = vld [vmem:[#allocation2 + $0x91] sm:$0xff]  ;;  %v1404_v53 = vld [vmem:[#allocation2 + $0xa9] sm:$0xff] }
 0x204   :  { %1230 = vst [vmem:[#allocation2 + $0x428] sm:$0xff] %v1084_v51  ;;  %1231 = vst [vmem:[#allocation2 + $0x430] sm:$0xff] %v1085_v27  ;;  %1639 = vmatmul.mubr.f32.gmra.mxu1 %v1398_v58  ;;  %3131 = vmatpush2.msra.mxu0 %v3091_v61  ;;  %v3088_v42 = vld [vmem:[#allocation8 + $0x3d0] sm:$0xff]  ;;  %v3087_v17 = vld [vmem:[#allocation8 + $0x3c8] sm:$0xff] }
 0x205   :  { %1233 = vst [vmem:[#allocation2 + $0x450] sm:$0xff] %v1087_v24  ;;  %1643 = vmatprep.mubr.f32.mxu1 %v1463_v22  ;;  %2039 = vmatmul.mubr.f32.gmra.mxu0 %v1463_v22  ;;  %v1469_v62 = vld [vmem:[#allocation2 + $0xcf] sm:$0xff]  ;;  %v1470_v36 = vld [vmem:[#allocation2 + $0xe7] sm:$0xff]  ;;  %v2455_v55 = vld [vmem:[#allocation8 + $0x218] sm:$0xff] }
 0x206   :  { %2043 = vmatprep.mubr.f32.mxu0 %v6766_v6  ;;  %2493 = vmatpush1.msra.mxu1 %v2463_v46  ;;  %v2461_v6 = vld [vmem:[#allocation8 + $0x248] sm:$0xff]  ;;  %v1405_v59 = vld [vmem:[#allocation2 + $0xb1] sm:$0xff]  ;;  %v2456_v12 = vld [vmem:[#allocation8 + $0x220] sm:$0xff] }
 0x207   :  { %2494 = vmatprep.subr.mxu1 %v6958_v21  ;;  %3132 = vmatprep.subr.mxu0 %v6958_v21  ;;  %v1406_v18 = vld [vmem:[#allocation2 + $0xc9] sm:$0xff]  ;;  %v3086_v52 = vld [vmem:[#allocation8 + $0x3c0] sm:$0xff]  ;;  %v1407_v33 = vld [vmem:[#allocation2 + $0xd1] sm:$0xff] }
 0x208   :  { %1644 = vmatmul.mubr.f32.gmra.mxu1 %v1399_v41  ;;  %3133 = vmatpush2.msra.mxu0 %v3090_v11  ;;  %v1408_v34 = vld [vmem:[#allocation2 + $0xe9] sm:$0xff]  ;;  %v3085_v27 = vld [vmem:[#allocation8 + $0x3b8] sm:$0xff]  ;;  %v2452_v35 = vld [vmem:[#allocation8 + $0x200] sm:$0xff] }
 0x209   :  { %1648 = vmatprep.mubr.f32.mxu1 %v1464_v48  ;;  %2044 = vmatmul.mubr.f32.gmra.mxu0 %v1464_v48  ;;  %v2454_v51 = vld [vmem:[#allocation8 + $0x210] sm:$0xff]  ;;  %v2453_v31 = vld [vmem:[#allocation8 + $0x208] sm:$0xff]  ;;  %v2483_v57 = vld [vmem:[#allocation8 + $0x2f8] sm:$0xff] }
 0x20a   :  { %2048 = vmatprep.mubr.f32.mxu0 %v6770_v40  ;;  %2495 = vmatpush1.msra.mxu1 %v2462_v44  ;;  %v2460_v40 = vld [vmem:[#allocation8 + $0x240] sm:$0xff]  ;;  %v1409_v24 = vld [vmem:[#allocation2 + $0xf1] sm:$0xff]  ;;  %v1410_v54 = vld [vmem:[#allocation2 + $0x109] sm:$0xff] }
 0x20b   :  { %2496 = vmatprep.subr.mxu1 %v6958_v21  ;;  %3134 = vmatprep.subr.mxu0 %v6958_v21  ;;  %v3084_v26 = vld [vmem:[#allocation8 + $0x3b0] sm:$0xff]  ;;  %v1476_v58 = vld [vmem:[#allocation2 + $0x147] sm:$0xff] }
 0x20c   :  { %1649 = vmatmul.mubr.f32.gmra.mxu1 %v1400_v10  ;;  %3135 = vmatpush2.msra.mxu0 %v3089_v47  ;;  %v1411_v37 = vld [vmem:[#allocation2 + $0x111] sm:$0xff]  ;;  %v1412_v22 = vld [vmem:[#allocation2 + $0x129] sm:$0xff]  ;;  %v3082_v61 = vld [vmem:[#allocation8 + $0x3a0] sm:$0xff] }
 0x20d   :  { %1653 = vmatprep.mubr.f32.mxu1 %v1465_v25  ;;  %2049 = vmatmul.mubr.f32.gmra.mxu0 %v1465_v25  ;;  %v1477_v46 = vld [vmem:[#allocation2 + $0x14f] sm:$0xff]  ;;  %v2480_v25 = vld [vmem:[#allocation8 + $0x2e0] sm:$0xff] }
 0x20e   :  { %2053 = vmatprep.mubr.f32.mxu0 %v6774_v2  ;;  %2497 = vmatpush1.msra.mxu1 %v2461_v6  ;;  %v2459_v2 = vld [vmem:[#allocation8 + $0x238] sm:$0xff]  ;;  %v3083_v48 = vld [vmem:[#allocation8 + $0x3a8] sm:$0xff]  ;;  %v2478_v11 = vld [vmem:[#allocation8 + $0x2d0] sm:$0xff] }
 0x20f   :  { %2498 = vmatprep.subr.mxu1 %v6958_v21  ;;  %3136 = vmatprep.subr.mxu0 %v6958_v21  ;;  %v1413_v19 = vld [vmem:[#allocation2 + $0x131] sm:$0xff]  ;;  %v2481_v10 = vld [vmem:[#allocation8 + $0x2e8] sm:$0xff] }
 0x210   :  { %1654 = vmatmul.mubr.f32.gmra.mxu1 %v1401_v32  ;;  %3137 = vmatpush2.msra.mxu0 %v3088_v42  ;;  %v1414_v44 = vld [vmem:[#allocation2 + $0x149] sm:$0xff]  ;;  %v1415_v32 = vld [vmem:[#allocation2 + $0x151] sm:$0xff] }
 0x211   :  { %1658 = vmatprep.mubr.f32.mxu1 %v1466_v49  ;;  %2054 = vmatmul.mubr.f32.gmra.mxu0 %v1466_v49  ;;  %v2479_v6 = vld [vmem:[#allocation8 + $0x2d8] sm:$0xff]  ;;  %v1416_v49 = vld [vmem:[#allocation2 + $0x169] sm:$0xff] }
 0x212   :  { %2058 = vmatprep.mubr.f32.mxu0 %v6778_v20  ;;  %2499 = vmatpush1.msra.mxu1 %v2460_v40  ;;  %v2458_v20 = vld [vmem:[#allocation8 + $0x230] sm:$0xff]  ;;  %v2475_v42 = vld [vmem:[#allocation8 + $0x2b8] sm:$0xff] }
 0x213   :  { %2500 = vmatprep.subr.mxu1 %v6958_v21  ;;  %3138 = vmatprep.subr.mxu0 %v6958_v21  ;;  %v1417_v40 = vld [vmem:[#allocation2 + $0x171] sm:$0xff]  ;;  %v1418_v47 = vld [vmem:[#allocation2 + $0x189] sm:$0xff] }
 0x214   :  { %1659 = vmatmul.mubr.f32.gmra.mxu1 %v1402_v23  ;;  %3139 = vmatpush2.msra.mxu0 %v3087_v17  ;;  %v3081_v23 = vld [vmem:[#allocation8 + $0x398] sm:$0xff] }
 0x215   :  { %1663 = vmatprep.mubr.f32.mxu1 %v1467_v7  ;;  %2059 = vmatmul.mubr.f32.gmra.mxu0 %v1467_v7  ;;  %v2477_v7 = vld [vmem:[#allocation8 + $0x2c8] sm:$0xff]  ;;  %v1421_v17 = vld [vmem:[#allocation2 + $0x1b1] sm:$0xff] }
 0x216   :  { %2063 = vmatprep.mubr.f32.mxu0 %v6782_v30  ;;  %2501 = vmatpush1.msra.mxu1 %v2459_v2  ;;  %v2457_v30 = vld [vmem:[#allocation8 + $0x228] sm:$0xff]  ;;  %v3080_v2 = vld [vmem:[#allocation8 + $0x390] sm:$0xff] }
 0x217   :  { %2502 = vmatprep.subr.mxu1 %v6958_v21  ;;  %3140 = vmatprep.subr.mxu0 %v6958_v21 }
 0x218   :  { %1664 = vmatmul.mubr.f32.gmra.mxu1 %v1403_v5  ;;  %3141 = vmatpush2.msra.mxu0 %v3086_v52  ;;  %v2476_v5 = vld [vmem:[#allocation8 + $0x2c0] sm:$0xff]  ;;  %v1423_v52 = vld [vmem:[#allocation2 + $0x1d1] sm:$0xff] }
 0x219   :  { %1668 = vmatprep.mubr.f32.mxu1 %v1468_v0  ;;  %2064 = vmatmul.mubr.f32.gmra.mxu0 %v1468_v0  ;;  %v6997_v28 = vpop.f32.mrf.mxu0  ;;  %v1419_v0 = vld [vmem:[#allocation2 + $0x191] sm:$0xff] }
 0x21a   :  { %2068 = vmatprep.mubr.f32.mxu0 %v6788_v39  ;;  %2503 = vmatpush1.msra.mxu1 %v2458_v20  ;;  %v1471_v39 = vld [vmem:[#allocation2 + $0xef] sm:$0xff] }
 0x21b   :  { %2504 = vmatprep.subr.mxu1 %v6958_v21  ;;  %3142 = vmatprep.subr.mxu0 %v6958_v21  ;;  %v2474_v20 = vld [vmem:[#allocation8 + $0x2b0] sm:$0xff] }
 0x21c   :  { %1669 = vmatmul.mubr.f32.gmra.mxu1 %v1404_v53  ;;  %3143 = vmatpush2.msra.mxu0 %v3085_v27  ;;  %v1420_v53 = vld [vmem:[#allocation2 + $0x1a9] sm:$0xff] }
 0x21d   :  { %1673 = vmatprep.mubr.f32.mxu1 %v1469_v62  ;;  %2069 = vmatmul.mubr.f32.gmra.mxu0 %v1469_v62  ;;  %v3079_v62 = vld [vmem:[#allocation8 + $0x388] sm:$0xff] }
 0x21e   :  { %2073 = vmatprep.mubr.f32.mxu0 %v6792_v60  ;;  %2505 = vmatpush1.msra.mxu1 %v2457_v30  ;;  %v1472_v60 = vld [vmem:[#allocation2 + $0x107] sm:$0xff]  ;;  %v1489_v27 = vld [vmem:[#allocation2 + $0x20f] sm:$0xff] }
 0x21f   :  { %2506 = vmatprep.subr.mxu1 %v6958_v21  ;;  %3144 = vmatprep.subr.mxu0 %v6958_v21  ;;  %v9159_v30 = vld [vmem:[#allocation30_spill] sm:$0xff] }
 0x220   :  { %1674 = vmatmul.mubr.f32.gmra.mxu1 %v1405_v59  ;;  %3145 = vmatpush2.msra.mxu0 %v3084_v26  ;;  %v2473_v59 = vld [vmem:[#allocation8 + $0x2a8] sm:$0xff]  ;;  %v2468_v26 = vld [vmem:[#allocation8 + $0x280] sm:$0xff] }
 0x221   :  { %1678 = vmatprep.mubr.f32.mxu1 %v1470_v36  ;;  %2074 = vmatmul.mubr.f32.gmra.mxu0 %v1470_v36  ;;  %v1422_v36 = vld [vmem:[#allocation2 + $0x1c9] sm:$0xff] }
 0x222   :  { %2078 = vmatprep.mubr.f32.mxu0 %v6796_v50  ;;  %2507 = vmatpush1.msra.mxu1 %v2456_v12  ;;  %v1473_v50 = vld [vmem:[#allocation2 + $0x10f] sm:$0xff]  ;;  %v3078_v12 = vld [vmem:[#allocation8 + $0x380] sm:$0xff] }
 0x223   :  { %2508 = vmatprep.subr.mxu1 %v6958_v21  ;;  %3146 = vmatprep.subr.mxu0 %v6958_v21 }
 0x224   :  { %1679 = vmatmul.mubr.f32.gmra.mxu1 %v1406_v18  ;;  %3147 = vmatpush2.msra.mxu0 %v3083_v48  ;;  %v2472_v18 = vld [vmem:[#allocation8 + $0x2a0] sm:$0xff] }
 0x225   :  { %1683 = vmatprep.mubr.f32.mxu1 %v1471_v39  ;;  %2079 = vmatmul.mubr.f32.gmra.mxu0 %v1471_v39  ;;  %v9160_v39 = vld [vmem:[#allocation14_spill] sm:$0xff] }
 0x226   :  { %2083 = vmatprep.mubr.f32.mxu0 %v6800_v16  ;;  %2509 = vmatpush1.msra.mxu1 %v2455_v55  ;;  %v1474_v16 = vld [vmem:[#allocation2 + $0x127] sm:$0xff] }
 0x227   :  { %2510 = vmatprep.subr.mxu1 %v6958_v21  ;;  %3148 = vmatprep.subr.mxu0 %v6958_v21  ;;  %v1488_v55 = vld [vmem:[#allocation2 + $0x207] sm:$0xff] }
 0x228   :  { %1684 = vmatmul.mubr.f32.gmra.mxu1 %v1407_v33  ;;  %3149 = vmatpush2.msra.mxu0 %v3082_v61  ;;  %v2471_v33 = vld [vmem:[#allocation8 + $0x298] sm:$0xff]  ;;  %v1494_v48 = vld [vmem:[#allocation2 + $0x2a7] sm:$0xff] }
 0x229   :  { %1688 = vmatprep.mubr.f32.mxu1 %v1472_v60  ;;  %2084 = vmatmul.mubr.f32.gmra.mxu0 %v1472_v60  ;;  %v1266_v60 = vld [vmem:[#allocation2 + $0x247] sm:$0xff] }
 0x22a   :  { %2088 = vmatprep.mubr.f32.mxu0 %v6808_v1  ;;  %2511 = vmatpush1.msra.mxu1 %v2454_v51  ;;  %v1475_v1 = vld [vmem:[#allocation2 + $0x12f] sm:$0xff] }
 0x22b   :  { %2512 = vmatprep.subr.mxu1 %v6958_v21  ;;  %3150 = vmatprep.subr.mxu0 %v6958_v21  ;;  %v2470_v51 = vld [vmem:[#allocation8 + $0x290] sm:$0xff]  ;;  %v1338_v61 = vld [vmem:[#allocation2 + $0x2c8] sm:$0xff] }
 0x22c   :  { %1689 = vmatmul.mubr.f32.gmra.mxu1 %v1408_v34  ;;  %3151 = vmatpush2.msra.mxu0 %v3081_v23  ;;  %v1424_v34 = vld [vmem:[#allocation2 + $0x1e9] sm:$0xff] }
 0x22d   :  { %1693 = vmatprep.mubr.f32.mxu1 %v1473_v50  ;;  %2089 = vmatmul.mubr.f32.gmra.mxu0 %v1473_v50  ;;  %v7035_v50 = vld [vmem:[#allocation8 + $0x478] sm:$0xff]  ;;  %v1434_v23 = vld [vmem:[#allocation2 + $0x2c9] sm:$0xff] }
 0x22e   :  { %2093 = vmatprep.mubr.f32.mxu0 %v6812_v8  ;;  %2513 = vmatpush1.msra.mxu1 %v2453_v31  ;;  %v2007_v8 = vpop.f32.mrf.mxu0  ;;  %v1425_v31 = vld [vmem:[#allocation2 + $0x1f1] sm:$0xff] }
 0x22f   :  { %2514 = vmatprep.subr.mxu1 %v6958_v21  ;;  %3152 = vmatprep.subr.mxu0 %v6958_v21  ;;  %v1427_v8 = vld [vmem:[#allocation2 + $0x251] sm:$0xff] }
 0x230   :  { %1694 = vmatmul.mubr.f32.gmra.mxu1 %v1409_v24  ;;  %v7002_v13 = vpop.f32.mrf.mxu0  ;;  %3153 = vmatpush2.msra.mxu0 %v3080_v2  ;;  %v1267_v24 = vld [vmem:[#allocation2 + $0x24f] sm:$0xff] }
 0x231   :  { %1698 = vmatprep.mubr.f32.mxu1 %v1474_v16  ;;  %2094 = vmatmul.mubr.f32.gmra.mxu0 %v1474_v16  ;;  %v2469_v16 = vld [vmem:[#allocation8 + $0x288] sm:$0xff] }
 0x232   :  { %2098 = vmatprep.mubr.f32.mxu0 %v6816_v9  ;;  %2515 = vmatpush1.msra.mxu1 %v2452_v35  ;;  %v2482_v9 = vld [vmem:[#allocation8 + $0x2f0] sm:$0xff]  ;;  %v2012_v41 = vpop.f32.mrf.mxu0  ;;  %v1332_v35 = vld [vmem:[#allocation2 + $0x268] sm:$0xff] }
 0x233   :  { %2516 = vmatprep.subr.mxu1 %v6958_v21  ;;  %3154 = vmatprep.subr.mxu0 %v6958_v21  ;;  %v1335_v41 = vld [vmem:[#allocation2 + $0x290] sm:$0xff] }
 0x234   :  { %1699 = vmatmul.mubr.f32.gmra.mxu1 %v1410_v54  ;;  %3155 = vmatpush2.msra.mxu0 %v3079_v62  ;;  %v1490_v54 = vld [vmem:[#allocation2 + $0x267] sm:$0xff]  ;;  %v1501_v2 = vld [vmem:[#allocation2 + $0x30f] sm:$0xff] }
 0x235   :  { %1703 = vmatprep.mubr.f32.mxu1 %v1475_v1  ;;  %2099 = vmatmul.mubr.f32.gmra.mxu0 %v1475_v1  ;;  %v1426_v1 = vld [vmem:[#allocation2 + $0x249] sm:$0xff] }
 0x236   :  { %2103 = vmatprep.mubr.f32.mxu0 %v6820_v43  ;;  %2517 = vmatpush2.msra.mxu1 %v2483_v57  ;;  %v1478_v43 = vld [vmem:[#allocation2 + $0x167] sm:$0xff]  ;;  %v1333_v57 = vld [vmem:[#allocation2 + $0x270] sm:$0xff] }
 0x237   :  { %2518 = vmatprep.subr.mxu1 %v6958_v21  ;;  %3156 = vmatprep.subr.mxu0 %v6958_v21  ;;  %v1345_v62 = vld [vmem:[#allocation2 + $0x330] sm:$0xff] }
 0x238   :  { %1704 = vmatmul.mubr.f32.gmra.mxu1 %v1411_v37  ;;  %3157 = vmatpush2.msra.mxu0 %v3078_v12  ;;  %v1491_v37 = vld [vmem:[#allocation2 + $0x26f] sm:$0xff]  ;;  %v1506_v12 = vld [vmem:[#allocation2 + $0x367] sm:$0xff] }
 0x239   :  { %1708 = vmatprep.mubr.f32.mxu1 %v1476_v58  ;;  %2104 = vmatmul.mubr.f32.gmra.mxu0 %v1476_v58  ;;  %v1492_v58 = vld [vmem:[#allocation2 + $0x287] sm:$0xff] }
 0x23a   :  { %2108 = vmatprep.mubr.f32.mxu0 %v6828_v45  ;;  %2519 = vmatpush2.msra.mxu1 %v2482_v9  ;;  %v1479_v45 = vld [vmem:[#allocation2 + $0x16f] sm:$0xff] }
 0x23b   :  { %2520 = vmatprep.subr.mxu1 %v6958_v21  ;;  %5061 = vmatprep.subr.mxu0 %v7035_v50  ;;  %v1428_v9 = vld [vmem:[#allocation2 + $0x269] sm:$0xff] }
 0x23c   :  { %1709 = vmatmul.mubr.f32.gmra.mxu1 %v1412_v22  ;;  %v1334_v22 = vld [vmem:[#allocation2 + $0x288] sm:$0xff] }
 0x23d   :  { %1713 = vmatprep.mubr.f32.mxu1 %v1477_v46  ;;  %2109 = vmatmul.mubr.f32.gmra.mxu0 %v1477_v46  ;;  %v1429_v46 = vld [vmem:[#allocation2 + $0x271] sm:$0xff] }
 0x23e   :  { %2113 = vmatprep.mubr.f32.mxu0 %v6832_v56  ;;  %2521 = vmatpush2.msra.mxu1 %v2481_v10  ;;  %v1480_v56 = vld [vmem:[#allocation2 + $0x187] sm:$0xff] }
 0x23f   :  { %2522 = vmatprep.subr.mxu1 %v6958_v21  ;;  %v1430_v10 = vld [vmem:[#allocation2 + $0x289] sm:$0xff] }
 0x240   :  { %1714 = vmatmul.mubr.f32.gmra.mxu1 %v1413_v19  ;;  %v1336_v19 = vld [vmem:[#allocation2 + $0x2a8] sm:$0xff] }
 0x241   :  { %1718 = vmatprep.mubr.f32.mxu1 %v1478_v43  ;;  %2114 = vmatmul.mubr.f32.gmra.mxu0 %v1478_v43  ;;  %v1495_v43 = vld [vmem:[#allocation2 + $0x2af] sm:$0xff] }
 0x242   :  { %2118 = vmatprep.mubr.f32.mxu0 %v6836_v3  ;;  %2523 = vmatpush2.msra.mxu1 %v2480_v25  ;;  %v1481_v3 = vld [vmem:[#allocation2 + $0x18f] sm:$0xff] }
 0x243   :  { %2524 = vmatprep.subr.mxu1 %v6958_v21  ;;  %v1431_v25 = vld [vmem:[#allocation2 + $0x291] sm:$0xff] }
 0x244   :  { %1719 = vmatmul.mubr.f32.gmra.mxu1 %v1414_v44  ;;  %v1337_v44 = vld [vmem:[#allocation2 + $0x2b0] sm:$0xff] }
 0x245   :  { %1723 = vmatprep.mubr.f32.mxu1 %v1479_v45  ;;  %2119 = vmatmul.mubr.f32.gmra.mxu0 %v1479_v45  ;;  %v1496_v45 = vld [vmem:[#allocation2 + $0x2c7] sm:$0xff] }
 0x246   :  { %2123 = vmatprep.mubr.f32.mxu0 %v6840_v14  ;;  %2525 = vmatpush2.msra.mxu1 %v2479_v6  ;;  %v1482_v14 = vld [vmem:[#allocation2 + $0x1a7] sm:$0xff]  ;;  %v1497_v6 = vld [vmem:[#allocation2 + $0x2cf] sm:$0xff] }
 0x247   :  { %2526 = vmatprep.subr.mxu1 %v6958_v21 }
 0x248   :  { %1724 = vmatmul.mubr.f32.gmra.mxu1 %v1415_v32  ;;  %v1432_v32 = vld [vmem:[#allocation2 + $0x2a9] sm:$0xff] }
 0x249   :  { %1728 = vmatprep.mubr.f32.mxu1 %v1480_v56  ;;  %2124 = vmatmul.mubr.f32.gmra.mxu0 %v1480_v56  ;;  %v1339_v56 = vld [vmem:[#allocation2 + $0x2d0] sm:$0xff] }
 0x24a   :  { %2128 = vmatprep.mubr.f32.mxu0 %v6848_v29  ;;  %2527 = vmatpush2.msra.mxu1 %v2478_v11  ;;  %v1483_v29 = vld [vmem:[#allocation2 + $0x1af] sm:$0xff]  ;;  %v1498_v11 = vld [vmem:[#allocation2 + $0x2e7] sm:$0xff] }
 0x24b   :  { %2528 = vmatprep.subr.mxu1 %v6958_v21 }
 0x24c   :  { %1729 = vmatmul.mubr.f32.gmra.mxu1 %v1416_v49  ;;  %v1433_v49 = vld [vmem:[#allocation2 + $0x2b1] sm:$0xff] }
 0x24d   :  { %1733 = vmatprep.mubr.f32.mxu1 %v1481_v3  ;;  %2129 = vmatmul.mubr.f32.gmra.mxu0 %v1481_v3  ;;  %v1340_v3 = vld [vmem:[#allocation2 + $0x2e8] sm:$0xff] }
 0x24e   :  { %2133 = vmatprep.mubr.f32.mxu0 %v6852_v38  ;;  %2529 = vmatpush2.msra.mxu1 %v2477_v7  ;;  %v1484_v38 = vld [vmem:[#allocation2 + $0x1c7] sm:$0xff]  ;;  %v1341_v7 = vld [vmem:[#allocation2 + $0x2f0] sm:$0xff] }
 0x24f   :  { %2530 = vmatprep.subr.mxu1 %v6958_v21 }
 0x250   :  { %1734 = vmatmul.mubr.f32.gmra.mxu1 %v1417_v40  ;;  %v1499_v40 = vld [vmem:[#allocation2 + $0x2ef] sm:$0xff] }
 0x251   :  { %1738 = vmatprep.mubr.f32.mxu1 %v1482_v14  ;;  %2134 = vmatmul.mubr.f32.gmra.mxu0 %v1482_v14  ;;  %v1435_v14 = vld [vmem:[#allocation2 + $0x2d1] sm:$0xff] }
 0x252   :  { %2138 = vmatprep.mubr.f32.mxu0 %v6856_v4  ;;  %2531 = vmatpush2.msra.mxu1 %v2476_v5  ;;  %v1485_v4 = vld [vmem:[#allocation2 + $0x1cf] sm:$0xff] }
 0x253   :  { %2532 = vmatprep.subr.mxu1 %v6958_v21  ;;  %v1342_v5 = vld [vmem:[#allocation2 + $0x308] sm:$0xff] }
 0x254   :  { %1739 = vmatmul.mubr.f32.gmra.mxu1 %v1418_v47  ;;  %v1500_v47 = vld [vmem:[#allocation2 + $0x307] sm:$0xff] }
 0x255   :  { %1743 = vmatprep.mubr.f32.mxu1 %v1483_v29  ;;  %2139 = vmatmul.mubr.f32.gmra.mxu0 %v1483_v29  ;;  %v1436_v29 = vld [vmem:[#allocation2 + $0x2e9] sm:$0xff] }
 0x256   :  { %2143 = vmatprep.mubr.f32.mxu0 %v6860_v63  ;;  %2533 = vmatpush2.msra.mxu1 %v2475_v42  ;;  %v1486_v63 = vld [vmem:[#allocation2 + $0x1e7] sm:$0xff]  ;;  %v1437_v42 = vld [vmem:[#allocation2 + $0x2f1] sm:$0xff] }
 0x257   :  { %2534 = vmatprep.subr.mxu1 %v6958_v21 }
 0x258   :  { %1744 = vmatmul.mubr.f32.gmra.mxu1 %v1419_v0  ;;  %v1343_v0 = vld [vmem:[#allocation2 + $0x310] sm:$0xff] }
 0x259   :  { %1748 = vmatprep.mubr.f32.mxu1 %v1484_v38  ;;  %2144 = vmatmul.mubr.f32.gmra.mxu0 %v1484_v38  ;;  %v1502_v38 = vld [vmem:[#allocation2 + $0x327] sm:$0xff] }
 0x25a   :  { %2148 = vmatprep.mubr.f32.mxu0 %v6869_v15  ;;  %2535 = vmatpush2.msra.mxu1 %v2474_v20  ;;  %v1487_v15 = vld [vmem:[#allocation2 + $0x1ef] sm:$0xff] }
 0x25b   :  { %2536 = vmatprep.subr.mxu1 %v6958_v21  ;;  %v1438_v20 = vld [vmem:[#allocation2 + $0x309] sm:$0xff] }
 0x25c   :  { %1749 = vmatmul.mubr.f32.gmra.mxu1 %v1420_v53  ;;  %v1344_v53 = vld [vmem:[#allocation2 + $0x328] sm:$0xff] }
 0x25d   :  { %1753 = vmatprep.mubr.f32.mxu1 %v1485_v4  ;;  %2149 = vmatmul.mubr.f32.gmra.mxu0 %v1485_v4  ;;  %v1503_v4 = vld [vmem:[#allocation2 + $0x32f] sm:$0xff] }
 0x25e   :  { %2153 = vmatprep.mubr.f32.mxu0 %v9159_v30  ;;  %2537 = vmatpush2.msra.mxu1 %v2473_v59  ;;  %v1504_v59 = vld [vmem:[#allocation2 + $0x347] sm:$0xff] }
 0x25f   :  { %2538 = vmatprep.subr.mxu1 %v6958_v21  ;;  %v1440_v30 = vld [vmem:[#allocation2 + $0x329] sm:$0xff] }
 0x260   :  { %1754 = vmatmul.mubr.f32.gmra.mxu1 %v1421_v17  ;;  %v1439_v17 = vld [vmem:[#allocation2 + $0x311] sm:$0xff] }
 0x261   :  { %1758 = vmatprep.mubr.f32.mxu1 %v1486_v63  ;;  %2154 = vmatmul.mubr.f32.gmra.mxu0 %v1486_v63  ;;  %v1346_v63 = vld [vmem:[#allocation2 + $0x348] sm:$0xff] }
 0x262   :  { %2158 = vmatprep.mubr.f32.mxu0 %v9160_v39  ;;  %2539 = vmatpush2.msra.mxu1 %v2472_v18  ;;  %v1347_v18 = vld [vmem:[#allocation2 + $0x350] sm:$0xff]  ;;  %v1348_v39 = vld [vmem:[#allocation2 + $0x368] sm:$0xff] }
 0x263   :  { %2540 = vmatprep.subr.mxu1 %v6958_v21 }
 0x264   :  { %1759 = vmatmul.mubr.f32.gmra.mxu1 %v1422_v36  ;;  %v1505_v36 = vld [vmem:[#allocation2 + $0x34f] sm:$0xff] }
 0x265   :  { %1763 = vmatprep.mubr.f32.mxu1 %v1487_v15  ;;  %2159 = vmatmul.mubr.f32.gmra.mxu0 %v1487_v15  ;;  %v1441_v15 = vld [vmem:[#allocation2 + $0x331] sm:$0xff] }
 0x266   :  { %2163 = vmatprep.mubr.f32.mxu0 %v6958_v21  ;;  %2541 = vmatpush2.msra.mxu1 %v2471_v33 }
 0x267   :  { %2542 = vmatprep.subr.mxu1 %v6958_v21 }
 0x268   :  { %1764 = vmatmul.mubr.f32.gmra.mxu1 %v1423_v52  ;;  %v1442_v52 = vld [vmem:[#allocation2 + $0x349] sm:$0xff] }
 0x269   :  { %1768 = vmatprep.mubr.f32.mxu1 %v1488_v55  ;;  %2164 = vmatmul.mubr.f32.gmra.mxu0 %v1266_v60  ;;  %v1507_v55 = vld [vmem:[#allocation2 + $0x36f] sm:$0xff] }
 0x26a   :  { %2168 = vmatprep.mubr.f32.mxu0 %v6958_v21  ;;  %2543 = vmatpush2.msra.mxu1 %v2470_v51 }
 0x26b   :  { %2544 = vmatprep.subr.mxu1 %v6958_v21 }
 0x26c   :  { %1769 = vmatmul.mubr.f32.gmra.mxu1 %v1424_v34  ;;  %v1349_v34 = vld [vmem:[#allocation2 + $0x370] sm:$0xff] }
 0x26d   :  { %1773 = vmatprep.mubr.f32.mxu1 %v1489_v27  ;;  %2169 = vmatmul.mubr.f32.gmra.mxu0 %v1267_v24  ;;  %v1443_v24 = vld [vmem:[#allocation2 + $0x351] sm:$0xff] }
 0x26e   :  { %2173 = vmatprep.mubr.f32.mxu0 %v1332_v35  ;;  %2545 = vmatpush2.msra.mxu1 %v2469_v16  ;;  %v1508_v16 = vld [vmem:[#allocation2 + $0x387] sm:$0xff] }
 0x26f   :  { %2546 = vmatprep.subr.mxu1 %v6958_v21  ;;  %v1493_v21 = vld [vmem:[#allocation2 + $0x28f] sm:$0xff] }
 0x270   :  { %1774 = vmatmul.mubr.f32.gmra.mxu1 %v1425_v31  ;;  %v1350_v35 = vld [vmem:[#allocation2 + $0x388] sm:$0xff] }
 0x271   :  { %1778 = vmatprep.mubr.f32.mxu1 %v1490_v54  ;;  %2174 = vmatmul.mubr.f32.gmra.mxu0 %v1490_v54 }
 0x272   :  { %2178 = vmatprep.mubr.f32.mxu0 %v1333_v57  ;;  %2547 = vmatpush2.msra.mxu1 %v2468_v26 }
 0x273   :  { %5189 = vmatprep.subr.mxu1 %v7035_v50 }
 0x274   :  { %1779 = vmatmul.mubr.f32.gmra.mxu1 %v1426_v1 }
 0x275   :  { %1783 = vmatprep.mubr.f32.mxu1 %v1491_v37  ;;  %2179 = vmatmul.mubr.f32.gmra.mxu0 %v1491_v37  ;;  %v1444_v37 = vld [vmem:[#allocation2 + $0x369] sm:$0xff] }
 0x276   :  { %2183 = vmatprep.mubr.f32.mxu0 %v1334_v22 }
 0x278   :  { %1784 = vmatmul.mubr.f32.gmra.mxu1 %v1427_v8  ;;  %v1509_v8 = vld [vmem:[#allocation2 + $0x38f] sm:$0xff] }
 0x279   :  { %1788 = vmatprep.mubr.f32.mxu1 %v1492_v58  ;;  %2184 = vmatmul.mubr.f32.gmra.mxu0 %v1492_v58 }
 0x27a   :  { %2188 = vmatprep.mubr.f32.mxu0 %v1335_v41 }
 0x27c   :  { %1789 = vmatmul.mubr.f32.gmra.mxu1 %v1428_v9  ;;  %v1351_v9 = vld [vmem:[#allocation2 + $0x390] sm:$0xff] }
 0x27d   :  { %1793 = vmatprep.mubr.f32.mxu1 %v1493_v21  ;;  %2189 = vmatmul.mubr.f32.gmra.mxu0 %v1493_v21 }
 0x27e   :  { %2193 = vmatprep.mubr.f32.mxu0 %v1336_v19  ;;  %v1510_v19 = vld [vmem:[#allocation2 + $0x3a7] sm:$0xff] }
 0x280   :  { %1794 = vmatmul.mubr.f32.gmra.mxu1 %v1429_v46  ;;  %v1445_v46 = vld [vmem:[#allocation2 + $0x371] sm:$0xff] }
 0x281   :  { %1798 = vmatprep.mubr.f32.mxu1 %v1494_v48  ;;  %2194 = vmatmul.mubr.f32.gmra.mxu0 %v1494_v48 }
 0x282   :  { %2198 = vmatprep.mubr.f32.mxu0 %v1337_v44  ;;  %v1352_v44 = vld [vmem:[#allocation2 + $0x3a8] sm:$0xff] }
 0x284   :  { %1799 = vmatmul.mubr.f32.gmra.mxu1 %v1430_v10 }
 0x285   :  { %1803 = vmatprep.mubr.f32.mxu1 %v1495_v43  ;;  %2199 = vmatmul.mubr.f32.gmra.mxu0 %v1495_v43 }
 0x286   :  { %2203 = vmatprep.mubr.f32.mxu0 %v1338_v61  ;;  %v1446_v61 = vld [vmem:[#allocation2 + $0x389] sm:$0xff] }
 0x288   :  { %1804 = vmatmul.mubr.f32.gmra.mxu1 %v1431_v25 }
 0x289   :  { %1808 = vmatprep.mubr.f32.mxu1 %v1496_v45  ;;  %2204 = vmatmul.mubr.f32.gmra.mxu0 %v1496_v45 }
 0x28a   :  { %2208 = vmatprep.mubr.f32.mxu0 %v1339_v56 }
 0x28c   :  { %1809 = vmatmul.mubr.f32.gmra.mxu1 %v1432_v32 }
 0x28d   :  { %1813 = vmatprep.mubr.f32.mxu1 %v1497_v6  ;;  %2209 = vmatmul.mubr.f32.gmra.mxu0 %v1497_v6  ;;  %v1511_v6 = vld [vmem:[#allocation2 + $0x3af] sm:$0xff] }
 0x28e   :  { %2213 = vmatprep.mubr.f32.mxu0 %v1340_v3 }
 0x290   :  { %1814 = vmatmul.mubr.f32.gmra.mxu1 %v1433_v49 }
 0x291   :  { %1818 = vmatprep.mubr.f32.mxu1 %v1498_v11  ;;  %2214 = vmatmul.mubr.f32.gmra.mxu0 %v1498_v11  ;;  %v1353_v11 = vld [vmem:[#allocation2 + $0x3b0] sm:$0xff] }
 0x292   :  { %2218 = vmatprep.mubr.f32.mxu0 %v1341_v7 }
 0x294   :  { %1819 = vmatmul.mubr.f32.gmra.mxu1 %v1434_v23 }
 0x295   :  { %1823 = vmatprep.mubr.f32.mxu1 %v1499_v40  ;;  %2219 = vmatmul.mubr.f32.gmra.mxu0 %v1499_v40  ;;  %v1447_v40 = vld [vmem:[#allocation2 + $0x391] sm:$0xff] }
 0x296   :  { %2223 = vmatprep.mubr.f32.mxu0 %v1342_v5 }
 0x298   :  { %1824 = vmatmul.mubr.f32.gmra.mxu1 %v1435_v14  ;;  %v1512_v14 = vld [vmem:[#allocation2 + $0x3c7] sm:$0xff] }
 0x299   :  { %1828 = vmatprep.mubr.f32.mxu1 %v1500_v47  ;;  %2224 = vmatmul.mubr.f32.gmra.mxu0 %v1500_v47 }
 0x29a   :  { %2228 = vmatprep.mubr.f32.mxu0 %v1343_v0 }
 0x29c   :  { %1829 = vmatmul.mubr.f32.gmra.mxu1 %v1436_v29  ;;  %v1354_v29 = vld [vmem:[#allocation2 + $0x3c8] sm:$0xff] }
 0x29d   :  { %1833 = vmatprep.mubr.f32.mxu1 %v1501_v2  ;;  %2229 = vmatmul.mubr.f32.gmra.mxu0 %v1501_v2 }
 0x29e   :  { %2233 = vmatprep.mubr.f32.mxu0 %v1344_v53  ;;  %v1513_v53 = vld [vmem:[#allocation2 + $0x3cf] sm:$0xff] }
 0x2a0   :  { %1834 = vmatmul.mubr.f32.gmra.mxu1 %v1437_v42  ;;  %v1448_v42 = vld [vmem:[#allocation2 + $0x3a9] sm:$0xff] }
 0x2a1   :  { %1838 = vmatprep.mubr.f32.mxu1 %v1502_v38  ;;  %2234 = vmatmul.mubr.f32.gmra.mxu0 %v1502_v38 }
 0x2a2   :  { %2238 = vmatprep.mubr.f32.mxu0 %v1345_v62  ;;  %v1355_v62 = vld [vmem:[#allocation2 + $0x3d0] sm:$0xff] }
 0x2a4   :  { %1839 = vmatmul.mubr.f32.gmra.mxu1 %v1438_v20 }
 0x2a5   :  { %1843 = vmatprep.mubr.f32.mxu1 %v1503_v4  ;;  %2239 = vmatmul.mubr.f32.gmra.mxu0 %v1503_v4 }
 0x2a6   :  { %2243 = vmatprep.mubr.f32.mxu0 %v1346_v63  ;;  %v1449_v63 = vld [vmem:[#allocation2 + $0x3b1] sm:$0xff] }
 0x2a8   :  { %1844 = vmatmul.mubr.f32.gmra.mxu1 %v1439_v17 }
 0x2a9   :  { %1848 = vmatprep.mubr.f32.mxu1 %v1504_v59  ;;  %2244 = vmatmul.mubr.f32.gmra.mxu0 %v1504_v59 }
 0x2aa   :  { %2248 = vmatprep.mubr.f32.mxu0 %v1347_v18 }
 0x2ac   :  { %1849 = vmatmul.mubr.f32.gmra.mxu1 %v1440_v30 }
 0x2ad   :  { %1853 = vmatprep.mubr.f32.mxu1 %v1505_v36  ;;  %2249 = vmatmul.mubr.f32.gmra.mxu0 %v1505_v36  ;;  %v1514_v36 = vld [vmem:[#allocation2 + $0x3e7] sm:$0xff] }
 0x2ae   :  { %2253 = vmatprep.mubr.f32.mxu0 %v1348_v39 }
 0x2af   :  { %v7042_v33 = vpop.f32.mrf.mxu1 }
 0x2b0   :  { %1854 = vmatmul.mubr.f32.gmra.mxu1 %v1441_v15  ;;  %v2015_v60 = vpop.f32.mrf.mxu0 }
 0x2b1   :  { %1858 = vmatprep.mubr.f32.mxu1 %v1506_v12  ;;  %2254 = vmatmul.mubr.f32.gmra.mxu0 %v1506_v12  ;;  %v1622_v51 = vpop.f32.mrf.mxu1  ;;  %v1356_v12 = vld [vmem:[#allocation2 + $0x3e8] sm:$0xff] }
 0x2b2   :  { %2258 = vmatprep.mubr.f32.mxu0 %v1349_v34  ;;  %v2017_v27 = vpop.f32.mrf.mxu0  ;;  %v1515_v34 = vld [vmem:[#allocation2 + $0x3ef] sm:$0xff] }
 0x2b4   :  { %1859 = vmatmul.mubr.f32.gmra.mxu1 %v1442_v52  ;;  %v2020_v54 = vpop.f32.mrf.mxu0 }
 0x2b5   :  { %1863 = vmatprep.mubr.f32.mxu1 %v1507_v55  ;;  %2259 = vmatmul.mubr.f32.gmra.mxu0 %v1507_v55  ;;  %v1450_v55 = vld [vmem:[#allocation2 + $0x3c9] sm:$0xff] }
 0x2b6   :  { %2263 = vmatprep.mubr.f32.mxu0 %v1350_v35  ;;  %v2022_v26 = vpop.f32.mrf.mxu0  ;;  %v1451_v35 = vld [vmem:[#allocation2 + $0x3d1] sm:$0xff] }
 0x2b7   :  { %v1516_v26 = vld [vmem:[#allocation2 + $0x407] sm:$0xff] }
 0x2b8   :  { %v7044_v31 = vpop.f32.mrf.mxu1  ;;  %1864 = vmatmul.mubr.f32.gmra.mxu1 %v1443_v24  ;;  %v2025_v22 = vpop.f32.mrf.mxu0  ;;  %v1357_v24 = vld [vmem:[#allocation2 + $0x3f0] sm:$0xff] }
 0x2b9   :  { %1868 = vmatprep.mubr.f32.mxu1 %v1508_v16  ;;  %2264 = vmatmul.mubr.f32.gmra.mxu0 %v1508_v16 }
 0x2ba   :  { %v1627_v1 = vpop.f32.mrf.mxu1  ;;  %2268 = vmatprep.mubr.f32.mxu0 %v1351_v9  ;;  %v2027_v41 = vpop.f32.mrf.mxu0 }
 0x2bc   :  { %v1630_v57 = vpop.f32.mrf.mxu1  ;;  %1869 = vmatmul.mubr.f32.gmra.mxu1 %v1444_v37  ;;  %v2030_v43 = vpop.f32.mrf.mxu0 }
 0x2bd   :  { %v7046_v58 = vadd.f32 %v2015_v60, %v1630_v57  ;;  %1873 = vmatprep.mubr.f32.mxu1 %v1509_v8  ;;  %2269 = vmatmul.mubr.f32.gmra.mxu0 %v1509_v8  ;;  %v1358_v8 = vld [vmem:[#allocation2 + $0x408] sm:$0xff] }
 0x2be   :  { %v1632_v21 = vpop.f32.mrf.mxu1  ;;  %2273 = vmatprep.mubr.f32.mxu0 %v1352_v44  ;;  %v2032_v45 = vpop.f32.mrf.mxu0 }
 0x2bf   :  { %v1452_v21 = vld [vmem:[#allocation2 + $0x3e9] sm:$0xff]  ;;  %v1453_v45 = vld [vmem:[#allocation2 + $0x3f1] sm:$0xff] }
 0x2c0   :  { %v1635_v48 = vpop.f32.mrf.mxu1  ;;  %1874 = vmatmul.mubr.f32.gmra.mxu1 %v1445_v46  ;;  %v1517_v46 = vld [vmem:[#allocation2 + $0x40f] sm:$0xff] }
 0x2c1   :  { %v7048_v10 = vadd.f32 %v2020_v54, %v1635_v48  ;;  %1878 = vmatprep.mubr.f32.mxu1 %v1510_v19  ;;  %v2035_v49 = vpop.f32.mrf.mxu0  ;;  %2274 = vmatmul.mubr.f32.gmra.mxu0 %v1510_v19 }
 0x2c2   :  { %v1637_v25 = vpop.f32.mrf.mxu1  ;;  %2278 = vmatprep.mubr.f32.mxu0 %v1353_v11  ;;  %v1360_v11 = vld [vmem:[#allocation2 + $0x428] sm:$0xff] }
 0x2c3   :  { %v2037_v23 = vpop.f32.mrf.mxu0 }
 0x2c4   :  { %v1640_v32 = vpop.f32.mrf.mxu1  ;;  %1879 = vmatmul.mubr.f32.gmra.mxu1 %v1446_v61 }
 0x2c5   :  { %v7050_v56 = vadd.f32 %v2025_v22, %v1640_v32  ;;  %1883 = vmatprep.mubr.f32.mxu1 %v1511_v6  ;;  %v2040_v5 = vpop.f32.mrf.mxu0  ;;  %2279 = vmatmul.mubr.f32.gmra.mxu0 %v1511_v6  ;;  %v1518_v32 = vld [vmem:[#allocation2 + $0x427] sm:$0xff] }
 0x2c6   :  { %v1642_v3 = vpop.f32.mrf.mxu1  ;;  %2283 = vmatprep.mubr.f32.mxu0 %v1354_v29 }
 0x2c7   :  { %v2042_v0 = vpop.f32.mrf.mxu0 }
 0x2c8   :  { %v1645_v7 = vpop.f32.mrf.mxu1  ;;  %1884 = vmatmul.mubr.f32.gmra.mxu1 %v1447_v40  ;;  %v1454_v40 = vld [vmem:[#allocation2 + $0x409] sm:$0xff] }
 0x2c9   :  { %v7052_v47 = vadd.f32 %v2030_v43, %v1645_v7  ;;  %1888 = vmatprep.mubr.f32.mxu1 %v1512_v14  ;;  %v2045_v4 = vpop.f32.mrf.mxu0  ;;  %2284 = vmatmul.mubr.f32.gmra.mxu0 %v1512_v14  ;;  %v1359_v43 = vld [vmem:[#allocation2 + $0x410] sm:$0xff] }
 0x2ca   :  { %v1647_v2 = vpop.f32.mrf.mxu1  ;;  %2288 = vmatprep.mubr.f32.mxu0 %v1355_v62  ;;  %v1519_v14 = vld [vmem:[#allocation2 + $0x42f] sm:$0xff] }
 0x2cb   :  { %v2047_v59 = vpop.f32.mrf.mxu0  ;;  %v1361_v2 = vld [vmem:[#allocation2 + $0x430] sm:$0xff] }
 0x2cc   :  { %v1650_v38 = vpop.f32.mrf.mxu1  ;;  %1889 = vmatmul.mubr.f32.gmra.mxu1 %v1448_v42  ;;  %v7070_v59 = vld [vmem:[#allocation2 + $0x48] sm:$0xff] }
 0x2cd   :  { %v7054_v20 = vadd.f32 %v2035_v49, %v1650_v38  ;;  %1893 = vmatprep.mubr.f32.mxu1 %v1513_v53  ;;  %v2050_v15 = vpop.f32.mrf.mxu0  ;;  %2289 = vmatmul.mubr.f32.gmra.mxu0 %v1513_v53  ;;  %v1455_v38 = vld [vmem:[#allocation2 + $0x411] sm:$0xff] }
 0x2ce   :  { %v1652_v17 = vpop.f32.mrf.mxu1  ;;  %2293 = vmatprep.mubr.f32.mxu0 %v1356_v12  ;;  %v2934_v12 = vld [vmem:[#allocation2 + $0x47] sm:$0xff] }
 0x2cf   :  { %v2052_v52 = vpop.f32.mrf.mxu0 }
 0x2d0   :  { %v1655_v30 = vpop.f32.mrf.mxu1  ;;  %1894 = vmatmul.mubr.f32.gmra.mxu1 %v1449_v63  ;;  %v3621_v52 = vld [vmem:[#allocation8 + $0x470] sm:$0xff] }
 0x2d1   :  { %v7056_v18 = vadd.f32 %v2040_v5, %v1655_v30  ;;  %1898 = vmatprep.mubr.f32.mxu1 %v1514_v36  ;;  %v2055_v27 = vpop.f32.mrf.mxu0  ;;  %2294 = vmatmul.mubr.f32.gmra.mxu0 %v1514_v36  ;;  %v1456_v36 = vld [vmem:[#allocation2 + $0x429] sm:$0xff] }
 0x2d2   :  { %v1657_v39 = vpop.f32.mrf.mxu1  ;;  %2298 = vmatprep.mubr.f32.mxu0 %v1357_v24 }
 0x2d3   :  { %v2057_v54 = vpop.f32.mrf.mxu0  ;;  %v1521_v39 = vld [vmem:[#allocation2 + $0x44f] sm:$0xff] }
 0x2d4   :  { %v1660_v60 = vpop.f32.mrf.mxu1  ;;  %1899 = vmatmul.mubr.f32.gmra.mxu1 %v1450_v55  ;;  %v7079_v54 = vld [vmem:[#allocation8 + $0x468] sm:$0xff] }
 0x2d5   :  { %v7058_v51 = vadd.f32 %v2045_v4, %v1660_v60  ;;  %1903 = vmatprep.mubr.f32.mxu1 %v1515_v34  ;;  %v2060_v57 = vpop.f32.mrf.mxu0  ;;  %2299 = vmatmul.mubr.f32.gmra.mxu0 %v1515_v34  ;;  %v1520_v4 = vld [vmem:[#allocation2 + $0x447] sm:$0xff]  ;;  %v7075_v34 = vld [vmem:[#allocation2 + $0x50] sm:$0xff] }
 0x2d6   :  { %v1662_v16 = vpop.f32.mrf.mxu1  ;;  %2303 = vmatprep.mubr.f32.mxu0 %v1358_v8 }
 0x2d7   :  { %v2062_v9 = vpop.f32.mrf.mxu0  ;;  %v1457_v16 = vld [vmem:[#allocation2 + $0x431] sm:$0xff] }
 0x2d8   :  { %v1665_v1 = vpop.f32.mrf.mxu1  ;;  %1904 = vmatmul.mubr.f32.gmra.mxu1 %v1451_v35  ;;  %v7085_v9 = vld [vmem:[#allocation8 + $0x460] sm:$0xff] }
 0x2d9   :  { %v7060_v37 = vadd.f32 %v2050_v15, %v1665_v1  ;;  %1908 = vmatprep.mubr.f32.mxu1 %v1516_v26  ;;  %v2065_v19 = vpop.f32.mrf.mxu0  ;;  %2304 = vmatmul.mubr.f32.gmra.mxu0 %v1516_v26  ;;  %v2935_v1 = vld [vmem:[#allocation2 + $0x4f] sm:$0xff] }
 0x2da   :  { %v1667_v22 = vpop.f32.mrf.mxu1  ;;  %2308 = vmatprep.mubr.f32.mxu0 %v1359_v43  ;;  %v2388_v26 = vld [vmem:[#allocation2 + $0x29] sm:$0xff] }
 0x2db   :  { %v2067_v25 = vpop.f32.mrf.mxu0  ;;  %v7083_v22 = vld [vmem:[#allocation2 + $0x68] sm:$0xff] }
 0x2dc   :  { %v1670_v41 = vpop.f32.mrf.mxu1  ;;  %1909 = vmatmul.mubr.f32.gmra.mxu1 %v1452_v21  ;;  %v2936_v43 = vld [vmem:[#allocation2 + $0x67] sm:$0xff] }
 0x2dd   :  { %v7062_v48 = vadd.f32 %v2055_v27, %v1670_v41  ;;  %1913 = vmatprep.mubr.f32.mxu1 %v1517_v46  ;;  %v2070_v49 = vpop.f32.mrf.mxu0  ;;  %2309 = vmatmul.mubr.f32.gmra.mxu0 %v1517_v46  ;;  %v2324_v46 = vld [vmem:[#allocation2 + $0x28] sm:$0xff] }
 0x2de   :  { %v1672_v44 = vpop.f32.mrf.mxu1  ;;  %2313 = vmatprep.mubr.f32.mxu0 %v1360_v11 }
 0x2df   :  { %v2072_v23 = vpop.f32.mrf.mxu0  ;;  %v2389_v44 = vld [vmem:[#allocation2 + $0x31] sm:$0xff] }
 0x2e0   :  { %v1675_v61 = vpop.f32.mrf.mxu1  ;;  %1914 = vmatmul.mubr.f32.gmra.mxu1 %v1453_v45 }
 0x2e1   :  { %v7064_v6 = vadd.f32 %v2060_v57, %v1675_v61  ;;  %1918 = vmatprep.mubr.f32.mxu1 %v1518_v32  ;;  %v2075_v29 = vpop.f32.mrf.mxu0  ;;  %2314 = vmatmul.mubr.f32.gmra.mxu0 %v1518_v32  ;;  %v7093_v61 = vld [vmem:[#allocation2 + $0x70] sm:$0xff]  ;;  %v7095_v32 = vld [vmem:[#allocation8 + $0x458] sm:$0xff] }
 0x2e2   :  { %v1677_v3 = vpop.f32.mrf.mxu1  ;;  %2318 = vmatprep.mubr.f32.mxu0 %v1361_v2  ;;  %v7103_v2 = vld [vmem:[#allocation2 + $0x88] sm:$0xff] }
 0x2e3   :  { %v2077_v42 = vpop.f32.mrf.mxu0  ;;  %v2325_v3 = vld [vmem:[#allocation2 + $0x30] sm:$0xff] }
 0x2e4   :  { %v1680_v7 = vpop.f32.mrf.mxu1  ;;  %1919 = vmatmul.mubr.f32.gmra.mxu1 %v1454_v40  ;;  %v2937_v40 = vld [vmem:[#allocation2 + $0x6f] sm:$0xff] }
 0x2e5   :  { %v7066_v5 = vadd.f32 %v2065_v19, %v1680_v7  ;;  %1923 = vmatprep.mubr.f32.mxu1 %v1519_v14  ;;  %v2080_v17 = vpop.f32.mrf.mxu0  ;;  %2319 = vmatmul.mubr.f32.gmra.mxu0 %v1519_v14  ;;  %v2390_v7 = vld [vmem:[#allocation2 + $0x49] sm:$0xff] }
 0x2e6   :  { %v1682_v0 = vpop.f32.mrf.mxu1  ;;  %3158 = vmatprep.mubr.f32.mxu0 %v7070_v59 }
 0x2e7   :  { %v2082_v30 = vpop.f32.mrf.mxu0  ;;  %v7105_v0 = vld [vmem:[#allocation8 + $0x450] sm:$0xff] }
 0x2e8   :  { %v1685_v53 = vpop.f32.mrf.mxu1  ;;  %1924 = vmatmul.mubr.f32.gmra.mxu1 %v1455_v38  ;;  %v7114_v30 = vld [vmem:[#allocation2 + $0x90] sm:$0xff] }
 0x2e9   :  { %v7068_v62 = vadd.f32 %v2070_v49, %v1685_v53  ;;  %1928 = vmatprep.mubr.f32.mxu1 %v1520_v4  ;;  %v2085_v60 = vpop.f32.mrf.mxu0  ;;  %3159 = vmatmul.mubr.f32.vlgmr.msra.gmra.mxu0 %v2934_v12  ;;  %v2938_v53 = vld [vmem:[#allocation2 + $0x87] sm:$0xff]  ;;  %v2391_v4 = vld [vmem:[#allocation2 + $0x51] sm:$0xff] }
 0x2ea   :  { %v1687_v63 = vpop.f32.mrf.mxu1  ;;  %5062 = vmatpush3.msra.mxu0 %v7035_v50  ;;  %3163 = vmatprep.mubr.f32.mxu0 %v7075_v34 }
 0x2eb   :  { %v2087_v24 = vpop.f32.mrf.mxu0  ;;  %5063 = vmatprep.subr.mxu0 %v3621_v52 }
 0x2ec   :  { %v1690_v15 = vpop.f32.mrf.mxu1  ;;  %1929 = vmatmul.mubr.f32.gmra.mxu1 %v1456_v36  ;;  %5064 = vmatpush3.msra.mxu0 %v3621_v52  ;;  %v7116_v36 = vld [vmem:[#allocation8 + $0x448] sm:$0xff] }
 0x2ed   :  { %v7073_v55 = vadd.f32 %v2075_v29, %v1690_v15  ;;  %1933 = vmatprep.mubr.f32.mxu1 %v1521_v39  ;;  %v2090_v8 = vpop.f32.mrf.mxu0  ;;  %3164 = vmatmul.mubr.f32.gmra.mxu0 %v2935_v1  ;;  %v2939_v39 = vld [vmem:[#allocation2 + $0x8f] sm:$0xff]  ;;  %v2940_v1 = vld [vmem:[#allocation2 + $0xa7] sm:$0xff] }
 0x2ee   :  { %v1692_v27 = vpop.f32.mrf.mxu1  ;;  %3168 = vmatprep.mubr.f32.mxu0 %v7083_v22  ;;  %5065 = vmatprep.subr.mxu0 %v7079_v54  ;;  %v7126_v24 = vld [vmem:[#allocation2 + $0xa8] sm:$0xff] }
 0x2ef   :  { %v2092_v41 = vpop.f32.mrf.mxu0  ;;  %5066 = vmatpush3.msra.mxu0 %v7079_v54 }
 0x2f0   :  { %v1695_v35 = vpop.f32.mrf.mxu1  ;;  %1934 = vmatmul.mubr.f32.gmra.mxu1 %v1457_v16  ;;  %5067 = vmatprep.subr.mxu0 %v7085_v9  ;;  %v7128_v16 = vld [vmem:[#allocation8 + $0x440] sm:$0xff]  ;;  %v7138_v41 = vld [vmem:[#allocation2 + $0xb0] sm:$0xff] }
 0x2f1   :  { %v7081_v57 = vadd.f32 %v2080_v17, %v1695_v35  ;;  %2548 = vmatprep.mubr.f32.mxu1 %v2388_v26  ;;  %v2095_v45 = vpop.f32.mrf.mxu0  ;;  %3169 = vmatmul.mubr.f32.gmra.mxu0 %v2936_v43  ;;  %v2393_v26 = vld [vmem:[#allocation2 + $0x71] sm:$0xff] }
 0x2f2   :  { %v1697_v21 = vpop.f32.mrf.mxu1  ;;  %3173 = vmatprep.mubr.f32.mxu0 %v7093_v61  ;;  %5068 = vmatpush3.msra.mxu0 %v7085_v9  ;;  %v2941_v43 = vld [vmem:[#allocation2 + $0xaf] sm:$0xff] }
 0x2f3   :  { %v2097_v11 = vpop.f32.mrf.mxu0  ;;  %5069 = vmatprep.subr.mxu0 %v7095_v32 }
 0x2f4   :  { %v1700_v19 = vpop.f32.mrf.mxu1  ;;  %2549 = vmatmul.mubr.f32.vlgmr.msra.gmra.mxu1 %v2324_v46  ;;  %5070 = vmatpush3.msra.mxu0 %v7095_v32  ;;  %v7150_v11 = vld [vmem:[#allocation2 + $0xc8] sm:$0xff] }
 0x2f5   :  { %v7091_v25 = vadd.f32 %v2085_v60, %v1700_v19  ;;  %2553 = vmatprep.mubr.f32.mxu1 %v2389_v44  ;;  %5205 = vmatpush3.msra.mxu1 %v7035_v50  ;;  %v2100_v29 = vpop.f32.mrf.mxu0  ;;  %v2394_v44 = vld [vmem:[#allocation2 + $0x89] sm:$0xff] }
 0x2f6   :  { %v1702_v49 = vpop.f32.mrf.mxu1  ;;  %5190 = vmatprep.subr.mxu1 %v3621_v52  ;;  %3174 = vmatmul.mubr.f32.gmra.mxu0 %v2937_v40  ;;  %v2942_v40 = vld [vmem:[#allocation2 + $0xc7] sm:$0xff] }
 0x2f7   :  { %3178 = vmatprep.mubr.f32.mxu0 %v7103_v2  ;;  %5206 = vmatpush3.msra.mxu1 %v3621_v52  ;;  %v2102_v42 = vpop.f32.mrf.mxu0  ;;  %v2392_v52 = vld [vmem:[#allocation2 + $0x69] sm:$0xff] }
 0x2f8   :  { %v1705_v23 = vpop.f32.mrf.mxu1  ;;  %2554 = vmatmul.mubr.f32.gmra.mxu1 %v2325_v3  ;;  %5191 = vmatprep.subr.mxu1 %v7079_v54  ;;  %v7162_v42 = vld [vmem:[#allocation2 + $0xd0] sm:$0xff] }
 0x2f9   :  { %v7101_v14 = vadd.f32 %v2090_v8, %v1705_v23  ;;  %2558 = vmatprep.mubr.f32.mxu1 %v2390_v7  ;;  %5071 = vmatprep.subr.mxu0 %v7105_v0  ;;  %v2105_v63 = vpop.f32.mrf.mxu0  ;;  %v2395_v7 = vld [vmem:[#allocation2 + $0x91] sm:$0xff] }
 0x2fa   :  { %v1707_v50 = vpop.f32.mrf.mxu1  ;;  %3179 = vmatmul.mubr.f32.gmra.mxu0 %v2938_v53  ;;  %5207 = vmatpush3.msra.mxu1 %v7079_v54 }
 0x2fb   :  { %3183 = vmatprep.mubr.f32.mxu0 %v7114_v30  ;;  %v2107_v12 = vpop.f32.mrf.mxu0  ;;  %5192 = vmatprep.subr.mxu1 %v7085_v9 }
 0x2fc   :  { %v1710_v38 = vpop.f32.mrf.mxu1  ;;  %2559 = vmatmul.mubr.f32.gmra.mxu1 %v7070_v59  ;;  %5072 = vmatpush3.msra.mxu0 %v7105_v0 }
 0x2fd   :  { %v7112_v17 = vadd.f32 %v2095_v45, %v1710_v38  ;;  %2563 = vmatprep.mubr.f32.mxu1 %v2391_v4  ;;  %5073 = vmatprep.subr.mxu0 %v7116_v36  ;;  %v2110_v27 = vpop.f32.mrf.mxu0  ;;  %v2943_v4 = vld [vmem:[#allocation2 + $0xcf] sm:$0xff] }
 0x2fe   :  { %v1712_v15 = vpop.f32.mrf.mxu1  ;;  %3184 = vmatmul.mubr.f32.gmra.mxu0 %v2939_v39  ;;  %5208 = vmatpush3.msra.mxu1 %v7085_v9  ;;  %v7140_v9 = vld [vmem:[#allocation8 + $0x438] sm:$0xff] }
 0x2ff   :  { %3188 = vmatprep.mubr.f32.mxu0 %v7126_v24  ;;  %v2112_v35 = vpop.f32.mrf.mxu0  ;;  %5193 = vmatprep.subr.mxu1 %v7095_v32 }
 0x300   :  { %v1715_v59 = vpop.f32.mrf.mxu1  ;;  %2564 = vmatmul.mubr.f32.gmra.mxu1 %v7075_v34  ;;  %5074 = vmatpush3.msra.mxu0 %v7116_v36 }
 0x301   :  { %v7124_v60 = vadd.f32 %v2100_v29, %v1715_v59  ;;  %2568 = vmatprep.mubr.f32.mxu1 %v2392_v52  ;;  %5075 = vmatprep.subr.mxu0 %v7128_v16  ;;  %v2115_v21 = vpop.f32.mrf.mxu0  ;;  %v7174_v59 = vld [vmem:[#allocation2 + $0xe8] sm:$0xff] }
 0x302   :  { %v1717_v54 = vpop.f32.mrf.mxu1  ;;  %3189 = vmatmul.mubr.f32.gmra.mxu0 %v2940_v1  ;;  %5209 = vmatpush3.msra.mxu1 %v7095_v32  ;;  %v7152_v32 = vld [vmem:[#allocation8 + $0x430] sm:$0xff]  ;;  %v2944_v52 = vld [vmem:[#allocation2 + $0xe7] sm:$0xff] }
 0x303   :  { %3193 = vmatprep.mubr.f32.mxu0 %v7138_v41  ;;  %v2117_v19 = vpop.f32.mrf.mxu0  ;;  %5194 = vmatprep.subr.mxu1 %v7105_v0 }
 0x304   :  { %v1720_v34 = vpop.f32.mrf.mxu1  ;;  %2569 = vmatmul.mubr.f32.gmra.mxu1 %v7083_v22  ;;  %5076 = vmatpush3.msra.mxu0 %v7128_v16 }
 0x305   :  { %v7136_v8 = vadd.f32 %v2105_v63, %v1720_v34  ;;  %2573 = vmatprep.mubr.f32.mxu1 %v2393_v26  ;;  %5077 = vmatprep.subr.mxu0 %v7140_v9  ;;  %v2120_v49 = vpop.f32.mrf.mxu0  ;;  %v2396_v63 = vld [vmem:[#allocation2 + $0xa9] sm:$0xff] }
 0x306   :  { %v1722_v46 = vpop.f32.mrf.mxu1  ;;  %3194 = vmatmul.mubr.f32.gmra.mxu0 %v2941_v43  ;;  %5210 = vmatpush3.msra.mxu1 %v7105_v0  ;;  %v7164_v0 = vld [vmem:[#allocation8 + $0x428] sm:$0xff]  ;;  %v3009_v34 = vld [vmem:[#allocation2 + $0xf0] sm:$0xff] }
 0x307   :  { %3198 = vmatprep.mubr.f32.mxu0 %v7150_v11  ;;  %v2122_v23 = vpop.f32.mrf.mxu0  ;;  %5195 = vmatprep.subr.mxu1 %v7116_v36 }
 0x308   :  { %v1725_v22 = vpop.f32.mrf.mxu1  ;;  %2574 = vmatmul.mubr.f32.gmra.mxu1 %v7093_v61  ;;  %5078 = vmatpush3.msra.mxu0 %v7140_v9 }
 0x309   :  { %v7148_v45 = vadd.f32 %v2110_v27, %v1725_v22  ;;  %2578 = vmatprep.mubr.f32.mxu1 %v2394_v44  ;;  %5079 = vmatprep.subr.mxu0 %v7152_v32  ;;  %v2125_v50 = vpop.f32.mrf.mxu0  ;;  %v2397_v27 = vld [vmem:[#allocation2 + $0xb1] sm:$0xff]  ;;  %v3010_v22 = vld [vmem:[#allocation2 + $0x108] sm:$0xff] }
 0x30a   :  { %v1727_v3 = vpop.f32.mrf.mxu1  ;;  %3199 = vmatmul.mubr.f32.gmra.mxu0 %v2942_v40  ;;  %5211 = vmatpush3.msra.mxu1 %v7116_v36  ;;  %v3011_v40 = vld [vmem:[#allocation2 + $0x110] sm:$0xff] }
 0x30b   :  { %3203 = vmatprep.mubr.f32.mxu0 %v7162_v42  ;;  %v2127_v53 = vpop.f32.mrf.mxu0  ;;  %5196 = vmatprep.subr.mxu1 %v7128_v16  ;;  %v2399_v3 = vld [vmem:[#allocation2 + $0xd1] sm:$0xff] }
 0x30c   :  { %v1730_v61 = vpop.f32.mrf.mxu1  ;;  %2579 = vmatmul.mubr.f32.gmra.mxu1 %v7103_v2  ;;  %5080 = vmatpush3.msra.mxu0 %v7152_v32 }
 0x30d   :  { %v7160_v29 = vadd.f32 %v2115_v21, %v1730_v61  ;;  %2583 = vmatprep.mubr.f32.mxu1 %v2395_v7  ;;  %5081 = vmatprep.subr.mxu0 %v7164_v0  ;;  %v2130_v12 = vpop.f32.mrf.mxu0  ;;  %v2945_v21 = vld [vmem:[#allocation2 + $0xef] sm:$0xff] }
 0x30e   :  { %v1732_v38 = vpop.f32.mrf.mxu1  ;;  %3204 = vmatmul.mubr.f32.gmra.mxu0 %v2943_v4  ;;  %5212 = vmatpush3.msra.mxu1 %v7128_v16  ;;  %v3012_v4 = vld [vmem:[#allocation2 + $0x128] sm:$0xff] }
 0x30f   :  { %3208 = vmatprep.mubr.f32.mxu0 %v7174_v59  ;;  %v2132_v39 = vpop.f32.mrf.mxu0  ;;  %5197 = vmatprep.subr.mxu1 %v7140_v9  ;;  %v2400_v38 = vld [vmem:[#allocation2 + $0xe9] sm:$0xff] }
 0x310   :  { %v1735_v2 = vpop.f32.mrf.mxu1  ;;  %2584 = vmatmul.mubr.f32.gmra.mxu1 %v7114_v30  ;;  %5082 = vmatpush3.msra.mxu0 %v7164_v0  ;;  %v2401_v39 = vld [vmem:[#allocation2 + $0xf1] sm:$0xff] }
 0x311   :  { %v7172_v15 = vadd.f32 %v2120_v49, %v1735_v2  ;;  %2588 = vmatprep.mubr.f32.mxu1 %v2396_v63  ;;  %v2135_v35 = vpop.f32.mrf.mxu0  ;;  %5213 = vmatpush3.msra.mxu1 %v7140_v9  ;;  %v3611_v9 = vld [vmem:[#allocation8 + $0x420] sm:$0xff] }
 0x312   :  { %v1737_v36 = vpop.f32.mrf.mxu1  ;;  %3209 = vmatmul.mubr.f32.gmra.mxu0 %v2944_v52  ;;  %5198 = vmatprep.subr.mxu1 %v7152_v32  ;;  %v3013_v52 = vld [vmem:[#allocation2 + $0x130] sm:$0xff] }
 0x313   :  { %3213 = vmatprep.mubr.f32.mxu0 %v3009_v34  ;;  %v2137_v16 = vpop.f32.mrf.mxu0  ;;  %5214 = vmatpush3.msra.mxu1 %v7152_v32 }
 0x314   :  { %v1740_v30 = vpop.f32.mrf.mxu1  ;;  %2589 = vmatmul.mubr.f32.gmra.mxu1 %v7126_v24  ;;  %v2398_v24 = vld [vmem:[#allocation2 + $0xc9] sm:$0xff]  ;;  %5199 = vmatprep.subr.mxu1 %v7164_v0 }
 0x315   :  { %v7181_v54 = vadd.f32 %v2125_v50, %v1740_v30  ;;  %2593 = vmatprep.mubr.f32.mxu1 %v2397_v27  ;;  %v2140_v19 = vpop.f32.mrf.mxu0  ;;  %5083 = vmatprep.subr.mxu0 %v3611_v9  ;;  %v2949_v16 = vld [vmem:[#allocation2 + $0x12f] sm:$0xff] }
 0x316   :  { %v1742_v1 = vpop.f32.mrf.mxu1  ;;  %3214 = vmatmul.mubr.f32.gmra.mxu0 %v2945_v21  ;;  %5215 = vmatpush3.msra.mxu1 %v7164_v0  ;;  %v2948_v0 = vld [vmem:[#allocation2 + $0x127] sm:$0xff] }
 0x317   :  { %3218 = vmatprep.mubr.f32.mxu0 %v3010_v22  ;;  %v2142_v44 = vpop.f32.mrf.mxu0  ;;  %5084 = vmatpush3.msra.mxu0 %v3611_v9 }
 0x318   :  { %v1745_v26 = vpop.f32.mrf.mxu1  ;;  %2594 = vmatmul.mubr.f32.gmra.mxu1 %v7138_v41  ;;  %v2946_v41 = vld [vmem:[#allocation2 + $0x107] sm:$0xff]  ;;  %5200 = vmatprep.subr.mxu1 %v3611_v9  ;;  %v3610_v44 = vld [vmem:[#allocation8 + $0x418] sm:$0xff] }
 0x319   :  { %v7186_v46 = vadd.f32 %v2130_v12, %v1745_v26  ;;  %2598 = vmatprep.mubr.f32.mxu1 %v2398_v24  ;;  %v2145_v61 = vpop.f32.mrf.mxu0  ;;  %5216 = vmatpush3.msra.mxu1 %v3611_v9  ;;  %v2402_v26 = vld [vmem:[#allocation2 + $0x109] sm:$0xff] }
 0x31a   :  { %v1747_v43 = vpop.f32.mrf.mxu1  ;;  %3219 = vmatmul.mubr.f32.gmra.mxu0 %v2946_v41  ;;  %v2403_v41 = vld [vmem:[#allocation2 + $0x111] sm:$0xff]  ;;  %5085 = vmatprep.subr.mxu0 %v3610_v44 }
 0x31b   :  { %3223 = vmatprep.mubr.f32.mxu0 %v3011_v40  ;;  %v2147_v32 = vpop.f32.mrf.mxu0  ;;  %5086 = vmatpush3.msra.mxu0 %v3610_v44 }
 0x31c   :  { %v1750_v49 = vpop.f32.mrf.mxu1  ;;  %2599 = vmatmul.mubr.f32.gmra.mxu1 %v7150_v11  ;;  %v2947_v11 = vld [vmem:[#allocation2 + $0x10f] sm:$0xff]  ;;  %5201 = vmatprep.subr.mxu1 %v3610_v44 }
 0x31d   :  { %v7191_v23 = vadd.f32 %v2135_v35, %v1750_v49  ;;  %2603 = vmatprep.mubr.f32.mxu1 %v2399_v3  ;;  %v2150_v2 = vpop.f32.mrf.mxu0  ;;  %v2950_v49 = vld [vmem:[#allocation2 + $0x147] sm:$0xff]  ;;  %5217 = vmatpush3.msra.mxu1 %v3610_v44 }
 0x31e   :  { %v1752_v7 = vpop.f32.mrf.mxu1  ;;  %3224 = vmatmul.mubr.f32.gmra.mxu0 %v2947_v11  ;;  %v2951_v11 = vld [vmem:[#allocation2 + $0x14f] sm:$0xff] }
 0x31f   :  { %3228 = vmatprep.mubr.f32.mxu0 %v3012_v4  ;;  %v2152_v12 = vpop.f32.mrf.mxu0 }
 0x320   :  { %v1755_v50 = vpop.f32.mrf.mxu1  ;;  %2604 = vmatmul.mubr.f32.gmra.mxu1 %v7162_v42 }
 0x321   :  { %v7195_v53 = vadd.f32 %v2140_v19, %v1755_v50  ;;  %2608 = vmatprep.mubr.f32.mxu1 %v2400_v38  ;;  %v2155_v42 = vpop.f32.mrf.mxu0  ;;  %v2404_v38 = vld [vmem:[#allocation2 + $0x129] sm:$0xff] }
 0x322   :  { %v1757_v63 = vpop.f32.mrf.mxu1  ;;  %3229 = vmatmul.mubr.f32.gmra.mxu0 %v2948_v0 }
 0x323   :  { %3233 = vmatprep.mubr.f32.mxu0 %v3013_v52  ;;  %v2157_v35 = vpop.f32.mrf.mxu0  ;;  %v3016_v63 = vld [vmem:[#allocation2 + $0x168] sm:$0xff] }
 0x324   :  { %v1760_v36 = vpop.f32.mrf.mxu1  ;;  %2609 = vmatmul.mubr.f32.gmra.mxu1 %v7174_v59  ;;  %v3014_v59 = vld [vmem:[#allocation2 + $0x148] sm:$0xff] }
 0x325   :  { %v7198_v30 = vadd.f32 %v2145_v61, %v1760_v36  ;;  %2613 = vmatprep.mubr.f32.mxu1 %v2401_v39  ;;  %v2160_v24 = vpop.f32.mrf.mxu0  ;;  %v3015_v61 = vld [vmem:[#allocation2 + $0x150] sm:$0xff]  ;;  %v2952_v39 = vld [vmem:[#allocation2 + $0x167] sm:$0xff] }
 0x326   :  { %v1762_v27 = vpop.f32.mrf.mxu1  ;;  %3234 = vmatmul.mubr.f32.gmra.mxu0 %v2949_v16 }
 0x327   :  { %3238 = vmatprep.mubr.f32.mxu0 %v3014_v59  ;;  %v2162_v43 = vpop.f32.mrf.mxu0 }
 0x328   :  { %v1765_v1 = vpop.f32.mrf.mxu1  ;;  %2614 = vmatmul.mubr.f32.gmra.mxu1 %v3009_v34 }
 0x329   :  { %v7200_v21 = vadd.f32 %v2150_v2, %v1765_v1  ;;  %2618 = vmatprep.mubr.f32.mxu1 %v2402_v26  ;;  %v2165_v34 = vpop.f32.mrf.mxu0 }
 0x32a   :  { %v1767_v19 = vpop.f32.mrf.mxu1  ;;  %3239 = vmatmul.mubr.f32.gmra.mxu0 %v2950_v49 }
 0x32b   :  { %3243 = vmatprep.mubr.f32.mxu0 %v3015_v61  ;;  %v2167_v32 = vpop.f32.mrf.mxu0  ;;  %v2406_v19 = vld [vmem:[#allocation2 + $0x149] sm:$0xff] }
 0x32c   :  { %v1770_v9 = vpop.f32.mrf.mxu1  ;;  %2619 = vmatmul.mubr.f32.gmra.mxu1 %v3010_v22  ;;  %v2407_v32 = vld [vmem:[#allocation2 + $0x151] sm:$0xff] }
 0x32d   :  { %v7202_v3 = vadd.f32 %v2155_v42, %v1770_v9  ;;  %2623 = vmatprep.mubr.f32.mxu1 %v2403_v41  ;;  %v2170_v22 = vpop.f32.mrf.mxu0  ;;  %v2405_v42 = vld [vmem:[#allocation2 + $0x131] sm:$0xff] }
 0x32e   :  { %v1772_v7 = vpop.f32.mrf.mxu1  ;;  %3244 = vmatmul.mubr.f32.gmra.mxu0 %v2951_v11  ;;  %v3609_v41 = vld [vmem:[#allocation8 + $0x410] sm:$0xff] }
 0x32f   :  { %3248 = vmatprep.mubr.f32.mxu0 %v3016_v63  ;;  %v2172_v36 = vpop.f32.mrf.mxu0  ;;  %v2954_v7 = vld [vmem:[#allocation2 + $0x187] sm:$0xff]  ;;  %5087 = vmatprep.subr.mxu0 %v3609_v41  ;;  %v3019_v11 = vld [vmem:[#allocation2 + $0x190] sm:$0xff] }
 0x330   :  { %v1775_v50 = vpop.f32.mrf.mxu1  ;;  %2624 = vmatmul.mubr.f32.gmra.mxu1 %v3011_v40  ;;  %v3017_v40 = vld [vmem:[#allocation2 + $0x170] sm:$0xff]  ;;  %5088 = vmatpush3.msra.mxu0 %v3609_v41 }
 0x331   :  { %v7204_v2 = vadd.f32 %v2160_v24, %v1775_v50  ;;  %2628 = vmatprep.mubr.f32.mxu1 %v2404_v38  ;;  %v2175_v35 = vpop.f32.mrf.mxu0  ;;  %v2953_v24 = vld [vmem:[#allocation2 + $0x16f] sm:$0xff]  ;;  %5202 = vmatprep.subr.mxu1 %v3609_v41 }
 0x332   :  { %v1777_v12 = vpop.f32.mrf.mxu1  ;;  %3249 = vmatmul.mubr.f32.gmra.mxu0 %v2952_v39  ;;  %v2955_v36 = vld [vmem:[#allocation2 + $0x18f] sm:$0xff]  ;;  %5218 = vmatpush3.msra.mxu1 %v3609_v41 }
 0x333   :  { %3253 = vmatprep.mubr.f32.mxu0 %v3017_v40  ;;  %v2177_v16 = vpop.f32.mrf.mxu0 }
 0x334   :  { %v1780_v0 = vpop.f32.mrf.mxu1  ;;  %2629 = vmatmul.mubr.f32.gmra.mxu1 %v3012_v4  ;;  %v3018_v4 = vld [vmem:[#allocation2 + $0x188] sm:$0xff] }
 0x335   :  { %v7206_v27 = vadd.f32 %v2165_v34, %v1780_v0  ;;  %2633 = vmatprep.mubr.f32.mxu1 %v2405_v42  ;;  %v2180_v44 = vpop.f32.mrf.mxu0  ;;  %v2408_v0 = vld [vmem:[#allocation2 + $0x169] sm:$0xff] }
 0x336   :  { %v1782_v1 = vpop.f32.mrf.mxu1  ;;  %3254 = vmatmul.mubr.f32.gmra.mxu0 %v2953_v24  ;;  %v3020_v42 = vld [vmem:[#allocation2 + $0x1a8] sm:$0xff]  ;;  %v2409_v24 = vld [vmem:[#allocation2 + $0x171] sm:$0xff] }
 0x337   :  { %3258 = vmatprep.mubr.f32.mxu0 %v3018_v4  ;;  %v2182_v49 = vpop.f32.mrf.mxu0 }
 0x338   :  { %v1785_v26 = vpop.f32.mrf.mxu1  ;;  %2634 = vmatmul.mubr.f32.gmra.mxu1 %v3013_v52 }
 0x339   :  { %v7208_v43 = vadd.f32 %v2170_v22, %v1785_v26  ;;  %2638 = vmatprep.mubr.f32.mxu1 %v2406_v19  ;;  %v2185_v52 = vpop.f32.mrf.mxu0  ;;  %v2956_v26 = vld [vmem:[#allocation2 + $0x1a7] sm:$0xff] }
 0x33a   :  { %v1787_v9 = vpop.f32.mrf.mxu1  ;;  %3259 = vmatmul.mubr.f32.gmra.mxu0 %v2954_v7  ;;  %v2957_v7 = vld [vmem:[#allocation2 + $0x1af] sm:$0xff] }
 0x33b   :  { %9161 = vst [vmem:[#allocation17_spill] sm:$0xff] %v7208_v43  ;;  %3263 = vmatprep.mubr.f32.mxu0 %v3019_v11  ;;  %v2187_v22 = vpop.f32.mrf.mxu0 }
 0x33c   :  { %v1790_v34 = vpop.f32.mrf.mxu1  ;;  %2639 = vmatmul.mubr.f32.gmra.mxu1 %v3014_v59 }
 0x33d   :  { %v7210_v50 = vadd.f32 %v2175_v35, %v1790_v34  ;;  %2643 = vmatprep.mubr.f32.mxu1 %v2407_v32  ;;  %v2190_v59 = vpop.f32.mrf.mxu0  ;;  %v2410_v32 = vld [vmem:[#allocation2 + $0x189] sm:$0xff] }
 0x33e   :  { %v1792_v38 = vpop.f32.mrf.mxu1  ;;  %3264 = vmatmul.mubr.f32.gmra.mxu0 %v2955_v36 }
 0x33f   :  { %9162 = vst [vmem:[#allocation24_spill] sm:$0xff] %v7210_v50  ;;  %3268 = vmatprep.mubr.f32.mxu0 %v3020_v42  ;;  %v2192_v1 = vpop.f32.mrf.mxu0  ;;  %v2982_v50 = vld [vmem:[#allocation2 + $0x387] sm:$0xff] }
 0x340   :  { %v1795_v12 = vpop.f32.mrf.mxu1  ;;  %2644 = vmatmul.mubr.f32.gmra.mxu1 %v3015_v61  ;;  %v3021_v61 = vld [vmem:[#allocation2 + $0x1b0] sm:$0xff] }
 0x341   :  { %v7212_v39 = vadd.f32 %v2180_v44, %v1795_v12  ;;  %2648 = vmatprep.mubr.f32.mxu1 %v2408_v0  ;;  %v2195_v9 = vpop.f32.mrf.mxu0  ;;  %v3608_v12 = vld [vmem:[#allocation8 + $0x408] sm:$0xff] }
 0x342   :  { %v1797_v35 = vpop.f32.mrf.mxu1  ;;  %3269 = vmatmul.mubr.f32.gmra.mxu0 %v2956_v26  ;;  %v2958_v0 = vld [vmem:[#allocation2 + $0x1c7] sm:$0xff]  ;;  %5089 = vmatprep.subr.mxu0 %v3608_v12 }
 0x343   :  { %9163 = vst [vmem:[#allocation23_spill] sm:$0xff] %v7212_v39  ;;  %3273 = vmatprep.mubr.f32.mxu0 %v3021_v61  ;;  %v2197_v49 = vpop.f32.mrf.mxu0  ;;  %v2411_v35 = vld [vmem:[#allocation2 + $0x191] sm:$0xff]  ;;  %5090 = vmatpush3.msra.mxu0 %v3608_v12 }
 0x344   :  { %v1800_v16 = vpop.f32.mrf.mxu1  ;;  %2649 = vmatmul.mubr.f32.gmra.mxu1 %v3016_v63  ;;  %v3022_v63 = vld [vmem:[#allocation2 + $0x1c8] sm:$0xff]  ;;  %5203 = vmatprep.subr.mxu1 %v3608_v12 }
 0x345   :  { %v7214_v19 = vadd.f32 %v2185_v52, %v1800_v16  ;;  %2653 = vmatprep.mubr.f32.mxu1 %v2409_v24  ;;  %v2200_v41 = vpop.f32.mrf.mxu0  ;;  %v2412_v49 = vld [vmem:[#allocation2 + $0x1a9] sm:$0xff]  ;;  %5219 = vmatpush3.msra.mxu1 %v3608_v12 }
 0x346   :  { %v1802_v44 = vpop.f32.mrf.mxu1  ;;  %3274 = vmatmul.mubr.f32.gmra.mxu0 %v2957_v7  ;;  %v2981_v39 = vld [vmem:[#allocation2 + $0x36f] sm:$0xff] }
 0x347   :  { %9164 = vst [vmem:[#allocation29_spill] sm:$0xff] %v7214_v19  ;;  %3278 = vmatprep.mubr.f32.mxu0 %v3022_v63  ;;  %v2202_v22 = vpop.f32.mrf.mxu0  ;;  %v2959_v44 = vld [vmem:[#allocation2 + $0x1cf] sm:$0xff]  ;;  %v2980_v19 = vld [vmem:[#allocation2 + $0x367] sm:$0xff] }
 0x348   :  { %v1805_v34 = vpop.f32.mrf.mxu1  ;;  %2654 = vmatmul.mubr.f32.gmra.mxu1 %v3017_v40  ;;  %v2960_v22 = vld [vmem:[#allocation2 + $0x1e7] sm:$0xff] }
 0x349   :  { %v7216_v38 = vadd.f32 %v2190_v59, %v1805_v34  ;;  %2658 = vmatprep.mubr.f32.mxu1 %v2410_v32  ;;  %v2205_v40 = vpop.f32.mrf.mxu0  ;;  %v3023_v59 = vld [vmem:[#allocation2 + $0x1d0] sm:$0xff] }
 0x34a   :  { %v1807_v52 = vpop.f32.mrf.mxu1  ;;  %3279 = vmatmul.mubr.f32.gmra.mxu0 %v2958_v0 }
 0x34b   :  { %9165 = vst [vmem:[#allocation31_spill] sm:$0xff] %v7216_v38  ;;  %3283 = vmatprep.mubr.f32.mxu0 %v3023_v59  ;;  %v2207_v26 = vpop.f32.mrf.mxu0  ;;  %v2979_v38 = vld [vmem:[#allocation2 + $0x34f] sm:$0xff] }
 0x34c   :  { %v1810_v36 = vpop.f32.mrf.mxu1  ;;  %2659 = vmatmul.mubr.f32.gmra.mxu1 %v3018_v4 }
 0x34d   :  { %v7218_v1 = vadd.f32 %v2195_v9, %v1810_v36  ;;  %2663 = vmatprep.mubr.f32.mxu1 %v2411_v35  ;;  %v2210_v4 = vpop.f32.mrf.mxu0  ;;  %v3024_v9 = vld [vmem:[#allocation2 + $0x1e8] sm:$0xff]  ;;  %v2413_v36 = vld [vmem:[#allocation2 + $0x1b1] sm:$0xff] }
 0x34e   :  { %v1812_v16 = vpop.f32.mrf.mxu1  ;;  %3284 = vmatmul.mubr.f32.gmra.mxu0 %v2959_v44  ;;  %v2414_v44 = vld [vmem:[#allocation2 + $0x1c9] sm:$0xff] }
 0x34f   :  { %9166 = vst [vmem:[#allocation32_spill] sm:$0xff] %v7218_v1  ;;  %3288 = vmatprep.mubr.f32.mxu0 %v3024_v9  ;;  %v2212_v32 = vpop.f32.mrf.mxu0  ;;  %v2978_v1 = vld [vmem:[#allocation2 + $0x347] sm:$0xff] }
 0x350   :  { %v1815_v24 = vpop.f32.mrf.mxu1  ;;  %2664 = vmatmul.mubr.f32.gmra.mxu1 %v3019_v11  ;;  %v3025_v11 = vld [vmem:[#allocation2 + $0x1f0] sm:$0xff]  ;;  %v3607_v32 = vld [vmem:[#allocation8 + $0x400] sm:$0xff] }
 0x351   :  { %v7220_v34 = vadd.f32 %v2200_v41, %v1815_v24  ;;  %2668 = vmatprep.mubr.f32.mxu1 %v2412_v49  ;;  %v2215_v35 = vpop.f32.mrf.mxu0  ;;  %v2961_v24 = vld [vmem:[#allocation2 + $0x1ef] sm:$0xff]  ;;  %5091 = vmatprep.subr.mxu0 %v3607_v32 }
 0x352   :  { %v1817_v7 = vpop.f32.mrf.mxu1  ;;  %3289 = vmatmul.mubr.f32.gmra.mxu0 %v2960_v22  ;;  %v2962_v22 = vld [vmem:[#allocation2 + $0x207] sm:$0xff]  ;;  %5204 = vmatprep.subr.mxu1 %v3607_v32 }
 0x353   :  { %9167 = vst [vmem:[#allocation15_spill] sm:$0xff] %v7220_v34  ;;  %3293 = vmatprep.mubr.f32.mxu0 %v3025_v11  ;;  %v2217_v16 = vpop.f32.mrf.mxu0  ;;  %5092 = vmatpush3.msra.mxu0 %v3607_v32  ;;  %v2977_v34 = vld [vmem:[#allocation2 + $0x32f] sm:$0xff] }
 0x354   :  { %v1820_v52 = vpop.f32.mrf.mxu1  ;;  %2669 = vmatmul.mubr.f32.gmra.mxu1 %v3020_v42  ;;  %v3026_v42 = vld [vmem:[#allocation2 + $0x208] sm:$0xff] }
 0x355   :  { %v7222_v0 = vadd.f32 %v2205_v40, %v1820_v52  ;;  %2673 = vmatprep.mubr.f32.mxu1 %v2413_v36  ;;  %v2220_v12 = vpop.f32.mrf.mxu0  ;;  %v2415_v36 = vld [vmem:[#allocation2 + $0x1d1] sm:$0xff]  ;;  %5220 = vmatpush3.msra.mxu1 %v3607_v32 }
 0x356   :  { %v1822_v41 = vpop.f32.mrf.mxu1  ;;  %3294 = vmatmul.mubr.f32.gmra.mxu0 %v2961_v24 }
 0x357   :  { %9168 = vst [vmem:[#allocation16_spill] sm:$0xff] %v7222_v0  ;;  %3298 = vmatprep.mubr.f32.mxu0 %v3026_v42  ;;  %v2222_v7 = vpop.f32.mrf.mxu0 }
 0x358   :  { %v1825_v26 = vpop.f32.mrf.mxu1  ;;  %2674 = vmatmul.mubr.f32.gmra.mxu1 %v3021_v61 }
 0x359   :  { %v7224_v49 = vadd.f32 %v2210_v4, %v1825_v26  ;;  %2678 = vmatprep.mubr.f32.mxu1 %v2414_v44  ;;  %v2225_v61 = vpop.f32.mrf.mxu0  ;;  %v3027_v4 = vld [vmem:[#allocation2 + $0x210] sm:$0xff] }
 0x35a   :  { %v1827_v40 = vpop.f32.mrf.mxu1  ;;  %3299 = vmatmul.mubr.f32.gmra.mxu0 %v2962_v22  ;;  %v2963_v44 = vld [vmem:[#allocation2 + $0x20f] sm:$0xff]  ;;  %v2964_v22 = vld [vmem:[#allocation2 + $0x227] sm:$0xff] }
 0x35b   :  { %9169 = vst [vmem:[#allocation18_spill] sm:$0xff] %v7224_v49  ;;  %3303 = vmatprep.mubr.f32.mxu0 %v3027_v4  ;;  %v2227_v26 = vpop.f32.mrf.mxu0  ;;  %v2416_v40 = vld [vmem:[#allocation2 + $0x1e9] sm:$0xff] }
 0x35c   :  { %v1830_v52 = vpop.f32.mrf.mxu1  ;;  %2679 = vmatmul.mubr.f32.gmra.mxu1 %v3022_v63  ;;  %v2417_v26 = vld [vmem:[#allocation2 + $0x1f1] sm:$0xff] }
 0x35d   :  { %v7226_v41 = vadd.f32 %v2215_v35, %v1830_v52  ;;  %2683 = vmatprep.mubr.f32.mxu1 %v2415_v36  ;;  %v2230_v63 = vpop.f32.mrf.mxu0  ;;  %v7230_v52 = vld [vmem:[#allocation2] sm:$0xff] }
 0x35e   :  { %v1832_v16 = vpop.f32.mrf.mxu1  ;;  %3304 = vmatmul.mubr.f32.gmra.mxu0 %v2963_v44 }
 0x35f   :  { %9170 = vst [vmem:[#allocation13_spill] sm:$0xff] %v7226_v41  ;;  %3308 = vmatprep.mubr.f32.mxu0 %v7230_v52  ;;  %v2232_v36 = vpop.f32.mrf.mxu0 }
 0x360   :  { %v1835_v24 = vpop.f32.mrf.mxu1  ;;  %2684 = vmatmul.mubr.f32.gmra.mxu1 %v3023_v59 }
 0x361   :  { %v7228_v7 = vadd.f32 %v2220_v12, %v1835_v24  ;;  %2688 = vmatprep.mubr.f32.mxu1 %v2416_v40  ;;  %v2235_v59 = vpop.f32.mrf.mxu0  ;;  %v2965_v24 = vld [vmem:[#allocation2 + $0x22f] sm:$0xff] }
 0x362   :  { %v1837_v35 = vpop.f32.mrf.mxu1  ;;  %3309 = vmatmul.mubr.f32.gmra.mxu0 %v2964_v22  ;;  %v2966_v22 = vld [vmem:[#allocation2 + $0x287] sm:$0xff] }
 0x363   :  { %9171 = vst [vmem:[#allocation19_spill] sm:$0xff] %v7228_v7  ;;  %3313 = vmatprep.mubr.f32.mxu0 %v7230_v52  ;;  %v2237_v44 = vpop.f32.mrf.mxu0  ;;  %v2418_v35 = vld [vmem:[#allocation2 + $0x209] sm:$0xff] }
 0x364   :  { %v1840_v16 = vpop.f32.mrf.mxu1  ;;  %2689 = vmatmul.mubr.f32.gmra.mxu1 %v3024_v9  ;;  %v3030_v9 = vld [vmem:[#allocation2 + $0x288] sm:$0xff] }
 0x365   :  { %v7233_v41 = vadd.f32 %v2225_v61, %v1840_v16  ;;  %2693 = vmatprep.mubr.f32.mxu1 %v2417_v26  ;;  %v2240_v32 = vpop.f32.mrf.mxu0  ;;  %v2419_v26 = vld [vmem:[#allocation2 + $0x211] sm:$0xff] }
 0x366   :  { %v1842_v12 = vpop.f32.mrf.mxu1  ;;  %3314 = vmatmul.mubr.f32.gmra.mxu0 %v2965_v24  ;;  %v2967_v24 = vld [vmem:[#allocation2 + $0x28f] sm:$0xff] }
 0x367   :  { %9172 = vst [vmem:[#allocation20_spill] sm:$0xff] %v7233_v41  ;;  %3318 = vmatprep.mubr.f32.mxu0 %v3030_v9  ;;  %v2242_v36 = vpop.f32.mrf.mxu0 }
 0x368   :  { %v1845_v40 = vpop.f32.mrf.mxu1  ;;  %2694 = vmatmul.mubr.f32.gmra.mxu1 %v3025_v11  ;;  %v3031_v11 = vld [vmem:[#allocation2 + $0x290] sm:$0xff] }
 0x369   :  { %v7236_v7 = vadd.f32 %v2230_v63, %v1845_v40  ;;  %2698 = vmatprep.mubr.f32.mxu1 %v2418_v35  ;;  %v2245_v41 = vpop.f32.mrf.mxu0  ;;  %v2420_v35 = vld [vmem:[#allocation2 + $0x269] sm:$0xff] }
 0x36a   :  { %v1847_v61 = vpop.f32.mrf.mxu1  ;;  %3319 = vmatmul.mubr.f32.gmra.mxu0 %v2966_v22 }
 0x36b   :  { %9173 = vst [vmem:[#allocation21_spill] sm:$0xff] %v7236_v7  ;;  %3323 = vmatprep.mubr.f32.mxu0 %v3031_v11  ;;  %v2247_v44 = vpop.f32.mrf.mxu0 }
 0x36c   :  { %v1850_v16 = vpop.f32.mrf.mxu1  ;;  %2699 = vmatmul.mubr.f32.gmra.mxu1 %v3026_v42  ;;  %v3032_v42 = vld [vmem:[#allocation2 + $0x2a8] sm:$0xff] }
 0x36d   :  { %v7238_v12 = vadd.f32 %v2235_v59, %v1850_v16  ;;  %2703 = vmatprep.mubr.f32.mxu1 %v2419_v26  ;;  %v2250_v61 = vpop.f32.mrf.mxu0  ;;  %v2356_v16 = vld [vmem:[#allocation2 + $0x268] sm:$0xff] }
 0x36e   :  { %v1852_v63 = vpop.f32.mrf.mxu1  ;;  %3324 = vmatmul.mubr.f32.gmra.mxu0 %v2967_v24  ;;  %v2968_v26 = vld [vmem:[#allocation2 + $0x2a7] sm:$0xff]  ;;  %v2357_v24 = vld [vmem:[#allocation2 + $0x270] sm:$0xff] }
 0x36f   :  { %9174 = vst [vmem:[#allocation22_spill] sm:$0xff] %v7238_v12  ;;  %3328 = vmatprep.mubr.f32.mxu0 %v3032_v42  ;;  %v2252_v36 = vpop.f32.mrf.mxu0  ;;  %v2421_v12 = vld [vmem:[#allocation2 + $0x271] sm:$0xff] }
 0x370   :  { %v1855_v40 = vpop.f32.mrf.mxu1  ;;  %2704 = vmatmul.mubr.f32.gmra.mxu1 %v3027_v4  ;;  %v3033_v4 = vld [vmem:[#allocation2 + $0x2b0] sm:$0xff] }
 0x371   :  { %v7240_v7 = vadd.f32 %v2240_v32, %v1855_v40  ;;  %2708 = vmatprep.mubr.f32.mxu1 %v2420_v35  ;;  %v2255_v44 = vpop.f32.mrf.mxu0 }
 0x372   :  { %v1857_v59 = vpop.f32.mrf.mxu1  ;;  %3329 = vmatmul.mubr.f32.gmra.mxu0 %v2968_v26 }
 0x373   :  { %9175 = vst [vmem:[#allocation25_spill] sm:$0xff] %v7240_v7  ;;  %3333 = vmatprep.mubr.f32.mxu0 %v3033_v4  ;;  %v2257_v40 = vpop.f32.mrf.mxu0  ;;  %v2969_v7 = vld [vmem:[#allocation2 + $0x2af] sm:$0xff] }
 0x374   :  { %v1860_v22 = vpop.f32.mrf.mxu1  ;;  %2709 = vmatmul.mubr.f32.gmra.mxu1 %v2356_v16  ;;  %v2422_v59 = vld [vmem:[#allocation2 + $0x289] sm:$0xff] }
 0x375   :  { %v7242_v63 = vadd.f32 %v2245_v41, %v1860_v22  ;;  %2713 = vmatprep.mubr.f32.mxu1 %v2421_v12  ;;  %v2260_v49 = vpop.f32.mrf.mxu0  ;;  %v3034_v16 = vld [vmem:[#allocation2 + $0x2c8] sm:$0xff] }
 0x376   :  { %v1862_v32 = vpop.f32.mrf.mxu1  ;;  %3334 = vmatmul.mubr.f32.gmra.mxu0 %v2969_v7  ;;  %v2970_v12 = vld [vmem:[#allocation2 + $0x2c7] sm:$0xff]  ;;  %v2971_v7 = vld [vmem:[#allocation2 + $0x2cf] sm:$0xff] }
 0x377   :  { %9176 = vst [vmem:[#allocation26_spill] sm:$0xff] %v7242_v63  ;;  %3338 = vmatprep.mubr.f32.mxu0 %v3034_v16  ;;  %v2262_v22 = vpop.f32.mrf.mxu0  ;;  %v2423_v63 = vld [vmem:[#allocation2 + $0x291] sm:$0xff] }
 0x378   :  { %v1865_v35 = vpop.f32.mrf.mxu1  ;;  %2714 = vmatmul.mubr.f32.gmra.mxu1 %v2357_v24  ;;  %v3035_v24 = vld [vmem:[#allocation2 + $0x2d0] sm:$0xff] }
 0x379   :  { %v7244_v36 = vadd.f32 %v2250_v61, %v1865_v35  ;;  %2718 = vmatprep.mubr.f32.mxu1 %v2422_v59  ;;  %v2265_v40 = vpop.f32.mrf.mxu0  ;;  %v2424_v59 = vld [vmem:[#allocation2 + $0x2a9] sm:$0xff] }
 0x37a   :  { %v1867_v41 = vpop.f32.mrf.mxu1  ;;  %3339 = vmatmul.mubr.f32.gmra.mxu0 %v2970_v12  ;;  %v2425_v12 = vld [vmem:[#allocation2 + $0x2b1] sm:$0xff] }
 0x37b   :  { %9177 = vst [vmem:[#allocation27_spill] sm:$0xff] %v7244_v36  ;;  %3343 = vmatprep.mubr.f32.mxu0 %v3035_v24  ;;  %v2267_v35 = vpop.f32.mrf.mxu0 }
 0x37c   :  { %v1870_v26 = vpop.f32.mrf.mxu1  ;;  %2719 = vmatmul.mubr.f32.gmra.mxu1 %v3030_v9  ;;  %v3036_v9 = vld [vmem:[#allocation2 + $0x2e8] sm:$0xff] }
 0x37d   :  { %v7246_v32 = vadd.f32 %v2255_v44, %v1870_v26  ;;  %2723 = vmatprep.mubr.f32.mxu1 %v2423_v63  ;;  %v2270_v41 = vpop.f32.mrf.mxu0  ;;  %v2972_v63 = vld [vmem:[#allocation2 + $0x2e7] sm:$0xff] }
 0x37e   :  { %v1872_v61 = vpop.f32.mrf.mxu1  ;;  %3344 = vmatmul.mubr.f32.gmra.mxu0 %v2971_v7  ;;  %v2973_v7 = vld [vmem:[#allocation2 + $0x2ef] sm:$0xff] }
 0x37f   :  { %9178 = vst [vmem:[#allocation28_spill] sm:$0xff] %v7246_v32  ;;  %3348 = vmatprep.mubr.f32.mxu0 %v3036_v9  ;;  %v2272_v22 = vpop.f32.mrf.mxu0 }
 0x380   :  { %v1875_v36 = vpop.f32.mrf.mxu1  ;;  %2724 = vmatmul.mubr.f32.gmra.mxu1 %v3031_v11  ;;  %v3037_v11 = vld [vmem:[#allocation2 + $0x2f0] sm:$0xff] }
 0x381   :  { %v7248_v0 = vadd.f32 %v2260_v49, %v1875_v36  ;;  %2728 = vmatprep.mubr.f32.mxu1 %v2424_v59  ;;  %v2275_v61 = vpop.f32.mrf.mxu0  ;;  %v7252_v59 = vld [vmem:[#allocation2 + $0x2c9] sm:$0xff] }
 0x382   :  { %v1877_v44 = vpop.f32.mrf.mxu1  ;;  %3349 = vmatmul.mubr.f32.gmra.mxu0 %v2972_v63 }
 0x383   :  { %9179 = vst [vmem:[#allocation30_spill] sm:$0xff] %v7248_v0  ;;  %3353 = vmatprep.mubr.f32.mxu0 %v3037_v11  ;;  %v2277_v36 = vpop.f32.mrf.mxu0  ;;  %v2976_v0 = vld [vmem:[#allocation2 + $0x327] sm:$0xff] }
 0x384   :  { %v1880_v26 = vpop.f32.mrf.mxu1  ;;  %2729 = vmatmul.mubr.f32.gmra.mxu1 %v3032_v42  ;;  %v3038_v42 = vld [vmem:[#allocation2 + $0x308] sm:$0xff] }
 0x385   :  { %v7250_v32 = vadd.f32 %v2265_v40, %v1880_v26  ;;  %2733 = vmatprep.mubr.f32.mxu1 %v2425_v12  ;;  %v2280_v22 = vpop.f32.mrf.mxu0  ;;  %v2974_v12 = vld [vmem:[#allocation2 + $0x307] sm:$0xff] }
 0x386   :  { %v1882_v49 = vpop.f32.mrf.mxu1  ;;  %3354 = vmatmul.mubr.f32.gmra.mxu0 %v2973_v7 }
 0x387   :  { %9180 = vst [vmem:[#allocation14_spill] sm:$0xff] %v7250_v32  ;;  %3358 = vmatprep.mubr.f32.mxu0 %v3038_v42  ;;  %v2282_v26 = vpop.f32.mrf.mxu0  ;;  %v7257_v49 = vld [vmem:[#allocation2 + $0x2d1] sm:$0xff] }
 0x388   :  { %v1885_v35 = vpop.f32.mrf.mxu1  ;;  %2734 = vmatmul.mubr.f32.gmra.mxu1 %v3033_v4  ;;  %v2975_v32 = vld [vmem:[#allocation2 + $0x30f] sm:$0xff] }
 0x389   :  { %v7254_v44 = vadd.f32 %v2270_v41, %v1885_v35  ;;  %2738 = vmatprep.mubr.f32.mxu1 %v7252_v59  ;;  %v2285_v4 = vpop.f32.mrf.mxu0  ;;  %v3039_v41 = vld [vmem:[#allocation2 + $0x310] sm:$0xff] }
 0x38a   :  { %v1887_v40 = vpop.f32.mrf.mxu1  ;;  %3359 = vmatmul.mubr.f32.gmra.mxu0 %v2974_v12 }
 0x38b   :  { %9181 = vst [vmem:[#allocation33_spill] sm:$0xff] %v7254_v44  ;;  %3363 = vmatprep.mubr.f32.mxu0 %v3039_v41  ;;  %v2287_v7 = vpop.f32.mrf.mxu0  ;;  %v7262_v40 = vld [vmem:[#allocation2 + $0x2e9] sm:$0xff] }
 0x38c   :  { %v1890_v63 = vpop.f32.mrf.mxu1  ;;  %2739 = vmatmul.mubr.f32.gmra.mxu1 %v3034_v16 }
 0x38d   :  { %v7259_v36 = vadd.f32 %v2275_v61, %v1890_v63  ;;  %2743 = vmatprep.mubr.f32.mxu1 %v7257_v49  ;;  %v2290_v16 = vpop.f32.mrf.mxu0  ;;  %v3040_v61 = vld [vmem:[#allocation2 + $0x328] sm:$0xff] }
 0x38e   :  { %v1892_v35 = vpop.f32.mrf.mxu1  ;;  %3364 = vmatmul.mubr.f32.gmra.mxu0 %v2975_v32 }
 0x38f   :  { %9182 = vst [vmem:[#allocation34_spill] sm:$0xff] %v7259_v36  ;;  %3368 = vmatprep.mubr.f32.mxu0 %v3040_v61  ;;  %v2292_v12 = vpop.f32.mrf.mxu0  ;;  %v7267_v35 = vld [vmem:[#allocation2 + $0x2f1] sm:$0xff] }
 0x390   :  { %v1895_v44 = vpop.f32.mrf.mxu1  ;;  %2744 = vmatmul.mubr.f32.gmra.mxu1 %v3035_v24 }
 0x391   :  { %v7264_v26 = vadd.f32 %v2280_v22, %v1895_v44  ;;  %2748 = vmatprep.mubr.f32.mxu1 %v7262_v40  ;;  %v2295_v24 = vpop.f32.mrf.mxu0  ;;  %v3041_v44 = vld [vmem:[#allocation2 + $0x330] sm:$0xff] }
 0x392   :  { %v1897_v63 = vpop.f32.mrf.mxu1  ;;  %3369 = vmatmul.mubr.f32.gmra.mxu0 %v2976_v0 }
 0x393   :  { %9183 = vst [vmem:[#allocation35_spill] sm:$0xff] %v7264_v26  ;;  %3373 = vmatprep.mubr.f32.mxu0 %v3041_v44  ;;  %v2297_v22 = vpop.f32.mrf.mxu0  ;;  %v7272_v63 = vld [vmem:[#allocation2 + $0x309] sm:$0xff] }
 0x394   :  { %v1900_v36 = vpop.f32.mrf.mxu1  ;;  %2749 = vmatmul.mubr.f32.gmra.mxu1 %v3036_v9 }
 0x395   :  { %v7269_v7 = vadd.f32 %v2285_v4, %v1900_v36  ;;  %2753 = vmatprep.mubr.f32.mxu1 %v7267_v35  ;;  %v2300_v9 = vpop.f32.mrf.mxu0  ;;  %v3042_v36 = vld [vmem:[#allocation2 + $0x348] sm:$0xff] }
 0x396   :  { %v1902_v32 = vpop.f32.mrf.mxu1  ;;  %3374 = vmatmul.mubr.f32.gmra.mxu0 %v2977_v34 }
 0x397   :  { %9184 = vst [vmem:[#allocation36_spill] sm:$0xff] %v7269_v7  ;;  %3378 = vmatprep.mubr.f32.mxu0 %v3042_v36  ;;  %v2302_v4 = vpop.f32.mrf.mxu0  ;;  %v7277_v32 = vld [vmem:[#allocation2 + $0x311] sm:$0xff] }
 0x398   :  { %v1905_v26 = vpop.f32.mrf.mxu1  ;;  %2754 = vmatmul.mubr.f32.gmra.mxu1 %v3037_v11 }
 0x399   :  { %v7274_v12 = vadd.f32 %v2290_v16, %v1905_v26  ;;  %2758 = vmatprep.mubr.f32.mxu1 %v7272_v63  ;;  %v2305_v11 = vpop.f32.mrf.mxu0  ;;  %v3043_v26 = vld [vmem:[#allocation2 + $0x350] sm:$0xff] }
 0x39a   :  { %v1907_v0 = vpop.f32.mrf.mxu1  ;;  %3379 = vmatmul.mubr.f32.gmra.mxu0 %v2978_v1 }
 0x39b   :  { %9185 = vst [vmem:[#allocation37_spill] sm:$0xff] %v7274_v12  ;;  %3383 = vmatprep.mubr.f32.mxu0 %v3043_v26  ;;  %v2307_v16 = vpop.f32.mrf.mxu0  ;;  %v7282_v0 = vld [vmem:[#allocation2 + $0x329] sm:$0xff] }
 0x39c   :  { %v1910_v7 = vpop.f32.mrf.mxu1  ;;  %2759 = vmatmul.mubr.f32.gmra.mxu1 %v3038_v42 }
 0x39d   :  { %v7279_v22 = vadd.f32 %v2295_v24, %v1910_v7  ;;  %2763 = vmatprep.mubr.f32.mxu1 %v7277_v32  ;;  %v2310_v42 = vpop.f32.mrf.mxu0  ;;  %v3044_v7 = vld [vmem:[#allocation2 + $0x368] sm:$0xff] }
 0x39e   :  { %v1912_v34 = vpop.f32.mrf.mxu1  ;;  %3384 = vmatmul.mubr.f32.gmra.mxu0 %v2979_v38 }
 0x39f   :  { %9186 = vst [vmem:[#allocation38_spill] sm:$0xff] %v7279_v22  ;;  %3388 = vmatprep.mubr.f32.mxu0 %v3044_v7  ;;  %v2312_v24 = vpop.f32.mrf.mxu0  ;;  %v7287_v34 = vld [vmem:[#allocation2 + $0x331] sm:$0xff] }
 0x3a0   :  { %v1915_v12 = vpop.f32.mrf.mxu1  ;;  %2764 = vmatmul.mubr.f32.gmra.mxu1 %v3039_v41 }
 0x3a1   :  { %v7284_v4 = vadd.f32 %v2300_v9, %v1915_v12  ;;  %2768 = vmatprep.mubr.f32.mxu1 %v7282_v0  ;;  %v2315_v41 = vpop.f32.mrf.mxu0  ;;  %v3045_v12 = vld [vmem:[#allocation2 + $0x370] sm:$0xff] }
 0x3a2   :  { %v1917_v1 = vpop.f32.mrf.mxu1  ;;  %3389 = vmatmul.mubr.f32.gmra.mxu0 %v2980_v19 }
 0x3a3   :  { %9187 = vst [vmem:[#allocation39_spill] sm:$0xff] %v7284_v4  ;;  %3393 = vmatprep.mubr.f32.mxu0 %v3045_v12  ;;  %v2317_v9 = vpop.f32.mrf.mxu0  ;;  %v7292_v1 = vld [vmem:[#allocation2 + $0x349] sm:$0xff] }
 0x3a4   :  { %v1920_v22 = vpop.f32.mrf.mxu1  ;;  %2769 = vmatmul.mubr.f32.gmra.mxu1 %v3040_v61  ;;  %9189 = vst [vmem:[#allocation41_spill] sm:$0xff] %v7292_v1 }
 0x3a5   :  { %v7289_v16 = vadd.f32 %v2305_v11, %v1920_v22  ;;  %2773 = vmatprep.mubr.f32.mxu1 %v7287_v34  ;;  %v2320_v61 = vpop.f32.mrf.mxu0  ;;  %v3046_v22 = vld [vmem:[#allocation2 + $0x388] sm:$0xff] }
 0x3a6   :  { %v1922_v38 = vpop.f32.mrf.mxu1  ;;  %3394 = vmatmul.mubr.f32.gmra.mxu0 %v2981_v39 }
 0x3a7   :  { %9188 = vst [vmem:[#allocation40_spill] sm:$0xff] %v7289_v16  ;;  %3398 = vmatprep.mubr.f32.mxu0 %v3046_v22  ;;  %v2322_v11 = vpop.f32.mrf.mxu0  ;;  %v7297_v38 = vld [vmem:[#allocation2 + $0x351] sm:$0xff] }
 0x3a8   :  { %v1925_v4 = vpop.f32.mrf.mxu1  ;;  %2774 = vmatmul.mubr.f32.gmra.mxu1 %v3041_v44  ;;  %9191 = vst [vmem:[#allocation43_spill] sm:$0xff] %v7297_v38 }
 0x3a9   :  { %v7294_v24 = vadd.f32 %v2310_v42, %v1925_v4  ;;  %2778 = vmatprep.mubr.f32.mxu1 %v7292_v1  ;;  %v3160_v44 = vpop.f32.mrf.mxu0  ;;  %v3047_v4 = vld [vmem:[#allocation2 + $0x390] sm:$0xff] }
 0x3aa   :  { %v1927_v19 = vpop.f32.mrf.mxu1  ;;  %3399 = vmatmul.mubr.f32.gmra.mxu0 %v2982_v50  ;;  %v2983_v1 = vld [vmem:[#allocation2 + $0x38f] sm:$0xff] }
 0x3ab   :  { %9190 = vst [vmem:[#allocation42_spill] sm:$0xff] %v7294_v24  ;;  %3403 = vmatprep.mubr.f32.mxu0 %v3047_v4  ;;  %v3162_v42 = vpop.f32.mrf.mxu0  ;;  %v7302_v19 = vld [vmem:[#allocation2 + $0x369] sm:$0xff] }
 0x3ac   :  { %v1930_v16 = vpop.f32.mrf.mxu1  ;;  %2779 = vmatmul.mubr.f32.gmra.mxu1 %v3042_v36  ;;  %9193 = vst [vmem:[#allocation45_spill] sm:$0xff] %v7302_v19  ;;  %v2984_v42 = vld [vmem:[#allocation2 + $0x3a7] sm:$0xff] }
 0x3ad   :  { %v7299_v9 = vadd.f32 %v2315_v41, %v1930_v16  ;;  %2783 = vmatprep.mubr.f32.mxu1 %v7297_v38  ;;  %v3165_v36 = vpop.f32.mrf.mxu0  ;;  %v3048_v16 = vld [vmem:[#allocation2 + $0x3a8] sm:$0xff]  ;;  %v2006_v41 = vadd.f32 %v6997_v28, %v7042_v33 }
 0x3ae   :  { %v1932_v39 = vpop.f32.mrf.mxu1  ;;  %3404 = vmatmul.mubr.f32.gmra.mxu0 %v2983_v1  ;;  %v3049_v1 = vld [vmem:[#allocation2 + $0x3b0] sm:$0xff] }
 0x3af   :  { %9192 = vst [vmem:[#allocation44_spill] sm:$0xff] %v7299_v9  ;;  %3408 = vmatprep.mubr.f32.mxu0 %v3048_v16  ;;  %v3167_v9 = vpop.f32.mrf.mxu0  ;;  %v2985_v28 = vld [vmem:[#allocation2 + $0x3af] sm:$0xff] }
 0x3b0   :  { %v1935_v24 = vpop.f32.mrf.mxu1  ;;  %2784 = vmatmul.mubr.f32.gmra.mxu1 %v3043_v26  ;;  %v7309_v26 = vld [vmem:[#allocation2 + $0x371] sm:$0xff]  ;;  %v7314_v33 = vld [vmem:[#allocation2 + $0x389] sm:$0xff] }
 0x3b1   :  { %v7304_v11 = vadd.f32 %v2320_v61, %v1935_v24  ;;  %2788 = vmatprep.mubr.f32.mxu1 %v7302_v19  ;;  %9195 = vst [vmem:[#allocation47_spill] sm:$0xff] %v7309_v26  ;;  %v3170_v43 = vpop.f32.mrf.mxu0  ;;  %v2011_v61 = vadd.f32 %v7002_v13, %v7044_v31  ;;  %9196 = vst [vmem:[#allocation48_spill] sm:$0xff] %v7314_v33  ;;  %v7317_v19 = vld [vmem:[#allocation2 + $0x391] sm:$0xff] }
 0x3b2   :  { %v1937_v50 = vpop.f32.mrf.mxu1  ;;  %3409 = vmatmul.mubr.f32.gmra.mxu0 %v2984_v42 }
 0x3b3   :  { %9194 = vst [vmem:[#allocation46_spill] sm:$0xff] %v7304_v11  ;;  %3413 = vmatprep.mubr.f32.mxu0 %v3049_v1  ;;  %v3172_v50 = vpop.f32.mrf.mxu0 }
 0x3b4   :  { %v2550_v39 = vpop.f32.mrf.mxu1  ;;  %2789 = vmatmul.mubr.f32.gmra.mxu1 %v3044_v7 }
 0x3b5   :  { %v2869_v38 = vadd.f32 %v2550_v39, %v2006_v41  ;;  %2793 = vmatprep.mubr.f32.mxu1 %v7309_v26  ;;  %v3050_v41 = vld [vmem:[#allocation2 + $0x3c8] sm:$0xff] }
 0x3b6   :  { %v2552_v24 = vpop.f32.mrf.mxu1  ;;  %v3175_v9 = vpop.f32.mrf.mxu0  ;;  %3414 = vmatmul.mubr.f32.gmra.mxu0 %v2985_v28 }
 0x3b7   :  { %3418 = vmatprep.mubr.f32.mxu0 %v3050_v41  ;;  %v2986_v24 = vld [vmem:[#allocation2 + $0x3c7] sm:$0xff] }
 0x3b8   :  { %v2555_v11 = vpop.f32.mrf.mxu1  ;;  %2794 = vmatmul.mubr.f32.gmra.mxu1 %v3045_v12  ;;  %v3177_v42 = vpop.f32.mrf.mxu0  ;;  %v3051_v12 = vld [vmem:[#allocation2 + $0x3d0] sm:$0xff] }
 0x3b9   :  { %v2870_v7 = vadd.f32 %v2555_v11, %v2011_v61  ;;  %2798 = vmatprep.mubr.f32.mxu1 %v7314_v33  ;;  %v7321_v61 = vadd.f32 %v3160_v44, %v2869_v38  ;;  %v7323_v42 = vld [vmem:[#allocation2 + $0x3a9] sm:$0xff] }
 0x3ba   :  { %v2557_v39 = vpop.f32.mrf.mxu1  ;;  %v3180_v31 = vpop.f32.mrf.mxu0  ;;  %3419 = vmatmul.mubr.f32.gmra.mxu0 %v2986_v24  ;;  %v2988_v44 = vld [vmem:[#allocation2 + $0x3e7] sm:$0xff] }
 0x3bb   :  { %3423 = vmatprep.mubr.f32.mxu0 %v3051_v12  ;;  %9197 = vst [vmem:[#allocation49_spill] sm:$0xff] %v7321_v61  ;;  %v2987_v39 = vld [vmem:[#allocation2 + $0x3cf] sm:$0xff]  ;;  %v7327_v24 = vadd.f32 %v3165_v36, %v2870_v7 }
 0x3bc   :  { %v2560_v26 = vpop.f32.mrf.mxu1  ;;  %2799 = vmatmul.mubr.f32.gmra.mxu1 %v3046_v22  ;;  %v3182_v50 = vpop.f32.mrf.mxu0  ;;  %v2989_v7 = vld [vmem:[#allocation2 + $0x3ef] sm:$0xff] }
 0x3bd   :  { %v2871_v13 = vadd.f32 %v2560_v26, %v7046_v58  ;;  %2803 = vmatprep.mubr.f32.mxu1 %v7317_v19  ;;  %v3052_v58 = vld [vmem:[#allocation2 + $0x3e8] sm:$0xff]  ;;  %9198 = vst [vmem:[#allocation50_spill] sm:$0xff] %v7327_v24  ;;  %v7329_v50 = vld [vmem:[#allocation2 + $0x3b1] sm:$0xff] }
 0x3be   :  { %v2562_v11 = vpop.f32.mrf.mxu1  ;;  %v3185_v33 = vpop.f32.mrf.mxu0  ;;  %3424 = vmatmul.mubr.f32.gmra.mxu0 %v2987_v39 }
 0x3bf   :  { %3428 = vmatprep.mubr.f32.mxu0 %v3052_v58  ;;  %v7333_v39 = vadd.f32 %v3170_v43, %v2871_v13  ;;  %v2990_v13 = vld [vmem:[#allocation2 + $0x407] sm:$0xff] }
 0x3c0   :  { %v2565_v28 = vpop.f32.mrf.mxu1  ;;  %2804 = vmatmul.mubr.f32.gmra.mxu1 %v3047_v4  ;;  %v3187_v11 = vpop.f32.mrf.mxu0 }
 0x3c1   :  { %v2872_v22 = vadd.f32 %v2565_v28, %v7048_v10  ;;  %2808 = vmatprep.mubr.f32.mxu1 %v7323_v42  ;;  %v3053_v10 = vld [vmem:[#allocation2 + $0x3f0] sm:$0xff]  ;;  %9199 = vst [vmem:[#allocation51_spill] sm:$0xff] %v7333_v39 }
 0x3c2   :  { %v2567_v26 = vpop.f32.mrf.mxu1  ;;  %v3190_v61 = vpop.f32.mrf.mxu0  ;;  %3429 = vmatmul.mubr.f32.gmra.mxu0 %v2988_v44  ;;  %v7335_v11 = vld [vmem:[#allocation2 + $0x3c9] sm:$0xff] }
 0x3c3   :  { %3433 = vmatprep.mubr.f32.mxu0 %v3053_v10  ;;  %v7339_v44 = vadd.f32 %v3175_v9, %v2872_v22  ;;  %v2991_v22 = vld [vmem:[#allocation2 + $0x40f] sm:$0xff] }
 0x3c4   :  { %v2570_v38 = vpop.f32.mrf.mxu1  ;;  %2809 = vmatmul.mubr.f32.gmra.mxu1 %v3048_v16  ;;  %v3192_v26 = vpop.f32.mrf.mxu0 }
 0x3c5   :  { %v2873_v4 = vadd.f32 %v2570_v38, %v7050_v56  ;;  %2813 = vmatprep.mubr.f32.mxu1 %v7329_v50  ;;  %v3054_v56 = vld [vmem:[#allocation2 + $0x408] sm:$0xff]  ;;  %9200 = vst [vmem:[#allocation52_spill] sm:$0xff] %v7339_v44  ;;  %v7341_v26 = vld [vmem:[#allocation2 + $0x3d1] sm:$0xff] }
 0x3c6   :  { %v2572_v28 = vpop.f32.mrf.mxu1  ;;  %v3195_v24 = vpop.f32.mrf.mxu0  ;;  %3434 = vmatmul.mubr.f32.gmra.mxu0 %v2989_v7 }
 0x3c7   :  { %3438 = vmatprep.mubr.f32.mxu0 %v3054_v56  ;;  %v7345_v7 = vadd.f32 %v3180_v31, %v2873_v4  ;;  %v2992_v4 = vld [vmem:[#allocation2 + $0x427] sm:$0xff] }
 0x3c8   :  { %v2575_v36 = vpop.f32.mrf.mxu1  ;;  %2814 = vmatmul.mubr.f32.gmra.mxu1 %v3049_v1  ;;  %v3197_v28 = vpop.f32.mrf.mxu0 }
 0x3c9   :  { %v2874_v16 = vadd.f32 %v2575_v36, %v7052_v47  ;;  %2818 = vmatprep.mubr.f32.mxu1 %v7335_v11  ;;  %v3055_v47 = vld [vmem:[#allocation2 + $0x410] sm:$0xff]  ;;  %9201 = vst [vmem:[#allocation53_spill] sm:$0xff] %v7345_v7 }
 0x3ca   :  { %v2577_v38 = vpop.f32.mrf.mxu1  ;;  %v3200_v39 = vpop.f32.mrf.mxu0  ;;  %3439 = vmatmul.mubr.f32.gmra.mxu0 %v2990_v13  ;;  %v7347_v28 = vld [vmem:[#allocation2 + $0x3e9] sm:$0xff] }
 0x3cb   :  { %3443 = vmatprep.mubr.f32.mxu0 %v3055_v47  ;;  %v7351_v13 = vadd.f32 %v3185_v33, %v2874_v16  ;;  %v2993_v16 = vld [vmem:[#allocation2 + $0x42f] sm:$0xff] }
 0x3cc   :  { %v2580_v43 = vpop.f32.mrf.mxu1  ;;  %2819 = vmatmul.mubr.f32.gmra.mxu1 %v3050_v41  ;;  %v3202_v38 = vpop.f32.mrf.mxu0 }
 0x3cd   :  { %v2875_v1 = vadd.f32 %v2580_v43, %v7054_v20  ;;  %2823 = vmatprep.mubr.f32.mxu1 %v7341_v26  ;;  %v3056_v20 = vld [vmem:[#allocation2 + $0x428] sm:$0xff]  ;;  %9202 = vst [vmem:[#allocation54_spill] sm:$0xff] %v7351_v13  ;;  %v7353_v38 = vld [vmem:[#allocation2 + $0x3f1] sm:$0xff] }
 0x3ce   :  { %v2582_v36 = vpop.f32.mrf.mxu1  ;;  %v3205_v44 = vpop.f32.mrf.mxu0  ;;  %3444 = vmatmul.mubr.f32.gmra.mxu0 %v2991_v22 }
 0x3cf   :  { %3448 = vmatprep.mubr.f32.mxu0 %v3056_v20  ;;  %v7357_v22 = vadd.f32 %v3190_v61, %v2875_v1  ;;  %v2994_v1 = vld [vmem:[#allocation2 + $0x447] sm:$0xff] }
 0x3d0   :  { %v2585_v9 = vpop.f32.mrf.mxu1  ;;  %2824 = vmatmul.mubr.f32.gmra.mxu1 %v3051_v12  ;;  %v3207_v36 = vpop.f32.mrf.mxu0 }
 0x3d1   :  { %v2876_v41 = vadd.f32 %v2585_v9, %v7056_v18  ;;  %2828 = vmatprep.mubr.f32.mxu1 %v7347_v28  ;;  %v3057_v18 = vld [vmem:[#allocation2 + $0x430] sm:$0xff]  ;;  %9203 = vst [vmem:[#allocation55_spill] sm:$0xff] %v7357_v22 }
 0x3d2   :  { %v2587_v43 = vpop.f32.mrf.mxu1  ;;  %v3210_v7 = vpop.f32.mrf.mxu0  ;;  %3449 = vmatmul.mubr.f32.gmra.mxu0 %v2992_v4  ;;  %v7359_v36 = vld [vmem:[#allocation2 + $0x409] sm:$0xff] }
 0x3d3   :  { %3453 = vmatprep.mubr.f32.mxu0 %v3057_v18  ;;  %v7363_v4 = vadd.f32 %v3195_v24, %v2876_v41  ;;  %v2995_v41 = vld [vmem:[#allocation2 + $0x44f] sm:$0xff] }
 0x3d4   :  { %v2590_v31 = vpop.f32.mrf.mxu1  ;;  %2829 = vmatmul.mubr.f32.gmra.mxu1 %v3052_v58  ;;  %v3212_v43 = vpop.f32.mrf.mxu0 }
 0x3d5   :  { %v2877_v12 = vadd.f32 %v2590_v31, %v7058_v51  ;;  %2833 = vmatprep.mubr.f32.mxu1 %v7353_v38  ;;  %v3058_v51 = vld [vmem:[#allocation2 + $0x448] sm:$0xff]  ;;  %9204 = vst [vmem:[#allocation56_spill] sm:$0xff] %v7363_v4  ;;  %v7365_v43 = vld [vmem:[#allocation2 + $0x411] sm:$0xff] }
 0x3d6   :  { %v2592_v9 = vpop.f32.mrf.mxu1  ;;  %v3215_v13 = vpop.f32.mrf.mxu0  ;;  %3454 = vmatmul.mubr.f32.gmra.mxu0 %v2993_v16 }
 0x3d7   :  { %3458 = vmatprep.mubr.f32.mxu0 %v3058_v51  ;;  %v7369_v16 = vadd.f32 %v3200_v39, %v2877_v12 }
 0x3d8   :  { %v2595_v33 = vpop.f32.mrf.mxu1  ;;  %2834 = vmatmul.mubr.f32.gmra.mxu1 %v3053_v10  ;;  %v3217_v9 = vpop.f32.mrf.mxu0 }
 0x3d9   :  { %v2878_v58 = vadd.f32 %v2595_v33, %v7060_v37  ;;  %2838 = vmatprep.mubr.f32.mxu1 %v7359_v36  ;;  %v3059_v37 = vld [vmem:[#allocation2 + $0x450] sm:$0xff] }
 0x3da   :  { %v2597_v31 = vpop.f32.mrf.mxu1  ;;  %v3220_v22 = vpop.f32.mrf.mxu0  ;;  %3459 = vmatmul.mubr.f32.gmra.mxu0 %v2994_v1  ;;  %v7371_v9 = vld [vmem:[#allocation2 + $0x429] sm:$0xff] }
 0x3db   :  { %3463 = vmatprep.mubr.f32.mxu0 %v3059_v37  ;;  %v7376_v1 = vadd.f32 %v3205_v44, %v2878_v58  ;;  %v7385_v58 = vld [vmem:[#allocation2 + $0x449] sm:$0xff] }
 0x3dc   :  { %v2600_v61 = vpop.f32.mrf.mxu1  ;;  %2839 = vmatmul.mubr.f32.gmra.mxu1 %v3054_v56  ;;  %v3222_v31 = vpop.f32.mrf.mxu0 }
 0x3dd   :  { %v2879_v10 = vadd.f32 %v2600_v61, %v7062_v48  ;;  %2843 = vmatprep.mubr.f32.mxu1 %v7365_v43  ;;  %v2996_v61 = vld [vmem:[#allocation2 + $0x467] sm:$0xff] }
 0x3de   :  { %v2602_v33 = vpop.f32.mrf.mxu1  ;;  %v3225_v4 = vpop.f32.mrf.mxu0  ;;  %3464 = vmatmul.mubr.f32.gmra.mxu0 %v2995_v41 }
 0x3df   :  { %3468 = vmatprep.mubr.f32.mxu0 %v7230_v52  ;;  %v7378_v33 = vld [vmem:[#allocation2 + $0x431] sm:$0xff]  ;;  %v7383_v41 = vadd.f32 %v3210_v7, %v2879_v10 }
 0x3e0   :  { %v2605_v24 = vpop.f32.mrf.mxu1  ;;  %2844 = vmatmul.mubr.f32.gmra.mxu1 %v3055_v47  ;;  %v3227_v39 = vpop.f32.mrf.mxu0  ;;  %v3544_v7 = vld [vmem:[#allocation2 + $0x51] sm:$0xff] }
 0x3e1   :  { %v2880_v56 = vadd.f32 %v2605_v24, %v7064_v6  ;;  %2848 = vmatprep.mubr.f32.mxu1 %v7371_v9  ;;  %v2997_v24 = vld [vmem:[#allocation2 + $0x46f] sm:$0xff] }
 0x3e2   :  { %v2607_v48 = vpop.f32.mrf.mxu1  ;;  %v3230_v31 = vpop.f32.mrf.mxu0  ;;  %3469 = vmatmul.mubr.f32.gmra.mxu0 %v2996_v61  ;;  %v7391_v10 = vld [vmem:[#allocation2 + $0x451] sm:$0xff] }
 0x3e3   :  { %3473 = vmatprep.mubr.f32.mxu0 %v7230_v52 }
 0x3e4   :  { %v2610_v12 = vpop.f32.mrf.mxu1  ;;  %2849 = vmatmul.mubr.f32.gmra.mxu1 %v3056_v20  ;;  %v3232_v48 = vpop.f32.mrf.mxu0 }
 0x3e5   :  { %v2881_v47 = vadd.f32 %v2610_v12, %v7066_v5  ;;  %2853 = vmatprep.mubr.f32.mxu1 %v7378_v33  ;;  %v3543_v5 = vld [vmem:[#allocation2 + $0x49] sm:$0xff]  ;;  %v7389_v12 = vadd.f32 %v3215_v13, %v2880_v56  ;;  %v3546_v56 = vld [vmem:[#allocation2 + $0x71] sm:$0xff] }
 0x3e6   :  { %v2612_v6 = vpop.f32.mrf.mxu1  ;;  %v3235_v39 = vpop.f32.mrf.mxu0  ;;  %3474 = vmatmul.mubr.f32.gmra.mxu0 %v2997_v24 }
 0x3e7   :  { %5093 = vmatprep.mubr.f32.mxu0 %v3543_v5  ;;  %9205 = vst [vmem:[#allocation57_spill] sm:$0xff] %v7389_v12  ;;  %v3547_v12 = vld [vmem:[#allocation2 + $0x89] sm:$0xff] }
 0x3e8   :  { %v2615_v44 = vpop.f32.mrf.mxu1  ;;  %2854 = vmatmul.mubr.f32.gmra.mxu1 %v3057_v18  ;;  %v3237_v52 = vpop.f32.mrf.mxu0 }
 0x3e9   :  { %v2882_v20 = vadd.f32 %v2615_v44, %v7068_v62  ;;  %2858 = vmatprep.mubr.f32.mxu1 %v7385_v58  ;;  %v3545_v62 = vld [vmem:[#allocation2 + $0x69] sm:$0xff]  ;;  %v7395_v44 = vadd.f32 %v3220_v22, %v2881_v47  ;;  %v3548_v22 = vld [vmem:[#allocation2 + $0x91] sm:$0xff] }
 0x3ea   :  { %v2617_v61 = vpop.f32.mrf.mxu1  ;;  %v3240_v48 = vpop.f32.mrf.mxu0  ;;  %5094 = vmatmul.mubr.f32.vlgmr.msra.gmra.mxu0 %v3544_v7  ;;  %v3553_v47 = vld [vmem:[#allocation2 + $0xe9] sm:$0xff] }
 0x3eb   :  { %5096 = vmatprep.mubr.f32.mxu0 %v3545_v62  ;;  %9206 = vst [vmem:[#allocation58_spill] sm:$0xff] %v7395_v44  ;;  %v3551_v61 = vld [vmem:[#allocation2 + $0xc9] sm:$0xff]  ;;  %v3552_v62 = vld [vmem:[#allocation2 + $0xd1] sm:$0xff] }
 0x3ec   :  { %v2620_v6 = vpop.f32.mrf.mxu1  ;;  %2859 = vmatmul.mubr.f32.gmra.mxu1 %v3058_v51  ;;  %v3242_v5 = vpop.f32.mrf.mxu0  ;;  %v3549_v44 = vld [vmem:[#allocation2 + $0xa9] sm:$0xff] }
 0x3ed   :  { %v2883_v18 = vadd.f32 %v2620_v6, %v7073_v55  ;;  %2863 = vmatprep.mubr.f32.mxu1 %v7391_v10  ;;  %v7398_v6 = vadd.f32 %v3225_v4, %v2882_v20  ;;  %v3550_v20 = vld [vmem:[#allocation2 + $0xb1] sm:$0xff] }
 0x3ee   :  { %v2622_v24 = vpop.f32.mrf.mxu1  ;;  %v3245_v52 = vpop.f32.mrf.mxu0  ;;  %5097 = vmatmul.mubr.f32.gmra.mxu0 %v3546_v56  ;;  %v3554_v56 = vld [vmem:[#allocation2 + $0xf1] sm:$0xff] }
 0x3ef   :  { %5099 = vmatprep.mubr.f32.mxu0 %v3547_v12 }
 0x3f0   :  { %v2625_v13 = vpop.f32.mrf.mxu1  ;;  %2864 = vmatmul.mubr.f32.gmra.mxu1 %v3059_v37  ;;  %v3247_v7 = vpop.f32.mrf.mxu0 }
 0x3f1   :  { %v2884_v51 = vadd.f32 %v2625_v13, %v7081_v57  ;;  %5105 = vmatprep.mubr.f32.mxu1 %v3551_v61  ;;  %v7401_v13 = vadd.f32 %v3230_v31, %v2883_v18  ;;  %v3555_v61 = vld [vmem:[#allocation2 + $0x109] sm:$0xff] }
 0x3f2   :  { %v2627_v55 = vpop.f32.mrf.mxu1  ;;  %v3250_v5 = vpop.f32.mrf.mxu0  ;;  %5100 = vmatmul.mubr.f32.gmra.mxu0 %v3548_v22  ;;  %v3556_v22 = vld [vmem:[#allocation2 + $0x111] sm:$0xff]  ;;  %v3557_v31 = vld [vmem:[#allocation2 + $0x129] sm:$0xff] }
 0x3f3   :  { %5102 = vmatprep.mubr.f32.mxu0 %v3549_v44 }
 0x3f4   :  { %v2630_v24 = vpop.f32.mrf.mxu1  ;;  %5106 = vmatmul.mubr.f32.vlgmr.msra.gmra.mxu1 %v3552_v62  ;;  %v3252_v12 = vpop.f32.mrf.mxu0  ;;  %v7404_v62 = vadd.f32 %v3235_v39, %v2884_v51 }
 0x3f5   :  { %v2885_v37 = vadd.f32 %v2630_v24, %v7091_v25  ;;  %5108 = vmatprep.mubr.f32.mxu1 %v3553_v47 }
 0x3f6   :  { %v2632_v57 = vpop.f32.mrf.mxu1  ;;  %v3255_v7 = vpop.f32.mrf.mxu0  ;;  %5103 = vmatmul.mubr.f32.gmra.mxu0 %v3550_v20  ;;  %v3559_v20 = vld [vmem:[#allocation2 + $0x149] sm:$0xff] }
 0x3f7   :  { %v7407_v12 = vadd.f32 %v3240_v48, %v2885_v37 }
 0x3f8   :  { %v2635_v4 = vpop.f32.mrf.mxu1  ;;  %5109 = vmatmul.mubr.f32.gmra.mxu1 %v3554_v56  ;;  %v3257_v24 = vpop.f32.mrf.mxu0 }
 0x3f9   :  { %v2886_v55 = vadd.f32 %v2635_v4, %v7101_v14  ;;  %5111 = vmatprep.mubr.f32.mxu1 %v3555_v61  ;;  %v3558_v14 = vld [vmem:[#allocation2 + $0x131] sm:$0xff] }
 0x3fa   :  { %v2637_v25 = vpop.f32.mrf.mxu1  ;;  %v3260_v47 = vpop.f32.mrf.mxu0 }
 0x3fb   :  { %v7410_v25 = vadd.f32 %v3245_v52, %v2886_v55 }
 0x3fc   :  { %v2640_v44 = vpop.f32.mrf.mxu1  ;;  %5112 = vmatmul.mubr.f32.gmra.mxu1 %v3556_v22  ;;  %v3262_v56 = vpop.f32.mrf.mxu0  ;;  %v3560_v22 = vld [vmem:[#allocation2 + $0x151] sm:$0xff] }
 0x3fd   :  { %v2887_v18 = vadd.f32 %v2640_v44, %v7112_v17  ;;  %5114 = vmatprep.mubr.f32.mxu1 %v3557_v31  ;;  %v3561_v44 = vld [vmem:[#allocation2 + $0x169] sm:$0xff] }
 0x3fe   :  { %v2642_v57 = vpop.f32.mrf.mxu1  ;;  %v3265_v51 = vpop.f32.mrf.mxu0 }
 0x3ff   :  { %v7413_v57 = vadd.f32 %v3250_v5, %v2887_v18 }
 0x400   :  { %v2645_v4 = vpop.f32.mrf.mxu1  ;;  %5115 = vmatmul.mubr.f32.gmra.mxu1 %v3558_v14  ;;  %v3267_v24 = vpop.f32.mrf.mxu0  ;;  %v3562_v14 = vld [vmem:[#allocation2 + $0x171] sm:$0xff] }
 0x401   :  { %v2888_v39 = vadd.f32 %v2645_v4, %v7124_v60  ;;  %5117 = vmatprep.mubr.f32.mxu1 %v3559_v20  ;;  %v3563_v4 = vld [vmem:[#allocation2 + $0x189] sm:$0xff] }
 0x402   :  { %v2647_v61 = vpop.f32.mrf.mxu1  ;;  %v3270_v37 = vpop.f32.mrf.mxu0 }
 0x403   :  { %v7416_v61 = vadd.f32 %v3255_v7, %v2888_v39 }
 0x404   :  { %v2650_v17 = vpop.f32.mrf.mxu1  ;;  %5118 = vmatmul.mubr.f32.gmra.mxu1 %v3560_v22  ;;  %v3272_v56 = vpop.f32.mrf.mxu0  ;;  %v3564_v22 = vld [vmem:[#allocation2 + $0x191] sm:$0xff] }
 0x405   :  { %v2889_v48 = vadd.f32 %v2650_v17, %v7136_v8  ;;  %5120 = vmatprep.mubr.f32.mxu1 %v3561_v44  ;;  %v3565_v17 = vld [vmem:[#allocation2 + $0x1a9] sm:$0xff] }
 0x406   :  { %v2652_v31 = vpop.f32.mrf.mxu1  ;;  %v3275_v55 = vpop.f32.mrf.mxu0 }
 0x407   :  { %v7419_v31 = vadd.f32 %v3260_v47, %v2889_v48 }
 0x408   :  { %v2655_v60 = vpop.f32.mrf.mxu1  ;;  %5121 = vmatmul.mubr.f32.gmra.mxu1 %v3562_v14  ;;  %v3277_v24 = vpop.f32.mrf.mxu0  ;;  %v3566_v14 = vld [vmem:[#allocation2 + $0x1b1] sm:$0xff] }
 0x409   :  { %v2890_v52 = vadd.f32 %v2655_v60, %v7148_v45  ;;  %5123 = vmatprep.mubr.f32.mxu1 %v3563_v4  ;;  %v3567_v60 = vld [vmem:[#allocation2 + $0x1c9] sm:$0xff] }
 0x40a   :  { %v2657_v20 = vpop.f32.mrf.mxu1  ;;  %v3280_v18 = vpop.f32.mrf.mxu0 }
 0x40b   :  { %v7422_v20 = vadd.f32 %v3265_v51, %v2890_v52 }
 0x40c   :  { %v2660_v8 = vpop.f32.mrf.mxu1  ;;  %5124 = vmatmul.mubr.f32.gmra.mxu1 %v3564_v22  ;;  %v3282_v56 = vpop.f32.mrf.mxu0  ;;  %v3568_v22 = vld [vmem:[#allocation2 + $0x1d1] sm:$0xff] }
 0x40d   :  { %v2891_v5 = vadd.f32 %v2660_v8, %v7160_v29  ;;  %5126 = vmatprep.mubr.f32.mxu1 %v3565_v17  ;;  %v3569_v8 = vld [vmem:[#allocation2 + $0x1e9] sm:$0xff] }
 0x40e   :  { %v2662_v44 = vpop.f32.mrf.mxu1  ;;  %v3285_v39 = vpop.f32.mrf.mxu0 }
 0x40f   :  { %v7425_v44 = vadd.f32 %v3270_v37, %v2891_v5 }
 0x410   :  { %v2665_v45 = vpop.f32.mrf.mxu1  ;;  %5127 = vmatmul.mubr.f32.gmra.mxu1 %v3566_v14  ;;  %v3287_v24 = vpop.f32.mrf.mxu0  ;;  %v3570_v14 = vld [vmem:[#allocation2 + $0x1f1] sm:$0xff] }
 0x411   :  { %v2892_v7 = vadd.f32 %v2665_v45, %v7172_v15  ;;  %5129 = vmatprep.mubr.f32.mxu1 %v3567_v60  ;;  %v3571_v45 = vld [vmem:[#allocation2 + $0x209] sm:$0xff] }
 0x412   :  { %v2667_v4 = vpop.f32.mrf.mxu1  ;;  %v3290_v48 = vpop.f32.mrf.mxu0 }
 0x413   :  { %v3573_v4 = vld [vmem:[#allocation2 + $0x229] sm:$0xff]  ;;  %v7428_v24 = vadd.f32 %v3275_v55, %v2892_v7 }
 0x414   :  { %v2670_v29 = vpop.f32.mrf.mxu1  ;;  %5130 = vmatmul.mubr.f32.gmra.mxu1 %v3568_v22  ;;  %v3292_v56 = vpop.f32.mrf.mxu0 }
 0x415   :  { %v2893_v47 = vadd.f32 %v2670_v29, %v7181_v54  ;;  %5132 = vmatprep.mubr.f32.mxu1 %v3569_v8  ;;  %v3572_v54 = vld [vmem:[#allocation2 + $0x211] sm:$0xff] }
 0x416   :  { %v2672_v17 = vpop.f32.mrf.mxu1  ;;  %v3295_v52 = vpop.f32.mrf.mxu0  ;;  %v3574_v8 = vld [vmem:[#allocation2 + $0x231] sm:$0xff] }
 0x417   :  { %v7431_v56 = vadd.f32 %v3280_v18, %v2893_v47 }
 0x418   :  { %v2675_v15 = vpop.f32.mrf.mxu1  ;;  %5133 = vmatmul.mubr.f32.gmra.mxu1 %v3570_v14  ;;  %v3297_v22 = vpop.f32.mrf.mxu0 }
 0x419   :  { %v2894_v51 = vadd.f32 %v2675_v15, %v7186_v46  ;;  %5135 = vmatprep.mubr.f32.mxu1 %v3571_v45  ;;  %v3575_v15 = vld [vmem:[#allocation2 + $0x289] sm:$0xff] }
 0x41a   :  { %v2677_v60 = vpop.f32.mrf.mxu1  ;;  %v3300_v5 = vpop.f32.mrf.mxu0 }
 0x41b   :  { %v7434_v60 = vadd.f32 %v3285_v39, %v2894_v51 }
 0x41c   :  { %v2680_v29 = vpop.f32.mrf.mxu1  ;;  %5136 = vmatmul.mubr.f32.gmra.mxu1 %v3572_v54  ;;  %v3302_v14 = vpop.f32.mrf.mxu0  ;;  %v3576_v54 = vld [vmem:[#allocation2 + $0x291] sm:$0xff] }
 0x41d   :  { %v2895_v37 = vadd.f32 %v2680_v29, %v7191_v23  ;;  %5138 = vmatprep.mubr.f32.mxu1 %v3573_v4  ;;  %v3577_v4 = vld [vmem:[#allocation2 + $0x2a9] sm:$0xff]  ;;  %v3578_v14 = vld [vmem:[#allocation2 + $0x2b1] sm:$0xff] }
 0x41e   :  { %v2682_v17 = vpop.f32.mrf.mxu1  ;;  %v3305_v55 = vpop.f32.mrf.mxu0 }
 0x41f   :  { %v7437_v17 = vadd.f32 %v3290_v48, %v2895_v37 }
 0x420   :  { %v2685_v46 = vpop.f32.mrf.mxu1  ;;  %5139 = vmatmul.mubr.f32.gmra.mxu1 %v3574_v8  ;;  %v3307_v22 = vpop.f32.mrf.mxu0 }
 0x421   :  { %v2896_v45 = vadd.f32 %v2685_v46, %v7195_v53  ;;  %5141 = vmatprep.mubr.f32.mxu1 %v3575_v15 }
 0x422   :  { %v2687_v7 = vpop.f32.mrf.mxu1  ;;  %v3310_v18 = vpop.f32.mrf.mxu0 }
 0x423   :  { %v7441_v15 = vadd.f32 %v3295_v52, %v2896_v45 }
 0x424   :  { %v2690_v23 = vpop.f32.mrf.mxu1  ;;  %5142 = vmatmul.mubr.f32.gmra.mxu1 %v3576_v54  ;;  %v3312_v8 = vpop.f32.mrf.mxu0 }
 0x425   :  { %v2897_v29 = vadd.f32 %v2690_v23, %v7198_v30  ;;  %5144 = vmatprep.mubr.f32.mxu1 %v3577_v4 }
 0x426   :  { %v2692_v47 = vpop.f32.mrf.mxu1  ;;  %v3315_v39 = vpop.f32.mrf.mxu0 }
 0x427   :  { %v7446_v54 = vadd.f32 %v3300_v5, %v2897_v29 }
 0x428   :  { %v2695_v53 = vpop.f32.mrf.mxu1  ;;  %5145 = vmatmul.mubr.f32.gmra.mxu1 %v3578_v14  ;;  %v3317_v7 = vpop.f32.mrf.mxu0  ;;  %v9208_v14 = vld [vmem:[#allocation41_spill] sm:$0xff] }
 0x429   :  { %v2898_v46 = vadd.f32 %v2695_v53, %v7200_v21  ;;  %5147 = vmatprep.mubr.f32.mxu1 %v7252_v59 }
 0x42a   :  { %v2697_v51 = vpop.f32.mrf.mxu1  ;;  %v3320_v48 = vpop.f32.mrf.mxu0 }
 0x42b   :  { %v7451_v4 = vadd.f32 %v3305_v55, %v2898_v46  ;;  %v9209_v51 = vld [vmem:[#allocation43_spill] sm:$0xff] }
 0x42c   :  { %v2700_v22 = vpop.f32.mrf.mxu1  ;;  %5148 = vmatmul.mubr.f32.gmra.mxu1 %v7257_v49  ;;  %v3322_v23 = vpop.f32.mrf.mxu0 }
 0x42d   :  { %v2899_v30 = vadd.f32 %v2700_v22, %v7202_v3  ;;  %5150 = vmatprep.mubr.f32.mxu1 %v7262_v40  ;;  %v9211_v22 = vld [vmem:[#allocation45_spill] sm:$0xff] }
 0x42e   :  { %v2702_v37 = vpop.f32.mrf.mxu1  ;;  %v3325_v52 = vpop.f32.mrf.mxu0 }
 0x42f   :  { %v7456_v47 = vadd.f32 %v3310_v18, %v2899_v30 }
 0x430   :  { %v2705_v21 = vpop.f32.mrf.mxu1  ;;  %5151 = vmatmul.mubr.f32.gmra.mxu1 %v7267_v35  ;;  %v3327_v49 = vpop.f32.mrf.mxu0 }
 0x431   :  { %v2900_v59 = vadd.f32 %v2705_v21, %v7204_v2  ;;  %5153 = vmatprep.mubr.f32.mxu1 %v7272_v63  ;;  %v9207_v63 = vld [vmem:[#allocation17_spill] sm:$0xff]  ;;  %v9212_v21 = vld [vmem:[#allocation47_spill] sm:$0xff] }
 0x432   :  { %v2707_v45 = vpop.f32.mrf.mxu1  ;;  %v3330_v5 = vpop.f32.mrf.mxu0 }
 0x433   :  { %v7461_v46 = vadd.f32 %v3315_v39, %v2900_v59  ;;  %v9213_v45 = vld [vmem:[#allocation23_spill] sm:$0xff]  ;;  %v9214_v59 = vld [vmem:[#allocation48_spill] sm:$0xff] }
 0x434   :  { %v2710_v3 = vpop.f32.mrf.mxu1  ;;  %5154 = vmatmul.mubr.f32.gmra.mxu1 %v7277_v32  ;;  %v3332_v35 = vpop.f32.mrf.mxu0 }
 0x435   :  { %v2901_v40 = vadd.f32 %v2710_v3, %v7206_v27  ;;  %5156 = vmatprep.mubr.f32.mxu1 %v7282_v0  ;;  %v9210_v0 = vld [vmem:[#allocation24_spill] sm:$0xff] }
 0x436   :  { %v2712_v29 = vpop.f32.mrf.mxu1  ;;  %v3335_v55 = vpop.f32.mrf.mxu0 }
 0x437   :  { %v7466_v37 = vadd.f32 %v3320_v48, %v2901_v40 }
 0x438   :  { %v2715_v2 = vpop.f32.mrf.mxu1  ;;  %5157 = vmatmul.mubr.f32.gmra.mxu1 %v7287_v34  ;;  %v3337_v32 = vpop.f32.mrf.mxu0 }
 0x439   :  { %v2902_v8 = vadd.f32 %v2715_v2, %v9207_v63  ;;  %5159 = vmatprep.mubr.f32.mxu1 %v9208_v14  ;;  %v9215_v63 = vld [vmem:[#allocation29_spill] sm:$0xff] }
 0x43a   :  { %v2717_v53 = vpop.f32.mrf.mxu1  ;;  %v3340_v18 = vpop.f32.mrf.mxu0 }
 0x43b   :  { %v7471_v29 = vadd.f32 %v3325_v52, %v2902_v8 }
 0x43c   :  { %v2720_v27 = vpop.f32.mrf.mxu1  ;;  %5160 = vmatmul.mubr.f32.gmra.mxu1 %v9209_v51  ;;  %v3342_v34 = vpop.f32.mrf.mxu0  ;;  %v9216_v51 = vld [vmem:[#allocation31_spill] sm:$0xff] }
 0x43d   :  { %v2903_v7 = vadd.f32 %v2720_v27, %v9210_v0  ;;  %5162 = vmatprep.mubr.f32.mxu1 %v9211_v22 }
 0x43e   :  { %v2722_v30 = vpop.f32.mrf.mxu1  ;;  %v3345_v39 = vpop.f32.mrf.mxu0 }
 0x43f   :  { %v7476_v53 = vadd.f32 %v3330_v5, %v2903_v7 }
 0x440   :  { %v2725_v23 = vpop.f32.mrf.mxu1  ;;  %5163 = vmatmul.mubr.f32.gmra.mxu1 %v9212_v21  ;;  %v3347_v35 = vpop.f32.mrf.mxu0 }
 0x441   :  { %v2904_v49 = vadd.f32 %v2725_v23, %v9213_v45  ;;  %5165 = vmatprep.mubr.f32.mxu1 %v9214_v59 }
 0x442   :  { %v2727_v3 = vpop.f32.mrf.mxu1  ;;  %v3350_v48 = vpop.f32.mrf.mxu0 }
 0x443   :  { %v7481_v22 = vadd.f32 %v3335_v55, %v2904_v49 }
 0x444   :  { %v2730_v2 = vpop.f32.mrf.mxu1  ;;  %5166 = vmatmul.mubr.f32.gmra.mxu1 %v7317_v19  ;;  %v3352_v32 = vpop.f32.mrf.mxu0 }
 0x445   :  { %v2905_v14 = vadd.f32 %v2730_v2, %v9215_v63  ;;  %5168 = vmatprep.mubr.f32.mxu1 %v7323_v42  ;;  %v9217_v42 = vld [vmem:[#allocation32_spill] sm:$0xff] }
 0x446   :  { %v2732_v40 = vpop.f32.mrf.mxu1  ;;  %v3355_v52 = vpop.f32.mrf.mxu0 }
 0x447   :  { %v7486_v23 = vadd.f32 %v3340_v18, %v2905_v14 }
 0x448   :  { %v2735_v27 = vpop.f32.mrf.mxu1  ;;  %5169 = vmatmul.mubr.f32.gmra.mxu1 %v7329_v50  ;;  %v3357_v19 = vpop.f32.mrf.mxu0 }
 0x449   :  { %v2906_v0 = vadd.f32 %v2735_v27, %v9216_v51  ;;  %5171 = vmatprep.mubr.f32.mxu1 %v7335_v11  ;;  %v9218_v11 = vld [vmem:[#allocation15_spill] sm:$0xff] }
 0x44a   :  { %v2737_v8 = vpop.f32.mrf.mxu1  ;;  %v3360_v5 = vpop.f32.mrf.mxu0  ;;  %v3605_v27 = vld [vmem:[#allocation2 + $0x469] sm:$0xff]  ;;  %v3606_v19 = vld [vmem:[#allocation2 + $0x471] sm:$0xff] }
 0x44b   :  { %v7491_v59 = vadd.f32 %v3345_v39, %v2906_v0 }
 0x44c   :  { %v2740_v30 = vpop.f32.mrf.mxu1  ;;  %5172 = vmatmul.mubr.f32.gmra.mxu1 %v7341_v26  ;;  %v3362_v50 = vpop.f32.mrf.mxu0 }
 0x44d   :  { %v2907_v34 = vadd.f32 %v2740_v30, %v9217_v42  ;;  %5174 = vmatprep.mubr.f32.mxu1 %v7347_v28  ;;  %v9219_v28 = vld [vmem:[#allocation16_spill] sm:$0xff] }
 0x44e   :  { %v2742_v7 = vpop.f32.mrf.mxu1  ;;  %v3365_v55 = vpop.f32.mrf.mxu0 }
 0x44f   :  { %v7496_v63 = vadd.f32 %v3350_v48, %v2907_v34 }
 0x450   :  { %v2745_v21 = vpop.f32.mrf.mxu1  ;;  %5175 = vmatmul.mubr.f32.gmra.mxu1 %v7353_v38  ;;  %v3367_v26 = vpop.f32.mrf.mxu0 }
 0x451   :  { %v2908_v45 = vadd.f32 %v2745_v21, %v9218_v11  ;;  %5177 = vmatprep.mubr.f32.mxu1 %v7359_v36  ;;  %v9220_v36 = vld [vmem:[#allocation18_spill] sm:$0xff] }
 0x452   :  { %v2747_v49 = vpop.f32.mrf.mxu1  ;;  %v3370_v18 = vpop.f32.mrf.mxu0 }
 0x454   :  { %v2750_v3 = vpop.f32.mrf.mxu1  ;;  %5178 = vmatmul.mubr.f32.gmra.mxu1 %v7365_v43  ;;  %v3372_v38 = vpop.f32.mrf.mxu0  ;;  %v7501_v43 = vadd.f32 %v3355_v52, %v2908_v45 }
 0x455   :  { %v2909_v35 = vadd.f32 %v2750_v3, %v9219_v28  ;;  %5180 = vmatprep.mubr.f32.mxu1 %v7371_v9  ;;  %v9221_v9 = vld [vmem:[#allocation13_spill] sm:$0xff] }
 0x456   :  { %v2752_v2 = vpop.f32.mrf.mxu1  ;;  %v3375_v39 = vpop.f32.mrf.mxu0 }
 0x458   :  { %v2755_v14 = vpop.f32.mrf.mxu1  ;;  %5181 = vmatmul.mubr.f32.gmra.mxu1 %v7378_v33  ;;  %v3377_v51 = vpop.f32.mrf.mxu0  ;;  %v7505_v33 = vadd.f32 %v3360_v5, %v2909_v35  ;;  %v9224_v35 = vld [vmem:[#allocation21_spill] sm:$0xff] }
 0x459   :  { %v2910_v40 = vadd.f32 %v2755_v14, %v9220_v36  ;;  %5183 = vmatprep.mubr.f32.mxu1 %v7385_v58  ;;  %v9222_v58 = vld [vmem:[#allocation19_spill] sm:$0xff] }
 0x45a   :  { %v2757_v32 = vpop.f32.mrf.mxu1  ;;  %v3380_v8 = vpop.f32.mrf.mxu0 }
 0x45b   :  { %v7508_v21 = vadd.f32 %v3365_v55, %v2910_v40  ;;  %v9225_v55 = vld [vmem:[#allocation22_spill] sm:$0xff] }
 0x45c   :  { %v2760_v0 = vpop.f32.mrf.mxu1  ;;  %5184 = vmatmul.mubr.f32.gmra.mxu1 %v7391_v10  ;;  %v3382_v42 = vpop.f32.mrf.mxu0  ;;  %v9223_v10 = vld [vmem:[#allocation20_spill] sm:$0xff] }
 0x45d   :  { %v2911_v48 = vadd.f32 %v2760_v0, %v9221_v9  ;;  %5186 = vmatprep.mubr.f32.mxu1 %v3605_v27 }
 0x45e   :  { %v2762_v30 = vpop.f32.mrf.mxu1  ;;  %v3385_v50 = vpop.f32.mrf.mxu0 }
 0x45f   :  { %v7511_v28 = vadd.f32 %v3370_v18, %v2911_v48  ;;  %v9226_v18 = vld [vmem:[#allocation25_spill] sm:$0xff] }
 0x460   :  { %v2765_v34 = vpop.f32.mrf.mxu1  ;;  %5187 = vmatmul.mubr.f32.gmra.mxu1 %v3606_v19  ;;  %v3387_v11 = vpop.f32.mrf.mxu0 }
 0x461   :  { %v2912_v7 = vadd.f32 %v2765_v34, %v9222_v58 }
 0x462   :  { %v2767_v52 = vpop.f32.mrf.mxu1  ;;  %v3390_v26 = vpop.f32.mrf.mxu0 }
 0x463   :  { %v7514_v32 = vadd.f32 %v3375_v39, %v2912_v7  ;;  %v9227_v39 = vld [vmem:[#allocation26_spill] sm:$0xff] }
 0x464   :  { %v2770_v45 = vpop.f32.mrf.mxu1  ;;  %v3392_v2 = vpop.f32.mrf.mxu0 }
 0x465   :  { %v2913_v49 = vadd.f32 %v2770_v45, %v9223_v10 }
 0x466   :  { %v2772_v3 = vpop.f32.mrf.mxu1  ;;  %v3395_v14 = vpop.f32.mrf.mxu0 }
 0x467   :  { %v7517_v19 = vadd.f32 %v3380_v8, %v2913_v49  ;;  %v9228_v8 = vld [vmem:[#allocation27_spill] sm:$0xff] }
 0x468   :  { %v2775_v5 = vpop.f32.mrf.mxu1  ;;  %v3397_v27 = vpop.f32.mrf.mxu0 }
 0x469   :  { %v2914_v38 = vadd.f32 %v2775_v5, %v9224_v35 }
 0x46a   :  { %v2777_v36 = vpop.f32.mrf.mxu1  ;;  %v3400_v0 = vpop.f32.mrf.mxu0 }
 0x46b   :  { %v7520_v52 = vadd.f32 %v3385_v50, %v2914_v38  ;;  %v9229_v50 = vld [vmem:[#allocation28_spill] sm:$0xff] }
 0x46c   :  { %v2780_v51 = vpop.f32.mrf.mxu1  ;;  %v3402_v30 = vpop.f32.mrf.mxu0 }
 0x46d   :  { %v2915_v40 = vadd.f32 %v2780_v51, %v9225_v55 }
 0x46e   :  { %v2782_v9 = vpop.f32.mrf.mxu1  ;;  %v3405_v34 = vpop.f32.mrf.mxu0 }
 0x46f   :  { %v7523_v2 = vadd.f32 %v3390_v26, %v2915_v40  ;;  %v9231_v26 = vld [vmem:[#allocation30_spill] sm:$0xff] }
 0x470   :  { %v2785_v42 = vpop.f32.mrf.mxu1  ;;  %v3407_v11 = vpop.f32.mrf.mxu0 }
 0x471   :  { %v2916_v48 = vadd.f32 %v2785_v42, %v9226_v18 }
 0x472   :  { %v2787_v58 = vpop.f32.mrf.mxu1  ;;  %v3410_v10 = vpop.f32.mrf.mxu0 }
 0x473   :  { %v7526_v51 = vadd.f32 %v3395_v14, %v2916_v48  ;;  %v9233_v14 = vld [vmem:[#allocation14_spill] sm:$0xff] }
 0x474   :  { %v2790_v45 = vpop.f32.mrf.mxu1  ;;  %v3412_v5 = vpop.f32.mrf.mxu0 }
 0x475   :  { %v2917_v7 = vadd.f32 %v2790_v45, %v9227_v39 }
 0x476   :  { %v2792_v3 = vpop.f32.mrf.mxu1  ;;  %v3415_v36 = vpop.f32.mrf.mxu0 }
 0x477   :  { %v7529_v18 = vadd.f32 %v3400_v0, %v2917_v7  ;;  %v9235_v0 = vld [vmem:[#allocation33_spill] sm:$0xff] }
 0x478   :  { %v2795_v35 = vpop.f32.mrf.mxu1  ;;  %v3417_v55 = vpop.f32.mrf.mxu0 }
 0x479   :  { %v2918_v49 = vadd.f32 %v2795_v35, %v9228_v8  ;;  %9230 = vst [vmem:[#allocation17_spill] sm:$0xff] %v7529_v18 }
 0x47a   :  { %v2797_v27 = vpop.f32.mrf.mxu1  ;;  %v3420_v30 = vpop.f32.mrf.mxu0 }
 0x47b   :  { %v7532_v3 = vadd.f32 %v3405_v34, %v2918_v49  ;;  %v9237_v34 = vld [vmem:[#allocation34_spill] sm:$0xff] }
 0x47c   :  { %v2800_v9 = vpop.f32.mrf.mxu1  ;;  %v3422_v58 = vpop.f32.mrf.mxu0 }
 0x47d   :  { %v2919_v38 = vadd.f32 %v2800_v9, %v9229_v50  ;;  %9232 = vst [vmem:[#allocation41_spill] sm:$0xff] %v7532_v3 }
 0x47e   :  { %v2802_v42 = vpop.f32.mrf.mxu1  ;;  %v3425_v45 = vpop.f32.mrf.mxu0 }
 0x47f   :  { %v7535_v55 = vadd.f32 %v3410_v10, %v2919_v38  ;;  %v9239_v10 = vld [vmem:[#allocation35_spill] sm:$0xff] }
 0x480   :  { %v2805_v11 = vpop.f32.mrf.mxu1  ;;  %v3427_v5 = vpop.f32.mrf.mxu0 }
 0x481   :  { %v2920_v40 = vadd.f32 %v2805_v11, %v9231_v26  ;;  %9234 = vst [vmem:[#allocation43_spill] sm:$0xff] %v7535_v55 }
 0x482   :  { %v2807_v39 = vpop.f32.mrf.mxu1  ;;  %v3430_v8 = vpop.f32.mrf.mxu0 }
 0x483   :  { %v7538_v18 = vadd.f32 %v3415_v36, %v2920_v40  ;;  %v9241_v36 = vld [vmem:[#allocation36_spill] sm:$0xff] }
 0x484   :  { %v2810_v35 = vpop.f32.mrf.mxu1  ;;  %v3432_v9 = vpop.f32.mrf.mxu0 }
 0x485   :  { %v2921_v48 = vadd.f32 %v2810_v35, %v9233_v14  ;;  %9236 = vst [vmem:[#allocation24_spill] sm:$0xff] %v7538_v18 }
 0x486   :  { %v2812_v27 = vpop.f32.mrf.mxu1  ;;  %v3435_v42 = vpop.f32.mrf.mxu0 }
 0x487   :  { %v7541_v3 = vadd.f32 %v3420_v30, %v2921_v48  ;;  %v9243_v30 = vld [vmem:[#allocation37_spill] sm:$0xff] }
 0x488   :  { %v2815_v50 = vpop.f32.mrf.mxu1  ;;  %v3437_v11 = vpop.f32.mrf.mxu0 }
 0x489   :  { %v2922_v7 = vadd.f32 %v2815_v50, %v9235_v0  ;;  %9238 = vst [vmem:[#allocation45_spill] sm:$0xff] %v7541_v3 }
 0x48a   :  { %v2817_v58 = vpop.f32.mrf.mxu1  ;;  %v3440_v39 = vpop.f32.mrf.mxu0 }
 0x48b   :  { %v7544_v55 = vadd.f32 %v3425_v45, %v2922_v7  ;;  %v9245_v45 = vld [vmem:[#allocation38_spill] sm:$0xff] }
 0x48c   :  { %v2820_v26 = vpop.f32.mrf.mxu1  ;;  %v3442_v35 = vpop.f32.mrf.mxu0 }
 0x48d   :  { %v2923_v49 = vadd.f32 %v2820_v26, %v9237_v34  ;;  %9240 = vst [vmem:[#allocation47_spill] sm:$0xff] %v7544_v55 }
 0x48e   :  { %v2822_v5 = vpop.f32.mrf.mxu1  ;;  %v3445_v27 = vpop.f32.mrf.mxu0 }
 0x48f   :  { %v7547_v18 = vadd.f32 %v3430_v8, %v2923_v49  ;;  %v9246_v8 = vld [vmem:[#allocation39_spill] sm:$0xff] }
 0x490   :  { %v2825_v14 = vpop.f32.mrf.mxu1  ;;  %v3447_v50 = vpop.f32.mrf.mxu0 }
 0x491   :  { %v2924_v38 = vadd.f32 %v2825_v14, %v9239_v10  ;;  %9242 = vst [vmem:[#allocation23_spill] sm:$0xff] %v7547_v18 }
 0x492   :  { %v2827_v9 = vpop.f32.mrf.mxu1  ;;  %v3450_v58 = vpop.f32.mrf.mxu0 }
 0x493   :  { %v7550_v3 = vadd.f32 %v3435_v42, %v2924_v38  ;;  %v9248_v42 = vld [vmem:[#allocation40_spill] sm:$0xff] }
 0x494   :  { %v2830_v0 = vpop.f32.mrf.mxu1  ;;  %v3452_v26 = vpop.f32.mrf.mxu0 }
 0x495   :  { %v2925_v40 = vadd.f32 %v2830_v0, %v9241_v36  ;;  %9244 = vst [vmem:[#allocation48_spill] sm:$0xff] %v7550_v3 }
 0x496   :  { %v2832_v11 = vpop.f32.mrf.mxu1  ;;  %v3455_v5 = vpop.f32.mrf.mxu0 }
 0x497   :  { %v7553_v55 = vadd.f32 %v3440_v39, %v2925_v40  ;;  %v9250_v39 = vld [vmem:[#allocation42_spill] sm:$0xff] }
 0x498   :  { %v2835_v34 = vpop.f32.mrf.mxu1  ;;  %v3457_v14 = vpop.f32.mrf.mxu0 }
 0x499   :  { %v2926_v48 = vadd.f32 %v2835_v34, %v9243_v30 }
 0x49a   :  { %v2837_v35 = vpop.f32.mrf.mxu1  ;;  %v3460_v9 = vpop.f32.mrf.mxu0 }
 0x49b   :  { %v7556_v18 = vadd.f32 %v3445_v27, %v2926_v48  ;;  %v9252_v27 = vld [vmem:[#allocation44_spill] sm:$0xff] }
 0x49c   :  { %v2840_v10 = vpop.f32.mrf.mxu1  ;;  %v3462_v0 = vpop.f32.mrf.mxu0 }
 0x49d   :  { %v2927_v7 = vadd.f32 %v2840_v10, %v9245_v45  ;;  %9247 = vst [vmem:[#allocation29_spill] sm:$0xff] %v7556_v18 }
 0x49e   :  { %v2842_v50 = vpop.f32.mrf.mxu1  ;;  %v3465_v11 = vpop.f32.mrf.mxu0 }
 0x49f   :  { %v7559_v3 = vadd.f32 %v3450_v58, %v2927_v7 }
 0x4a0   :  { %v2845_v36 = vpop.f32.mrf.mxu1  ;;  %v3467_v34 = vpop.f32.mrf.mxu0 }
 0x4a1   :  { %v2928_v49 = vadd.f32 %v2845_v36, %v9246_v8  ;;  %9249 = vst [vmem:[#allocation31_spill] sm:$0xff] %v7559_v3 }
 0x4a2   :  { %v2847_v26 = vpop.f32.mrf.mxu1  ;;  %v3470_v35 = vpop.f32.mrf.mxu0 }
 0x4a3   :  { %v7562_v0 = vadd.f32 %v3455_v5, %v2928_v49 }
 0x4a4   :  { %v2850_v30 = vpop.f32.mrf.mxu1  ;;  %v3472_v10 = vpop.f32.mrf.mxu0 }
 0x4a5   :  { %v2929_v38 = vadd.f32 %v2850_v30, %v9248_v42  ;;  %9251 = vst [vmem:[#allocation32_spill] sm:$0xff] %v7562_v0  ;;  %v7568_v30 = vld [vmem:[%s8912_s6] ss:$0 sm:$0xff]  ;;  %v9255_v42 = vld [vmem:[#allocation50_spill] sm:$0xff] }
 0x4a6   :  { %v2852_v14 = vpop.f32.mrf.mxu1  ;;  %v3475_v50 = vpop.f32.mrf.mxu0 }
 0x4a7   :  { %v7572_v7 = vadd.f32 %v3460_v9, %v2929_v38 }
 0x4a8   :  { %v2855_v45 = vpop.f32.mrf.mxu1  ;;  %v3477_v8 = vpop.f32.mrf.mxu0 }
 0x4a9   :  { %v2930_v40 = vadd.f32 %v2855_v45, %v9250_v39  ;;  %9254 = vst [vmem:[#allocation16_spill] sm:$0xff] %v7572_v7  ;;  %v9256_v45 = vld [vmem:[#allocation49_spill] sm:$0xff]  ;;  %v9257_v8 = vld [vmem:[#allocation46_spill] sm:$0xff]  ;;  %v9268_v7 = vld [vmem:[#allocation56_spill] sm:$0xff] }
 0x4aa   :  { %v2857_v36 = vpop.f32.mrf.mxu1  ;;  %v5095_v34 = vpop.f32.mrf.mxu0 }
 0x4ab   :  { %v7570_v58 = vadd.f32 %v3465_v11, %v2930_v40  ;;  %v4009_v14 = vadd.f32 %v5095_v34, %v9255_v42  ;;  %v9259_v11 = vld [vmem:[#allocation52_spill] sm:$0xff] }
 0x4ac   :  { %v2860_v26 = vpop.f32.mrf.mxu1  ;;  %v3689_v5 = vpop.f32.mrf.mxu0 }
 0x4ad   :  { %v2931_v48 = vadd.f32 %v2860_v26, %v9252_v27  ;;  %9253 = vst [vmem:[#allocation15_spill] sm:$0xff] %v7570_v58  ;;  %v4082_v49 = vadd.f32 %v7568_v30, %v4009_v14  ;;  %v4008_v39 = vadd.f32 %v3689_v5, %v9256_v45  ;;  %v9263_v5 = vld [vmem:[#allocation51_spill] sm:$0xff] }
 0x4ae   :  { %v2862_v10 = vpop.f32.mrf.mxu1  ;;  %v5098_v27 = vpop.f32.mrf.mxu0 }
 0x4af   :  { %v7578_v0 = vadd.f32 %v3470_v35, %v2931_v48  ;;  %v4081_v3 = vadd.f32 %v7568_v30, %v4008_v39  ;;  %v4011_v40 = vadd.f32 %v5098_v27, %v9259_v11  ;;  %v7582_v38 = vmax.f32 %v4082_v49, 0.0 }
 0x4b0   :  { %v2865_v36 = vpop.f32.mrf.mxu1  ;;  %v3699_v34 = vpop.f32.mrf.mxu0 }
 0x4b1   :  { %v2932_v26 = vadd.f32 %v2865_v36, %v9257_v8  ;;  %9258 = vst [vmem:[#allocation18_spill] sm:$0xff] %v7578_v0  ;;  %9260 = vst [vmem:[#allocation13_spill] sm:$0xff] %v7582_v38  ;;  %v7586_v10 = vmax.f32 %v4081_v3, 0.0  ;;  %v4084_v14 = vadd.f32 %v7568_v30, %v4011_v40  ;;  %v4010_v45 = vadd.f32 %v3699_v34, %v9263_v5 }
 0x4b2   :  { %v2867_v9 = vpop.f32.mrf.mxu1  ;;  %v5101_v8 = vpop.f32.mrf.mxu0  ;;  %v4279_v49 = vmul.f32 %v7582_v38, %v7582_v38 }
 0x4b3   :  { %v7584_v42 = vadd.f32 %v3475_v50, %v2932_v26  ;;  %9262 = vst [vmem:[#allocation20_spill] sm:$0xff] %v7586_v10  ;;  %v4278_v35 = vmul.f32 %v7586_v10, %v7586_v10  ;;  %v4083_v48 = vadd.f32 %v7568_v30, %v4010_v45  ;;  %v7595_v27 = vmax.f32 %v4084_v14, 0.0  ;;  %v9265_v50 = vld [vmem:[#allocation54_spill] sm:$0xff]  ;;  %v9267_v9 = vld [vmem:[#allocation53_spill] sm:$0xff] }
 0x4b4   :  { %v5107_v36 = vpop.f32.mrf.mxu1  ;;  %v4013_v3 = vadd.f32 %v5101_v8, %v9265_v50  ;;  %v3709_v26 = vpop.f32.mrf.mxu0  ;;  %v4209_v11 = vadd.f32 %v7582_v38, %v7586_v10 }
 0x4b5   :  { %9261 = vst [vmem:[#allocation19_spill] sm:$0xff] %v7584_v42  ;;  %9264 = vst [vmem:[#allocation21_spill] sm:$0xff] %v7595_v27  ;;  %v7600_v40 = vmax.f32 %v4083_v48, 0.0  ;;  %v4012_v34 = vadd.f32 %v3709_v26, %v9267_v9  ;;  %v4342_v42 = vadd.f32 %v4279_v49, %v4278_v35  ;;  %v4281_v26 = vmul.f32 %v7595_v27, %v7595_v27 }
 0x4b6   :  { %v3729_v39 = vpop.f32.mrf.mxu1  ;;  %v4086_v45 = vadd.f32 %v7568_v30, %v4013_v3  ;;  %v5104_v58 = vpop.f32.mrf.mxu0  ;;  %v4017_v35 = vadd.f32 %v5107_v36, %v7376_v1 }
 0x4b7   :  { %9266 = vst [vmem:[#allocation22_spill] sm:$0xff] %v7600_v40  ;;  %v4016_v0 = vadd.f32 %v3729_v39, %v7369_v16  ;;  %v4210_v14 = vadd.f32 %v4209_v11, %v7600_v40  ;;  %v4280_v8 = vmul.f32 %v7600_v40, %v7600_v40  ;;  %v4085_v50 = vadd.f32 %v7568_v30, %v4012_v34  ;;  %v9270_v34 = vld [vmem:[#allocation55_spill] sm:$0xff] }
 0x4b8   :  { %v5110_v5 = vpop.f32.mrf.mxu1  ;;  %v4015_v38 = vadd.f32 %v5104_v58, %v9268_v7  ;;  %v3719_v49 = vpop.f32.mrf.mxu0  ;;  %v7613_v9 = vmax.f32 %v4086_v45, 0.0  ;;  %v4090_v36 = vadd.f32 %v7568_v30, %v4017_v35 }
 0x4b9   :  { %v4343_v3 = vadd.f32 %v4342_v42, %v4280_v8  ;;  %v7615_v16 = vmax.f32 %v4085_v50, 0.0  ;;  %v4211_v39 = vadd.f32 %v4210_v14, %v7595_v27  ;;  %v4014_v10 = vadd.f32 %v3719_v49, %v9270_v34  ;;  %v9271_v50 = vld [vmem:[#allocation57_spill] sm:$0xff] }
 0x4ba   :  { %v3739_v48 = vpop.f32.mrf.mxu1  ;;  %v4088_v40 = vadd.f32 %v7568_v30, %v4015_v38  ;;  %v4089_v1 = vadd.f32 %v7568_v30, %v4016_v0  ;;  %v4283_v38 = vmul.f32 %v7613_v9, %v7613_v9  ;;  %v4019_v49 = vadd.f32 %v5110_v5, %v9271_v50 }
 0x4bb   :  { %9269 = vst [vmem:[#allocation25_spill] sm:$0xff] %v7615_v16  ;;  %v4212_v58 = vadd.f32 %v4211_v39, %v7615_v16  ;;  %v4282_v7 = vmul.f32 %v7615_v16, %v7615_v16  ;;  %v4344_v18 = vadd.f32 %v4343_v3, %v4281_v26  ;;  %v4087_v45 = vadd.f32 %v7568_v30, %v4014_v10  ;;  %v9272_v3 = vld [vmem:[#allocation58_spill] sm:$0xff] }
 0x4bc   :  { %v5113_v11 = vpop.f32.mrf.mxu1  ;;  %v4018_v14 = vadd.f32 %v3739_v48, %v7383_v41  ;;  %v7631_v16 = vmax.f32 %v4088_v40, 0.0  ;;  %v7635_v0 = vmax.f32 %v4089_v1, 0.0  ;;  %v7642_v48 = vmax.f32 %v4090_v36, 0.0 }
 0x4bd   :  { %v4345_v8 = vadd.f32 %v4344_v18, %v4282_v7  ;;  %v4213_v39 = vadd.f32 %v4212_v58, %v7613_v9  ;;  %v7633_v26 = vmax.f32 %v4087_v45, 0.0  ;;  %v4092_v40 = vadd.f32 %v7568_v30, %v4019_v49 }
 0x4be   :  { %v3749_v42 = vpop.f32.mrf.mxu1  ;;  %v4091_v5 = vadd.f32 %v7568_v30, %v4018_v14  ;;  %v4285_v7 = vmul.f32 %v7631_v16, %v7631_v16 }
 0x4bf   :  { %v4346_v35 = vadd.f32 %v4345_v8, %v4283_v38  ;;  %v4020_v10 = vadd.f32 %v3749_v42, %v9272_v3  ;;  %v4214_v41 = vadd.f32 %v4213_v39, %v7633_v26  ;;  %v4284_v18 = vmul.f32 %v7633_v26, %v7633_v26 }
 0x4c0   :  { %v5116_v34 = vpop.f32.mrf.mxu1  ;;  %v4021_v42 = vadd.f32 %v5113_v11, %v7398_v6  ;;  %v4286_v38 = vmul.f32 %v7635_v0, %v7635_v0  ;;  %v7652_v36 = vmax.f32 %v4091_v5, 0.0  ;;  %v4287_v3 = vmul.f32 %v7642_v48, %v7642_v48 }
 0x4c1   :  { %v4215_v1 = vadd.f32 %v4214_v41, %v7631_v16  ;;  %v4347_v45 = vadd.f32 %v4346_v35, %v4284_v18  ;;  %v4093_v8 = vadd.f32 %v7568_v30, %v4020_v10  ;;  %v7658_v41 = vmax.f32 %v4092_v40, 0.0 }
 0x4c2   :  { %v3759_v27 = vpop.f32.mrf.mxu1  ;;  %v4094_v18 = vadd.f32 %v7568_v30, %v4021_v42  ;;  %v4023_v10 = vadd.f32 %v5116_v34, %v7404_v62 }
 0x4c3   :  { %v4348_v14 = vadd.f32 %v4347_v45, %v4285_v7  ;;  %v4216_v49 = vadd.f32 %v4215_v1, %v7635_v0  ;;  %v4022_v39 = vadd.f32 %v3759_v27, %v7401_v13  ;;  %v7663_v7 = vmax.f32 %v4093_v8, 0.0 }
 0x4c4   :  { %v5119_v58 = vpop.f32.mrf.mxu1  ;;  %v4288_v27 = vmul.f32 %v7652_v36, %v7652_v36  ;;  %v7673_v34 = vmax.f32 %v4094_v18, 0.0  ;;  %v4096_v8 = vadd.f32 %v7568_v30, %v4023_v10 }
 0x4c5   :  { %v4217_v6 = vadd.f32 %v4216_v49, %v7642_v48  ;;  %v4349_v11 = vadd.f32 %v4348_v14, %v4286_v38  ;;  %v4095_v45 = vadd.f32 %v7568_v30, %v4022_v39  ;;  %v4289_v38 = vmul.f32 %v7658_v41, %v7658_v41 }
 0x4c6   :  { %v3769_v50 = vpop.f32.mrf.mxu1  ;;  %v4025_v42 = vadd.f32 %v5119_v58, %v7410_v25  ;;  %v4291_v10 = vmul.f32 %v7673_v34, %v7673_v34 }
 0x4c7   :  { %v4024_v5 = vadd.f32 %v3769_v50, %v7407_v12  ;;  %v4218_v13 = vadd.f32 %v4217_v6, %v7652_v36  ;;  %v4350_v40 = vadd.f32 %v4349_v11, %v4287_v3  ;;  %v4290_v6 = vmul.f32 %v7663_v7, %v7663_v7 }
 0x4c8   :  { %v5122_v35 = vpop.f32.mrf.mxu1  ;;  %v7682_v25 = vmax.f32 %v4095_v45, 0.0  ;;  %v4098_v58 = vadd.f32 %v7568_v30, %v4025_v42 }
 0x4c9   :  { %v4351_v62 = vadd.f32 %v4350_v40, %v4288_v27  ;;  %v4219_v12 = vadd.f32 %v4218_v13, %v7658_v41  ;;  %v4097_v50 = vadd.f32 %v7568_v30, %v4024_v5  ;;  %v4027_v18 = vadd.f32 %v5122_v35, %v7416_v61 }
 0x4ca   :  { %v3779_v1 = vpop.f32.mrf.mxu1  ;;  %v7688_v27 = vmax.f32 %v4096_v8, 0.0  ;;  %v4292_v42 = vmul.f32 %v7682_v25, %v7682_v25 }
 0x4cb   :  { %v4026_v49 = vadd.f32 %v3779_v1, %v7413_v57  ;;  %v4220_v39 = vadd.f32 %v4219_v12, %v7663_v7  ;;  %v4352_v11 = vadd.f32 %v4351_v62, %v4289_v38  ;;  %v7691_v1 = vmax.f32 %v4097_v50, 0.0 }
 0x4cc   :  { %v5125_v14 = vpop.f32.mrf.mxu1  ;;  %v7698_v62 = vmax.f32 %v4098_v58, 0.0  ;;  %v4100_v12 = vadd.f32 %v7568_v30, %v4027_v18  ;;  %v4293_v50 = vmul.f32 %v7688_v27, %v7688_v27 }
 0x4cd   :  { %v4353_v5 = vadd.f32 %v4352_v11, %v4290_v6  ;;  %v4221_v57 = vadd.f32 %v4220_v39, %v7673_v34  ;;  %v4099_v40 = vadd.f32 %v7568_v30, %v4026_v49  ;;  %v4029_v6 = vadd.f32 %v5125_v14, %v7422_v20 }
 0x4ce   :  { %v3789_v3 = vpop.f32.mrf.mxu1  ;;  %v4294_v11 = vmul.f32 %v7691_v1, %v7691_v1 }
 0x4cf   :  { %v4222_v45 = vadd.f32 %v4221_v57, %v7682_v25  ;;  %v4354_v61 = vadd.f32 %v4353_v5, %v4291_v10  ;;  %v4028_v35 = vadd.f32 %v3789_v3, %v7419_v31  ;;  %v7707_v57 = vmax.f32 %v4099_v40, 0.0 }
 0x4d0   :  { %v5128_v13 = vpop.f32.mrf.mxu1  ;;  %v4295_v5 = vmul.f32 %v7698_v62, %v7698_v62  ;;  %v4102_v40 = vadd.f32 %v7568_v30, %v4029_v6 }
 0x4d1   :  { %v4355_v39 = vadd.f32 %v4354_v61, %v4292_v42  ;;  %v4223_v49 = vadd.f32 %v4222_v45, %v7688_v27  ;;  %v4101_v58 = vadd.f32 %v7568_v30, %v4028_v35  ;;  %v7714_v42 = vmax.f32 %v4100_v12, 0.0 }
 0x4d2   :  { %v3799_v38 = vpop.f32.mrf.mxu1  ;;  %v4031_v61 = vadd.f32 %v5128_v13, %v7428_v24  ;;  %v7729_v13 = vmax.f32 %v4102_v40, 0.0 }
 0x4d3   :  { %v4224_v31 = vadd.f32 %v4223_v49, %v7691_v1  ;;  %v4356_v3 = vadd.f32 %v4355_v39, %v4293_v50  ;;  %v4030_v18 = vadd.f32 %v3799_v38, %v7425_v44  ;;  %v4296_v50 = vmul.f32 %v7707_v57, %v7707_v57 }
 0x4d4   :  { %v5131_v8 = vpop.f32.mrf.mxu1  ;;  %v7723_v49 = vmax.f32 %v4101_v58, 0.0 }
 0x4d5   :  { %v4357_v20 = vadd.f32 %v4356_v3, %v4294_v11  ;;  %v4225_v14 = vadd.f32 %v4224_v31, %v7698_v62  ;;  %v4103_v12 = vadd.f32 %v7568_v30, %v4030_v18  ;;  %v4297_v11 = vmul.f32 %v7714_v42, %v7714_v42 }
 0x4d6   :  { %v3809_v10 = vpop.f32.mrf.mxu1  ;;  %v4033_v6 = vadd.f32 %v5131_v8, %v7434_v60 }
 0x4d7   :  { %v4032_v35 = vadd.f32 %v3809_v10, %v7431_v56  ;;  %v4226_v44 = vadd.f32 %v4225_v14, %v7707_v57  ;;  %v4358_v38 = vadd.f32 %v4357_v20, %v4295_v5  ;;  %v4104_v56 = vadd.f32 %v7568_v30, %v4031_v61 }
 0x4d8   :  { %v5134_v45 = vpop.f32.mrf.mxu1  ;;  %v4298_v20 = vmul.f32 %v7723_v49, %v7723_v49  ;;  %v7738_v60 = vmax.f32 %v4103_v12, 0.0  ;;  %v4106_v8 = vadd.f32 %v7568_v30, %v4033_v6  ;;  %v4299_v61 = vmul.f32 %v7729_v13, %v7729_v13 }
 0x4d9   :  { %v4359_v24 = vadd.f32 %v4358_v38, %v4296_v50  ;;  %v4227_v3 = vadd.f32 %v4226_v44, %v7714_v42  ;;  %v4105_v10 = vadd.f32 %v7568_v30, %v4032_v35  ;;  %v4035_v40 = vadd.f32 %v5134_v45, %v7441_v15 }
 0x4da   :  { %v3819_v39 = vpop.f32.mrf.mxu1  ;;  %v7744_v44 = vmax.f32 %v4104_v56, 0.0  ;;  %v4300_v6 = vmul.f32 %v7738_v60, %v7738_v60 }
 0x4db   :  { %v4034_v58 = vadd.f32 %v3819_v39, %v7437_v17  ;;  %v4228_v18 = vadd.f32 %v4227_v3, %v7723_v49  ;;  %v4360_v14 = vadd.f32 %v4359_v24, %v4297_v11  ;;  %v7747_v39 = vmax.f32 %v4105_v10, 0.0 }
 0x4dc   :  { %v5137_v31 = vpop.f32.mrf.mxu1  ;;  %v7754_v24 = vmax.f32 %v4106_v8, 0.0  ;;  %v4108_v3 = vadd.f32 %v7568_v30, %v4035_v40  ;;  %v4301_v10 = vmul.f32 %v7744_v44, %v7744_v44 }
 0x4dd   :  { %v4361_v35 = vadd.f32 %v4360_v14, %v4298_v20  ;;  %v4229_v17 = vadd.f32 %v4228_v18, %v7729_v13  ;;  %v4107_v38 = vadd.f32 %v7568_v30, %v4034_v58  ;;  %v4037_v20 = vadd.f32 %v5137_v31, %v7451_v4 }
 0x4de   :  { %v3829_v5 = vpop.f32.mrf.mxu1  ;;  %v4302_v14 = vmul.f32 %v7747_v39, %v7747_v39 }
 0x4df   :  { %v4230_v12 = vadd.f32 %v4229_v17, %v7738_v60  ;;  %v4362_v15 = vadd.f32 %v4361_v35, %v4299_v61  ;;  %v4036_v45 = vadd.f32 %v3829_v5, %v7446_v54  ;;  %v7763_v17 = vmax.f32 %v4107_v38, 0.0 }
 0x4e0   :  { %v5140_v50 = vpop.f32.mrf.mxu1  ;;  %v4303_v35 = vmul.f32 %v7754_v24, %v7754_v24  ;;  %v4110_v38 = vadd.f32 %v7568_v30, %v4037_v20 }
 0x4e1   :  { %v4363_v18 = vadd.f32 %v4362_v15, %v4300_v6  ;;  %v4231_v58 = vadd.f32 %v4230_v12, %v7744_v44  ;;  %v4109_v8 = vadd.f32 %v7568_v30, %v4036_v45  ;;  %v7770_v6 = vmax.f32 %v4108_v3, 0.0 }
 0x4e2   :  { %v3839_v11 = vpop.f32.mrf.mxu1  ;;  %v4039_v15 = vadd.f32 %v5140_v50, %v7461_v46  ;;  %v7785_v50 = vmax.f32 %v4110_v38, 0.0 }
 0x4e3   :  { %v4232_v54 = vadd.f32 %v4231_v58, %v7747_v39  ;;  %v4364_v5 = vadd.f32 %v4363_v18, %v4301_v10  ;;  %v4038_v40 = vadd.f32 %v3839_v11, %v7456_v47  ;;  %v4304_v10 = vmul.f32 %v7763_v17, %v7763_v17 }
 0x4e4   :  { %v5143_v56 = vpop.f32.mrf.mxu1  ;;  %v7779_v58 = vmax.f32 %v4109_v8, 0.0 }
 0x4e5   :  { %v4365_v4 = vadd.f32 %v4364_v5, %v4302_v14  ;;  %v4233_v31 = vadd.f32 %v4232_v54, %v7754_v24  ;;  %v4111_v3 = vadd.f32 %v7568_v30, %v4038_v40  ;;  %v4305_v14 = vmul.f32 %v7770_v6, %v7770_v6 }
 0x4e6   :  { %v3849_v61 = vpop.f32.mrf.mxu1  ;;  %v4041_v20 = vadd.f32 %v5143_v56, %v7471_v29 }
 0x4e7   :  { %v4040_v45 = vadd.f32 %v3849_v61, %v7466_v37  ;;  %v4234_v47 = vadd.f32 %v4233_v31, %v7763_v17  ;;  %v4366_v11 = vadd.f32 %v4365_v4, %v4303_v35  ;;  %v4112_v37 = vadd.f32 %v7568_v30, %v4039_v15 }
 0x4e8   :  { %v5146_v12 = vpop.f32.mrf.mxu1  ;;  %v4306_v4 = vmul.f32 %v7779_v58, %v7779_v58  ;;  %v7794_v29 = vmax.f32 %v4111_v3, 0.0  ;;  %v4114_v56 = vadd.f32 %v7568_v30, %v4041_v20  ;;  %v4307_v15 = vmul.f32 %v7785_v50, %v7785_v50 }
 0x4e9   :  { %v4367_v46 = vadd.f32 %v4366_v11, %v4304_v10  ;;  %v4235_v5 = vadd.f32 %v4234_v47, %v7770_v6  ;;  %v4113_v61 = vadd.f32 %v7568_v30, %v4040_v45  ;;  %v4043_v38 = vadd.f32 %v5146_v12, %v7481_v22 }
 0x4ea   :  { %v3859_v18 = vpop.f32.mrf.mxu1  ;;  %v7800_v47 = vmax.f32 %v4112_v37, 0.0  ;;  %v4308_v20 = vmul.f32 %v7794_v29, %v7794_v29 }
 0x4eb   :  { %v4042_v8 = vadd.f32 %v3859_v18, %v7476_v53  ;;  %v4236_v40 = vadd.f32 %v4235_v5, %v7779_v58  ;;  %v4368_v31 = vadd.f32 %v4367_v46, %v4305_v14  ;;  %v7803_v18 = vmax.f32 %v4113_v61, 0.0 }
 0x4ec   :  { %v5149_v54 = vpop.f32.mrf.mxu1  ;;  %v7810_v46 = vmax.f32 %v4114_v56, 0.0  ;;  %v4116_v5 = vadd.f32 %v7568_v30, %v4043_v38  ;;  %v4309_v61 = vmul.f32 %v7800_v47, %v7800_v47 }
 0x4ed   :  { %v4369_v45 = vadd.f32 %v4368_v31, %v4306_v4  ;;  %v4237_v53 = vadd.f32 %v4236_v40, %v7785_v50  ;;  %v4115_v11 = vadd.f32 %v7568_v30, %v4042_v8  ;;  %v4045_v4 = vadd.f32 %v5149_v54, %v7491_v59 }
 0x4ee   :  { %v3869_v35 = vpop.f32.mrf.mxu1  ;;  %v4310_v31 = vmul.f32 %v7803_v18, %v7803_v18 }
 0x4ef   :  { %v4238_v3 = vadd.f32 %v4237_v53, %v7794_v29  ;;  %v4370_v22 = vadd.f32 %v4369_v45, %v4307_v15  ;;  %v4044_v12 = vadd.f32 %v3869_v35, %v7486_v23  ;;  %v7819_v53 = vmax.f32 %v4115_v11, 0.0 }
 0x4f0   :  { %v5152_v10 = vpop.f32.mrf.mxu1  ;;  %v4311_v45 = vmul.f32 %v7810_v46, %v7810_v46  ;;  %v4118_v11 = vadd.f32 %v7568_v30, %v4045_v4 }
 0x4f1   :  { %v4371_v40 = vadd.f32 %v4370_v22, %v4308_v20  ;;  %v4239_v8 = vadd.f32 %v4238_v3, %v7800_v47  ;;  %v4117_v56 = vadd.f32 %v7568_v30, %v4044_v12  ;;  %v7826_v20 = vmax.f32 %v4116_v5, 0.0 }
 0x4f2   :  { %v3879_v14 = vpop.f32.mrf.mxu1  ;;  %v4047_v22 = vadd.f32 %v5152_v10, %v7501_v43  ;;  %v7841_v10 = vmax.f32 %v4118_v11, 0.0 }
 0x4f3   :  { %v4240_v23 = vadd.f32 %v4239_v8, %v7803_v18  ;;  %v4372_v35 = vadd.f32 %v4371_v40, %v4309_v61  ;;  %v4046_v38 = vadd.f32 %v3879_v14, %v7496_v63  ;;  %v4312_v61 = vmul.f32 %v7819_v53, %v7819_v53 }
 0x4f4   :  { %v5155_v37 = vpop.f32.mrf.mxu1  ;;  %v7835_v8 = vmax.f32 %v4117_v56, 0.0 }
 0x4f5   :  { %v4373_v59 = vadd.f32 %v4372_v35, %v4310_v31  ;;  %v4241_v54 = vadd.f32 %v4240_v23, %v7810_v46  ;;  %v4119_v5 = vadd.f32 %v7568_v30, %v4046_v38  ;;  %v4313_v31 = vmul.f32 %v7826_v20, %v7826_v20 }
 0x4f6   :  { %v3889_v15 = vpop.f32.mrf.mxu1  ;;  %v4049_v4 = vadd.f32 %v5155_v37, %v7508_v21 }
 0x4f7   :  { %v4048_v12 = vadd.f32 %v3889_v15, %v7505_v33  ;;  %v4242_v63 = vadd.f32 %v4241_v54, %v7819_v53  ;;  %v4374_v14 = vadd.f32 %v4373_v59, %v4311_v45  ;;  %v4120_v33 = vadd.f32 %v7568_v30, %v4047_v22 }
 0x4f8   :  { %v5158_v3 = vpop.f32.mrf.mxu1  ;;  %v4314_v59 = vmul.f32 %v7835_v8, %v7835_v8  ;;  %v7850_v21 = vmax.f32 %v4119_v5, 0.0  ;;  %v4122_v37 = vadd.f32 %v7568_v30, %v4049_v4  ;;  %v4315_v22 = vmul.f32 %v7841_v10, %v7841_v10 }
 0x4f9   :  { %v4375_v43 = vadd.f32 %v4374_v14, %v4312_v61  ;;  %v4243_v35 = vadd.f32 %v4242_v63, %v7826_v20  ;;  %v4121_v15 = vadd.f32 %v7568_v30, %v4048_v12  ;;  %v4051_v11 = vadd.f32 %v5158_v3, %v7514_v32 }
 0x4fa   :  { %v3899_v40 = vpop.f32.mrf.mxu1  ;;  %v7856_v63 = vmax.f32 %v4120_v33, 0.0  ;;  %v4316_v4 = vmul.f32 %v7850_v21, %v7850_v21 }
 0x4fb   :  { %v4050_v56 = vadd.f32 %v3899_v40, %v7511_v28  ;;  %v4244_v38 = vadd.f32 %v4243_v35, %v7835_v8  ;;  %v4376_v54 = vadd.f32 %v4375_v43, %v4313_v31  ;;  %v7859_v40 = vmax.f32 %v4121_v15, 0.0 }
 0x4fc   :  { %v5161_v23 = vpop.f32.mrf.mxu1  ;;  %v7866_v43 = vmax.f32 %v4122_v37, 0.0  ;;  %v4124_v35 = vadd.f32 %v7568_v30, %v4051_v11  ;;  %v4317_v15 = vmul.f32 %v7856_v63, %v7856_v63 }
 0x4fd   :  { %v4377_v12 = vadd.f32 %v4376_v54, %v4314_v59  ;;  %v4245_v28 = vadd.f32 %v4244_v38, %v7841_v10  ;;  %9273 = vst [vmem:[#allocation26_spill] sm:$0xff] %v7859_v40  ;;  %v4123_v14 = vadd.f32 %v7568_v30, %v4050_v56  ;;  %v4053_v59 = vadd.f32 %v5161_v23, %v7520_v52 }
 0x4fe   :  { %v3909_v45 = vpop.f32.mrf.mxu1  ;;  %9274 = vst [vmem:[#allocation27_spill] sm:$0xff] %v7866_v43  ;;  %v4318_v54 = vmul.f32 %v7859_v40, %v7859_v40 }
 0x4ff   :  { %v4246_v5 = vadd.f32 %v4245_v28, %v7850_v21  ;;  %v4378_v32 = vadd.f32 %v4377_v12, %v4315_v22  ;;  %v4052_v3 = vadd.f32 %v3909_v45, %v7517_v19  ;;  %v7875_v28 = vmax.f32 %v4123_v14, 0.0 }
 0x500   :  { %v5164_v61 = vpop.f32.mrf.mxu1  ;;  %v4319_v12 = vmul.f32 %v7866_v43, %v7866_v43  ;;  %v4126_v14 = vadd.f32 %v7568_v30, %v4053_v59 }
 0x501   :  { %v4379_v38 = vadd.f32 %v4378_v32, %v4316_v4  ;;  %v4247_v56 = vadd.f32 %v4246_v5, %v7856_v63  ;;  %9275 = vst [vmem:[#allocation28_spill] sm:$0xff] %v7875_v28  ;;  %v4125_v37 = vadd.f32 %v7568_v30, %v4052_v3  ;;  %v7882_v4 = vmax.f32 %v4124_v35, 0.0 }
 0x502   :  { %v3919_v31 = vpop.f32.mrf.mxu1  ;;  %v4055_v32 = vadd.f32 %v5164_v61, %v7526_v51  ;;  %v7897_v61 = vmax.f32 %v4126_v14, 0.0 }
 0x503   :  { %v4248_v19 = vadd.f32 %v4247_v56, %v7859_v40  ;;  %v4380_v45 = vadd.f32 %v4379_v38, %v4317_v15  ;;  %v4054_v11 = vadd.f32 %v3919_v31, %v7523_v2  ;;  %9276 = vst [vmem:[#allocation30_spill] sm:$0xff] %v7882_v4  ;;  %v4320_v15 = vmul.f32 %v7875_v28, %v7875_v28  ;;  %v9277_v38 = vld [vmem:[#allocation17_spill] sm:$0xff] }
 0x504   :  { %v5167_v33 = vpop.f32.mrf.mxu1  ;;  %v7891_v40 = vmax.f32 %v4125_v37, 0.0  ;;  %9280 = vst [vmem:[#allocation33_spill] sm:$0xff] %v7897_v61 }
 0x505   :  { %v4381_v52 = vadd.f32 %v4380_v45, %v4318_v54  ;;  %v4249_v23 = vadd.f32 %v4248_v19, %v7866_v43  ;;  %v4127_v35 = vadd.f32 %v7568_v30, %v4054_v11  ;;  %v4321_v54 = vmul.f32 %v7882_v4, %v7882_v4  ;;  %v9279_v19 = vld [vmem:[#allocation41_spill] sm:$0xff] }
 0x506   :  { %v3929_v22 = vpop.f32.mrf.mxu1  ;;  %9278 = vst [vmem:[#allocation14_spill] sm:$0xff] %v7891_v40  ;;  %v4057_v59 = vadd.f32 %v5167_v33, %v9279_v19 }
 0x507   :  { %v4056_v3 = vadd.f32 %v3929_v22, %v9277_v38  ;;  %v4250_v2 = vadd.f32 %v4249_v23, %v7875_v28  ;;  %v4382_v31 = vadd.f32 %v4381_v52, %v4319_v12  ;;  %v4128_v22 = vadd.f32 %v7568_v30, %v4055_v32  ;;  %v9281_v12 = vld [vmem:[#allocation43_spill] sm:$0xff] }
 0x508   :  { %v5170_v5 = vpop.f32.mrf.mxu1  ;;  %v4322_v38 = vmul.f32 %v7891_v40, %v7891_v40  ;;  %v7906_v33 = vmax.f32 %v4127_v35, 0.0  ;;  %v4130_v14 = vadd.f32 %v7568_v30, %v4057_v59  ;;  %v4323_v32 = vmul.f32 %v7897_v61, %v7897_v61 }
 0x509   :  { %v4383_v51 = vadd.f32 %v4382_v31, %v4320_v15  ;;  %v4251_v43 = vadd.f32 %v4250_v2, %v7882_v4  ;;  %v4129_v23 = vadd.f32 %v7568_v30, %v4056_v3  ;;  %v9283_v15 = vld [vmem:[#allocation24_spill] sm:$0xff]  ;;  %v7912_v19 = vmax.f32 %v4128_v22, 0.0 }
 0x50a   :  { %v3939_v56 = vpop.f32.mrf.mxu1  ;;  %9282 = vst [vmem:[#allocation34_spill] sm:$0xff] %v7906_v33  ;;  %v4059_v31 = vadd.f32 %v5170_v5, %v9283_v15  ;;  %v4324_v59 = vmul.f32 %v7906_v33, %v7906_v33 }
 0x50b   :  { %v4058_v37 = vadd.f32 %v3939_v56, %v9281_v12  ;;  %v4252_v11 = vadd.f32 %v4251_v43, %v7891_v40  ;;  %v4384_v28 = vadd.f32 %v4383_v51, %v4321_v54  ;;  %9284 = vst [vmem:[#allocation35_spill] sm:$0xff] %v7912_v19  ;;  %v7915_v43 = vmax.f32 %v4129_v23, 0.0  ;;  %v9286_v51 = vld [vmem:[#allocation45_spill] sm:$0xff] }
 0x50c   :  { %v5173_v45 = vpop.f32.mrf.mxu1  ;;  %v7922_v40 = vmax.f32 %v4130_v14, 0.0  ;;  %v4325_v23 = vmul.f32 %v7912_v19, %v7912_v19 }
 0x50d   :  { %v4385_v3 = vadd.f32 %v4384_v28, %v4322_v38  ;;  %v4253_v56 = vadd.f32 %v4252_v11, %v7897_v61  ;;  %9285 = vst [vmem:[#allocation36_spill] sm:$0xff] %v7915_v43  ;;  %v4131_v12 = vadd.f32 %v7568_v30, %v4058_v37  ;;  %v4132_v28 = vadd.f32 %v7568_v30, %v4059_v31  ;;  %v9288_v38 = vld [vmem:[#allocation47_spill] sm:$0xff] }
 0x50e   :  { %v3949_v52 = vpop.f32.mrf.mxu1  ;;  %9287 = vst [vmem:[#allocation37_spill] sm:$0xff] %v7922_v40  ;;  %v4061_v61 = vadd.f32 %v5173_v45, %v9288_v38 }
 0x50f   :  { %v4254_v35 = vadd.f32 %v4253_v56, %v7906_v33  ;;  %v4386_v5 = vadd.f32 %v4385_v3, %v4323_v32  ;;  %v4060_v15 = vadd.f32 %v3949_v52, %v9286_v51  ;;  %v4326_v56 = vmul.f32 %v7915_v43, %v7915_v43  ;;  %v9290_v3 = vld [vmem:[#allocation23_spill] sm:$0xff] }
 0x510   :  { %v5176_v2 = vpop.f32.mrf.mxu1  ;;  %v7931_v33 = vmax.f32 %v4131_v12, 0.0  ;;  %v4134_v12 = vadd.f32 %v7568_v30, %v4061_v61 }
 0x511   :  { %v4387_v11 = vadd.f32 %v4386_v5, %v4324_v59  ;;  %v4255_v37 = vadd.f32 %v4254_v35, %v7912_v19  ;;  %v4133_v31 = vadd.f32 %v7568_v30, %v4060_v15  ;;  %v4327_v59 = vmul.f32 %v7922_v40, %v7922_v40  ;;  %v9292_v19 = vld [vmem:[#allocation48_spill] sm:$0xff] }
 0x512   :  { %v3959_v54 = vpop.f32.mrf.mxu1  ;;  %9289 = vst [vmem:[#allocation38_spill] sm:$0xff] %v7931_v33  ;;  %v7938_v5 = vmax.f32 %v4132_v28, 0.0  ;;  %v4063_v4 = vadd.f32 %v5176_v2, %v9292_v19  ;;  %v7953_v19 = vmax.f32 %v4134_v12, 0.0 }
 0x513   :  { %v4256_v52 = vadd.f32 %v4255_v37, %v7915_v43  ;;  %v4388_v14 = vadd.f32 %v4387_v11, %v4325_v23  ;;  %v4062_v51 = vadd.f32 %v3959_v54, %v9290_v3  ;;  %v4328_v23 = vmul.f32 %v7931_v33, %v7931_v33 }
 0x514   :  { %v5179_v22 = vpop.f32.mrf.mxu1  ;;  %9291 = vst [vmem:[#allocation39_spill] sm:$0xff] %v7938_v5  ;;  %v7947_v3 = vmax.f32 %v4133_v31, 0.0  ;;  %9295 = vst [vmem:[#allocation42_spill] sm:$0xff] %v7953_v19 }
 0x515   :  { %v4389_v45 = vadd.f32 %v4388_v14, %v4326_v56  ;;  %v4257_v38 = vadd.f32 %v4256_v52, %v7922_v40  ;;  %v4135_v28 = vadd.f32 %v7568_v30, %v4062_v51  ;;  %v4329_v56 = vmul.f32 %v7938_v5, %v7938_v5  ;;  %v9294_v52 = vld [vmem:[#allocation29_spill] sm:$0xff] }
 0x516   :  { %v3969_v32 = vpop.f32.mrf.mxu1  ;;  %9293 = vst [vmem:[#allocation40_spill] sm:$0xff] %v7947_v3  ;;  %v4065_v61 = vadd.f32 %v5179_v22, %v9294_v52 }
 0x517   :  { %v4064_v15 = vadd.f32 %v3969_v32, %v7553_v55  ;;  %v4258_v54 = vadd.f32 %v4257_v38, %v7931_v33  ;;  %v4390_v37 = vadd.f32 %v4389_v45, %v4327_v59  ;;  %v4136_v55 = vadd.f32 %v7568_v30, %v4063_v4  ;;  %v9296_v59 = vld [vmem:[#allocation31_spill] sm:$0xff] }
 0x518   :  { %v5182_v35 = vpop.f32.mrf.mxu1  ;;  %v4330_v38 = vmul.f32 %v7947_v3, %v7947_v3  ;;  %v7962_v22 = vmax.f32 %v4135_v28, 0.0  ;;  %v4138_v12 = vadd.f32 %v7568_v30, %v4065_v61  ;;  %v4331_v4 = vmul.f32 %v7953_v19, %v7953_v19 }
 0x519   :  { %v4391_v2 = vadd.f32 %v4390_v37, %v4328_v23  ;;  %v4259_v40 = vadd.f32 %v4258_v54, %v7938_v5  ;;  %v4137_v32 = vadd.f32 %v7568_v30, %v4064_v15  ;;  %v9298_v23 = vld [vmem:[#allocation32_spill] sm:$0xff]  ;;  %v7968_v52 = vmax.f32 %v4136_v55, 0.0 }
 0x51a   :  { %v3979_v11 = vpop.f32.mrf.mxu1  ;;  %9297 = vst [vmem:[#allocation44_spill] sm:$0xff] %v7962_v22  ;;  %v4067_v37 = vadd.f32 %v5182_v35, %v9298_v23  ;;  %v9301_v35 = vld [vmem:[#allocation16_spill] sm:$0xff]  ;;  %v7978_v23 = vmax.f32 %v4138_v12, 0.0 }
 0x51b   :  { %v4066_v31 = vadd.f32 %v3979_v11, %v9296_v59  ;;  %v4260_v51 = vadd.f32 %v4259_v40, %v7947_v3  ;;  %v4392_v33 = vadd.f32 %v4391_v2, %v4329_v56  ;;  %9299 = vst [vmem:[#allocation50_spill] sm:$0xff] %v7968_v52  ;;  %v7971_v40 = vmax.f32 %v4137_v32, 0.0 }
 0x51c   :  { %v5185_v14 = vpop.f32.mrf.mxu1  ;;  %v4332_v56 = vmul.f32 %v7962_v22, %v7962_v22  ;;  %9302 = vst [vmem:[#allocation46_spill] sm:$0xff] %v7978_v23 }
 0x51d   :  { %v4393_v15 = vadd.f32 %v4392_v33, %v4330_v38  ;;  %v4261_v11 = vadd.f32 %v4260_v51, %v7953_v19  ;;  %9300 = vst [vmem:[#allocation49_spill] sm:$0xff] %v7971_v40  ;;  %v4139_v59 = vadd.f32 %v7568_v30, %v4066_v31  ;;  %v4140_v33 = vadd.f32 %v7568_v30, %v4067_v37  ;;  %v9303_v31 = vld [vmem:[#allocation15_spill] sm:$0xff]  ;;  %v9305_v37 = vld [vmem:[#allocation18_spill] sm:$0xff] }
 0x51e   :  { %v3989_v45 = vpop.f32.mrf.mxu1  ;;  %v4333_v51 = vmul.f32 %v7968_v52, %v7968_v52  ;;  %v4069_v5 = vadd.f32 %v5185_v14, %v9303_v31  ;;  %v9307_v31 = vld [vmem:[#allocation19_spill] sm:$0xff] }
 0x51f   :  { %v4262_v28 = vadd.f32 %v4261_v11, %v7962_v22  ;;  %v4394_v61 = vadd.f32 %v4393_v15, %v4331_v4  ;;  %v4068_v2 = vadd.f32 %v3989_v45, %v9301_v35  ;;  %v4334_v11 = vmul.f32 %v7971_v40, %v7971_v40 }
 0x520   :  { %v5188_v54 = vpop.f32.mrf.mxu1  ;;  %v7987_v43 = vmax.f32 %v4139_v59, 0.0  ;;  %v4335_v35 = vmul.f32 %v7978_v23, %v7978_v23 }
 0x521   :  { %v4395_v32 = vadd.f32 %v4394_v61, %v4332_v56  ;;  %v4263_v38 = vadd.f32 %v4262_v28, %v7968_v52  ;;  %v4141_v4 = vadd.f32 %v7568_v30, %v4068_v2  ;;  %v7994_v56 = vmax.f32 %v4140_v33, 0.0 }
 0x522   :  { %v3999_v55 = vpop.f32.mrf.mxu1  ;;  %9304 = vst [vmem:[#allocation52_spill] sm:$0xff] %v7987_v43  ;;  %v4142_v61 = vadd.f32 %v7568_v30, %v4069_v5  ;;  %v4071_v59 = vadd.f32 %v5188_v54, %v9307_v31 }
 0x523   :  { %v4264_v45 = vadd.f32 %v4263_v38, %v7971_v40  ;;  %v4396_v12 = vadd.f32 %v4395_v32, %v4333_v51  ;;  %v4070_v15 = vadd.f32 %v3999_v55, %v9305_v37  ;;  %9306 = vst [vmem:[#allocation51_spill] sm:$0xff] %v7994_v56  ;;  %v4336_v38 = vmul.f32 %v7987_v43, %v7987_v43 }
 0x524   :  { %v8002_v32 = vmax.f32 %v4141_v4, 0.0  ;;  %v4337_v33 = vmul.f32 %v7994_v56, %v7994_v56  ;;  %v4144_v54 = vadd.f32 %v7568_v30, %v4071_v59 }
 0x525   :  { %v4397_v28 = vadd.f32 %v4396_v12, %v4334_v11  ;;  %v4265_v14 = vadd.f32 %v4264_v45, %v7978_v23  ;;  %v4143_v55 = vadd.f32 %v7568_v30, %v4070_v15  ;;  %v8007_v12 = vmax.f32 %v4142_v61, 0.0 }
 0x526   :  { %9308 = vst [vmem:[#allocation54_spill] sm:$0xff] %v8002_v32  ;;  %v4338_v37 = vmul.f32 %v8002_v32, %v8002_v32 }
 0x527   :  { %v4266_v51 = vadd.f32 %v4265_v14, %v7987_v43  ;;  %v4398_v2 = vadd.f32 %v4397_v28, %v4335_v35  ;;  %9309 = vst [vmem:[#allocation53_spill] sm:$0xff] %v8007_v12  ;;  %v8014_v4 = vmax.f32 %v4143_v55, 0.0  ;;  %v4339_v15 = vmul.f32 %v8007_v12, %v8007_v12 }
 0x528   :  { %v8018_v14 = vmax.f32 %v4144_v54, 0.0 }
 0x529   :  { %v4399_v11 = vadd.f32 %v4398_v2, %v4336_v38  ;;  %v4267_v5 = vadd.f32 %v4266_v51, %v7994_v56  ;;  %v4340_v30 = vmul.f32 %v8014_v4, %v8014_v4 }
 0x52a   :  { %9310 = vst [vmem:[#allocation56_spill] sm:$0xff] %v8018_v14  ;;  %v4341_v38 = vmul.f32 %v8018_v14, %v8018_v14 }
 0x52b   :  { %v4268_v45 = vadd.f32 %v4267_v5, %v8002_v32  ;;  %v4400_v35 = vadd.f32 %v4399_v11, %v4337_v33 }
 0x52d   :  { %v4401_v28 = vadd.f32 %v4400_v35, %v4338_v37  ;;  %v4269_v61 = vadd.f32 %v4268_v45, %v8007_v12 }
 0x52f   :  { %v4270_v31 = vadd.f32 %v4269_v61, %v8014_v4  ;;  %v4402_v59 = vadd.f32 %v4401_v28, %v4339_v15 }
 0x531   :  { %v4271_v51 = vadd.f32 %v4270_v31, %v8018_v14  ;;  %v4403_v2 = vadd.f32 %v4402_v59, %v4340_v30 }
 0x533   :  { %v4272_v55 = vrot.slane %v4271_v51, 4  ;;  %v4404_v33 = vadd.f32 %v4403_v2, %v4341_v38  ;;  %v9311_v38 = vld [vmem:[#allocation20_spill] sm:$0xff] }
 0x535   :  { %v4273_v11 = vadd.f32 %v4272_v55, %v4271_v51  ;;  %v4405_v5 = vrot.slane %v4404_v33, 4  ;;  %v9312_v55 = vld [vmem:[#allocation13_spill] sm:$0xff] }
 0x537   :  { %v4274_v54 = vrot.slane %v4273_v11, 2  ;;  %v4406_v37 = vadd.f32 %v4405_v5, %v4404_v33  ;;  %v9324_v5 = vld [vmem:[#allocation14_spill] sm:$0xff] }
 0x539   :  { %v4275_v35 = vadd.f32 %v4274_v54, %v4273_v11  ;;  %v4407_v45 = vrot.slane %v4406_v37, 2  ;;  %v9315_v11 = vld [vmem:[#allocation25_spill] sm:$0xff] }
 0x53b   :  { %v4276_v12 = vrot.slane %v4275_v35, 1  ;;  %v4408_v61 = vadd.f32 %v4407_v45, %v4406_v37 }
 0x53d   :  { %v4277_v32 = vadd.f32 %v4276_v12, %v4275_v35  ;;  %v4409_v56 = vrot.slane %v4408_v61, 1  ;;  %v9313_v12 = vld [vmem:[#allocation22_spill] sm:$0xff] }
 0x53f   :  { %v4410_v43 = vadd.f32 %v4409_v56, %v4408_v61  ;;  %v8027_v15 = vmul.f32 0.001953125, %v4277_v32  ;;  %v9314_v32 = vld [vmem:[#allocation21_spill] sm:$0xff]  ;;  %v9321_v61 = vld [vmem:[#allocation27_spill] sm:$0xff]  ;;  %v9326_v56 = vld [vmem:[#allocation34_spill] sm:$0xff] }
 0x541   :  { %v4412_v28 = vmul.f32 0.001953125, %v4410_v43  ;;  %v4413_v31 = vmul.f32 %v8027_v15, %v8027_v15  ;;  %v4456_v33 = vsub.f32 %v9321_v61, %v8027_v15  ;;  %v4459_v37 = vsub.f32 %v9324_v5, %v8027_v15  ;;  %v9325_v43 = vld [vmem:[#allocation33_spill] sm:$0xff]  ;;  %v9327_v61 = vld [vmem:[#allocation35_spill] sm:$0xff] }
 0x542   :  { %v4461_v45 = vsub.f32 %v9326_v56, %v8027_v15  ;;  %v4462_v35 = vsub.f32 %v9327_v61, %v8027_v15  ;;  %v9329_v5 = vld [vmem:[#allocation37_spill] sm:$0xff]  ;;  %v9331_v56 = vld [vmem:[#allocation39_spill] sm:$0xff]  ;;  %v9332_v61 = vsub.f32 %v8014_v4, %v8027_v15  ;;  %v9333_v19 = vsub.f32 %v9311_v38, %v8027_v15 }
 0x543   :  { %v4414_v59 = vsub.f32 %v4412_v28, %v4413_v31  ;;  %v9322_v28 = vld [vmem:[#allocation28_spill] sm:$0xff]  ;;  %v9323_v31 = vld [vmem:[#allocation30_spill] sm:$0xff]  ;;  %v4464_v14 = vsub.f32 %v9329_v5, %v8027_v15  ;;  %v4466_v52 = vsub.f32 %v9331_v56, %v8027_v15  ;;  %v8191_v4 = vld [vmem:[%s8914_s8] ss:$0 sm:$0xff]  ;;  %s5328_s8 = smov [#allocation9]  }
 0x544   :  { %v4457_v51 = vsub.f32 %v9322_v28, %v8027_v15  ;;  %v4458_v30 = vsub.f32 %v9323_v31, %v8027_v15  ;;  %v8156_v28 = vld [vmem:[%s8913_s7] ss:$0 sm:$0xff]  ;;  %v9328_v31 = vld [vmem:[#allocation36_spill] sm:$0xff]  ;;  %9336 = vst [vmem:[#allocation55_spill] sm:$0xff] %v8191_v4  ;;  %s4754_s11 = sshll.u32 %s5328_s8, 4  ;;  %s4755_s11 = int_to_ptr.vmem [resolvable:$true] %s4754_s11 }
 0x545   :  { %v4479_v2 = vadd.f32 1e-05, %v4414_v59  ;;  %v9316_v59 = vld [vmem:[#allocation26_spill] sm:$0xff]  ;;  %v4463_v54 = vsub.f32 %v9328_v31, %v8027_v15  ;;  %v9334_v31 = vsub.f32 %v9312_v55, %v8027_v15  ;;  %v9338_v55 = vsub.f32 %v9315_v11, %v8027_v15  ;;  %s5296_s12 = scalar_lea.vmem %s4755_s11, 8192  ;;  %p5301_p2 = scmp.lt.s32.totalorder %s4755_s11, %s4755_s11 }
 0x546   :  { %v9341_v11 = vsub.f32 %v7631_v16, %v8027_v15  ;;  %p5297_p1 = scmp.ne.s32.totalorder %s4755_s11, %s5296_s12  ;;  %p5302_p3 = scmp.lt.s32.totalorder %s5296_s12, %s5296_s12 }
 0x547   :  { %5230 = vrsqrt.f32 %v4479_v2  ;;  %v4460_v2 = vsub.f32 %v9325_v43, %v8027_v15  ;;  %v9330_v43 = vld [vmem:[#allocation38_spill] sm:$0xff] }
 0x548   :  { %v4465_v40 = vsub.f32 %v9330_v43, %v8027_v15  ;;  %v9335_v43 = vsub.f32 %v9313_v12, %v8027_v15  ;;  %v9339_v12 = vsub.f32 %v7613_v9, %v8027_v15  ;;  %v9342_v9 = vsub.f32 %v7635_v0, %v8027_v15  ;;  %p5303_p4 = por %p5302_p3, %p5301_p2 }
 0x54a   :  { %p5304_p5 = pnand %p5303_p4, %p5297_p1 }
 0x554   :  { %v8151_v23 = vpop.eup %5230 }
 0x555   :  { %v4543_v22 = vmul.f32 %v8151_v23, %v9332_v61  ;;  %v8174_v3 = vmul.f32 %v8151_v23, %v9333_v19  ;;  %v8180_v5 = vmul.f32 %v8151_v23, %v9334_v31  ;;  %v8186_v56 = vmul.f32 %v8151_v23, %v9335_v43 }
 0x556   :  { %v9337_v19 = vsub.f32 %v9314_v32, %v8027_v15  ;;  %v8203_v61 = vmul.f32 %v8151_v23, %v9338_v55  ;;  %v8209_v31 = vmul.f32 %v8151_v23, %v9339_v12  ;;  %v9340_v43 = vsub.f32 %v7633_v26, %v8027_v15 }
 0x557   :  { %v8222_v55 = vmul.f32 %v8151_v23, %v9341_v11  ;;  %v8228_v12 = vmul.f32 %v8151_v23, %v9342_v9  ;;  %v9343_v26 = vsub.f32 %v7642_v48, %v8027_v15  ;;  %v9345_v11 = vsub.f32 %v7658_v41, %v8027_v15 }
 0x558   :  { %v8197_v38 = vmul.f32 %v8151_v23, %v9337_v19  ;;  %v8215_v32 = vmul.f32 %v8151_v23, %v9340_v43  ;;  %v4613_v19 = vmul.f32 %v8156_v28, %v4543_v22  ;;  %v9344_v22 = vsub.f32 %v7652_v36, %v8027_v15 }
 0x559   :  { %v8234_v43 = vmul.f32 %v8151_v23, %v9343_v26  ;;  %v8246_v0 = vmul.f32 %v8151_v23, %v9345_v11  ;;  %v9346_v9 = vsub.f32 %v7663_v7, %v8027_v15  ;;  %v9347_v26 = vsub.f32 %v7673_v34, %v8027_v15 }
 0x55a   :  { %v8240_v16 = vmul.f32 %v8151_v23, %v9344_v22  ;;  %v4683_v22 = vadd.f32 %v8191_v4, %v4613_v19  ;;  %v9348_v41 = vsub.f32 %v7682_v25, %v8027_v15  ;;  %v9349_v7 = vsub.f32 %v7688_v27, %v8027_v15 }
 0x55b   :  { %v8252_v48 = vmul.f32 %v8151_v23, %v9346_v9  ;;  %v8258_v36 = vmul.f32 %v8151_v23, %v9347_v26  ;;  %v9350_v34 = vsub.f32 %v7691_v1, %v8027_v15  ;;  %v9351_v19 = vsub.f32 %v7698_v62, %v8027_v15 }
 0x55c   :  { %v8265_v11 = vmul.f32 %v8151_v23, %v9348_v41  ;;  %v8271_v9 = vmul.f32 %v8151_v23, %v9349_v7  ;;  %v9352_v41 = vsub.f32 %v7707_v57, %v8027_v15  ;;  %v9353_v7 = vsub.f32 %v7714_v42, %v8027_v15  ;;  %4747 = vst [vmem:[#allocation9 + $0x1f0] sm:$0xff] %v4683_v22 }
 0x55d   :  { %v8277_v26 = vmul.f32 %v8151_v23, %v9350_v34  ;;  %v8283_v25 = vmul.f32 %v8151_v23, %v9351_v19  ;;  %v9354_v34 = vsub.f32 %v7723_v49, %v8027_v15  ;;  %v9355_v19 = vsub.f32 %v7729_v13, %v8027_v15 }
 0x55e   :  { %v8289_v27 = vmul.f32 %v8151_v23, %v9352_v41  ;;  %v8295_v1 = vmul.f32 %v8151_v23, %v9353_v7  ;;  %v9356_v41 = vsub.f32 %v7738_v60, %v8027_v15  ;;  %v9357_v7 = vsub.f32 %v7744_v44, %v8027_v15 }
 0x55f   :  { %v8301_v62 = vmul.f32 %v8151_v23, %v9354_v34  ;;  %v8307_v57 = vmul.f32 %v8151_v23, %v9355_v19  ;;  %v9358_v22 = vsub.f32 %v7747_v39, %v8027_v15  ;;  %v9359_v34 = vsub.f32 %v7754_v24, %v8027_v15 }
 0x560   :  { %v8313_v42 = vmul.f32 %v8151_v23, %v9356_v41  ;;  %v8319_v49 = vmul.f32 %v8151_v23, %v9357_v7  ;;  %v9360_v19 = vsub.f32 %v7763_v17, %v8027_v15  ;;  %v9361_v41 = vsub.f32 %v7770_v6, %v8027_v15 }
 0x561   :  { %v8325_v13 = vmul.f32 %v8151_v23, %v9358_v22  ;;  %v8331_v60 = vmul.f32 %v8151_v23, %v9359_v34  ;;  %v9362_v7 = vsub.f32 %v7779_v58, %v8027_v15  ;;  %v9363_v22 = vsub.f32 %v7785_v50, %v8027_v15 }
 0x562   :  { %v8337_v44 = vmul.f32 %v8151_v23, %v9360_v19  ;;  %v8343_v39 = vmul.f32 %v8151_v23, %v9361_v41  ;;  %v9364_v34 = vsub.f32 %v7794_v29, %v8027_v15  ;;  %v9365_v19 = vsub.f32 %v7800_v47, %v8027_v15 }
 0x563   :  { %v8349_v24 = vmul.f32 %v8151_v23, %v9362_v7  ;;  %v8355_v17 = vmul.f32 %v8151_v23, %v9363_v22  ;;  %v9366_v41 = vsub.f32 %v7803_v18, %v8027_v15  ;;  %v9367_v7 = vsub.f32 %v7810_v46, %v8027_v15 }
 0x564   :  { %v8361_v6 = vmul.f32 %v8151_v23, %v9364_v34  ;;  %v8367_v58 = vmul.f32 %v8151_v23, %v9365_v19  ;;  %v9368_v22 = vsub.f32 %v7819_v53, %v8027_v15  ;;  %v9369_v34 = vsub.f32 %v7826_v20, %v8027_v15 }
 0x565   :  { %v8373_v50 = vmul.f32 %v8151_v23, %v9366_v41  ;;  %v8379_v29 = vmul.f32 %v8151_v23, %v9367_v7  ;;  %v9370_v19 = vsub.f32 %v7835_v8, %v8027_v15  ;;  %v9371_v41 = vsub.f32 %v7841_v10, %v8027_v15 }
 0x566   :  { %v8385_v47 = vmul.f32 %v8151_v23, %v9368_v22  ;;  %v8391_v18 = vmul.f32 %v8151_v23, %v9369_v34  ;;  %v9372_v7 = vsub.f32 %v7850_v21, %v8027_v15  ;;  %v9373_v22 = vsub.f32 %v7856_v63, %v8027_v15 }
 0x567   :  { %v8397_v46 = vmul.f32 %v8151_v23, %v9370_v19  ;;  %v8403_v53 = vmul.f32 %v8151_v23, %v9371_v41  ;;  %v9374_v34 = vsub.f32 %v9316_v59, %v8027_v15  ;;  %v8424_v19 = vmul.f32 %v8151_v23, %v4456_v33 }
 0x568   :  { %v8409_v20 = vmul.f32 %v8151_v23, %v9372_v7  ;;  %v8415_v8 = vmul.f32 %v8151_v23, %v9373_v22  ;;  %v8427_v21 = vmul.f32 %v8151_v23, %v4457_v51  ;;  %v8430_v41 = vmul.f32 %v8151_v23, %v4458_v30 }
 0x569   :  { %v8421_v10 = vmul.f32 %v8151_v23, %v9374_v34  ;;  %v8433_v63 = vmul.f32 %v8151_v23, %v4459_v37  ;;  %v8436_v7 = vmul.f32 %v8151_v23, %v4460_v2  ;;  %v8439_v59 = vmul.f32 %v8151_v23, %v4461_v45  ;;  %v9377_v2 = vld [vmem:[#allocation40_spill] sm:$0xff] }
 0x56a   :  { %v8442_v22 = vmul.f32 %v8151_v23, %v4462_v35  ;;  %v8445_v33 = vmul.f32 %v8151_v23, %v4463_v54  ;;  %v8448_v51 = vmul.f32 %v8151_v23, %v4464_v14  ;;  %v8451_v30 = vmul.f32 %v8151_v23, %v4465_v40  ;;  %v9380_v35 = vld [vmem:[#allocation42_spill] sm:$0xff]  ;;  %v9383_v14 = vld [vmem:[#allocation44_spill] sm:$0xff] }
 0x56b   :  { %v8454_v37 = vmul.f32 %v8151_v23, %v4466_v52  ;;  %v9378_v34 = vsub.f32 %v9377_v2, %v8027_v15  ;;  %v9381_v4 = vsub.f32 %v9380_v35, %v8027_v15  ;;  %v9386_v52 = vld [vmem:[#allocation50_spill] sm:$0xff] }
 0x56c   :  { %9375 = vst [vmem:[#allocation57_spill] sm:$0xff] %v8448_v51  ;;  %v9384_v51 = vsub.f32 %v9383_v14, %v8027_v15 }
 0x56d   :  { %9376 = vst [vmem:[#allocation58_spill] sm:$0xff] %v8454_v37  ;;  %v8460_v45 = vmul.f32 %v8151_v23, %v9378_v34  ;;  %v8466_v54 = vmul.f32 %v8151_v23, %v9381_v4  ;;  %v9387_v37 = vsub.f32 %v9386_v52, %v8027_v15  ;;  %v9389_v34 = vld [vmem:[#allocation49_spill] sm:$0xff]  ;;  %v9392_v4 = vld [vmem:[#allocation46_spill] sm:$0xff] }
 0x56e   :  { %v8472_v40 = vmul.f32 %v8151_v23, %v9384_v51  ;;  %v9395_v51 = vld [vmem:[#allocation52_spill] sm:$0xff] }
 0x56f   :  { %9379 = vst [vmem:[#allocation17_spill] sm:$0xff] %v8460_v45  ;;  %9382 = vst [vmem:[#allocation41_spill] sm:$0xff] %v8466_v54  ;;  %v8478_v2 = vmul.f32 %v8151_v23, %v9387_v37  ;;  %v9390_v45 = vsub.f32 %v9389_v34, %v8027_v15  ;;  %v9393_v54 = vsub.f32 %v9392_v4, %v8027_v15  ;;  %v9398_v37 = vld [vmem:[#allocation51_spill] sm:$0xff] }
 0x570   :  { %9385 = vst [vmem:[#allocation43_spill] sm:$0xff] %v8472_v40  ;;  %v9396_v40 = vsub.f32 %v9395_v51, %v8027_v15 }
 0x571   :  { %9388 = vst [vmem:[#allocation24_spill] sm:$0xff] %v8478_v2  ;;  %v8484_v35 = vmul.f32 %v8151_v23, %v9390_v45  ;;  %v8490_v14 = vmul.f32 %v8151_v23, %v9393_v54  ;;  %v9399_v2 = vsub.f32 %v9398_v37, %v8027_v15  ;;  %v9400_v45 = vld [vmem:[#allocation54_spill] sm:$0xff]  ;;  %v9402_v54 = vld [vmem:[#allocation53_spill] sm:$0xff] }
 0x572   :  { %v8496_v52 = vmul.f32 %v8151_v23, %v9396_v40  ;;  %v9404_v40 = vld [vmem:[#allocation56_spill] sm:$0xff] }
 0x573   :  { %9391 = vst [vmem:[#allocation45_spill] sm:$0xff] %v8484_v35  ;;  %9394 = vst [vmem:[#allocation47_spill] sm:$0xff] %v8490_v14  ;;  %v8502_v34 = vmul.f32 %v8151_v23, %v9399_v2  ;;  %v9401_v35 = vsub.f32 %v9400_v45, %v8027_v15  ;;  %v9403_v14 = vsub.f32 %v9402_v54, %v8027_v15 }
 0x574   :  { %9397 = vst [vmem:[#allocation23_spill] sm:$0xff] %v8496_v52  ;;  %v9405_v52 = vsub.f32 %v9404_v40, %v8027_v15  ;;  %v8524_v2 = vmul.f32 %v8156_v28, %v8174_v3  ;;  %v8532_v45 = vmul.f32 %v8156_v28, %v8186_v56  ;;  %v8544_v3 = vmul.f32 %v8156_v28, %v8209_v31 }
 0x575   :  { %v8508_v4 = vmul.f32 %v8151_v23, %v9401_v35  ;;  %v8514_v51 = vmul.f32 %v8151_v23, %v9403_v14  ;;  %v8528_v35 = vmul.f32 %v8156_v28, %v8180_v5  ;;  %v8536_v14 = vmul.f32 %v8156_v28, %v8197_v38 }
 0x576   :  { %v8520_v37 = vmul.f32 %v8151_v23, %v9405_v52  ;;  %v8540_v23 = vmul.f32 %v8156_v28, %v8203_v61  ;;  %v8548_v15 = vmul.f32 %v8156_v28, %v8215_v32  ;;  %v8552_v5 = vmul.f32 %v8156_v28, %v8222_v55  ;;  %v9410_v52 = vld [vmem:[#allocation58_spill] sm:$0xff]  ;;  %v9412_v54 = vld [vmem:[#allocation17_spill] sm:$0xff] }
 0x577   :  { %v8556_v56 = vmul.f32 %v8156_v28, %v8228_v12  ;;  %v8560_v38 = vmul.f32 %v8156_v28, %v8234_v43  ;;  %v8564_v61 = vmul.f32 %v8156_v28, %v8240_v16  ;;  %v8568_v31 = vmul.f32 %v8156_v28, %v8246_v0  ;;  %v9414_v40 = vld [vmem:[#allocation41_spill] sm:$0xff] }
 0x578   :  { %v8572_v32 = vmul.f32 %v8156_v28, %v8252_v48  ;;  %v8576_v55 = vmul.f32 %v8156_v28, %v8258_v36  ;;  %v8580_v12 = vmul.f32 %v8156_v28, %v8265_v11  ;;  %v8584_v43 = vmul.f32 %v8156_v28, %v8271_v9 }
 0x579   :  { %v8588_v16 = vmul.f32 %v8156_v28, %v8277_v26  ;;  %v8592_v0 = vmul.f32 %v8156_v28, %v8283_v25  ;;  %v8596_v48 = vmul.f32 %v8156_v28, %v8289_v27  ;;  %v8600_v36 = vmul.f32 %v8156_v28, %v8295_v1 }
 0x57a   :  { %v8604_v11 = vmul.f32 %v8156_v28, %v8301_v62  ;;  %v8608_v9 = vmul.f32 %v8156_v28, %v8307_v57  ;;  %v8612_v26 = vmul.f32 %v8156_v28, %v8313_v42  ;;  %v8616_v25 = vmul.f32 %v8156_v28, %v8319_v49 }
 0x57b   :  { %v8620_v27 = vmul.f32 %v8156_v28, %v8325_v13  ;;  %v8624_v1 = vmul.f32 %v8156_v28, %v8331_v60  ;;  %v8628_v62 = vmul.f32 %v8156_v28, %v8337_v44  ;;  %v8632_v57 = vmul.f32 %v8156_v28, %v8343_v39 }
 0x57c   :  { %v8636_v42 = vmul.f32 %v8156_v28, %v8349_v24  ;;  %v8640_v49 = vmul.f32 %v8156_v28, %v8355_v17  ;;  %v8644_v13 = vmul.f32 %v8156_v28, %v8361_v6  ;;  %v8648_v60 = vmul.f32 %v8156_v28, %v8367_v58 }
 0x57d   :  { %v8652_v44 = vmul.f32 %v8156_v28, %v8373_v50  ;;  %v8656_v39 = vmul.f32 %v8156_v28, %v8379_v29  ;;  %v8660_v24 = vmul.f32 %v8156_v28, %v8385_v47  ;;  %v8664_v17 = vmul.f32 %v8156_v28, %v8391_v18 }
 0x57e   :  { %v8668_v6 = vmul.f32 %v8156_v28, %v8397_v46  ;;  %v8672_v58 = vmul.f32 %v8156_v28, %v8403_v53  ;;  %v8676_v50 = vmul.f32 %v8156_v28, %v8409_v20  ;;  %v8680_v29 = vmul.f32 %v8156_v28, %v8415_v8 }
 0x57f   :  { %v8684_v47 = vmul.f32 %v8156_v28, %v8421_v10  ;;  %v8688_v18 = vmul.f32 %v8156_v28, %v8424_v19  ;;  %v8692_v46 = vmul.f32 %v8156_v28, %v8427_v21  ;;  %v8696_v53 = vmul.f32 %v8156_v28, %v8430_v41  ;;  %v9407_v41 = vld [vmem:[#allocation57_spill] sm:$0xff] }
 0x580   :  { %v8700_v20 = vmul.f32 %v8156_v28, %v8433_v63  ;;  %v8704_v8 = vmul.f32 %v8156_v28, %v8436_v7  ;;  %v8708_v10 = vmul.f32 %v8156_v28, %v8439_v59  ;;  %v8712_v19 = vmul.f32 %v8156_v28, %v8442_v22 }
 0x581   :  { %v8716_v21 = vmul.f32 %v8156_v28, %v8445_v33  ;;  %v8720_v63 = vmul.f32 %v8156_v28, %v9407_v41  ;;  %v8724_v7 = vmul.f32 %v8156_v28, %v8451_v30  ;;  %v8728_v59 = vmul.f32 %v8156_v28, %v9410_v52 }
 0x582   :  { %v8732_v22 = vmul.f32 %v8156_v28, %v9412_v54  ;;  %v8736_v33 = vmul.f32 %v8156_v28, %v9414_v40 }
 0x583   :  { %9406 = vst [vmem:[#allocation48_spill] sm:$0xff] %v8716_v21  ;;  %9408 = vst [vmem:[#allocation29_spill] sm:$0xff] %v8720_v63  ;;  %v9415_v21 = vld [vmem:[#allocation43_spill] sm:$0xff]  ;;  %v9416_v63 = vld [vmem:[#allocation24_spill] sm:$0xff] }
 0x584   :  { %9409 = vst [vmem:[#allocation31_spill] sm:$0xff] %v8724_v7  ;;  %9411 = vst [vmem:[#allocation32_spill] sm:$0xff] %v8728_v59  ;;  %v8740_v41 = vmul.f32 %v8156_v28, %v9415_v21  ;;  %v8744_v30 = vmul.f32 %v8156_v28, %v9416_v63  ;;  %v9417_v7 = vld [vmem:[#allocation45_spill] sm:$0xff]  ;;  %v9418_v59 = vld [vmem:[#allocation47_spill] sm:$0xff]  ;;  %v8760_v21 = vmul.f32 %v8156_v28, %v8502_v34 }
 0x585   :  { %9413 = vst [vmem:[#allocation16_spill] sm:$0xff] %v8732_v22  ;;  %v8748_v52 = vmul.f32 %v8156_v28, %v9417_v7  ;;  %v8752_v54 = vmul.f32 %v8156_v28, %v9418_v59  ;;  %v9420_v22 = vld [vmem:[#allocation23_spill] sm:$0xff]  ;;  %v8764_v63 = vmul.f32 %v8156_v28, %v8508_v4  ;;  %v8768_v7 = vmul.f32 %v8156_v28, %v8514_v51 }
 0x586   :  { %v8756_v40 = vmul.f32 %v8156_v28, %v9420_v22  ;;  %v8772_v59 = vmul.f32 %v8156_v28, %v8520_v37 }
 0x587   :  { %9419 = vst [vmem:[#allocation15_spill] sm:$0xff] %v8752_v54  ;;  %9422 = vst [vmem:[#allocation19_spill] sm:$0xff] %v8768_v7  ;;  %v9423_v54 = vld [vmem:[#allocation55_spill] sm:$0xff] }
 0x588   :  { %9421 = vst [vmem:[#allocation18_spill] sm:$0xff] %v8756_v40  ;;  %v4621_v22 = vadd.f32 %v9423_v54, %v8524_v2  ;;  %v4622_v40 = vadd.f32 %v9423_v54, %v8528_v35  ;;  %v4623_v34 = vadd.f32 %v9423_v54, %v8532_v45  ;;  %v4624_v4 = vadd.f32 %v9423_v54, %v8536_v14 }
 0x589   :  { %v4625_v51 = vadd.f32 %v9423_v54, %v8540_v23  ;;  %v4626_v7 = vadd.f32 %v9423_v54, %v8544_v3  ;;  %v4627_v28 = vadd.f32 %v9423_v54, %v8548_v15  ;;  %v4628_v37 = vadd.f32 %v9423_v54, %v8552_v5 }
 0x58a   :  { %v4629_v2 = vadd.f32 %v9423_v54, %v8556_v56  ;;  %v4630_v35 = vadd.f32 %v9423_v54, %v8560_v38  ;;  %v4631_v45 = vadd.f32 %v9423_v54, %v8564_v61  ;;  %4685 = vst [vmem:[#allocation9] sm:$0xff] %v4621_v22  ;;  %4686 = vst [vmem:[#allocation9 + $0x8] sm:$0xff] %v4622_v40 }
 0x58b   :  { %4687 = vst [vmem:[#allocation9 + $0x10] sm:$0xff] %v4623_v34  ;;  %v4632_v14 = vadd.f32 %v9423_v54, %v8568_v31  ;;  %v4633_v23 = vadd.f32 %v9423_v54, %v8572_v32  ;;  %v4634_v3 = vadd.f32 %v9423_v54, %v8576_v55  ;;  %v4635_v15 = vadd.f32 %v9423_v54, %v8580_v12 }
 0x58c   :  { %4688 = vst [vmem:[#allocation9 + $0x18] sm:$0xff] %v4624_v4  ;;  %4689 = vst [vmem:[#allocation9 + $0x20] sm:$0xff] %v4625_v51  ;;  %v4636_v5 = vadd.f32 %v9423_v54, %v8584_v43  ;;  %v4637_v56 = vadd.f32 %v9423_v54, %v8588_v16  ;;  %v4638_v38 = vadd.f32 %v9423_v54, %v8592_v0 }
 0x58d   :  { %4690 = vst [vmem:[#allocation9 + $0x28] sm:$0xff] %v4626_v7  ;;  %4691 = vst [vmem:[#allocation9 + $0x30] sm:$0xff] %v4627_v28  ;;  %v4639_v61 = vadd.f32 %v9423_v54, %v8596_v48  ;;  %v4640_v31 = vadd.f32 %v9423_v54, %v8600_v36  ;;  %v4641_v32 = vadd.f32 %v9423_v54, %v8604_v11  ;;  %v9428_v7 = vld [vmem:[#allocation16_spill] sm:$0xff] }
 0x58e   :  { %4692 = vst [vmem:[#allocation9 + $0x38] sm:$0xff] %v4628_v37  ;;  %4693 = vst [vmem:[#allocation9 + $0x40] sm:$0xff] %v4629_v2  ;;  %v4642_v55 = vadd.f32 %v9423_v54, %v8608_v9  ;;  %v4643_v12 = vadd.f32 %v9423_v54, %v8612_v26  ;;  %v4644_v43 = vadd.f32 %v9423_v54, %v8616_v25  ;;  %v9429_v28 = vld [vmem:[#allocation15_spill] sm:$0xff] }
 0x58f   :  { %4694 = vst [vmem:[#allocation9 + $0x48] sm:$0xff] %v4630_v35  ;;  %4695 = vst [vmem:[#allocation9 + $0x50] sm:$0xff] %v4631_v45  ;;  %v4645_v16 = vadd.f32 %v9423_v54, %v8620_v27  ;;  %v4646_v0 = vadd.f32 %v9423_v54, %v8624_v1  ;;  %v4647_v48 = vadd.f32 %v9423_v54, %v8628_v62  ;;  %v9430_v2 = vld [vmem:[#allocation18_spill] sm:$0xff] }
 0x590   :  { %4696 = vst [vmem:[#allocation9 + $0x58] sm:$0xff] %v4632_v14  ;;  %4697 = vst [vmem:[#allocation9 + $0x60] sm:$0xff] %v4633_v23  ;;  %v4648_v36 = vadd.f32 %v9423_v54, %v8632_v57  ;;  %v4649_v11 = vadd.f32 %v9423_v54, %v8636_v42  ;;  %v4650_v9 = vadd.f32 %v9423_v54, %v8640_v49 }
 0x591   :  { %4698 = vst [vmem:[#allocation9 + $0x68] sm:$0xff] %v4634_v3  ;;  %4699 = vst [vmem:[#allocation9 + $0x70] sm:$0xff] %v4635_v15  ;;  %v4651_v26 = vadd.f32 %v9423_v54, %v8644_v13  ;;  %v4652_v25 = vadd.f32 %v9423_v54, %v8648_v60  ;;  %v4653_v27 = vadd.f32 %v9423_v54, %v8652_v44 }
 0x592   :  { %4700 = vst [vmem:[#allocation9 + $0x78] sm:$0xff] %v4636_v5  ;;  %4701 = vst [vmem:[#allocation9 + $0x80] sm:$0xff] %v4637_v56  ;;  %v4654_v1 = vadd.f32 %v9423_v54, %v8656_v39  ;;  %v4655_v62 = vadd.f32 %v9423_v54, %v8660_v24  ;;  %v4656_v57 = vadd.f32 %v9423_v54, %v8664_v17 }
 0x593   :  { %4702 = vst [vmem:[#allocation9 + $0x88] sm:$0xff] %v4638_v38  ;;  %4703 = vst [vmem:[#allocation9 + $0x90] sm:$0xff] %v4639_v61  ;;  %v4657_v42 = vadd.f32 %v9423_v54, %v8668_v6  ;;  %v4658_v49 = vadd.f32 %v9423_v54, %v8672_v58  ;;  %v4659_v13 = vadd.f32 %v9423_v54, %v8676_v50 }
 0x594   :  { %4704 = vst [vmem:[#allocation9 + $0x98] sm:$0xff] %v4640_v31  ;;  %4705 = vst [vmem:[#allocation9 + $0xa0] sm:$0xff] %v4641_v32  ;;  %v4660_v60 = vadd.f32 %v9423_v54, %v8680_v29  ;;  %v4661_v44 = vadd.f32 %v9423_v54, %v8684_v47  ;;  %v4662_v39 = vadd.f32 %v9423_v54, %v8688_v18  ;;  %v9424_v47 = vld [vmem:[#allocation48_spill] sm:$0xff] }
 0x595   :  { %4706 = vst [vmem:[#allocation9 + $0xa8] sm:$0xff] %v4642_v55  ;;  %4707 = vst [vmem:[#allocation9 + $0xb0] sm:$0xff] %v4643_v12  ;;  %v4663_v24 = vadd.f32 %v9423_v54, %v8692_v46  ;;  %v4664_v17 = vadd.f32 %v9423_v54, %v8696_v53  ;;  %v4665_v6 = vadd.f32 %v9423_v54, %v8700_v20  ;;  %v9425_v46 = vld [vmem:[#allocation29_spill] sm:$0xff]  ;;  %v9426_v20 = vld [vmem:[#allocation31_spill] sm:$0xff] }
 0x596   :  { %4708 = vst [vmem:[#allocation9 + $0xb8] sm:$0xff] %v4644_v43  ;;  %4709 = vst [vmem:[#allocation9 + $0xc0] sm:$0xff] %v4645_v16  ;;  %v4666_v58 = vadd.f32 %v9423_v54, %v8704_v8  ;;  %v4667_v50 = vadd.f32 %v9423_v54, %v8708_v10  ;;  %v4668_v29 = vadd.f32 %v9423_v54, %v8712_v19  ;;  %v9427_v8 = vld [vmem:[#allocation32_spill] sm:$0xff] }
 0x597   :  { %4710 = vst [vmem:[#allocation9 + $0xc8] sm:$0xff] %v4646_v0  ;;  %4711 = vst [vmem:[#allocation9 + $0xd0] sm:$0xff] %v4647_v48  ;;  %v4669_v18 = vadd.f32 %v9423_v54, %v9424_v47  ;;  %v4670_v53 = vadd.f32 %v9423_v54, %v9425_v46  ;;  %v4671_v40 = vadd.f32 %v9423_v54, %v9426_v20 }
 0x598   :  { %4712 = vst [vmem:[#allocation9 + $0xd8] sm:$0xff] %v4648_v36  ;;  %4713 = vst [vmem:[#allocation9 + $0xe0] sm:$0xff] %v4649_v11  ;;  %v4672_v10 = vadd.f32 %v9423_v54, %v9427_v8  ;;  %v4673_v19 = vadd.f32 %v9423_v54, %v9428_v7  ;;  %v4674_v22 = vadd.f32 %v9423_v54, %v8736_v33 }
 0x599   :  { %4714 = vst [vmem:[#allocation9 + $0xe8] sm:$0xff] %v4650_v9  ;;  %4715 = vst [vmem:[#allocation9 + $0xf0] sm:$0xff] %v4651_v26  ;;  %v4675_v34 = vadd.f32 %v9423_v54, %v8740_v41  ;;  %v4676_v4 = vadd.f32 %v9423_v54, %v8744_v30  ;;  %v4677_v51 = vadd.f32 %v9423_v54, %v8748_v52  ;;  %v9431_v30 = vld [vmem:[#allocation19_spill] sm:$0xff] }
 0x59a   :  { %4716 = vst [vmem:[#allocation9 + $0xf8] sm:$0xff] %v4652_v25  ;;  %4717 = vst [vmem:[#allocation9 + $0x100] sm:$0xff] %v4653_v27  ;;  %v4678_v37 = vadd.f32 %v9423_v54, %v9429_v28  ;;  %v4679_v35 = vadd.f32 %v9423_v54, %v9430_v2  ;;  %v4680_v33 = vadd.f32 %v9423_v54, %v8760_v21 }
 0x59b   :  { %4718 = vst [vmem:[#allocation9 + $0x108] sm:$0xff] %v4654_v1  ;;  %4719 = vst [vmem:[#allocation9 + $0x110] sm:$0xff] %v4655_v62  ;;  %v4681_v41 = vadd.f32 %v9423_v54, %v8764_v63  ;;  %v4682_v45 = vadd.f32 %v9423_v54, %v9431_v30  ;;  %v4684_v52 = vadd.f32 %v9423_v54, %v8772_v59 }
 0x59c   :  { %4720 = vst [vmem:[#allocation9 + $0x118] sm:$0xff] %v4656_v57  ;;  %4721 = vst [vmem:[#allocation9 + $0x120] sm:$0xff] %v4657_v42 }
 0x59d   :  { %4722 = vst [vmem:[#allocation9 + $0x128] sm:$0xff] %v4658_v49  ;;  %4723 = vst [vmem:[#allocation9 + $0x130] sm:$0xff] %v4659_v13 }
 0x59e   :  { %4724 = vst [vmem:[#allocation9 + $0x138] sm:$0xff] %v4660_v60  ;;  %4725 = vst [vmem:[#allocation9 + $0x140] sm:$0xff] %v4661_v44 }
 0x59f   :  { %4726 = vst [vmem:[#allocation9 + $0x148] sm:$0xff] %v4662_v39  ;;  %4727 = vst [vmem:[#allocation9 + $0x150] sm:$0xff] %v4663_v24 }
 0x5a0   :  { %4728 = vst [vmem:[#allocation9 + $0x158] sm:$0xff] %v4664_v17  ;;  %4729 = vst [vmem:[#allocation9 + $0x160] sm:$0xff] %v4665_v6 }
 0x5a1   :  { %4730 = vst [vmem:[#allocation9 + $0x168] sm:$0xff] %v4666_v58  ;;  %4731 = vst [vmem:[#allocation9 + $0x170] sm:$0xff] %v4667_v50 }
 0x5a2   :  { %4732 = vst [vmem:[#allocation9 + $0x178] sm:$0xff] %v4668_v29  ;;  %4733 = vst [vmem:[#allocation9 + $0x180] sm:$0xff] %v4669_v18 }
 0x5a3   :  { %4734 = vst [vmem:[#allocation9 + $0x188] sm:$0xff] %v4670_v53  ;;  %4735 = vst [vmem:[#allocation9 + $0x190] sm:$0xff] %v4671_v40 }
 0x5a4   :  { %4736 = vst [vmem:[#allocation9 + $0x198] sm:$0xff] %v4672_v10  ;;  %4737 = vst [vmem:[#allocation9 + $0x1a0] sm:$0xff] %v4673_v19 }
 0x5a5   :  { %4738 = vst [vmem:[#allocation9 + $0x1a8] sm:$0xff] %v4674_v22  ;;  %4739 = vst [vmem:[#allocation9 + $0x1b0] sm:$0xff] %v4675_v34 }
 0x5a6   :  { %4740 = vst [vmem:[#allocation9 + $0x1b8] sm:$0xff] %v4676_v4  ;;  %4741 = vst [vmem:[#allocation9 + $0x1c0] sm:$0xff] %v4677_v51 }
 0x5a7   :  { %4742 = vst [vmem:[#allocation9 + $0x1c8] sm:$0xff] %v4678_v37  ;;  %4743 = vst [vmem:[#allocation9 + $0x1d0] sm:$0xff] %v4679_v35 }
 0x5a8   :  { %4744 = vst [vmem:[#allocation9 + $0x1d8] sm:$0xff] %v4680_v33  ;;  %4745 = vst [vmem:[#allocation9 + $0x1e0] sm:$0xff] %v4681_v41 }
 0x5a9   :  { %4746 = vst [vmem:[#allocation9 + $0x1e8] sm:$0xff] %v4682_v45  ;;  %4748 = vst [vmem:[#allocation9 + $0x1f8] sm:$0xff] %v4684_v52 }
 0x5aa   :  { %5307 = shalt.err (!%p5304_p5)
}
 0x5ab   :  { %4760 = dma.vmem_to_hbm [thread:$0]  %s4755_s11, 8192, %s8915_s9, [#allocation5], %s5324_s14, %s5324_s14, %s5325_s15  }
 0x5ac   :  { %5320 = dma.done.wait [#allocation5], 8192  }
 0x5ad   :  { %5321 = vsyncadd [#allocation5], 4294959104 }
 0x5ae   :  { %4764 = vsyncpa [#allocation4], 1 }
 0x5af   :  { %4765 = vsyncpa [#allocation7], 1 }
 0x5b0   :  { %4766 = vsyncpa [#allocation5], 1 }

</bundles_post_ra>
